<compile_context>
chip_gen: v6e
topology: v6e:2x2x1
jax: 0.10.0
libtpu: 0.0.40
codegen_flags: <defaults>
</compile_context>

<pallas_src>
import functools

import numpy as np
import jax
import jax.numpy as jnp
from jax.experimental import pallas as pl
from jax.experimental.pallas import tpu as pltpu

BN_EPS = 1e-5
LANE = 128
# Conservative budget for the direct kernel's VMEM footprint (incl. double
# buffering); the pallas_call raises the scoped limit to 40 MiB which is safe
# on v5e/v6e (128 MiB physical) and v7x (64 MiB physical).
_DIRECT_VMEM_BUDGET = 20 * 1024 * 1024
_DIRECT_VMEM_LIMIT = 40 * 1024 * 1024
# Bound in-kernel static unrolling (m-tiles * taps matmuls) to keep compile
# time sane; larger problems fall back to the tiled im2col matmul path.
_DIRECT_MAX_UNROLLED_MATMULS = 256


def _round_up(x, m):
    return (x + m - 1) // m * m


def _pick_tn(coutp):
    return max(t for t in (512, 256, 128) if coutp % t == 0)


# ----------------------------- Pallas kernels -----------------------------

def _direct_conv_kernel(x_ref, w_ref, b_ref, o_ref, *, tap_offsets, tm, relu):
    """Im2col-free tap-sum convolution for stride==1.

    x_ref: (1, Lp, Cin)      flattened zero-padded NHWC image (bf16)
    w_ref: (ntaps, Cin, tn)  BN-folded weights (bf16), tn multiple of 128
    b_ref: (1, tn)           folded shift (f32)
    o_ref: (1, M8, tn)       M8 = round_up(Hout*Wp, 8) rows, lane-dense last dim
    """
    m8 = o_ref.shape[1]
    tn = o_ref.shape[2]
    bias = b_ref[...]                                  # (1, tn) f32, hoisted
    # Static M tiling: bounds the live f32 accumulator to (tm, tn) so it stays
    # (mostly) in vregs instead of spilling a huge (M8, tn) value to VMEM.
    for r0 in range(0, m8, tm):                        # static unroll
        rows = min(tm, m8 - r0)                        # multiple of 8
        acc = jnp.zeros((rows, tn), jnp.float32)
        for t, off in enumerate(tap_offsets):          # static tap unroll
            a = x_ref[0, r0 + off:r0 + off + rows, :]  # (rows, Cin) shifted window
            acc = acc + jnp.dot(a, w_ref[t],
                                preferred_element_type=jnp.float32)
        y = acc + bias
        if relu:
            y = jnp.maximum(y, 0.0)
        o_ref[0, r0:r0 + rows, :] = y.astype(o_ref.dtype)


def _matmul_affine_kernel(x_ref, w_ref, b_ref, o_ref, acc_ref, *, relu):
    """K-tiled matmul + shift + optional ReLU with an f32 VMEM accumulator."""
    @pl.when(pl.program_id(2) == 0)
    def _init():
        acc_ref[...] = jnp.zeros_like(acc_ref)

    acc_ref[...] += jnp.dot(x_ref[...], w_ref[...],
                            preferred_element_type=jnp.float32)

    @pl.when(pl.program_id(2) == pl.num_programs(2) - 1)
    def _store():
        y = acc_ref[...] + b_ref[...]
        if relu:
            y = jnp.maximum(y, 0.0)
        o_ref[...] = y.astype(o_ref.dtype)


# ----------------------------- kernel wrappers -----------------------------

def _direct_conv(x_nhwc, w3, shift, *, kh, kw, dilation, padding, relu,
                 compute_dtype, tm, tn):
    """stride==1 conv: per-tap matmul accumulation, no im2col in HBM."""
    n, h, w, cin = x_nhwc.shape
    hp, wp = h + 2 * padding, w + 2 * padding
    hout = hp - dilation * (kh - 1)
    wout = wp - dilation * (kw - 1)
    m = hout * wp                          # compute with full padded width
    m8 = _round_up(m, 8)
    off_max = dilation * (kh - 1) * wp + dilation * (kw - 1)
    lp = m8 + off_max                      # rows needed by the last tap/tile
    ntaps, _, coutp = w3.shape

    xp = jnp.pad(x_nhwc, ((0, 0), (padding, padding), (padding, padding), (0, 0)))
    x_flat = xp.reshape(n, hp * wp, cin)
    if lp > hp * wp:
        x_flat = jnp.pad(x_flat, ((0, 0), (0, lp - hp * wp), (0, 0)))
    x_flat = x_flat.astype(compute_dtype)

    taps = tuple(ki * dilation * wp + kj * dilation
                 for ki in range(kh) for kj in range(kw))

    out = pl.pallas_call(
        functools.partial(_direct_conv_kernel, tap_offsets=taps, tm=tm, relu=relu),
        out_shape=jax.ShapeDtypeStruct((n, m8, coutp), jnp.float32),
        grid=(n, coutp // tn),
        in_specs=[
            pl.BlockSpec((1, lp, cin), lambda i, j: (i, 0, 0)),
            pl.BlockSpec((ntaps, cin, tn), lambda i, j: (0, 0, j)),
            pl.BlockSpec((1, tn), lambda i, j: (0, j)),
        ],
        out_specs=pl.BlockSpec((1, m8, tn), lambda i, j: (i, 0, j)),
        compiler_params=pltpu.CompilerParams(
            dimension_semantics=("parallel", "parallel"),
            vmem_limit_bytes=_DIRECT_VMEM_LIMIT),
    )(x_flat, w3.astype(compute_dtype), shift.reshape(1, coutp))

    # Crop padded rows and the wrap-around columns of the full-width trick.
    return out[:, :m, :].reshape(n, hout, wp, coutp)[:, :, :wout, :]


def _im2col(x, kh, kw, stride, padding, dilation):
    n, h, w, cin = x.shape
    hp, wp = h + 2 * padding, w + 2 * padding
    hout = (hp - dilation * (kh - 1) - 1) // stride + 1
    wout = (wp - dilation * (kw - 1) - 1) // stride + 1
    xp = jnp.pad(x, ((0, 0), (padding, padding), (padding, padding), (0, 0)))
    cols = []
    for i in range(kh):
        for j in range(kw):
            hi, wj = i * dilation, j * dilation
            cols.append(xp[:, hi:hi + (hout - 1) * stride + 1:stride,
                           wj:wj + (wout - 1) * stride + 1:stride, :])
    col = jnp.concatenate(cols, axis=-1)
    return col.reshape(n * hout * wout, kh * kw * cin), (n, hout, wout)


def _tiled_matmul_affine(x2d, w2d, shift, relu, compute_dtype):
    """(M,K) @ (K,Np) + shift with M/N/K grid tiling and an f32 accumulator."""
    m, k = x2d.shape
    _, coutp = w2d.shape

    if m >= 2048:
        tm = 512
    elif m >= 256:
        tm = 256
    else:
        tm = _round_up(m, 8)
    mp = _round_up(m, tm)
    tk = 256 if k > 128 else 128          # 128-multiples suit every MXU gen
    kp = _round_up(k, tk)
    tn = _pick_tn(coutp)

    x2d = x2d.astype(compute_dtype)
    w2d = w2d.astype(compute_dtype)
    if mp != m or kp != k:
        x2d = jnp.pad(x2d, ((0, mp - m), (0, kp - k)))
    if kp != k:
        w2d = jnp.pad(w2d, ((0, kp - k), (0, 0)))

    out = pl.pallas_call(
        functools.partial(_matmul_affine_kernel, relu=relu),
        out_shape=jax.ShapeDtypeStruct((mp, coutp), jnp.float32),
        grid=(mp // tm, coutp // tn, kp // tk),
        in_specs=[
            pl.BlockSpec((tm, tk), lambda i, j, kk: (i, kk)),
            pl.BlockSpec((tk, tn), lambda i, j, kk: (kk, j)),
            pl.BlockSpec((1, tn), lambda i, j, kk: (0, j)),
        ],
        out_specs=pl.BlockSpec((tm, tn), lambda i, j, kk: (i, j)),
        scratch_shapes=[pltpu.VMEM((tm, tn), jnp.float32)],
        compiler_params=pltpu.CompilerParams(
            dimension_semantics=("parallel", "parallel", "arbitrary")),
    )(x2d, w2d, shift.reshape(1, coutp))
    return out[:m] if mp != m else out


# ----------------------------- module equivalent -----------------------------

def init_params(key, in_channels, out_channels, kernel_size, bias):
    """PyTorch-like init of Conv2d + fresh BatchNorm2d."""
    kw_key, kb_key = jax.random.split(key)
    k = kernel_size
    fan_in = in_channels * k * k
    bound = 1.0 / np.sqrt(fan_in)
    w = jax.random.uniform(kw_key, (k, k, in_channels, out_channels),
                           jnp.float32, -bound, bound)        # HWIO
    b = (jax.random.uniform(kb_key, (out_channels,), jnp.float32, -bound, bound)
         if bias else jnp.zeros((out_channels,), jnp.float32))
    return {"w": w, "conv_bias": b,
            "gamma": jnp.ones((out_channels,), jnp.float32),
            "beta": jnp.zeros((out_channels,), jnp.float32),
            "running_mean": jnp.zeros((out_channels,), jnp.float32),
            "running_var": jnp.ones((out_channels,), jnp.float32)}


def fold_bn(params):
    """One-time build-time folding of BN (+conv bias) into weight / shift.

    Also pads the output channels to a multiple of 128 so Pallas stores are
    lane-dense.  Returns (folded_arrays, true_out_channels)."""
    scale = params["gamma"] / jnp.sqrt(params["running_var"] + BN_EPS)
    shift = (params["conv_bias"] - params["running_mean"]) * scale + params["beta"]
    w = params["w"] * scale[None, None, None, :]
    kh, kw, cin, cout = w.shape
    coutp = _round_up(cout, LANE)
    if coutp != cout:
        w = jnp.pad(w, ((0, 0), (0, 0), (0, 0), (0, coutp - cout)))
        shift = jnp.pad(shift, ((0, coutp - cout),))
    return {"w": w, "shift": shift.astype(jnp.float32)}, cout


def conv2d_batchnorm_relu(folded, x_nchw, *, out_channels, stride, padding,
                          dilation, relu=True, compute_dtype=jnp.bfloat16):
    """Forward of conv2DBatchNormRelu.  x: (N, Cin, H, W) f32 -> (N, Cout, Ho, Wo)."""
    # TODO(synk): train-mode BatchNorm (batch statistics) not implemented.
    w = folded["w"]
    kh, kw, cin, coutp = w.shape
    shift = folded["shift"]
    x = jnp.transpose(x_nchw, (0, 2, 3, 1)).astype(jnp.float32)   # NCHW -> NHWC
    n, h, w_sz, _ = x.shape

    use_direct = (stride == 1)
    if use_direct:
        hp, wp = h + 2 * padding, w_sz + 2 * padding
        hout = hp - dilation * (kh - 1)
        m8 = _round_up(hout * wp, 8)
        off_max = dilation * (kh - 1) * wp + dilation * (kw - 1)
        lp = m8 + off_max
        tn = LANE                              # fixed 128: lane-dense, max reuse
        tm = min(256, m8)                      # bounded in-kernel accumulator
        cbytes = jnp.dtype(compute_dtype).itemsize
        est = (2 * lp * cin * cbytes                # image block (dbl-buffered)
               + 2 * kh * kw * cin * tn * cbytes    # weight block
               + 2 * m8 * tn * 4                    # f32 output block
               + 3 * tm * tn * 4                    # accumulator + matmul temps
               + 2 * tm * cin * cbytes)             # per-tap window temporaries
        n_unrolled = (m8 // tm + (1 if m8 % tm else 0)) * kh * kw
        use_direct = (est <= _DIRECT_VMEM_BUDGET
                      and n_unrolled <= _DIRECT_MAX_UNROLLED_MATMULS)

    if use_direct:
        y = _direct_conv(x, w.reshape(kh * kw, cin, coutp), shift,
                         kh=kh, kw=kw, dilation=dilation, padding=padding,
                         relu=relu, compute_dtype=compute_dtype, tm=tm, tn=tn)
    else:
        col, (n2, ho, wo) = _im2col(x, kh, kw, stride, padding, dilation)
        y2 = _tiled_matmul_affine(col, w.reshape(kh * kw * cin, coutp),
                                  shift, relu, compute_dtype)
        y = y2.reshape(n2, ho, wo, coutp)

    y = y[..., :out_channels]
    return jnp.transpose(y, (0, 3, 1, 2))            # NHWC -> NCHW


# ----------------------------- reference & main -----------------------------

def _reference(params, x_nchw, stride, padding, dilation, relu=True):
    w_oihw = jnp.transpose(params["w"], (3, 2, 0, 1))
    y = jax.lax.conv_general_dilated(
        x_nchw, w_oihw, window_strides=(stride, stride),
        padding=((padding, padding), (padding, padding)),
        rhs_dilation=(dilation, dilation),
        dimension_numbers=("NCHW", "OIHW", "NCHW"))
    y = y + params["conv_bias"][None, :, None, None]
    scale = params["gamma"] / jnp.sqrt(params["running_var"] + BN_EPS)
    shift = params["beta"] - params["running_mean"] * scale
    y = y * scale[None, :, None, None] + shift[None, :, None, None]
    return jnp.maximum(y, 0.0) if relu else y


if __name__ == "__main__":
    key = jax.random.PRNGKey(0)
    kp1, kp2, kx = jax.random.split(key, 3)

    batch, cin, cout, hw = 2, 16, 32, 32
    x = jax.random.normal(kx, (batch, cin, hw, hw), jnp.float32)

    # Config 1: 3x3, stride=1, pad=1, dilation=1, bias=False  -> direct kernel.
    p1 = init_params(kp1, cin, cout, 3, bias=False)
    f1, oc1 = fold_bn(p1)
    fwd1 = jax.jit(functools.partial(conv2d_batchnorm_relu, out_channels=oc1,
                                     stride=1, padding=1, dilation=1))
    y1 = jax.block_until_ready(fwd1(f1, x))
    r1 = _reference(p1, x, 1, 1, 1)
    assert y1.shape == (batch, cout, hw, hw), y1.shape

    # Config 2: 3x3, stride=2, pad=1, dilation=1, bias=True -> K-tiled im2col path.
    p2 = init_params(kp2, cin, cout, 3, bias=True)
    f2, oc2 = fold_bn(p2)
    fwd2 = jax.jit(functools.partial(conv2d_batchnorm_relu, out_channels=oc2,
                                     stride=2, padding=1, dilation=1))
    y2 = jax.block_until_ready(fwd2(f2, x))
    r2 = _reference(p2, x, 2, 1, 1)
    assert y2.shape == (batch, cout, hw // 2, hw // 2), y2.shape

    err1 = float(jnp.max(jnp.abs(y1 - r1)))
    err2 = float(jnp.max(jnp.abs(y2 - r2)))
    assert bool(jnp.isfinite(y1).all()) and bool(jnp.isfinite(y2).all())
    assert err1 < 8e-2 and err2 < 8e-2, (err1, err2)   # bf16 MXU tolerance
    print("KERNEL_OK")
</pallas_src>

<mosaic_0001>
module attributes {stable_mosaic.version = 11 : i64} {
  func.func @_direct_conv_kernel(%arg0: i32, %arg1: i32, %arg2: memref<1x1158x16xbf16, #tpu.memory_space<vmem>>, %arg3: memref<9x16x128xbf16, #tpu.memory_space<vmem>>, %arg4: memref<1x128xf32, #tpu.memory_space<vmem>>, %arg5: memref<1x1088x128xf32, #tpu.memory_space<vmem>>) attributes {dimension_semantics = [#tpu.dimension_semantics<parallel>, #tpu.dimension_semantics<parallel>], iteration_bounds = array<i64: 2, 1>, scalar_prefetch = 0 : i64, scratch_operands = 0 : i64, tpu.core_type = #tpu.core_type<tc>, window_params = [{transform_indices = @transform_0, window_bounds = array<i64: 1, 1158, 16>}, {transform_indices = @transform_1, window_bounds = array<i64: 9, 16, 128>}, {transform_indices = @transform_2, window_bounds = array<i64: 1, 128>}, {transform_indices = @transform_3, window_bounds = array<i64: 1, 1088, 128>}]} {
    %c0 = arith.constant 0 : index
    %c0_0 = arith.constant 0 : index
    %0 = vector.load %arg4[%c0, %c0_0] : memref<1x128xf32, #tpu.memory_space<vmem>>, vector<1x128xf32>
    %cst = arith.constant 0.000000e+00 : f32
    %1 = vector.broadcast %cst : f32 to vector<256x128xf32>
    %c0_1 = arith.constant 0 : index
    %c0_2 = arith.constant 0 : index
    %c0_3 = arith.constant 0 : index
    %2 = vector.load %arg2[%c0_1, %c0_2, %c0_3] : memref<1x1158x16xbf16, #tpu.memory_space<vmem>>, vector<1x256x16xbf16>
    %3 = vector.shape_cast %2 : vector<1x256x16xbf16> to vector<256x16xbf16>
    %c0_4 = arith.constant 0 : index
    %c0_5 = arith.constant 0 : index
    %c0_6 = arith.constant 0 : index
    %4 = vector.load %arg3[%c0_4, %c0_5, %c0_6] : memref<9x16x128xbf16, #tpu.memory_space<vmem>>, vector<1x16x128xbf16>
    %5 = vector.shape_cast %4 : vector<1x16x128xbf16> to vector<16x128xbf16>
    %cst_7 = arith.constant dense<0.000000e+00> : vector<256x128xf32>
    %6 = tpu.matmul %3, %5, %cst_7 {dimension_numbers = #tpu.dot_dimension_numbers<[1], [0], [0], [1], [0, 0, 1, 1], [], []>} : vector<256x16xbf16>, vector<16x128xbf16>, vector<256x128xf32> -> vector<256x128xf32>
    %7 = arith.addf %1, %6 : vector<256x128xf32>
    %c0_8 = arith.constant 0 : index
    %c1 = arith.constant 1 : index
    %c0_9 = arith.constant 0 : index
    %8 = vector.load %arg2[%c0_8, %c1, %c0_9] : memref<1x1158x16xbf16, #tpu.memory_space<vmem>>, vector<1x256x16xbf16>
    %9 = vector.shape_cast %8 : vector<1x256x16xbf16> to vector<256x16xbf16>
    %c1_10 = arith.constant 1 : index
    %c0_11 = arith.constant 0 : index
    %c0_12 = arith.constant 0 : index
    %10 = vector.load %arg3[%c1_10, %c0_11, %c0_12] : memref<9x16x128xbf16, #tpu.memory_space<vmem>>, vector<1x16x128xbf16>
    %11 = vector.shape_cast %10 : vector<1x16x128xbf16> to vector<16x128xbf16>
    %cst_13 = arith.constant dense<0.000000e+00> : vector<256x128xf32>
    %12 = tpu.matmul %9, %11, %cst_13 {dimension_numbers = #tpu.dot_dimension_numbers<[1], [0], [0], [1], [0, 0, 1, 1], [], []>} : vector<256x16xbf16>, vector<16x128xbf16>, vector<256x128xf32> -> vector<256x128xf32>
    %13 = arith.addf %7, %12 : vector<256x128xf32>
    %c0_14 = arith.constant 0 : index
    %c2 = arith.constant 2 : index
    %c0_15 = arith.constant 0 : index
    %14 = vector.load %arg2[%c0_14, %c2, %c0_15] : memref<1x1158x16xbf16, #tpu.memory_space<vmem>>, vector<1x256x16xbf16>
    %15 = vector.shape_cast %14 : vector<1x256x16xbf16> to vector<256x16xbf16>
    %c2_16 = arith.constant 2 : index
    %c0_17 = arith.constant 0 : index
    %c0_18 = arith.constant 0 : index
    %16 = vector.load %arg3[%c2_16, %c0_17, %c0_18] : memref<9x16x128xbf16, #tpu.memory_space<vmem>>, vector<1x16x128xbf16>
    %17 = vector.shape_cast %16 : vector<1x16x128xbf16> to vector<16x128xbf16>
    %cst_19 = arith.constant dense<0.000000e+00> : vector<256x128xf32>
    %18 = tpu.matmul %15, %17, %cst_19 {dimension_numbers = #tpu.dot_dimension_numbers<[1], [0], [0], [1], [0, 0, 1, 1], [], []>} : vector<256x16xbf16>, vector<16x128xbf16>, vector<256x128xf32> -> vector<256x128xf32>
    %19 = arith.addf %13, %18 : vector<256x128xf32>
    %c0_20 = arith.constant 0 : index
    %c34 = arith.constant 34 : index
    %c0_21 = arith.constant 0 : index
    %20 = vector.load %arg2[%c0_20, %c34, %c0_21] : memref<1x1158x16xbf16, #tpu.memory_space<vmem>>, vector<1x256x16xbf16>
    %21 = vector.shape_cast %20 : vector<1x256x16xbf16> to vector<256x16xbf16>
    %c3 = arith.constant 3 : index
    %c0_22 = arith.constant 0 : index
    %c0_23 = arith.constant 0 : index
    %22 = vector.load %arg3[%c3, %c0_22, %c0_23] : memref<9x16x128xbf16, #tpu.memory_space<vmem>>, vector<1x16x128xbf16>
    %23 = vector.shape_cast %22 : vector<1x16x128xbf16> to vector<16x128xbf16>
    %cst_24 = arith.constant dense<0.000000e+00> : vector<256x128xf32>
    %24 = tpu.matmul %21, %23, %cst_24 {dimension_numbers = #tpu.dot_dimension_numbers<[1], [0], [0], [1], [0, 0, 1, 1], [], []>} : vector<256x16xbf16>, vector<16x128xbf16>, vector<256x128xf32> -> vector<256x128xf32>
    %25 = arith.addf %19, %24 : vector<256x128xf32>
    %c0_25 = arith.constant 0 : index
    %c35 = arith.constant 35 : index
    %c0_26 = arith.constant 0 : index
    %26 = vector.load %arg2[%c0_25, %c35, %c0_26] : memref<1x1158x16xbf16, #tpu.memory_space<vmem>>, vector<1x256x16xbf16>
    %27 = vector.shape_cast %26 : vector<1x256x16xbf16> to vector<256x16xbf16>
    %c4 = arith.constant 4 : index
    %c0_27 = arith.constant 0 : index
    %c0_28 = arith.constant 0 : index
    %28 = vector.load %arg3[%c4, %c0_27, %c0_28] : memref<9x16x128xbf16, #tpu.memory_space<vmem>>, vector<1x16x128xbf16>
    %29 = vector.shape_cast %28 : vector<1x16x128xbf16> to vector<16x128xbf16>
    %cst_29 = arith.constant dense<0.000000e+00> : vector<256x128xf32>
    %30 = tpu.matmul %27, %29, %cst_29 {dimension_numbers = #tpu.dot_dimension_numbers<[1], [0], [0], [1], [0, 0, 1, 1], [], []>} : vector<256x16xbf16>, vector<16x128xbf16>, vector<256x128xf32> -> vector<256x128xf32>
    %31 = arith.addf %25, %30 : vector<256x128xf32>
    %c0_30 = arith.constant 0 : index
    %c36 = arith.constant 36 : index
    %c0_31 = arith.constant 0 : index
    %32 = vector.load %arg2[%c0_30, %c36, %c0_31] : memref<1x1158x16xbf16, #tpu.memory_space<vmem>>, vector<1x256x16xbf16>
    %33 = vector.shape_cast %32 : vector<1x256x16xbf16> to vector<256x16xbf16>
    %c5 = arith.constant 5 : index
    %c0_32 = arith.constant 0 : index
    %c0_33 = arith.constant 0 : index
    %34 = vector.load %arg3[%c5, %c0_32, %c0_33] : memref<9x16x128xbf16, #tpu.memory_space<vmem>>, vector<1x16x128xbf16>
    %35 = vector.shape_cast %34 : vector<1x16x128xbf16> to vector<16x128xbf16>
    %cst_34 = arith.constant dense<0.000000e+00> : vector<256x128xf32>
    %36 = tpu.matmul %33, %35, %cst_34 {dimension_numbers = #tpu.dot_dimension_numbers<[1], [0], [0], [1], [0, 0, 1, 1], [], []>} : vector<256x16xbf16>, vector<16x128xbf16>, vector<256x128xf32> -> vector<256x128xf32>
    %37 = arith.addf %31, %36 : vector<256x128xf32>
    %c0_35 = arith.constant 0 : index
    %c68 = arith.constant 68 : index
    %c0_36 = arith.constant 0 : index
    %38 = vector.load %arg2[%c0_35, %c68, %c0_36] : memref<1x1158x16xbf16, #tpu.memory_space<vmem>>, vector<1x256x16xbf16>
    %39 = vector.shape_cast %38 : vector<1x256x16xbf16> to vector<256x16xbf16>
    %c6 = arith.constant 6 : index
    %c0_37 = arith.constant 0 : index
    %c0_38 = arith.constant 0 : index
    %40 = vector.load %arg3[%c6, %c0_37, %c0_38] : memref<9x16x128xbf16, #tpu.memory_space<vmem>>, vector<1x16x128xbf16>
    %41 = vector.shape_cast %40 : vector<1x16x128xbf16> to vector<16x128xbf16>
    %cst_39 = arith.constant dense<0.000000e+00> : vector<256x128xf32>
    %42 = tpu.matmul %39, %41, %cst_39 {dimension_numbers = #tpu.dot_dimension_numbers<[1], [0], [0], [1], [0, 0, 1, 1], [], []>} : vector<256x16xbf16>, vector<16x128xbf16>, vector<256x128xf32> -> vector<256x128xf32>
    %43 = arith.addf %37, %42 : vector<256x128xf32>
    %c0_40 = arith.constant 0 : index
    %c69 = arith.constant 69 : index
    %c0_41 = arith.constant 0 : index
    %44 = vector.load %arg2[%c0_40, %c69, %c0_41] : memref<1x1158x16xbf16, #tpu.memory_space<vmem>>, vector<1x256x16xbf16>
    %45 = vector.shape_cast %44 : vector<1x256x16xbf16> to vector<256x16xbf16>
    %c7 = arith.constant 7 : index
    %c0_42 = arith.constant 0 : index
    %c0_43 = arith.constant 0 : index
    %46 = vector.load %arg3[%c7, %c0_42, %c0_43] : memref<9x16x128xbf16, #tpu.memory_space<vmem>>, vector<1x16x128xbf16>
    %47 = vector.shape_cast %46 : vector<1x16x128xbf16> to vector<16x128xbf16>
    %cst_44 = arith.constant dense<0.000000e+00> : vector<256x128xf32>
    %48 = tpu.matmul %45, %47, %cst_44 {dimension_numbers = #tpu.dot_dimension_numbers<[1], [0], [0], [1], [0, 0, 1, 1], [], []>} : vector<256x16xbf16>, vector<16x128xbf16>, vector<256x128xf32> -> vector<256x128xf32>
    %49 = arith.addf %43, %48 : vector<256x128xf32>
    %c0_45 = arith.constant 0 : index
    %c70 = arith.constant 70 : index
    %c0_46 = arith.constant 0 : index
    %50 = vector.load %arg2[%c0_45, %c70, %c0_46] : memref<1x1158x16xbf16, #tpu.memory_space<vmem>>, vector<1x256x16xbf16>
    %51 = vector.shape_cast %50 : vector<1x256x16xbf16> to vector<256x16xbf16>
    %c8 = arith.constant 8 : index
    %c0_47 = arith.constant 0 : index
    %c0_48 = arith.constant 0 : index
    %52 = vector.load %arg3[%c8, %c0_47, %c0_48] : memref<9x16x128xbf16, #tpu.memory_space<vmem>>, vector<1x16x128xbf16>
    %53 = vector.shape_cast %52 : vector<1x16x128xbf16> to vector<16x128xbf16>
    %cst_49 = arith.constant dense<0.000000e+00> : vector<256x128xf32>
    %54 = tpu.matmul %51, %53, %cst_49 {dimension_numbers = #tpu.dot_dimension_numbers<[1], [0], [0], [1], [0, 0, 1, 1], [], []>} : vector<256x16xbf16>, vector<16x128xbf16>, vector<256x128xf32> -> vector<256x128xf32>
    %55 = arith.addf %49, %54 : vector<256x128xf32>
    %56 = vector.broadcast %0 : vector<1x128xf32> to vector<256x128xf32>
    %57 = arith.addf %55, %56 : vector<256x128xf32>
    %cst_50 = arith.constant 0.000000e+00 : f32
    %58 = vector.broadcast %cst_50 : f32 to vector<256x128xf32>
    %59 = arith.maximumf %57, %58 : vector<256x128xf32>
    %c0_51 = arith.constant 0 : index
    %c0_52 = arith.constant 0 : index
    %c0_53 = arith.constant 0 : index
    %60 = vector.load %arg5[%c0_51, %c0_52, %c0_53] : memref<1x1088x128xf32, #tpu.memory_space<vmem>>, vector<1x256x128xf32>
    %61 = vector.shape_cast %60 : vector<1x256x128xf32> to vector<256x128xf32>
    %62 = vector.shape_cast %59 : vector<256x128xf32> to vector<1x256x128xf32>
    tpu.vector_store %arg5[%c0_51, %c0_52, %c0_53], %62 {strides = array<i32>} : memref<1x1088x128xf32, #tpu.memory_space<vmem>>, vector<1x256x128xf32>,
    %cst_54 = arith.constant 0.000000e+00 : f32
    %63 = vector.broadcast %cst_54 : f32 to vector<256x128xf32>
    %c0_55 = arith.constant 0 : index
    %c256 = arith.constant 256 : index
    %c0_56 = arith.constant 0 : index
    %64 = vector.load %arg2[%c0_55, %c256, %c0_56] : memref<1x1158x16xbf16, #tpu.memory_space<vmem>>, vector<1x256x16xbf16>
    %65 = vector.shape_cast %64 : vector<1x256x16xbf16> to vector<256x16xbf16>
    %c0_57 = arith.constant 0 : index
    %c0_58 = arith.constant 0 : index
    %c0_59 = arith.constant 0 : index
    %66 = vector.load %arg3[%c0_57, %c0_58, %c0_59] : memref<9x16x128xbf16, #tpu.memory_space<vmem>>, vector<1x16x128xbf16>
    %67 = vector.shape_cast %66 : vector<1x16x128xbf16> to vector<16x128xbf16>
    %cst_60 = arith.constant dense<0.000000e+00> : vector<256x128xf32>
    %68 = tpu.matmul %65, %67, %cst_60 {dimension_numbers = #tpu.dot_dimension_numbers<[1], [0], [0], [1], [0, 0, 1, 1], [], []>} : vector<256x16xbf16>, vector<16x128xbf16>, vector<256x128xf32> -> vector<256x128xf32>
    %69 = arith.addf %63, %68 : vector<256x128xf32>
    %c0_61 = arith.constant 0 : index
    %c257 = arith.constant 257 : index
    %c0_62 = arith.constant 0 : index
    %70 = vector.load %arg2[%c0_61, %c257, %c0_62] : memref<1x1158x16xbf16, #tpu.memory_space<vmem>>, vector<1x256x16xbf16>
    %71 = vector.shape_cast %70 : vector<1x256x16xbf16> to vector<256x16xbf16>
    %c1_63 = arith.constant 1 : index
    %c0_64 = arith.constant 0 : index
    %c0_65 = arith.constant 0 : index
    %72 = vector.load %arg3[%c1_63, %c0_64, %c0_65] : memref<9x16x128xbf16, #tpu.memory_space<vmem>>, vector<1x16x128xbf16>
    %73 = vector.shape_cast %72 : vector<1x16x128xbf16> to vector<16x128xbf16>
    %cst_66 = arith.constant dense<0.000000e+00> : vector<256x128xf32>
    %74 = tpu.matmul %71, %73, %cst_66 {dimension_numbers = #tpu.dot_dimension_numbers<[1], [0], [0], [1], [0, 0, 1, 1], [], []>} : vector<256x16xbf16>, vector<16x128xbf16>, vector<256x128xf32> -> vector<256x128xf32>
    %75 = arith.addf %69, %74 : vector<256x128xf32>
    %c0_67 = arith.constant 0 : index
    %c258 = arith.constant 258 : index
    %c0_68 = arith.constant 0 : index
    %76 = vector.load %arg2[%c0_67, %c258, %c0_68] : memref<1x1158x16xbf16, #tpu.memory_space<vmem>>, vector<1x256x16xbf16>
    %77 = vector.shape_cast %76 : vector<1x256x16xbf16> to vector<256x16xbf16>
    %c2_69 = arith.constant 2 : index
    %c0_70 = arith.constant 0 : index
    %c0_71 = arith.constant 0 : index
    %78 = vector.load %arg3[%c2_69, %c0_70, %c0_71] : memref<9x16x128xbf16, #tpu.memory_space<vmem>>, vector<1x16x128xbf16>
    %79 = vector.shape_cast %78 : vector<1x16x128xbf16> to vector<16x128xbf16>
    %cst_72 = arith.constant dense<0.000000e+00> : vector<256x128xf32>
    %80 = tpu.matmul %77, %79, %cst_72 {dimension_numbers = #tpu.dot_dimension_numbers<[1], [0], [0], [1], [0, 0, 1, 1], [], []>} : vector<256x16xbf16>, vector<16x128xbf16>, vector<256x128xf32> -> vector<256x128xf32>
    %81 = arith.addf %75, %80 : vector<256x128xf32>
    %c0_73 = arith.constant 0 : index
    %c290 = arith.constant 290 : index
    %c0_74 = arith.constant 0 : index
    %82 = vector.load %arg2[%c0_73, %c290, %c0_74] : memref<1x1158x16xbf16, #tpu.memory_space<vmem>>, vector<1x256x16xbf16>
    %83 = vector.shape_cast %82 : vector<1x256x16xbf16> to vector<256x16xbf16>
    %c3_75 = arith.constant 3 : index
    %c0_76 = arith.constant 0 : index
    %c0_77 = arith.constant 0 : index
    %84 = vector.load %arg3[%c3_75, %c0_76, %c0_77] : memref<9x16x128xbf16, #tpu.memory_space<vmem>>, vector<1x16x128xbf16>
    %85 = vector.shape_cast %84 : vector<1x16x128xbf16> to vector<16x128xbf16>
    %cst_78 = arith.constant dense<0.000000e+00> : vector<256x128xf32>
    %86 = tpu.matmul %83, %85, %cst_78 {dimension_numbers = #tpu.dot_dimension_numbers<[1], [0], [0], [1], [0, 0, 1, 1], [], []>} : vector<256x16xbf16>, vector<16x128xbf16>, vector<256x128xf32> -> vector<256x128xf32>
    %87 = arith.addf %81, %86 : vector<256x128xf32>
    %c0_79 = arith.constant 0 : index
    %c291 = arith.constant 291 : index
    %c0_80 = arith.constant 0 : index
    %88 = vector.load %arg2[%c0_79, %c291, %c0_80] : memref<1x1158x16xbf16, #tpu.memory_space<vmem>>, vector<1x256x16xbf16>
    %89 = vector.shape_cast %88 : vector<1x256x16xbf16> to vector<256x16xbf16>
    %c4_81 = arith.constant 4 : index
    %c0_82 = arith.constant 0 : index
    %c0_83 = arith.constant 0 : index
    %90 = vector.load %arg3[%c4_81, %c0_82, %c0_83] : memref<9x16x128xbf16, #tpu.memory_space<vmem>>, vector<1x16x128xbf16>
    %91 = vector.shape_cast %90 : vector<1x16x128xbf16> to vector<16x128xbf16>
    %cst_84 = arith.constant dense<0.000000e+00> : vector<256x128xf32>
    %92 = tpu.matmul %89, %91, %cst_84 {dimension_numbers = #tpu.dot_dimension_numbers<[1], [0], [0], [1], [0, 0, 1, 1], [], []>} : vector<256x16xbf16>, vector<16x128xbf16>, vector<256x128xf32> -> vector<256x128xf32>
    %93 = arith.addf %87, %92 : vector<256x128xf32>
    %c0_85 = arith.constant 0 : index
    %c292 = arith.constant 292 : index
    %c0_86 = arith.constant 0 : index
    %94 = vector.load %arg2[%c0_85, %c292, %c0_86] : memref<1x1158x16xbf16, #tpu.memory_space<vmem>>, vector<1x256x16xbf16>
    %95 = vector.shape_cast %94 : vector<1x256x16xbf16> to vector<256x16xbf16>
    %c5_87 = arith.constant 5 : index
    %c0_88 = arith.constant 0 : index
    %c0_89 = arith.constant 0 : index
    %96 = vector.load %arg3[%c5_87, %c0_88, %c0_89] : memref<9x16x128xbf16, #tpu.memory_space<vmem>>, vector<1x16x128xbf16>
    %97 = vector.shape_cast %96 : vector<1x16x128xbf16> to vector<16x128xbf16>
    %cst_90 = arith.constant dense<0.000000e+00> : vector<256x128xf32>
    %98 = tpu.matmul %95, %97, %cst_90 {dimension_numbers = #tpu.dot_dimension_numbers<[1], [0], [0], [1], [0, 0, 1, 1], [], []>} : vector<256x16xbf16>, vector<16x128xbf16>, vector<256x128xf32> -> vector<256x128xf32>
    %99 = arith.addf %93, %98 : vector<256x128xf32>
    %c0_91 = arith.constant 0 : index
    %c324 = arith.constant 324 : index
    %c0_92 = arith.constant 0 : index
    %100 = vector.load %arg2[%c0_91, %c324, %c0_92] : memref<1x1158x16xbf16, #tpu.memory_space<vmem>>, vector<1x256x16xbf16>
    %101 = vector.shape_cast %100 : vector<1x256x16xbf16> to vector<256x16xbf16>
    %c6_93 = arith.constant 6 : index
    %c0_94 = arith.constant 0 : index
    %c0_95 = arith.constant 0 : index
    %102 = vector.load %arg3[%c6_93, %c0_94, %c0_95] : memref<9x16x128xbf16, #tpu.memory_space<vmem>>, vector<1x16x128xbf16>
    %103 = vector.shape_cast %102 : vector<1x16x128xbf16> to vector<16x128xbf16>
    %cst_96 = arith.constant dense<0.000000e+00> : vector<256x128xf32>
    %104 = tpu.matmul %101, %103, %cst_96 {dimension_numbers = #tpu.dot_dimension_numbers<[1], [0], [0], [1], [0, 0, 1, 1], [], []>} : vector<256x16xbf16>, vector<16x128xbf16>, vector<256x128xf32> -> vector<256x128xf32>
    %105 = arith.addf %99, %104 : vector<256x128xf32>
    %c0_97 = arith.constant 0 : index
    %c325 = arith.constant 325 : index
    %c0_98 = arith.constant 0 : index
    %106 = vector.load %arg2[%c0_97, %c325, %c0_98] : memref<1x1158x16xbf16, #tpu.memory_space<vmem>>, vector<1x256x16xbf16>
    %107 = vector.shape_cast %106 : vector<1x256x16xbf16> to vector<256x16xbf16>
    %c7_99 = arith.constant 7 : index
    %c0_100 = arith.constant 0 : index
    %c0_101 = arith.constant 0 : index
    %108 = vector.load %arg3[%c7_99, %c0_100, %c0_101] : memref<9x16x128xbf16, #tpu.memory_space<vmem>>, vector<1x16x128xbf16>
    %109 = vector.shape_cast %108 : vector<1x16x128xbf16> to vector<16x128xbf16>
    %cst_102 = arith.constant dense<0.000000e+00> : vector<256x128xf32>
    %110 = tpu.matmul %107, %109, %cst_102 {dimension_numbers = #tpu.dot_dimension_numbers<[1], [0], [0], [1], [0, 0, 1, 1], [], []>} : vector<256x16xbf16>, vector<16x128xbf16>, vector<256x128xf32> -> vector<256x128xf32>
    %111 = arith.addf %105, %110 : vector<256x128xf32>
    %c0_103 = arith.constant 0 : index
    %c326 = arith.constant 326 : index
    %c0_104 = arith.constant 0 : index
    %112 = vector.load %arg2[%c0_103, %c326, %c0_104] : memref<1x1158x16xbf16, #tpu.memory_space<vmem>>, vector<1x256x16xbf16>
    %113 = vector.shape_cast %112 : vector<1x256x16xbf16> to vector<256x16xbf16>
    %c8_105 = arith.constant 8 : index
    %c0_106 = arith.constant 0 : index
    %c0_107 = arith.constant 0 : index
    %114 = vector.load %arg3[%c8_105, %c0_106, %c0_107] : memref<9x16x128xbf16, #tpu.memory_space<vmem>>, vector<1x16x128xbf16>
    %115 = vector.shape_cast %114 : vector<1x16x128xbf16> to vector<16x128xbf16>
    %cst_108 = arith.constant dense<0.000000e+00> : vector<256x128xf32>
    %116 = tpu.matmul %113, %115, %cst_108 {dimension_numbers = #tpu.dot_dimension_numbers<[1], [0], [0], [1], [0, 0, 1, 1], [], []>} : vector<256x16xbf16>, vector<16x128xbf16>, vector<256x128xf32> -> vector<256x128xf32>
    %117 = arith.addf %111, %116 : vector<256x128xf32>
    %118 = vector.broadcast %0 : vector<1x128xf32> to vector<256x128xf32>
    %119 = arith.addf %117, %118 : vector<256x128xf32>
    %cst_109 = arith.constant 0.000000e+00 : f32
    %120 = vector.broadcast %cst_109 : f32 to vector<256x128xf32>
    %121 = arith.maximumf %119, %120 : vector<256x128xf32>
    %c0_110 = arith.constant 0 : index
    %c256_111 = arith.constant 256 : index
    %c0_112 = arith.constant 0 : index
    %122 = vector.load %arg5[%c0_110, %c256_111, %c0_112] : memref<1x1088x128xf32, #tpu.memory_space<vmem>>, vector<1x256x128xf32>
    %123 = vector.shape_cast %122 : vector<1x256x128xf32> to vector<256x128xf32>
    %124 = vector.shape_cast %121 : vector<256x128xf32> to vector<1x256x128xf32>
    tpu.vector_store %arg5[%c0_110, %c256_111, %c0_112], %124 {strides = array<i32>} : memref<1x1088x128xf32, #tpu.memory_space<vmem>>, vector<1x256x128xf32>,
    %cst_113 = arith.constant 0.000000e+00 : f32
    %125 = vector.broadcast %cst_113 : f32 to vector<256x128xf32>
    %c0_114 = arith.constant 0 : index
    %c512 = arith.constant 512 : index
    %c0_115 = arith.constant 0 : index
    %126 = vector.load %arg2[%c0_114, %c512, %c0_115] : memref<1x1158x16xbf16, #tpu.memory_space<vmem>>, vector<1x256x16xbf16>
    %127 = vector.shape_cast %126 : vector<1x256x16xbf16> to vector<256x16xbf16>
    %c0_116 = arith.constant 0 : index
    %c0_117 = arith.constant 0 : index
    %c0_118 = arith.constant 0 : index
    %128 = vector.load %arg3[%c0_116, %c0_117, %c0_118] : memref<9x16x128xbf16, #tpu.memory_space<vmem>>, vector<1x16x128xbf16>
    %129 = vector.shape_cast %128 : vector<1x16x128xbf16> to vector<16x128xbf16>
    %cst_119 = arith.constant dense<0.000000e+00> : vector<256x128xf32>
    %130 = tpu.matmul %127, %129, %cst_119 {dimension_numbers = #tpu.dot_dimension_numbers<[1], [0], [0], [1], [0, 0, 1, 1], [], []>} : vector<256x16xbf16>, vector<16x128xbf16>, vector<256x128xf32> -> vector<256x128xf32>
    %131 = arith.addf %125, %130 : vector<256x128xf32>
    %c0_120 = arith.constant 0 : index
    %c513 = arith.constant 513 : index
    %c0_121 = arith.constant 0 : index
    %132 = vector.load %arg2[%c0_120, %c513, %c0_121] : memref<1x1158x16xbf16, #tpu.memory_space<vmem>>, vector<1x256x16xbf16>
    %133 = vector.shape_cast %132 : vector<1x256x16xbf16> to vector<256x16xbf16>
    %c1_122 = arith.constant 1 : index
    %c0_123 = arith.constant 0 : index
    %c0_124 = arith.constant 0 : index
    %134 = vector.load %arg3[%c1_122, %c0_123, %c0_124] : memref<9x16x128xbf16, #tpu.memory_space<vmem>>, vector<1x16x128xbf16>
    %135 = vector.shape_cast %134 : vector<1x16x128xbf16> to vector<16x128xbf16>
    %cst_125 = arith.constant dense<0.000000e+00> : vector<256x128xf32>
    %136 = tpu.matmul %133, %135, %cst_125 {dimension_numbers = #tpu.dot_dimension_numbers<[1], [0], [0], [1], [0, 0, 1, 1], [], []>} : vector<256x16xbf16>, vector<16x128xbf16>, vector<256x128xf32> -> vector<256x128xf32>
    %137 = arith.addf %131, %136 : vector<256x128xf32>
    %c0_126 = arith.constant 0 : index
    %c514 = arith.constant 514 : index
    %c0_127 = arith.constant 0 : index
    %138 = vector.load %arg2[%c0_126, %c514, %c0_127] : memref<1x1158x16xbf16, #tpu.memory_space<vmem>>, vector<1x256x16xbf16>
    %139 = vector.shape_cast %138 : vector<1x256x16xbf16> to vector<256x16xbf16>
    %c2_128 = arith.constant 2 : index
    %c0_129 = arith.constant 0 : index
    %c0_130 = arith.constant 0 : index
    %140 = vector.load %arg3[%c2_128, %c0_129, %c0_130] : memref<9x16x128xbf16, #tpu.memory_space<vmem>>, vector<1x16x128xbf16>
    %141 = vector.shape_cast %140 : vector<1x16x128xbf16> to vector<16x128xbf16>
    %cst_131 = arith.constant dense<0.000000e+00> : vector<256x128xf32>
    %142 = tpu.matmul %139, %141, %cst_131 {dimension_numbers = #tpu.dot_dimension_numbers<[1], [0], [0], [1], [0, 0, 1, 1], [], []>} : vector<256x16xbf16>, vector<16x128xbf16>, vector<256x128xf32> -> vector<256x128xf32>
    %143 = arith.addf %137, %142 : vector<256x128xf32>
    %c0_132 = arith.constant 0 : index
    %c546 = arith.constant 546 : index
    %c0_133 = arith.constant 0 : index
    %144 = vector.load %arg2[%c0_132, %c546, %c0_133] : memref<1x1158x16xbf16, #tpu.memory_space<vmem>>, vector<1x256x16xbf16>
    %145 = vector.shape_cast %144 : vector<1x256x16xbf16> to vector<256x16xbf16>
    %c3_134 = arith.constant 3 : index
    %c0_135 = arith.constant 0 : index
    %c0_136 = arith.constant 0 : index
    %146 = vector.load %arg3[%c3_134, %c0_135, %c0_136] : memref<9x16x128xbf16, #tpu.memory_space<vmem>>, vector<1x16x128xbf16>
    %147 = vector.shape_cast %146 : vector<1x16x128xbf16> to vector<16x128xbf16>
    %cst_137 = arith.constant dense<0.000000e+00> : vector<256x128xf32>
    %148 = tpu.matmul %145, %147, %cst_137 {dimension_numbers = #tpu.dot_dimension_numbers<[1], [0], [0], [1], [0, 0, 1, 1], [], []>} : vector<256x16xbf16>, vector<16x128xbf16>, vector<256x128xf32> -> vector<256x128xf32>
    %149 = arith.addf %143, %148 : vector<256x128xf32>
    %c0_138 = arith.constant 0 : index
    %c547 = arith.constant 547 : index
    %c0_139 = arith.constant 0 : index
    %150 = vector.load %arg2[%c0_138, %c547, %c0_139] : memref<1x1158x16xbf16, #tpu.memory_space<vmem>>, vector<1x256x16xbf16>
    %151 = vector.shape_cast %150 : vector<1x256x16xbf16> to vector<256x16xbf16>
    %c4_140 = arith.constant 4 : index
    %c0_141 = arith.constant 0 : index
    %c0_142 = arith.constant 0 : index
    %152 = vector.load %arg3[%c4_140, %c0_141, %c0_142] : memref<9x16x128xbf16, #tpu.memory_space<vmem>>, vector<1x16x128xbf16>
    %153 = vector.shape_cast %152 : vector<1x16x128xbf16> to vector<16x128xbf16>
    %cst_143 = arith.constant dense<0.000000e+00> : vector<256x128xf32>
    %154 = tpu.matmul %151, %153, %cst_143 {dimension_numbers = #tpu.dot_dimension_numbers<[1], [0], [0], [1], [0, 0, 1, 1], [], []>} : vector<256x16xbf16>, vector<16x128xbf16>, vector<256x128xf32> -> vector<256x128xf32>
    %155 = arith.addf %149, %154 : vector<256x128xf32>
    %c0_144 = arith.constant 0 : index
    %c548 = arith.constant 548 : index
    %c0_145 = arith.constant 0 : index
    %156 = vector.load %arg2[%c0_144, %c548, %c0_145] : memref<1x1158x16xbf16, #tpu.memory_space<vmem>>, vector<1x256x16xbf16>
    %157 = vector.shape_cast %156 : vector<1x256x16xbf16> to vector<256x16xbf16>
    %c5_146 = arith.constant 5 : index
    %c0_147 = arith.constant 0 : index
    %c0_148 = arith.constant 0 : index
    %158 = vector.load %arg3[%c5_146, %c0_147, %c0_148] : memref<9x16x128xbf16, #tpu.memory_space<vmem>>, vector<1x16x128xbf16>
    %159 = vector.shape_cast %158 : vector<1x16x128xbf16> to vector<16x128xbf16>
    %cst_149 = arith.constant dense<0.000000e+00> : vector<256x128xf32>
    %160 = tpu.matmul %157, %159, %cst_149 {dimension_numbers = #tpu.dot_dimension_numbers<[1], [0], [0], [1], [0, 0, 1, 1], [], []>} : vector<256x16xbf16>, vector<16x128xbf16>, vector<256x128xf32> -> vector<256x128xf32>
    %161 = arith.addf %155, %160 : vector<256x128xf32>
    %c0_150 = arith.constant 0 : index
    %c580 = arith.constant 580 : index
    %c0_151 = arith.constant 0 : index
    %162 = vector.load %arg2[%c0_150, %c580, %c0_151] : memref<1x1158x16xbf16, #tpu.memory_space<vmem>>, vector<1x256x16xbf16>
    %163 = vector.shape_cast %162 : vector<1x256x16xbf16> to vector<256x16xbf16>
    %c6_152 = arith.constant 6 : index
    %c0_153 = arith.constant 0 : index
    %c0_154 = arith.constant 0 : index
    %164 = vector.load %arg3[%c6_152, %c0_153, %c0_154] : memref<9x16x128xbf16, #tpu.memory_space<vmem>>, vector<1x16x128xbf16>
    %165 = vector.shape_cast %164 : vector<1x16x128xbf16> to vector<16x128xbf16>
    %cst_155 = arith.constant dense<0.000000e+00> : vector<256x128xf32>
    %166 = tpu.matmul %163, %165, %cst_155 {dimension_numbers = #tpu.dot_dimension_numbers<[1], [0], [0], [1], [0, 0, 1, 1], [], []>} : vector<256x16xbf16>, vector<16x128xbf16>, vector<256x128xf32> -> vector<256x128xf32>
    %167 = arith.addf %161, %166 : vector<256x128xf32>
    %c0_156 = arith.constant 0 : index
    %c581 = arith.constant 581 : index
    %c0_157 = arith.constant 0 : index
    %168 = vector.load %arg2[%c0_156, %c581, %c0_157] : memref<1x1158x16xbf16, #tpu.memory_space<vmem>>, vector<1x256x16xbf16>
    %169 = vector.shape_cast %168 : vector<1x256x16xbf16> to vector<256x16xbf16>
    %c7_158 = arith.constant 7 : index
    %c0_159 = arith.constant 0 : index
    %c0_160 = arith.constant 0 : index
    %170 = vector.load %arg3[%c7_158, %c0_159, %c0_160] : memref<9x16x128xbf16, #tpu.memory_space<vmem>>, vector<1x16x128xbf16>
    %171 = vector.shape_cast %170 : vector<1x16x128xbf16> to vector<16x128xbf16>
    %cst_161 = arith.constant dense<0.000000e+00> : vector<256x128xf32>
    %172 = tpu.matmul %169, %171, %cst_161 {dimension_numbers = #tpu.dot_dimension_numbers<[1], [0], [0], [1], [0, 0, 1, 1], [], []>} : vector<256x16xbf16>, vector<16x128xbf16>, vector<256x128xf32> -> vector<256x128xf32>
    %173 = arith.addf %167, %172 : vector<256x128xf32>
    %c0_162 = arith.constant 0 : index
    %c582 = arith.constant 582 : index
    %c0_163 = arith.constant 0 : index
    %174 = vector.load %arg2[%c0_162, %c582, %c0_163] : memref<1x1158x16xbf16, #tpu.memory_space<vmem>>, vector<1x256x16xbf16>
    %175 = vector.shape_cast %174 : vector<1x256x16xbf16> to vector<256x16xbf16>
    %c8_164 = arith.constant 8 : index
    %c0_165 = arith.constant 0 : index
    %c0_166 = arith.constant 0 : index
    %176 = vector.load %arg3[%c8_164, %c0_165, %c0_166] : memref<9x16x128xbf16, #tpu.memory_space<vmem>>, vector<1x16x128xbf16>
    %177 = vector.shape_cast %176 : vector<1x16x128xbf16> to vector<16x128xbf16>
    %cst_167 = arith.constant dense<0.000000e+00> : vector<256x128xf32>
    %178 = tpu.matmul %175, %177, %cst_167 {dimension_numbers = #tpu.dot_dimension_numbers<[1], [0], [0], [1], [0, 0, 1, 1], [], []>} : vector<256x16xbf16>, vector<16x128xbf16>, vector<256x128xf32> -> vector<256x128xf32>
    %179 = arith.addf %173, %178 : vector<256x128xf32>
    %180 = vector.broadcast %0 : vector<1x128xf32> to vector<256x128xf32>
    %181 = arith.addf %179, %180 : vector<256x128xf32>
    %cst_168 = arith.constant 0.000000e+00 : f32
    %182 = vector.broadcast %cst_168 : f32 to vector<256x128xf32>
    %183 = arith.maximumf %181, %182 : vector<256x128xf32>
    %c0_169 = arith.constant 0 : index
    %c512_170 = arith.constant 512 : index
    %c0_171 = arith.constant 0 : index
    %184 = vector.load %arg5[%c0_169, %c512_170, %c0_171] : memref<1x1088x128xf32, #tpu.memory_space<vmem>>, vector<1x256x128xf32>
    %185 = vector.shape_cast %184 : vector<1x256x128xf32> to vector<256x128xf32>
    %186 = vector.shape_cast %183 : vector<256x128xf32> to vector<1x256x128xf32>
    tpu.vector_store %arg5[%c0_169, %c512_170, %c0_171], %186 {strides = array<i32>} : memref<1x1088x128xf32, #tpu.memory_space<vmem>>, vector<1x256x128xf32>,
    %cst_172 = arith.constant 0.000000e+00 : f32
    %187 = vector.broadcast %cst_172 : f32 to vector<256x128xf32>
    %c0_173 = arith.constant 0 : index
    %c768 = arith.constant 768 : index
    %c0_174 = arith.constant 0 : index
    %188 = vector.load %arg2[%c0_173, %c768, %c0_174] : memref<1x1158x16xbf16, #tpu.memory_space<vmem>>, vector<1x256x16xbf16>
    %189 = vector.shape_cast %188 : vector<1x256x16xbf16> to vector<256x16xbf16>
    %c0_175 = arith.constant 0 : index
    %c0_176 = arith.constant 0 : index
    %c0_177 = arith.constant 0 : index
    %190 = vector.load %arg3[%c0_175, %c0_176, %c0_177] : memref<9x16x128xbf16, #tpu.memory_space<vmem>>, vector<1x16x128xbf16>
    %191 = vector.shape_cast %190 : vector<1x16x128xbf16> to vector<16x128xbf16>
    %cst_178 = arith.constant dense<0.000000e+00> : vector<256x128xf32>
    %192 = tpu.matmul %189, %191, %cst_178 {dimension_numbers = #tpu.dot_dimension_numbers<[1], [0], [0], [1], [0, 0, 1, 1], [], []>} : vector<256x16xbf16>, vector<16x128xbf16>, vector<256x128xf32> -> vector<256x128xf32>
    %193 = arith.addf %187, %192 : vector<256x128xf32>
    %c0_179 = arith.constant 0 : index
    %c769 = arith.constant 769 : index
    %c0_180 = arith.constant 0 : index
    %194 = vector.load %arg2[%c0_179, %c769, %c0_180] : memref<1x1158x16xbf16, #tpu.memory_space<vmem>>, vector<1x256x16xbf16>
    %195 = vector.shape_cast %194 : vector<1x256x16xbf16> to vector<256x16xbf16>
    %c1_181 = arith.constant 1 : index
    %c0_182 = arith.constant 0 : index
    %c0_183 = arith.constant 0 : index
    %196 = vector.load %arg3[%c1_181, %c0_182, %c0_183] : memref<9x16x128xbf16, #tpu.memory_space<vmem>>, vector<1x16x128xbf16>
    %197 = vector.shape_cast %196 : vector<1x16x128xbf16> to vector<16x128xbf16>
    %cst_184 = arith.constant dense<0.000000e+00> : vector<256x128xf32>
    %198 = tpu.matmul %195, %197, %cst_184 {dimension_numbers = #tpu.dot_dimension_numbers<[1], [0], [0], [1], [0, 0, 1, 1], [], []>} : vector<256x16xbf16>, vector<16x128xbf16>, vector<256x128xf32> -> vector<256x128xf32>
    %199 = arith.addf %193, %198 : vector<256x128xf32>
    %c0_185 = arith.constant 0 : index
    %c770 = arith.constant 770 : index
    %c0_186 = arith.constant 0 : index
    %200 = vector.load %arg2[%c0_185, %c770, %c0_186] : memref<1x1158x16xbf16, #tpu.memory_space<vmem>>, vector<1x256x16xbf16>
    %201 = vector.shape_cast %200 : vector<1x256x16xbf16> to vector<256x16xbf16>
    %c2_187 = arith.constant 2 : index
    %c0_188 = arith.constant 0 : index
    %c0_189 = arith.constant 0 : index
    %202 = vector.load %arg3[%c2_187, %c0_188, %c0_189] : memref<9x16x128xbf16, #tpu.memory_space<vmem>>, vector<1x16x128xbf16>
    %203 = vector.shape_cast %202 : vector<1x16x128xbf16> to vector<16x128xbf16>
    %cst_190 = arith.constant dense<0.000000e+00> : vector<256x128xf32>
    %204 = tpu.matmul %201, %203, %cst_190 {dimension_numbers = #tpu.dot_dimension_numbers<[1], [0], [0], [1], [0, 0, 1, 1], [], []>} : vector<256x16xbf16>, vector<16x128xbf16>, vector<256x128xf32> -> vector<256x128xf32>
    %205 = arith.addf %199, %204 : vector<256x128xf32>
    %c0_191 = arith.constant 0 : index
    %c802 = arith.constant 802 : index
    %c0_192 = arith.constant 0 : index
    %206 = vector.load %arg2[%c0_191, %c802, %c0_192] : memref<1x1158x16xbf16, #tpu.memory_space<vmem>>, vector<1x256x16xbf16>
    %207 = vector.shape_cast %206 : vector<1x256x16xbf16> to vector<256x16xbf16>
    %c3_193 = arith.constant 3 : index
    %c0_194 = arith.constant 0 : index
    %c0_195 = arith.constant 0 : index
    %208 = vector.load %arg3[%c3_193, %c0_194, %c0_195] : memref<9x16x128xbf16, #tpu.memory_space<vmem>>, vector<1x16x128xbf16>
    %209 = vector.shape_cast %208 : vector<1x16x128xbf16> to vector<16x128xbf16>
    %cst_196 = arith.constant dense<0.000000e+00> : vector<256x128xf32>
    %210 = tpu.matmul %207, %209, %cst_196 {dimension_numbers = #tpu.dot_dimension_numbers<[1], [0], [0], [1], [0, 0, 1, 1], [], []>} : vector<256x16xbf16>, vector<16x128xbf16>, vector<256x128xf32> -> vector<256x128xf32>
    %211 = arith.addf %205, %210 : vector<256x128xf32>
    %c0_197 = arith.constant 0 : index
    %c803 = arith.constant 803 : index
    %c0_198 = arith.constant 0 : index
    %212 = vector.load %arg2[%c0_197, %c803, %c0_198] : memref<1x1158x16xbf16, #tpu.memory_space<vmem>>, vector<1x256x16xbf16>
    %213 = vector.shape_cast %212 : vector<1x256x16xbf16> to vector<256x16xbf16>
    %c4_199 = arith.constant 4 : index
    %c0_200 = arith.constant 0 : index
    %c0_201 = arith.constant 0 : index
    %214 = vector.load %arg3[%c4_199, %c0_200, %c0_201] : memref<9x16x128xbf16, #tpu.memory_space<vmem>>, vector<1x16x128xbf16>
    %215 = vector.shape_cast %214 : vector<1x16x128xbf16> to vector<16x128xbf16>
    %cst_202 = arith.constant dense<0.000000e+00> : vector<256x128xf32>
    %216 = tpu.matmul %213, %215, %cst_202 {dimension_numbers = #tpu.dot_dimension_numbers<[1], [0], [0], [1], [0, 0, 1, 1], [], []>} : vector<256x16xbf16>, vector<16x128xbf16>, vector<256x128xf32> -> vector<256x128xf32>
    %217 = arith.addf %211, %216 : vector<256x128xf32>
    %c0_203 = arith.constant 0 : index
    %c804 = arith.constant 804 : index
    %c0_204 = arith.constant 0 : index
    %218 = vector.load %arg2[%c0_203, %c804, %c0_204] : memref<1x1158x16xbf16, #tpu.memory_space<vmem>>, vector<1x256x16xbf16>
    %219 = vector.shape_cast %218 : vector<1x256x16xbf16> to vector<256x16xbf16>
    %c5_205 = arith.constant 5 : index
    %c0_206 = arith.constant 0 : index
    %c0_207 = arith.constant 0 : index
    %220 = vector.load %arg3[%c5_205, %c0_206, %c0_207] : memref<9x16x128xbf16, #tpu.memory_space<vmem>>, vector<1x16x128xbf16>
    %221 = vector.shape_cast %220 : vector<1x16x128xbf16> to vector<16x128xbf16>
    %cst_208 = arith.constant dense<0.000000e+00> : vector<256x128xf32>
    %222 = tpu.matmul %219, %221, %cst_208 {dimension_numbers = #tpu.dot_dimension_numbers<[1], [0], [0], [1], [0, 0, 1, 1], [], []>} : vector<256x16xbf16>, vector<16x128xbf16>, vector<256x128xf32> -> vector<256x128xf32>
    %223 = arith.addf %217, %222 : vector<256x128xf32>
    %c0_209 = arith.constant 0 : index
    %c836 = arith.constant 836 : index
    %c0_210 = arith.constant 0 : index
    %224 = vector.load %arg2[%c0_209, %c836, %c0_210] : memref<1x1158x16xbf16, #tpu.memory_space<vmem>>, vector<1x256x16xbf16>
    %225 = vector.shape_cast %224 : vector<1x256x16xbf16> to vector<256x16xbf16>
    %c6_211 = arith.constant 6 : index
    %c0_212 = arith.constant 0 : index
    %c0_213 = arith.constant 0 : index
    %226 = vector.load %arg3[%c6_211, %c0_212, %c0_213] : memref<9x16x128xbf16, #tpu.memory_space<vmem>>, vector<1x16x128xbf16>
    %227 = vector.shape_cast %226 : vector<1x16x128xbf16> to vector<16x128xbf16>
    %cst_214 = arith.constant dense<0.000000e+00> : vector<256x128xf32>
    %228 = tpu.matmul %225, %227, %cst_214 {dimension_numbers = #tpu.dot_dimension_numbers<[1], [0], [0], [1], [0, 0, 1, 1], [], []>} : vector<256x16xbf16>, vector<16x128xbf16>, vector<256x128xf32> -> vector<256x128xf32>
    %229 = arith.addf %223, %228 : vector<256x128xf32>
    %c0_215 = arith.constant 0 : index
    %c837 = arith.constant 837 : index
    %c0_216 = arith.constant 0 : index
    %230 = vector.load %arg2[%c0_215, %c837, %c0_216] : memref<1x1158x16xbf16, #tpu.memory_space<vmem>>, vector<1x256x16xbf16>
    %231 = vector.shape_cast %230 : vector<1x256x16xbf16> to vector<256x16xbf16>
    %c7_217 = arith.constant 7 : index
    %c0_218 = arith.constant 0 : index
    %c0_219 = arith.constant 0 : index
    %232 = vector.load %arg3[%c7_217, %c0_218, %c0_219] : memref<9x16x128xbf16, #tpu.memory_space<vmem>>, vector<1x16x128xbf16>
    %233 = vector.shape_cast %232 : vector<1x16x128xbf16> to vector<16x128xbf16>
    %cst_220 = arith.constant dense<0.000000e+00> : vector<256x128xf32>
    %234 = tpu.matmul %231, %233, %cst_220 {dimension_numbers = #tpu.dot_dimension_numbers<[1], [0], [0], [1], [0, 0, 1, 1], [], []>} : vector<256x16xbf16>, vector<16x128xbf16>, vector<256x128xf32> -> vector<256x128xf32>
    %235 = arith.addf %229, %234 : vector<256x128xf32>
    %c0_221 = arith.constant 0 : index
    %c838 = arith.constant 838 : index
    %c0_222 = arith.constant 0 : index
    %236 = vector.load %arg2[%c0_221, %c838, %c0_222] : memref<1x1158x16xbf16, #tpu.memory_space<vmem>>, vector<1x256x16xbf16>
    %237 = vector.shape_cast %236 : vector<1x256x16xbf16> to vector<256x16xbf16>
    %c8_223 = arith.constant 8 : index
    %c0_224 = arith.constant 0 : index
    %c0_225 = arith.constant 0 : index
    %238 = vector.load %arg3[%c8_223, %c0_224, %c0_225] : memref<9x16x128xbf16, #tpu.memory_space<vmem>>, vector<1x16x128xbf16>
    %239 = vector.shape_cast %238 : vector<1x16x128xbf16> to vector<16x128xbf16>
    %cst_226 = arith.constant dense<0.000000e+00> : vector<256x128xf32>
    %240 = tpu.matmul %237, %239, %cst_226 {dimension_numbers = #tpu.dot_dimension_numbers<[1], [0], [0], [1], [0, 0, 1, 1], [], []>} : vector<256x16xbf16>, vector<16x128xbf16>, vector<256x128xf32> -> vector<256x128xf32>
    %241 = arith.addf %235, %240 : vector<256x128xf32>
    %242 = vector.broadcast %0 : vector<1x128xf32> to vector<256x128xf32>
    %243 = arith.addf %241, %242 : vector<256x128xf32>
    %cst_227 = arith.constant 0.000000e+00 : f32
    %244 = vector.broadcast %cst_227 : f32 to vector<256x128xf32>
    %245 = arith.maximumf %243, %244 : vector<256x128xf32>
    %c0_228 = arith.constant 0 : index
    %c768_229 = arith.constant 768 : index
    %c0_230 = arith.constant 0 : index
    %246 = vector.load %arg5[%c0_228, %c768_229, %c0_230] : memref<1x1088x128xf32, #tpu.memory_space<vmem>>, vector<1x256x128xf32>
    %247 = vector.shape_cast %246 : vector<1x256x128xf32> to vector<256x128xf32>
    %248 = vector.shape_cast %245 : vector<256x128xf32> to vector<1x256x128xf32>
    tpu.vector_store %arg5[%c0_228, %c768_229, %c0_230], %248 {strides = array<i32>} : memref<1x1088x128xf32, #tpu.memory_space<vmem>>, vector<1x256x128xf32>,
    %cst_231 = arith.constant 0.000000e+00 : f32
    %249 = vector.broadcast %cst_231 : f32 to vector<64x128xf32>
    %c0_232 = arith.constant 0 : index
    %c1024 = arith.constant 1024 : index
    %c0_233 = arith.constant 0 : index
    %250 = vector.load %arg2[%c0_232, %c1024, %c0_233] : memref<1x1158x16xbf16, #tpu.memory_space<vmem>>, vector<1x64x16xbf16>
    %251 = vector.shape_cast %250 : vector<1x64x16xbf16> to vector<64x16xbf16>
    %c0_234 = arith.constant 0 : index
    %c0_235 = arith.constant 0 : index
    %c0_236 = arith.constant 0 : index
    %252 = vector.load %arg3[%c0_234, %c0_235, %c0_236] : memref<9x16x128xbf16, #tpu.memory_space<vmem>>, vector<1x16x128xbf16>
    %253 = vector.shape_cast %252 : vector<1x16x128xbf16> to vector<16x128xbf16>
    %cst_237 = arith.constant dense<0.000000e+00> : vector<64x128xf32>
    %254 = tpu.matmul %251, %253, %cst_237 {dimension_numbers = #tpu.dot_dimension_numbers<[1], [0], [0], [1], [0, 0, 1, 1], [], []>} : vector<64x16xbf16>, vector<16x128xbf16>, vector<64x128xf32> -> vector<64x128xf32>
    %255 = arith.addf %249, %254 : vector<64x128xf32>
    %c0_238 = arith.constant 0 : index
    %c1025 = arith.constant 1025 : index
    %c0_239 = arith.constant 0 : index
    %256 = vector.load %arg2[%c0_238, %c1025, %c0_239] : memref<1x1158x16xbf16, #tpu.memory_space<vmem>>, vector<1x64x16xbf16>
    %257 = vector.shape_cast %256 : vector<1x64x16xbf16> to vector<64x16xbf16>
    %c1_240 = arith.constant 1 : index
    %c0_241 = arith.constant 0 : index
    %c0_242 = arith.constant 0 : index
    %258 = vector.load %arg3[%c1_240, %c0_241, %c0_242] : memref<9x16x128xbf16, #tpu.memory_space<vmem>>, vector<1x16x128xbf16>
    %259 = vector.shape_cast %258 : vector<1x16x128xbf16> to vector<16x128xbf16>
    %cst_243 = arith.constant dense<0.000000e+00> : vector<64x128xf32>
    %260 = tpu.matmul %257, %259, %cst_243 {dimension_numbers = #tpu.dot_dimension_numbers<[1], [0], [0], [1], [0, 0, 1, 1], [], []>} : vector<64x16xbf16>, vector<16x128xbf16>, vector<64x128xf32> -> vector<64x128xf32>
    %261 = arith.addf %255, %260 : vector<64x128xf32>
    %c0_244 = arith.constant 0 : index
    %c1026 = arith.constant 1026 : index
    %c0_245 = arith.constant 0 : index
    %262 = vector.load %arg2[%c0_244, %c1026, %c0_245] : memref<1x1158x16xbf16, #tpu.memory_space<vmem>>, vector<1x64x16xbf16>
    %263 = vector.shape_cast %262 : vector<1x64x16xbf16> to vector<64x16xbf16>
    %c2_246 = arith.constant 2 : index
    %c0_247 = arith.constant 0 : index
    %c0_248 = arith.constant 0 : index
    %264 = vector.load %arg3[%c2_246, %c0_247, %c0_248] : memref<9x16x128xbf16, #tpu.memory_space<vmem>>, vector<1x16x128xbf16>
    %265 = vector.shape_cast %264 : vector<1x16x128xbf16> to vector<16x128xbf16>
    %cst_249 = arith.constant dense<0.000000e+00> : vector<64x128xf32>
    %266 = tpu.matmul %263, %265, %cst_249 {dimension_numbers = #tpu.dot_dimension_numbers<[1], [0], [0], [1], [0, 0, 1, 1], [], []>} : vector<64x16xbf16>, vector<16x128xbf16>, vector<64x128xf32> -> vector<64x128xf32>
    %267 = arith.addf %261, %266 : vector<64x128xf32>
    %c0_250 = arith.constant 0 : index
    %c1058 = arith.constant 1058 : index
    %c0_251 = arith.constant 0 : index
    %268 = vector.load %arg2[%c0_250, %c1058, %c0_251] : memref<1x1158x16xbf16, #tpu.memory_space<vmem>>, vector<1x64x16xbf16>
    %269 = vector.shape_cast %268 : vector<1x64x16xbf16> to vector<64x16xbf16>
    %c3_252 = arith.constant 3 : index
    %c0_253 = arith.constant 0 : index
    %c0_254 = arith.constant 0 : index
    %270 = vector.load %arg3[%c3_252, %c0_253, %c0_254] : memref<9x16x128xbf16, #tpu.memory_space<vmem>>, vector<1x16x128xbf16>
    %271 = vector.shape_cast %270 : vector<1x16x128xbf16> to vector<16x128xbf16>
    %cst_255 = arith.constant dense<0.000000e+00> : vector<64x128xf32>
    %272 = tpu.matmul %269, %271, %cst_255 {dimension_numbers = #tpu.dot_dimension_numbers<[1], [0], [0], [1], [0, 0, 1, 1], [], []>} : vector<64x16xbf16>, vector<16x128xbf16>, vector<64x128xf32> -> vector<64x128xf32>
    %273 = arith.addf %267, %272 : vector<64x128xf32>
    %c0_256 = arith.constant 0 : index
    %c1059 = arith.constant 1059 : index
    %c0_257 = arith.constant 0 : index
    %274 = vector.load %arg2[%c0_256, %c1059, %c0_257] : memref<1x1158x16xbf16, #tpu.memory_space<vmem>>, vector<1x64x16xbf16>
    %275 = vector.shape_cast %274 : vector<1x64x16xbf16> to vector<64x16xbf16>
    %c4_258 = arith.constant 4 : index
    %c0_259 = arith.constant 0 : index
    %c0_260 = arith.constant 0 : index
    %276 = vector.load %arg3[%c4_258, %c0_259, %c0_260] : memref<9x16x128xbf16, #tpu.memory_space<vmem>>, vector<1x16x128xbf16>
    %277 = vector.shape_cast %276 : vector<1x16x128xbf16> to vector<16x128xbf16>
    %cst_261 = arith.constant dense<0.000000e+00> : vector<64x128xf32>
    %278 = tpu.matmul %275, %277, %cst_261 {dimension_numbers = #tpu.dot_dimension_numbers<[1], [0], [0], [1], [0, 0, 1, 1], [], []>} : vector<64x16xbf16>, vector<16x128xbf16>, vector<64x128xf32> -> vector<64x128xf32>
    %279 = arith.addf %273, %278 : vector<64x128xf32>
    %c0_262 = arith.constant 0 : index
    %c1060 = arith.constant 1060 : index
    %c0_263 = arith.constant 0 : index
    %280 = vector.load %arg2[%c0_262, %c1060, %c0_263] : memref<1x1158x16xbf16, #tpu.memory_space<vmem>>, vector<1x64x16xbf16>
    %281 = vector.shape_cast %280 : vector<1x64x16xbf16> to vector<64x16xbf16>
    %c5_264 = arith.constant 5 : index
    %c0_265 = arith.constant 0 : index
    %c0_266 = arith.constant 0 : index
    %282 = vector.load %arg3[%c5_264, %c0_265, %c0_266] : memref<9x16x128xbf16, #tpu.memory_space<vmem>>, vector<1x16x128xbf16>
    %283 = vector.shape_cast %282 : vector<1x16x128xbf16> to vector<16x128xbf16>
    %cst_267 = arith.constant dense<0.000000e+00> : vector<64x128xf32>
    %284 = tpu.matmul %281, %283, %cst_267 {dimension_numbers = #tpu.dot_dimension_numbers<[1], [0], [0], [1], [0, 0, 1, 1], [], []>} : vector<64x16xbf16>, vector<16x128xbf16>, vector<64x128xf32> -> vector<64x128xf32>
    %285 = arith.addf %279, %284 : vector<64x128xf32>
    %c0_268 = arith.constant 0 : index
    %c1092 = arith.constant 1092 : index
    %c0_269 = arith.constant 0 : index
    %286 = vector.load %arg2[%c0_268, %c1092, %c0_269] : memref<1x1158x16xbf16, #tpu.memory_space<vmem>>, vector<1x64x16xbf16>
    %287 = vector.shape_cast %286 : vector<1x64x16xbf16> to vector<64x16xbf16>
    %c6_270 = arith.constant 6 : index
    %c0_271 = arith.constant 0 : index
    %c0_272 = arith.constant 0 : index
    %288 = vector.load %arg3[%c6_270, %c0_271, %c0_272] : memref<9x16x128xbf16, #tpu.memory_space<vmem>>, vector<1x16x128xbf16>
    %289 = vector.shape_cast %288 : vector<1x16x128xbf16> to vector<16x128xbf16>
    %cst_273 = arith.constant dense<0.000000e+00> : vector<64x128xf32>
    %290 = tpu.matmul %287, %289, %cst_273 {dimension_numbers = #tpu.dot_dimension_numbers<[1], [0], [0], [1], [0, 0, 1, 1], [], []>} : vector<64x16xbf16>, vector<16x128xbf16>, vector<64x128xf32> -> vector<64x128xf32>
    %291 = arith.addf %285, %290 : vector<64x128xf32>
    %c0_274 = arith.constant 0 : index
    %c1093 = arith.constant 1093 : index
    %c0_275 = arith.constant 0 : index
    %292 = vector.load %arg2[%c0_274, %c1093, %c0_275] : memref<1x1158x16xbf16, #tpu.memory_space<vmem>>, vector<1x64x16xbf16>
    %293 = vector.shape_cast %292 : vector<1x64x16xbf16> to vector<64x16xbf16>
    %c7_276 = arith.constant 7 : index
    %c0_277 = arith.constant 0 : index
    %c0_278 = arith.constant 0 : index
    %294 = vector.load %arg3[%c7_276, %c0_277, %c0_278] : memref<9x16x128xbf16, #tpu.memory_space<vmem>>, vector<1x16x128xbf16>
    %295 = vector.shape_cast %294 : vector<1x16x128xbf16> to vector<16x128xbf16>
    %cst_279 = arith.constant dense<0.000000e+00> : vector<64x128xf32>
    %296 = tpu.matmul %293, %295, %cst_279 {dimension_numbers = #tpu.dot_dimension_numbers<[1], [0], [0], [1], [0, 0, 1, 1], [], []>} : vector<64x16xbf16>, vector<16x128xbf16>, vector<64x128xf32> -> vector<64x128xf32>
    %297 = arith.addf %291, %296 : vector<64x128xf32>
    %c0_280 = arith.constant 0 : index
    %c1094 = arith.constant 1094 : index
    %c0_281 = arith.constant 0 : index
    %298 = vector.load %arg2[%c0_280, %c1094, %c0_281] : memref<1x1158x16xbf16, #tpu.memory_space<vmem>>, vector<1x64x16xbf16>
    %299 = vector.shape_cast %298 : vector<1x64x16xbf16> to vector<64x16xbf16>
    %c8_282 = arith.constant 8 : index
    %c0_283 = arith.constant 0 : index
    %c0_284 = arith.constant 0 : index
    %300 = vector.load %arg3[%c8_282, %c0_283, %c0_284] : memref<9x16x128xbf16, #tpu.memory_space<vmem>>, vector<1x16x128xbf16>
    %301 = vector.shape_cast %300 : vector<1x16x128xbf16> to vector<16x128xbf16>
    %cst_285 = arith.constant dense<0.000000e+00> : vector<64x128xf32>
    %302 = tpu.matmul %299, %301, %cst_285 {dimension_numbers = #tpu.dot_dimension_numbers<[1], [0], [0], [1], [0, 0, 1, 1], [], []>} : vector<64x16xbf16>, vector<16x128xbf16>, vector<64x128xf32> -> vector<64x128xf32>
    %303 = arith.addf %297, %302 : vector<64x128xf32>
    %304 = vector.broadcast %0 : vector<1x128xf32> to vector<64x128xf32>
    %305 = arith.addf %303, %304 : vector<64x128xf32>
    %cst_286 = arith.constant 0.000000e+00 : f32
    %306 = vector.broadcast %cst_286 : f32 to vector<64x128xf32>
    %307 = arith.maximumf %305, %306 : vector<64x128xf32>
    %c0_287 = arith.constant 0 : index
    %c1024_288 = arith.constant 1024 : index
    %c0_289 = arith.constant 0 : index
    %308 = vector.load %arg5[%c0_287, %c1024_288, %c0_289] : memref<1x1088x128xf32, #tpu.memory_space<vmem>>, vector<1x64x128xf32>
    %309 = vector.shape_cast %308 : vector<1x64x128xf32> to vector<64x128xf32>
    %310 = vector.shape_cast %307 : vector<64x128xf32> to vector<1x64x128xf32>
    tpu.vector_store %arg5[%c0_287, %c1024_288, %c0_289], %310 {strides = array<i32>} : memref<1x1088x128xf32, #tpu.memory_space<vmem>>, vector<1x64x128xf32>,
    return
  }
  func.func @transform_0(%arg0: i32, %arg1: i32) -> (i32, i32, i32) {
    %c0_i32 = arith.constant 0 : i32
    %c0_i32_0 = arith.constant 0 : i32
    %c0_i32_1 = arith.constant 0 : i32
    return %arg0, %c0_i32, %c0_i32_0 : i32, i32, i32
  }
  func.func @transform_1(%arg0: i32, %arg1: i32) -> (i32, i32, i32) {
    %c0_i32 = arith.constant 0 : i32
    %c0_i32_0 = arith.constant 0 : i32
    %c0_i32_1 = arith.constant 0 : i32
    return %c0_i32, %c0_i32_0, %arg1 : i32, i32, i32
  }
  func.func @transform_2(%arg0: i32, %arg1: i32) -> (i32, i32) {
    %c0_i32 = arith.constant 0 : i32
    %c0_i32_0 = arith.constant 0 : i32
    return %c0_i32, %arg1 : i32, i32
  }
  func.func @transform_3(%arg0: i32, %arg1: i32) -> (i32, i32, i32) {
    %c0_i32 = arith.constant 0 : i32
    %c0_i32_0 = arith.constant 0 : i32
    return %arg0, %c0_i32, %arg1 : i32, i32, i32
  }
}

</mosaic_0001>

<bundles_post_ra>
// kernel: conv2d_batchnorm_relu.1
= control target key start
LH: loop header
LB: loop body
LE: loop exit
PB: predicated region body
PF: predicated region fallthrough
CT: control target
= control target key end

     0   :  { %s17713_s12 = smov 0   ;;  %s17715_s13 = smov 0   ;;  %s24741_s0 = inlined_call_operand.vmem [shape: bf16[2,1158,16], index: 0, kind: input, shape index: {}]   ;;  %s24742_s1 = inlined_call_operand.vmem [shape: bf16[9,16,128], index: 1, kind: input, shape index: {}]   ;;  %s24743_s2 = inlined_call_operand.vmem [shape: f32[1,128], index: 2, kind: input, shape index: {}]   ;;  %s24744_s3 = inlined_call_operand.vmem [shape: f32[2,1088,128], index: 3, kind: output, shape index: {}]  }
   0x1   :  { %s17717_s14 = smov 0  }
   0x2 LB: > { %s25_s15 = sadd.s32 1, %s17687_s13  ;;  %p14386_p0 = scmp.ge.s32.totalorder %s17691_s14, 1  ;;  %s17691_s14 = sphi %s17717_s14, %s13_s14   ;;  %s17687_s13 = sphi %s17715_s13, %s25509_s13   ;;  %s17683_s12 = sphi %s17713_s12, %s25508_s12  }
   0x3   : > { %p27_p1 = scmp.ge.s32.totalorder %s25_s15, 2  ;;  %p168_p2 = scmp.lt.s32.totalorder %s17691_s14, 3 }
   0x5   : > { %s25511_s15 = smov (%p27_p1, %s25_s15), 0  ;;  %p169_p3 = pnand %p14386_p0, %p168_p2 }
   0x7   : > { %172 = sbr.rel (%p169_p3) target bundleno = 1455 (0x5af), region = 32 }
   0xc   : > { %v17372_v0 = vld [vmem:[%s24742_s1 + $0x8] sm:$0xff]   ;;  %p202_p4 = scmp.lt.s32.totalorder %s17683_s12, 1  ;;  %v17737_v1 = vld [vmem:[%s24742_s1] sm:$0xff]   ;;  %v17380_v2 = vld [vmem:[%s24742_s1 + $0x10] sm:$0xff]   ;;  %vm345_vm0 = vsmask.f32 7424 }
   0xd   : > { %17344 = vmatprep.subr.bf16.mxu1 %v17372_v0  ;;  %16030 = vmatprep.subr.bf16.mxu0 %v17372_v0  ;;  %vm484_vm1 = vcmask 130048   ;;  %v17786_v26 = vld [vmem:[%s24742_s1 + $0x20] sm:$0xff]   ;;  %v17382_v41 = vld [vmem:[%s24742_s1 + $0x18] sm:$0xff]   ;;  %v17837_v63 = vld [vmem:[%s24742_s1 + $0x28] sm:$0xff]   ;;  %vm1994_vm2 = vcmask 1045504   ;;  %vm900_vm3 = vcmask 1046528  }
   0xe   : > { %s25513_s12 = smov (!%p202_p4, %s17683_s12), 1  ;;  %17345 = vmatpush3.bf16.msra.mxu1 %v17372_v0  ;;  %16031 = vmatpush3.bf16.msra.mxu0 %v17372_v0  ;;  %vm1587_vm4 = vsmask.f32 6400  ;;  %vm3088_vm5 = vcmask 1044480   ;;  %vm2681_vm6 = vsmask.f32 5376 }
   0xf   : > { %s17346_s22 = smul.u32 580, %s25513_s12  ;;  %16064 = vmatprep.subr.bf16.mxu1 %v17737_v1  ;;  %16098 = vmatprep.subr.bf16.mxu0 %v17380_v2 }
  0x10   : > { %s17347_s9 = smul.u32 1088, %s25513_s12 }
  0x11   : > { %s17749_s25 = scalar_lea.vmem %s24741_s0, %s17346_s22 }
  0x12   : > { %v224_v3 = vld [vmem:[%s17749_s25] sm:$0xf]  ;;  %v17753_v4 = vld [vmem:[%s17749_s25 + $0x4] sm:$0xf]  ;;  %v17757_v6 = vld [vmem:[%s17749_s25 + $0x8] sm:$0xff]   ;;  %s19882_s17 = scalar_lea.vmem %s24744_s3, %s17347_s9 }
  0x13   : > { %v14391_v5 = vcombine.low %v224_v3, %v17753_v4  ;;  %v354_v9 = vshll.u32 %v17757_v6, 16  ;;  %v358_v10 = vshrl.u32 %v17757_v6, 16  ;;  %v17762_v11 = vld [vmem:[%s17749_s25 + $0x70] sm:$0xff]   ;;  %v17765_v12 = vld [vmem:[%s17749_s25 + $0x78] sm:$0xff]   ;;  %v17794_v34 = vld [vmem:[%s17749_s25 + $0x20] sm:$0xff]  }
  0x14   : > { %v17768_v13 = vld [vmem:[%s17749_s25 + $0x10] sm:$0xff]   ;;  %v458_v16 = vshll.u32 %v17762_v11, 16  ;;  %v462_v17 = vshrl.u32 %v17762_v11, 16  ;;  %v466_v18 = vshll.u32 %v17765_v12, 16  ;;  %v470_v19 = vshrl.u32 %v17765_v12, 16  ;;  %v17781_v25 = vld [vmem:[%s17749_s25 + $0x18] sm:$0xff]  }
  0x15   : > { %v347_v7 = vshrl.u32 %v14391_v5, 16  ;;  %v349_v8 = vshll.u32 %v14391_v5, 16  ;;  %v356_v15 = vrot.slane %v354_v9, 1  ;;  %v362_v20 = vshll.u32 %v17768_v13, 16  ;;  %v17798_v36 = vld [vmem:[%s17749_s25 + $0x28] sm:$0xff]   ;;  %v17810_v46 = vld [vmem:[%s17749_s25 + $0x30] sm:$0xff]  }
  0x16   : > { %v17776_v21 = vld [vmem:[%s17749_s25 + $0x80] ss:$0 sps:$4 sm:$0x11]   ;;  %v17778_v24 = vrot.slane %v458_v16, 1  ;;  %v468_v27 = vrot.slane %v466_v18, 1  ;;  %v366_v30 = vshrl.u32 %v17768_v13, 16 }
  0x17   : > { %v351_v14 = vrot.slane %v349_v8, 1  ;;  %v360_v23 = vor.u32 %v358_v10, %v356_v15  ;;  %v364_v28 = vrot.slane %v362_v20, 1  ;;  %v474_v29 = vshll.u32 %v17776_v21, 16  ;;  %v17818_v52 = vld [vmem:[%s17749_s25 + $0x38] sm:$0xff]   ;;  %v17832_v62 = vld [vmem:[%s17749_s25 + $0x40] sm:$0xff]   ;;  %v17843_v3 = vld [vmem:[%s17749_s25 + $0x48] sm:$0xff]  }
  0x18   : > { %v464_v32 = vor.u32 %v462_v17, %v17778_v24  ;;  %v370_v33 = vshll.u32 %v17781_v25, 16  ;;  %v374_v35 = vshrl.u32 %v17781_v25, 16  ;;  %v472_v37 = vor.u32 %v470_v19, %v468_v27  ;;  %v17856_v16 = vld [vmem:[%s17749_s25 + $0x50] sm:$0xff]   ;;  %v17862_v20 = vld [vmem:[%s17749_s25 + $0x58] sm:$0xff]  }
  0x19   : > { %v352_v22 = vor.u32 %v351_v14, %v347_v7  ;;  %v365_v38 = vsel %vm345_vm0, %v360_v23, %v364_v28  ;;  %v476_v39 = vrot.slane %v474_v29, 1  ;;  %v368_v40 = vor.u32 %v366_v30, %v364_v28 }
  0x1a   : > { %v469_v42 = vsel %vm345_vm0, %v464_v32, %v468_v27  ;;  %v372_v43 = vrot.slane %v370_v33, 1  ;;  %v378_v44 = vshll.u32 %v17794_v34, 16  ;;  %v382_v45 = vshrl.u32 %v17794_v34, 16  ;;  %v17874_v32 = vld [vmem:[%s17749_s25 + $0x60] sm:$0xff]  }
  0x1b   : > { %v357_v31 = vsel %vm345_vm0, %v352_v22, %v356_v15  ;;  %16060 = vmatprep.mubr.msk.bf16.mxu1 %vm484_vm1, %v469_v42  ;;  %v477_v47 = vsel %vm345_vm0, %v472_v37, %v476_v39  ;;  %v386_v48 = vshll.u32 %v17798_v36, 16  ;;  %v394_v55 = vshll.u32 %v17810_v46, 16 }
  0x1c   : > { %16032 = vmatprep.mubr.msk.bf16.mxu0 %vm484_vm1, %v357_v31  ;;  %16061 = vmatmul.mubr.msk.bf16.vlgmr.msra.gmra.mxu1 %vm484_vm1, %v477_v47  ;;  %v373_v49 = vsel %vm345_vm0, %v368_v40, %v372_v43  ;;  %v376_v50 = vor.u32 %v374_v35, %v372_v43  ;;  %v380_v51 = vrot.slane %v378_v44, 1  ;;  %v390_v57 = vshrl.u32 %v17798_v36, 16 }
  0x1d   : > { %16033 = vmatmul.mubr.msk.bf16.vlgmr.msra.gmra.mxu0 %vm484_vm1, %v365_v38  ;;  %16065 = vmatpush3.bf16.msra.mxu1 %v17737_v1  ;;  %v388_v53 = vrot.slane %v386_v48, 1  ;;  %v398_v59 = vshrl.u32 %v17810_v46, 16  ;;  %v402_v60 = vshll.u32 %v17818_v52, 16  ;;  %v396_v61 = vrot.slane %v394_v55, 1  ;;  %v17880_v38 = vld [vmem:[%s17749_s25 + $0x68] sm:$0xff]  }
  0x1e   : > { %16099 = vmatpush3.bf16.msra.mxu0 %v17380_v2  ;;  %16036 = vmatprep.mubr.msk.bf16.mxu0 %vm484_vm1, %v373_v49  ;;  %v384_v54 = vor.u32 %v382_v45, %v380_v51  ;;  %v381_v56 = vsel %vm345_vm0, %v376_v50, %v380_v51  ;;  %v406_v8 = vshrl.u32 %v17818_v52, 16  ;;  %v414_v10 = vshrl.u32 %v17832_v62, 16  ;;  %v1987_v50 = vld [vmem:[%s17749_s25 + $0x10] sm:$0xc]  ;;  %v893_v51 = vld [vmem:[%s17749_s25] sm:$0xe] }
  0x1f   : > { %16166 = vmatprep.subr.bf16.mxu0 %v17786_v26  ;;  %16066 = vmatprep.mubr.msk.bf16.mxu1 %vm484_vm1, %v14391_v5  ;;  %v392_v0 = vor.u32 %v390_v57, %v388_v53  ;;  %v400_v1 = vor.u32 %v398_v59, %v396_v61  ;;  %v404_v2 = vrot.slane %v402_v60, 1  ;;  %v410_v5 = vshll.u32 %v17832_v62, 16  ;;  %v17907_v60 = vld [vmem:[%s17749_s25 + $0x20] sm:$0xff]  }
  0x20   : > { %16132 = vmatprep.subr.bf16.mxu1 %v17382_v41  ;;  %v389_v58 = vsel %vm345_vm0, %v384_v54, %v388_v53  ;;  %v418_v14 = vshll.u32 %v17843_v3, 16  ;;  %v426_v22 = vshll.u32 %v17856_v16, 16  ;;  %v422_v27 = vshrl.u32 %v17843_v3, 16  ;;  %v1182_v53 = vld [vmem:[%s17749_s25 + $0x14] sm:$0xf] }
  0x21   : > { %v397_v7 = vsel %vm345_vm0, %v392_v0, %v396_v61  ;;  %v405_v9 = vsel %vm345_vm0, %v400_v1, %v404_v2  ;;  %v412_v15 = vrot.slane %v410_v5, 1  ;;  %v408_v17 = vor.u32 %v406_v8, %v404_v2  ;;  %v17912_v1 = vld [vmem:[%s17749_s25 + $0x28] sm:$0xff]  }
  0x22   : > { %v420_v19 = vrot.slane %v418_v14, 1  ;;  %v430_v29 = vshrl.u32 %v17856_v16, 16  ;;  %v434_v30 = vshll.u32 %v17862_v20, 16  ;;  %v428_v31 = vrot.slane %v426_v22, 1 }
  0x23   : > { %v416_v18 = vor.u32 %v414_v10, %v412_v15  ;;  %v413_v23 = vsel %vm345_vm0, %v408_v17, %v412_v15  ;;  %v442_v39 = vshll.u32 %v17874_v32, 16  ;;  %v446_v43 = vshrl.u32 %v17874_v32, 16  ;;  %v17926_v10 = vld [vmem:[%s17749_s25 + $0x30] sm:$0xff]   ;;  %v17932_v15 = vld [vmem:[%s17749_s25 + $0x38] sm:$0xff]  }
  0x24   : > { %16067 = vmatmul.mubr.msk.bf16.vlgmr.msra.gmra.mxu1 %vm484_vm1, %v17757_v6  ;;  %v424_v33 = vor.u32 %v422_v27, %v420_v19  ;;  %v432_v35 = vor.u32 %v430_v29, %v428_v31  ;;  %v436_v37 = vrot.slane %v434_v30, 1  ;;  %v450_v44 = vshll.u32 %v17880_v38, 16 }
  0x25   : > { %16037 = vmatmul.mubr.msk.bf16.gmra.mxu0 %vm484_vm1, %v381_v56  ;;  %16133 = vmatpush3.bf16.msra.mxu1 %v17382_v41  ;;  %v421_v28 = vsel %vm345_vm0, %v416_v18, %v420_v19  ;;  %v438_v41 = vshrl.u32 %v17862_v20, 16  ;;  %v444_v45 = vrot.slane %v442_v39, 1  ;;  %v454_v55 = vshrl.u32 %v17880_v38, 16  ;;  %v17902_v56 = vld [vmem:[%s17749_s25 + $0x18] sm:$0xff]  }
  0x26   : > { %16040 = vmatprep.mubr.msk.bf16.mxu0 %vm484_vm1, %v389_v58  ;;  %16070 = vmatprep.mubr.msk.bf16.mxu1 %vm484_vm1, %v17768_v13  ;;  %v429_v40 = vsel %vm345_vm0, %v424_v33, %v428_v31  ;;  %v437_v42 = vsel %vm345_vm0, %v432_v35, %v436_v37  ;;  %v452_v49 = vrot.slane %v450_v44, 1  ;;  %v14520_v57 = vcombine.low %v1987_v50, %v1182_v53  ;;  %v17965_v35 = vld [vmem:[%s17749_s25 + $0x50] sm:$0xff]  }
  0x27   : > { %16200 = vmatprep.subr.bf16.mxu1 %v17837_v63  ;;  %v440_v47 = vor.u32 %v438_v41, %v436_v37  ;;  %v448_v48 = vor.u32 %v446_v43, %v444_v45  ;;  %v14444_v59 = vcombine.low %v893_v51, %v17753_v4  ;;  %v1996_v0 = vrot.slane %v17902_v56, 2  ;;  %v1181_v41 = vld [vmem:[%s17749_s25 + $0x10] sm:$0xe] }
  0x28   : > { %v1995_v61 = vrot.slane %v14520_v57, 2  ;;  %v456_v2 = vor.u32 %v454_v55, %v452_v49  ;;  %v1998_v4 = vrot.slane %v17907_v60, 2  ;;  %v902_v8 = vrot.slane %v17757_v6, 1  ;;  %v17983_v43 = vld [vmem:[%s24742_s1 + $0x30] sm:$0xff]   ;;  %v18016_v57 = vld [vmem:[%s17749_s25 + $0x78] sm:$0xff]  }
  0x29   : > { %v445_v54 = vsel %vm345_vm0, %v440_v47, %v444_v45  ;;  %v453_v58 = vsel %vm345_vm0, %v448_v48, %v452_v49  ;;  %v2002_v6 = vrot.slane %v17926_v10, 2  ;;  %v2004_v22 = vrot.slane %v17932_v15, 2  ;;  %v17987_v45 = vld [vmem:[%s17749_s25 + $0x60] sm:$0xff]   ;;  %v17996_v49 = vld [vmem:[%s17749_s25 + $0x68] sm:$0xff]  }
  0x2a   : > { %v17916_v5 = vsel %vm1994_vm2, %v1995_v61, %v1996_v0  ;;  %v17929_v14 = vsel %vm1994_vm2, %v1996_v0, %v1998_v4  ;;  %v461_v18 = vsel %vm345_vm0, %v456_v2, %v17778_v24  ;;  %v904_v29 = vrot.slane %v17768_v13, 1  ;;  %v17971_v13 = vld [vmem:[%s17749_s25 + $0x58] sm:$0xff]   ;;  %v18028_v0 = vld [vmem:[%s17749_s25 + $0x80] sm:$0xff]  }
  0x2b   : > { %v17953_v24 = vsel %vm1994_vm2, %v2002_v6, %v2004_v22  ;;  %v906_v31 = vrot.slane %v17781_v25, 1  ;;  %v2012_v44 = vrot.slane %v17971_v13, 2  ;;  %v17993_v48 = vcombine.low %v1181_v41, %v1182_v53 }
  0x2c   : > { %16071 = vmatmul.mubr.msk.bf16.gmra.mxu1 %vm484_vm1, %v17781_v25  ;;  %v2010_v25 = vrot.slane %v17965_v35, 2  ;;  %v908_v51 = vrot.slane %v17794_v34, 1  ;;  %v910_v53 = vrot.slane %v17798_v36, 1  ;;  %v2016_v55 = vrot.slane %v17996_v49, 2 }
  0x2d   : > { %16041 = vmatmul.mubr.msk.bf16.gmra.mxu0 %vm484_vm1, %v397_v7  ;;  %16074 = vmatprep.mubr.msk.bf16.mxu1 %vm484_vm1, %v17794_v34  ;;  %v901_v7 = vrot.slane %v14444_v59, 1  ;;  %v1301_v59 = vrot.slane %v17902_v56, 1  ;;  %v1305_v41 = vrot.slane %v17912_v1, 1 }
  0x2e   : > { %16044 = vmatprep.mubr.msk.bf16.mxu0 %vm484_vm1, %v405_v9  ;;  %v2000_v9 = vrot.slane %v17912_v1, 2  ;;  %v17999_v50 = vsel %vm1994_vm2, %v2010_v25, %v2012_v44  ;;  %v909_v61 = vsel %vm900_vm3, %v906_v31, %v908_v51 }
  0x2f   : > { %v903_v19 = vsel %vm900_vm3, %v901_v7, %v902_v8  ;;  %v911_v7 = vsel %vm900_vm3, %v908_v51, %v910_v53  ;;  %v18071_v51 = vld [vmem:[%s24742_s1 + $0x38] sm:$0xff]  }
  0x30   : > { %v17935_v17 = vsel %vm1994_vm2, %v1998_v4, %v2000_v9  ;;  %v17946_v27 = vsel %vm1994_vm2, %v2000_v9, %v2002_v6  ;;  %v2020_v4 = vrot.slane %v18016_v57, 2  ;;  %v2022_v6 = vrot.slane %v18028_v0, 2 }
  0x34   : > { %16075 = vmatmul.mubr.msk.bf16.gmra.mxu1 %vm484_vm1, %v17798_v36 }
  0x35   : > { %16045 = vmatmul.mubr.msk.bf16.gmra.mxu0 %vm484_vm1, %v413_v23  ;;  %16078 = vmatprep.mubr.msk.bf16.mxu1 %vm484_vm1, %v17810_v46  ;;  %v17943_v23 = vld [vmem:[%s17749_s25 + $0x40] sm:$0xff]  }
  0x36   : > { %16048 = vmatprep.mubr.msk.bf16.mxu0 %vm484_vm1, %v421_v28  ;;  %v17950_v28 = vld [vmem:[%s17749_s25 + $0x48] sm:$0xff]   ;;  %v2006_v30 = vrot.slane %v17943_v23, 2 }
  0x37   : > { %v2008_v33 = vrot.slane %v17950_v28, 2 }
  0x38   : > { %v17968_v37 = vsel %vm1994_vm2, %v2004_v22, %v2006_v30 }
  0x39   : > { %v17974_v39 = vsel %vm1994_vm2, %v2006_v30, %v2008_v33  ;;  %v17990_v47 = vsel %vm1994_vm2, %v2008_v33, %v2010_v25  ;;  %v18049_v30 = vsel %vm1994_vm2, %v2020_v4, %v2022_v6 }
  0x3c   : > { %16079 = vmatmul.mubr.msk.bf16.gmra.mxu1 %vm484_vm1, %v17818_v52 }
  0x3d   : > { %16049 = vmatmul.mubr.msk.bf16.gmra.mxu0 %vm484_vm1, %v429_v40  ;;  %16082 = vmatprep.mubr.msk.bf16.mxu1 %vm484_vm1, %v17832_v62  ;;  %v905_v40 = vsel %vm900_vm3, %v902_v8, %v904_v29  ;;  %v18034_v8 = vld [vmem:[%s17749_s25 + $0x88] sm:$0xff]  }
  0x3e   : > { %16052 = vmatprep.mubr.msk.bf16.mxu0 %vm484_vm1, %v437_v42  ;;  %v907_v42 = vsel %vm900_vm3, %v904_v29, %v906_v31  ;;  %v24745_v22 = vrot.slane %v18034_v8, 2  ;;  %v912_v29 = vrot.slane %v17810_v46, 1  ;;  %v914_v31 = vrot.slane %v17818_v52, 1 }
  0x40   : > { %v18057_v33 = vsel %vm1994_vm2, %v2022_v6, %v24745_v22  ;;  %v913_v46 = vsel %vm900_vm3, %v910_v53, %v912_v29  ;;  %v915_v25 = vsel %vm900_vm3, %v912_v29, %v914_v31  ;;  %v1307_v53 = vrot.slane %v17926_v10, 1 }
  0x41   : > { %v924_v29 = vrot.slane %v17874_v32, 1 }
  0x44   : > { %16083 = vmatmul.mubr.msk.bf16.gmra.mxu1 %vm484_vm1, %v17843_v3 }
  0x45   : > { %16053 = vmatmul.mubr.msk.bf16.gmra.mxu0 %vm484_vm1, %v445_v54  ;;  %16086 = vmatprep.mubr.msk.bf16.mxu1 %vm484_vm1, %v17856_v16  ;;  %v2014_v54 = vrot.slane %v17987_v45, 2 }
  0x46   : > { %16056 = vmatprep.mubr.msk.bf16.mxu0 %vm484_vm1, %v453_v58  ;;  %v1300_v58 = vrot.slane %v17993_v48, 1 }
  0x47   : > { %v18019_v34 = vsel %vm1994_vm2, %v2012_v44, %v2014_v54  ;;  %v18024_v36 = vsel %vm1994_vm2, %v2014_v54, %v2016_v55  ;;  %v916_v44 = vrot.slane %v17832_v62, 1  ;;  %v918_v54 = vrot.slane %v17843_v3, 1 }
  0x49   : > { %v917_v62 = vsel %vm900_vm3, %v914_v31, %v916_v44  ;;  %v1315_v31 = vrot.slane %v17965_v35, 1 }
  0x4c   : > { %16087 = vmatmul.mubr.msk.bf16.gmra.mxu1 %vm484_vm1, %v17862_v20 }
  0x4d   : > { %16057 = vmatmul.mubr.msk.bf16.gmra.mxu0 %vm484_vm1, %v461_v18  ;;  %16090 = vmatprep.mubr.msk.bf16.mxu1 %vm484_vm1, %v17874_v32  ;;  %v928_v32 = vrot.slane %v17762_v11, 1 }
  0x4e   : > { %16100 = vmatprep.mubr.msk.bf16.mxu0 %vm484_vm1, %v903_v19  ;;  %v1302_v19 = vsel %vm900_vm3, %v1300_v58, %v1301_v59  ;;  %v919_v58 = vsel %vm900_vm3, %v916_v44, %v918_v54  ;;  %v1592_v44 = vshll.u32 %v17993_v48, 16 }
  0x54   : > { %16091 = vmatmul.mubr.msk.bf16.gmra.mxu1 %vm484_vm1, %v17880_v38 }
  0x55   : > { %16101 = vmatmul.mubr.msk.bf16.vlgmr.msra.gmra.mxu0 %vm484_vm1, %v905_v40  ;;  %16094 = vmatprep.mubr.msk.bf16.mxu1 %vm484_vm1, %v17762_v11  ;;  %v1303_v40 = vrot.slane %v17907_v60, 1  ;;  %v1319_v11 = vrot.slane %v17987_v45, 1 }
  0x56   : > { %16167 = vmatpush3.bf16.msra.mxu0 %v17786_v26  ;;  %16104 = vmatprep.mubr.msk.bf16.mxu0 %vm484_vm1, %v907_v42  ;;  %v18013_v26 = vld [vmem:[%s17749_s25 + $0x70] sm:$0xff]  }
  0x57   : > { %16234 = vmatprep.subr.bf16.mxu0 %v17983_v43  ;;  %v2018_v2 = vrot.slane %v18013_v26, 2  ;;  %v1304_v42 = vsel %vm900_vm3, %v1301_v59, %v1303_v40  ;;  %v1306_v52 = vsel %vm900_vm3, %v1303_v40, %v1305_v41  ;;  %v1308_v59 = vsel %vm900_vm3, %v1305_v41, %v1307_v53 }
  0x58   : > { %v1317_v40 = vrot.slane %v17971_v13, 1 }
  0x59   : > { %v18037_v9 = vsel %vm1994_vm2, %v2016_v55, %v2018_v2  ;;  %v18040_v18 = vsel %vm1994_vm2, %v2018_v2, %v2020_v4  ;;  %v1309_v55 = vrot.slane %v17932_v15, 1  ;;  %v1311_v2 = vrot.slane %v17943_v23, 1 }
  0x5a   : > { %v1313_v4 = vrot.slane %v17950_v28, 1 }
  0x5b   : > { %v1310_v3 = vsel %vm900_vm3, %v1307_v53, %v1309_v55  ;;  %v1600_v53 = vshll.u32 %v17902_v56, 16 }
  0x5c   : > { %16095 = vmatmul.mubr.msk.bf16.gmra.mxu1 %vm484_vm1, %v17765_v12 }
  0x5d   : > { %16105 = vmatmul.mubr.msk.bf16.gmra.mxu0 %vm484_vm1, %v909_v61  ;;  %16134 = vmatprep.mubr.msk.bf16.mxu1 %vm484_vm1, %v1302_v19  ;;  %v922_v61 = vrot.slane %v17862_v20, 1  ;;  %v1312_v19 = vsel %vm900_vm3, %v1309_v55, %v1311_v2  ;;  %v926_v20 = vrot.slane %v17880_v38, 1  ;;  %v1318_v38 = vsel %vm900_vm3, %v1315_v31, %v1317_v40 }
  0x5e   : > { %16108 = vmatprep.mubr.msk.bf16.mxu0 %vm484_vm1, %v911_v7 }
  0x5f   : > { %v925_v41 = vsel %vm900_vm3, %v922_v61, %v924_v29  ;;  %v929_v55 = vsel %vm900_vm3, %v926_v20, %v928_v32 }
  0x64   : > { %16135 = vmatmul.mubr.msk.bf16.vlgmr.msra.gmra.mxu1 %vm484_vm1, %v1304_v42  ;;  %v930_v42 = vrot.slane %v17765_v12, 1  ;;  %v1321_v12 = vrot.slane %v17996_v49, 1 }
  0x65   : > { %16109 = vmatmul.mubr.msk.bf16.gmra.mxu0 %vm484_vm1, %v913_v46  ;;  %16201 = vmatpush3.bf16.msra.mxu1 %v17837_v63  ;;  %v920_v63 = vrot.slane %v17856_v16, 1  ;;  %v1314_v16 = vsel %vm900_vm3, %v1311_v2, %v1313_v4  ;;  %v927_v46 = vsel %vm900_vm3, %v924_v29, %v926_v20  ;;  %v1606_v2 = vshrl.u32 %v17907_v60, 16 }
  0x66   : > { %16112 = vmatprep.mubr.msk.bf16.mxu0 %vm484_vm1, %v915_v25  ;;  %16138 = vmatprep.mubr.msk.bf16.mxu1 %vm484_vm1, %v1306_v52  ;;  %v1316_v25 = vsel %vm900_vm3, %v1313_v4, %v1315_v31  ;;  %v1589_v52 = vshrl.u32 %v17993_v48, 16  ;;  %v1322_v4 = vsel %vm900_vm3, %v1319_v11, %v1321_v12  ;;  %v1624_v29 = vshrl.u32 %v17926_v10, 16 }
  0x67   : > { %16268 = vmatprep.subr.bf16.mxu1 %v18071_v51  ;;  %v921_v7 = vsel %vm900_vm3, %v918_v54, %v920_v63  ;;  %v923_v6 = vsel %vm900_vm3, %v920_v63, %v922_v61  ;;  %v1597_v54 = vshrl.u32 %v17902_v56, 16  ;;  %v1602_v63 = vrot.slane %v1600_v53, 2 }
  0x68   : > { %v1591_v48 = vrot.slane %v1589_v52, 1  ;;  %v1320_v61 = vsel %vm900_vm3, %v1317_v40, %v1319_v11  ;;  %v1323_v56 = vrot.slane %v18013_v26, 1  ;;  %v1627_v20 = vshll.u32 %v17926_v10, 16 }
  0x69   : > { %v1633_v31 = vshrl.u32 %v17932_v15, 16  ;;  %v1325_v40 = vrot.slane %v18016_v57, 1  ;;  %v1626_v10 = vrot.slane %v1624_v29, 1 }
  0x6b   : > { %v1635_v53 = vrot.slane %v1633_v31, 1 }
  0x6c   : > { %16139 = vmatmul.mubr.msk.bf16.gmra.mxu1 %vm484_vm1, %v1308_v59  ;;  %v931_v59 = vsel %vm900_vm3, %v928_v32, %v930_v42 }
  0x6d   : > { %16113 = vmatmul.mubr.msk.bf16.gmra.mxu0 %vm484_vm1, %v917_v62  ;;  %16142 = vmatprep.mubr.msk.bf16.mxu1 %vm484_vm1, %v1310_v3  ;;  %v932_v62 = vrot.slane %v17776_v21, 1  ;;  %v1599_v3 = vrot.slane %v1597_v54, 1  ;;  %v1615_v21 = vshrl.u32 %v17912_v1, 16  ;;  %v1629_v54 = vrot.slane %v1627_v20, 2 }
  0x6e   : > { %16116 = vmatprep.mubr.msk.bf16.mxu0 %vm484_vm1, %v919_v58  ;;  %v1594_v58 = vrot.slane %v1592_v44, 2 }
  0x6f   : > { %v1617_v52 = vrot.slane %v1615_v21, 1  ;;  %v1630_v20 = vor.u32 %v1629_v54, %v1626_v10  ;;  %v1663_v10 = vshll.u32 %v17965_v35, 16 }
  0x74   : > { %16143 = vmatmul.mubr.msk.bf16.gmra.mxu1 %vm484_vm1, %v1312_v19  ;;  %v1603_v19 = vor.u32 %v1602_v63, %v1599_v3  ;;  %v17413_v3 = vld [vmem:[%s17749_s25 + $0x90] ss:$0 sps:$4 sm:$0x11]   ;;  %v1651_v63 = vshrl.u32 %v17950_v28, 16 }
  0x75   : > { %16117 = vmatmul.mubr.msk.bf16.gmra.mxu0 %vm484_vm1, %v921_v7  ;;  %16146 = vmatprep.mubr.msk.bf16.mxu1 %vm484_vm1, %v1314_v16  ;;  %v1609_v7 = vshll.u32 %v17907_v60, 16  ;;  %v1618_v16 = vshll.u32 %v17912_v1, 16  ;;  %v933_v60 = vsel %vm900_vm3, %v930_v42, %v932_v62  ;;  %v1329_v1 = vrot.slane %v18034_v8, 1 }
  0x76   : > { %16120 = vmatprep.mubr.msk.bf16.mxu0 %vm484_vm1, %v923_v6  ;;  %v1595_v6 = vor.u32 %v1594_v58, %v1591_v48  ;;  %v1324_v42 = vsel %vm900_vm3, %v1321_v12, %v1323_v56  ;;  %v18151_v58 = vld [vmem:[%s17749_s25 + $0x24] sm:$0xf]  ;;  %v1645_v12 = vshll.u32 %v17943_v23, 16 }
  0x77   : > { %v1611_v32 = vrot.slane %v1609_v7, 2  ;;  %v1620_v44 = vrot.slane %v1618_v16, 2  ;;  %v18169_v7 = vld [vmem:[%s24742_s1 + $0x40] sm:$0xff]  }
  0x79   : > { %v1621_v48 = vor.u32 %v1620_v44, %v1617_v52  ;;  %v18191_v52 = vld [vmem:[%s17749_s25 + $0x38] sm:$0xff]  }
  0x7b   : > { %v1631_v44 = vsel %vm1587_vm4, %v1621_v48, %v1630_v20 }
  0x7c   : > { %16147 = vmatmul.mubr.msk.bf16.gmra.mxu1 %vm484_vm1, %v1316_v25  ;;  %v1608_v25 = vrot.slane %v1606_v2, 1 }
  0x7d   : > { %16121 = vmatmul.mubr.msk.bf16.gmra.mxu0 %vm484_vm1, %v925_v41  ;;  %16150 = vmatprep.mubr.msk.bf16.mxu1 %vm484_vm1, %v1318_v38  ;;  %v1636_v41 = vshll.u32 %v17932_v15, 16  ;;  %v1604_v38 = vsel %vm1587_vm4, %v1595_v6, %v1603_v19  ;;  %v1326_v15 = vsel %vm900_vm3, %v1323_v56, %v1325_v40  ;;  %v3081_v56 = vld [vmem:[%s17749_s25 + $0x20] sm:$0x8] }
  0x7e   : > { %16124 = vmatprep.mubr.msk.bf16.mxu0 %vm484_vm1, %v927_v46  ;;  %v1327_v46 = vrot.slane %v18028_v0, 1  ;;  %v1612_v62 = vor.u32 %v1611_v32, %v1608_v25  ;;  %v14596_v21 = vcombine.low %v3081_v56, %v18151_v58  ;;  %v1653_v25 = vrot.slane %v1651_v63, 1 }
  0x7f   : > { %v1638_v11 = vrot.slane %v1636_v41, 2  ;;  %v1660_v32 = vshrl.u32 %v17965_v35, 16 }
  0x80   : > { %v1613_v2 = vsel %vm1587_vm4, %v1603_v19, %v1612_v62  ;;  %v1328_v6 = vsel %vm900_vm3, %v1325_v40, %v1327_v46  ;;  %v3089_v16 = vrot.slane %v14596_v21, 3  ;;  %v1330_v19 = vsel %vm900_vm3, %v1327_v46, %v1329_v1 }
  0x81   : > { %v1639_v40 = vor.u32 %v1638_v11, %v1635_v53  ;;  %v1672_v11 = vshll.u32 %v17971_v13, 16 }
  0x83   : > { %v1640_v54 = vsel %vm1587_vm4, %v1630_v20, %v1639_v40  ;;  %v1674_v56 = vrot.slane %v1672_v11, 2  ;;  %v18257_v11 = vld [vmem:[%s17749_s25 + $0x60] sm:$0xff]  }
  0x84   : > { %16151 = vmatmul.mubr.msk.bf16.gmra.mxu1 %vm484_vm1, %v1320_v61  ;;  %v18161_v61 = vld [vmem:[%s17749_s25 + $0x30] sm:$0xff]  }
  0x85   : > { %16125 = vmatmul.mubr.msk.bf16.gmra.mxu0 %vm484_vm1, %v929_v55  ;;  %16154 = vmatprep.mubr.msk.bf16.mxu1 %vm484_vm1, %v1322_v4  ;;  %v1642_v55 = vshrl.u32 %v17943_v23, 16  ;;  %v1654_v4 = vshll.u32 %v17950_v28, 16  ;;  %v1622_v23 = vsel %vm1587_vm4, %v1612_v62, %v1621_v48  ;;  %v3092_v28 = vrot.slane %v18161_v61, 3 }
  0x86   : > { %16128 = vmatprep.mubr.msk.bf16.mxu0 %vm484_vm1, %v931_v59  ;;  %v18156_v59 = vld [vmem:[%s17749_s25 + $0x28] sm:$0xff]  }
  0x87   : > { %v3090_v29 = vrot.slane %v18156_v59, 3  ;;  %v1644_v46 = vrot.slane %v1642_v55, 1  ;;  %v3094_v55 = vrot.slane %v18191_v52, 3 }
  0x89   : > { %v18181_v31 = vsel %vm3088_vm5, %v3089_v16, %v3090_v29  ;;  %v18186_v41 = vsel %vm3088_vm5, %v3090_v29, %v3092_v28  ;;  %v18207_v48 = vsel %vm3088_vm5, %v3092_v28, %v3094_v55  ;;  %v18221_v16 = vld [vmem:[%s17749_s25 + $0x48] sm:$0xff]   ;;  %v18224_v29 = vld [vmem:[%s17749_s25 + $0x50] sm:$0xff]  }
  0x8a   : > { %v3098_v28 = vrot.slane %v18221_v16, 3 }
  0x8c   : > { %16155 = vmatmul.mubr.msk.bf16.gmra.mxu1 %vm484_vm1, %v1324_v42  ;;  %v18196_v42 = vld [vmem:[%s17749_s25 + $0x40] sm:$0xff]  }
  0x8d   : > { %16129 = vmatmul.mubr.msk.bf16.gmra.mxu0 %vm484_vm1, %v933_v60  ;;  %16158 = vmatprep.mubr.msk.bf16.mxu1 %vm484_vm1, %v1326_v15  ;;  %v1331_v60 = vrot.slane %v17413_v3, 1  ;;  %v1669_v15 = vshrl.u32 %v17971_v13, 16  ;;  %v3096_v62 = vrot.slane %v18196_v42, 3  ;;  %v1665_v3 = vrot.slane %v1663_v10, 2 }
  0x8e   : > { %16168 = vmatprep.mubr.msk.bf16.mxu0 %vm484_vm1, %v1604_v38  ;;  %v1656_v38 = vrot.slane %v1654_v4, 2  ;;  %v1681_v4 = vshll.u32 %v17987_v45, 16  ;;  %v1705_v10 = vshrl.u32 %v18016_v57, 16 }
  0x8f   : > { %v1332_v53 = vsel %vm900_vm3, %v1329_v1, %v1331_v60  ;;  %v18211_v13 = vsel %vm3088_vm5, %v3094_v55, %v3096_v62  ;;  %v1671_v63 = vrot.slane %v1669_v15, 1  ;;  %v18254_v15 = vld [vmem:[%s17749_s25 + $0x58] sm:$0xff]   ;;  %v18262_v55 = vld [vmem:[%s17749_s25 + $0x90] ss:$0 sps:$4 sm:$0x33]  }
  0x90   : > { %v1657_v1 = vor.u32 %v1656_v38, %v1653_v25 }
  0x91   : > { %v1675_v25 = vor.u32 %v1674_v56, %v1671_v63 }
  0x94   : > { %16159 = vmatmul.mubr.msk.bf16.gmra.mxu1 %vm484_vm1, %v1328_v6  ;;  %v1690_v6 = vshll.u32 %v17996_v49, 16 }
  0x95   : > { %16169 = vmatmul.mubr.msk.bf16.vlgmr.msra.gmra.mxu0 %vm484_vm1, %v1613_v2  ;;  %16162 = vmatprep.mubr.msk.bf16.mxu1 %vm484_vm1, %v1330_v19  ;;  %v1678_v2 = vshrl.u32 %v17987_v45, 16  ;;  %v18233_v45 = vld [vmem:[%s24742_s1 + $0x8] sm:$0xff]  }
  0x96   : > { %16235 = vmatpush3.bf16.msra.mxu0 %v17983_v43  ;;  %16172 = vmatprep.mubr.msk.bf16.mxu0 %vm484_vm1, %v1622_v23  ;;  %v1647_v43 = vrot.slane %v1645_v12, 2  ;;  %v1662_v12 = vrot.slane %v1660_v32, 1  ;;  %v1687_v23 = vshrl.u32 %v17996_v49, 16  ;;  %v3100_v49 = vrot.slane %v18224_v29, 3 }
  0x97   : > { %16302 = vmatprep.subr.bf16.mxu0 %v18169_v7  ;;  %v1680_v60 = vrot.slane %v1678_v2, 1  ;;  %v2275_v2 = vld [vmem:[%s17749_s25 + $0x20] sm:$0xc] }
  0x98   : > { %v1648_v35 = vor.u32 %v1647_v43, %v1644_v46  ;;  %v1666_v20 = vor.u32 %v1665_v3, %v1662_v12  ;;  %v1699_v46 = vshll.u32 %v18013_v26, 16  ;;  %v18239_v43 = vsel %vm3088_vm5, %v3096_v62, %v3098_v28 }
  0x99   : > { %v18244_v32 = vsel %vm3088_vm5, %v3098_v28, %v3100_v49  ;;  %v1689_v38 = vrot.slane %v1687_v23, 1  ;;  %v3102_v62 = vrot.slane %v18254_v15, 3  ;;  %v1707_v12 = vrot.slane %v1705_v10, 1  ;;  %v18286_v28 = vld [vmem:[%s17749_s25 + $0x68] sm:$0xff]  }
  0x9a   : > { %v1649_v21 = vsel %vm1587_vm4, %v1639_v40, %v1648_v35  ;;  %v1658_v19 = vsel %vm1587_vm4, %v1648_v35, %v1657_v1  ;;  %v1683_v40 = vrot.slane %v1681_v4, 2  ;;  %v1717_v35 = vshll.u32 %v18028_v0, 16 }
  0x9b   : > { %v18270_v63 = vsel %vm3088_vm5, %v3100_v49, %v3102_v62 }
  0x9c   : > { %16163 = vmatmul.mubr.msk.bf16.gmra.mxu1 %vm484_vm1, %v1332_v53  ;;  %v1708_v53 = vshll.u32 %v18016_v57, 16  ;;  %v1684_v57 = vor.u32 %v1683_v40, %v1680_v60  ;;  %v1719_v23 = vrot.slane %v1717_v35, 2  ;;  %v3106_v40 = vrot.slane %v18286_v28, 3 }
  0x9d   : > { %16173 = vmatmul.mubr.msk.bf16.gmra.mxu0 %vm484_vm1, %v1631_v44  ;;  %16202 = vmatprep.mubr.msk.bf16.mxu1 %vm484_vm1, %v17916_v5  ;;  %v1696_v5 = vshrl.u32 %v18013_v26, 16  ;;  %v1692_v44 = vrot.slane %v1690_v6, 2  ;;  %v1726_v6 = vshll.u32 %v18034_v8, 16 }
  0x9e   : > { %16176 = vmatprep.mubr.msk.bf16.mxu0 %vm484_vm1, %v1640_v54  ;;  %v1667_v54 = vsel %vm1587_vm4, %v1657_v1, %v1666_v20  ;;  %v3104_v1 = vrot.slane %v18257_v11, 3  ;;  %v1710_v3 = vrot.slane %v1708_v53, 2 }
  0x9f   : > { %v1698_v26 = vrot.slane %v1696_v5, 1  ;;  %v1693_v56 = vor.u32 %v1692_v44, %v1689_v38  ;;  %v1732_v5 = vshrl.u32 %v18262_v55, 16 }
  0xa0   : > { %v18276_v4 = vsel %vm3088_vm5, %v3102_v62, %v3104_v1 }
  0xa1   : > { %v1694_v49 = vsel %vm1587_vm4, %v1684_v57, %v1693_v56  ;;  %v1734_v44 = vrot.slane %v1732_v5, 1 }
  0xa4   : > { %16203 = vmatmul.mubr.msk.bf16.vlgmr.msra.gmra.mxu1 %vm484_vm1, %v17929_v14  ;;  %v1701_v14 = vrot.slane %v1699_v46, 2  ;;  %v1728_v46 = vrot.slane %v1726_v6, 2  ;;  %v2691_v6 = vshrl.u32 %v18156_v59, 16 }
  0xa5   : > { %16177 = vmatmul.mubr.msk.bf16.gmra.mxu0 %vm484_vm1, %v1649_v21  ;;  %16269 = vmatpush3.bf16.msra.mxu1 %v18071_v51  ;;  %v1676_v51 = vsel %vm1587_vm4, %v1666_v20, %v1675_v25  ;;  %v1723_v21 = vshrl.u32 %v18034_v8, 16  ;;  %v18289_v20 = vld [vmem:[%s17749_s25 + $0x70] sm:$0xff]  }
  0xa6   : > { %16180 = vmatprep.mubr.msk.bf16.mxu0 %vm484_vm1, %v1658_v19  ;;  %16206 = vmatprep.mubr.msk.bf16.mxu1 %vm484_vm1, %v17935_v17  ;;  %v1714_v17 = vshrl.u32 %v18028_v0, 16  ;;  %v1685_v19 = vsel %vm1587_vm4, %v1675_v25, %v1684_v57  ;;  %v3108_v25 = vrot.slane %v18289_v20, 3  ;;  %v1702_v38 = vor.u32 %v1701_v14, %v1698_v26  ;;  %v18320_v57 = vld [vmem:[%s17749_s25 + $0x80] sm:$0xff]  }
  0xa7   : > { %16336 = vmatprep.subr.bf16.mxu1 %v18233_v45  ;;  %v1725_v60 = vrot.slane %v1723_v21, 1  ;;  %v2395_v26 = vrot.slane %v18156_v59, 2  ;;  %v2397_v14 = vrot.slane %v18161_v61, 2 }
  0xa8   : > { %v1716_v0 = vrot.slane %v1714_v17, 1  ;;  %v18305_v53 = vsel %vm3088_vm5, %v3106_v40, %v3108_v25  ;;  %v2399_v17 = vrot.slane %v18191_v52, 2  ;;  %v1703_v62 = vsel %vm1587_vm4, %v1693_v56, %v1702_v38 }
  0xa9   : > { %v3112_v56 = vrot.slane %v18320_v57, 3 }
  0xaa   : > { %v1720_v21 = vor.u32 %v1719_v23, %v1716_v0  ;;  %v2700_v0 = vshrl.u32 %v18161_v61, 16 }
  0xac   : > { %16207 = vmatmul.mubr.msk.bf16.gmra.mxu1 %vm484_vm1, %v17946_v27  ;;  %v1735_v27 = vshll.u32 %v18262_v55, 16 }
  0xad   : > { %16181 = vmatmul.mubr.msk.bf16.gmra.mxu0 %vm484_vm1, %v1667_v54  ;;  %16210 = vmatprep.mubr.msk.bf16.mxu1 %vm484_vm1, %v17953_v24  ;;  %v18293_v24 = vcombine.low %v2275_v2, %v18151_v58  ;;  %v18300_v54 = vsel %vm3088_vm5, %v3104_v1, %v3106_v40  ;;  %v1711_v58 = vor.u32 %v1710_v3, %v1707_v12  ;;  %v18317_v1 = vld [vmem:[%s17749_s25 + $0x78] sm:$0xff]   ;;  %v2703_v40 = vshll.u32 %v18161_v61, 16 }
  0xae   : > { %16184 = vmatprep.mubr.msk.bf16.mxu0 %vm484_vm1, %v1676_v51  ;;  %v1737_v10 = vrot.slane %v1735_v27, 2  ;;  %v3110_v3 = vrot.slane %v18317_v1, 3  ;;  %v1729_v27 = vor.u32 %v1728_v46, %v1725_v60  ;;  %v18353_v60 = vld [vmem:[%s17749_s25 + $0x88] sm:$0xff]   ;;  %v18356_v46 = vld [vmem:[%s17749_s25 + $0x90] sm:$0xff]  }
  0xaf   : > { %v2394_v51 = vrot.slane %v18293_v24, 2  ;;  %v2683_v12 = vshrl.u32 %v18293_v24, 16  ;;  %v2686_v2 = vshll.u32 %v18293_v24, 16 }
  0xb0   : > { %v18332_v5 = vsel %vm3088_vm5, %v3108_v25, %v3110_v3  ;;  %v1721_v25 = vsel %vm1587_vm4, %v1711_v58, %v1720_v21 }
  0xb1   : > { %24849 = vst [vmem:[#allocation2_spill] sm:$0xff] %v18332_v5  ;;  %v18341_v24 = vrot.slane %v2683_v12, 2  ;;  %v18344_v23 = vrot.slane %v2686_v2, 3  ;;  %v2709_v12 = vshrl.u32 %v18191_v52, 16  ;;  %v2712_v2 = vshll.u32 %v18191_v52, 16 }
  0xb2   : > { %v18690_v5 = vld [vmem:[%s17749_s25 + $0xa0] ss:$0 sps:$4 sm:$0x77]  }
  0xb3   : > { %v18386_v22 = vrot.slane %v2712_v2, 3  ;;  %v2409_v2 = vrot.slane %v18257_v11, 2  ;;  %24874 = vst [vmem:[#allocation9_spill] sm:$0xff] %v18690_v5 }
  0xb4   : > { %16211 = vmatmul.mubr.msk.bf16.gmra.mxu1 %vm484_vm1, %v17968_v37  ;;  %v2401_v37 = vrot.slane %v18196_v42, 2 }
  0xb5   : > { %16185 = vmatmul.mubr.msk.bf16.gmra.mxu0 %vm484_vm1, %v1685_v19  ;;  %16214 = vmatprep.mubr.msk.bf16.mxu1 %vm484_vm1, %v17974_v39  ;;  %v1712_v39 = vsel %vm1587_vm4, %v1702_v38, %v1711_v58  ;;  %v2694_v19 = vshll.u32 %v18156_v59, 16  ;;  %v18348_v38 = vrot.slane %v2691_v6, 2  ;;  %v3116_v58 = vrot.slane %v18356_v46, 3 }
  0xb6   : > { %16188 = vmatprep.mubr.msk.bf16.mxu0 %vm484_vm1, %v1694_v49  ;;  %v18337_v49 = vsel %vm3088_vm5, %v3110_v3, %v3112_v56  ;;  %v1738_v3 = vor.u32 %v1737_v10, %v1734_v44  ;;  %v2718_v6 = vshrl.u32 %v18196_v42, 16  ;;  %v2721_v44 = vshll.u32 %v18196_v42, 16 }
  0xb7   : > { %24850 = vst [vmem:[#allocation3_spill] sm:$0xff] %v18337_v49  ;;  %v2400_v59 = vsel %vm1994_vm2, %v2397_v14, %v2399_v17  ;;  %v2402_v61 = vsel %vm1994_vm2, %v2399_v17, %v2401_v37 }
  0xb8   : > { %v18396_v35 = vrot.slane %v2721_v44, 3 }
  0xbc   : > { %16215 = vmatmul.mubr.msk.bf16.gmra.mxu1 %vm484_vm1, %v17990_v47  ;;  %v18350_v47 = vrot.slane %v2694_v19, 3 }
  0xbd   : > { %16189 = vmatmul.mubr.msk.bf16.gmra.mxu0 %vm484_vm1, %v1703_v62  ;;  %16218 = vmatprep.mubr.msk.bf16.mxu1 %vm484_vm1, %v17999_v50  ;;  %v1730_v50 = vsel %vm1587_vm4, %v1720_v21, %v1729_v27  ;;  %v18359_v62 = vrot.slane %v2700_v0, 2  ;;  %v2403_v0 = vrot.slane %v18221_v16, 2 }
  0xbe   : > { %16192 = vmatprep.mubr.msk.bf16.mxu0 %vm484_vm1, %v1712_v39  ;;  %v3114_v39 = vrot.slane %v18353_v60, 3  ;;  %v2697_v52 = vor.u32 %v18350_v47, %v18348_v38  ;;  %v24856_v38 = vrot.slane %v18034_v8, 2 }
  0xc0   : > { %v18369_v21 = vsel %vm3088_vm5, %v3112_v56, %v3114_v39  ;;  %v18374_v19 = vsel %vm3088_vm5, %v3114_v39, %v3116_v58  ;;  %v1739_v56 = vsel %vm1587_vm4, %v1729_v27, %v1738_v3  ;;  %v18391_v39 = vld [vmem:[%s17749_s25 + $0x98] sm:$0xff]   ;;  %v2727_v27 = vshrl.u32 %v18221_v16, 16 }
  0xc1   : > { %24851 = vst [vmem:[#allocation4_spill] sm:$0xff] %v18369_v21  ;;  %24852 = vst [vmem:[#allocation5_spill] sm:$0xff] %v18374_v19  ;;  %v24746_v10 = vrot.slane %v18391_v39, 3  ;;  %v2736_v3 = vshrl.u32 %v18224_v29, 16 }
  0xc2   : > { %24853 = vst [vmem:[#allocation6_spill] sm:$0xff] %v18391_v39  ;;  %v18416_v44 = vrot.slane %v2727_v27, 2  ;;  %v18432_v27 = vld [vmem:[%s24742_s1] sm:$0xff]  }
  0xc4   : > { %16219 = vmatmul.mubr.msk.bf16.gmra.mxu1 %vm484_vm1, %v18019_v34  ;;  %v18388_v34 = vrot.slane %v2718_v6, 2  ;;  %v2739_v6 = vshll.u32 %v18224_v29, 16 }
  0xc5   : > { %16193 = vmatmul.mubr.msk.bf16.gmra.mxu0 %vm484_vm1, %v1721_v25  ;;  %16222 = vmatprep.mubr.msk.bf16.mxu1 %vm484_vm1, %v18024_v36  ;;  %v18381_v25 = vrot.slane %v2703_v40, 3  ;;  %v2396_v36 = vsel %vm1994_vm2, %v2394_v51, %v2395_v26  ;;  %v2730_v40 = vshll.u32 %v18221_v16, 16  ;;  %v18408_v51 = vsel %vm3088_vm5, %v3116_v58, %v24746_v10  ;;  %v18525_v16 = vld [vmem:[%s24742_s1 + $0x10] sm:$0xff]  }
  0xc6   : > { %16196 = vmatprep.mubr.msk.bf16.mxu0 %vm484_vm1, %v1730_v50  ;;  %v18384_v50 = vrot.slane %v2709_v12, 2  ;;  %v24747_v12 = vrot.slane %v18254_v15, 2  ;;  %24854 = vst [vmem:[#allocation7_spill] sm:$0xff] %v18408_v51  ;;  %v2398_v58 = vsel %vm1994_vm2, %v2395_v26, %v2397_v14  ;;  %v2754_v26 = vshrl.u32 %v18257_v11, 16 }
  0xc7   : > { %v18445_v10 = vrot.slane %v2739_v6, 3  ;;  %v2706_v8 = vor.u32 %v18381_v25, %v18359_v62 }
  0xc8   : > { %v18467_v17 = vrot.slane %v2754_v26, 2 }
  0xcc   : > { %16223 = vmatmul.mubr.msk.bf16.gmra.mxu1 %vm484_vm1, %v18037_v9  ;;  %v2745_v9 = vshrl.u32 %v18254_v15, 16 }
  0xcd   : > { %16197 = vmatmul.mubr.msk.bf16.gmra.mxu0 %vm484_vm1, %v1739_v56  ;;  %16226 = vmatprep.mubr.msk.bf16.mxu1 %vm484_vm1, %v18040_v18  ;;  %v18418_v56 = vrot.slane %v2730_v40, 3  ;;  %v2748_v18 = vshll.u32 %v18254_v15, 16  ;;  %v2757_v40 = vshll.u32 %v18257_v11, 16 }
  0xce   : > { %16236 = vmatprep.mubr.msk.bf16.mxu0 %vm484_vm1, %v2396_v36  ;;  %v18425_v36 = vrot.slane %v2736_v3, 2  ;;  %v18458_v14 = vrot.slane %v2745_v9, 2  ;;  %v2766_v9 = vshll.u32 %v18286_v28, 16 }
  0xcf   : > { %v18460_v6 = vrot.slane %v2748_v18, 3  ;;  %v2772_v18 = vshrl.u32 %v18289_v20, 16 }
  0xd4   : > { %16227 = vmatmul.mubr.msk.bf16.gmra.mxu1 %vm484_vm1, %v18049_v30  ;;  %v2689_v30 = vor.u32 %v18344_v23, %v18341_v24  ;;  %v2404_v24 = vsel %vm1994_vm2, %v2401_v37, %v2403_v0  ;;  %v24855_v23 = vrot.slane %v18262_v55, 2  ;;  %v18497_v37 = vrot.slane %v2766_v9, 3 }
  0xd5   : > { %16237 = vmatmul.mubr.msk.bf16.vlgmr.msra.gmra.mxu0 %vm484_vm1, %v2398_v58  ;;  %16230 = vmatprep.mubr.msk.bf16.mxu1 %vm484_vm1, %v18057_v33  ;;  %v2763_v58 = vshrl.u32 %v18286_v28, 16 }
  0xd6   : > { %16303 = vmatpush3.bf16.msra.mxu0 %v18169_v7  ;;  %16240 = vmatprep.mubr.msk.bf16.mxu0 %vm484_vm1, %v2400_v59  ;;  %v18469_v59 = vrot.slane %v2757_v40, 3  ;;  %v2027_v47 = vsel %vm1994_vm2, %v24856_v38, %v24855_v23  ;;  %v2775_v40 = vshll.u32 %v18289_v20, 16  ;;  %v2698_v33 = vsel %vm2681_vm6, %v2689_v30, %v2697_v52 }
  0xd7   : > { %16370 = vmatprep.subr.bf16.mxu0 %v18432_v27  ;;  %v18485_v26 = vrot.slane %v2763_v58, 2  ;;  %v18499_v58 = vrot.slane %v2772_v18, 2  ;;  %v2715_v30 = vor.u32 %v18386_v22, %v18384_v50  ;;  %v2707_v22 = vsel %vm2681_vm6, %v2697_v52, %v2706_v8 }
  0xd8   : > { %v18518_v18 = vrot.slane %v2775_v40, 3  ;;  %v2781_v40 = vshrl.u32 %v18317_v1, 16  ;;  %v2784_v52 = vshll.u32 %v18317_v1, 16 }
  0xdc   : > { %v18491_v42 = vpop.f32.mrf.mxu1  ;;  %16231 = vmatmul.mubr.msk.bf16.gmra.mxu1 %vm484_vm1, %v2027_v47 }
  0xdd   : > { %v16034_v7 = vpop.f32.mrf.mxu0  ;;  %16241 = vmatmul.mubr.msk.bf16.gmra.mxu0 %vm484_vm1, %v2402_v61  ;;  %16270 = vmatprep.mubr.msk.bf16.mxu1 %vm484_vm1, %v2698_v33 }
  0xde   : > { %16244 = vmatprep.mubr.msk.bf16.mxu0 %vm484_vm1, %v2404_v24  ;;  %v18501_v23 = vpop.f32.mrf.mxu1  ;;  %v24857_v24 = vrot.slane %v18224_v29, 2  ;;  %v2716_v29 = vsel %vm2681_vm6, %v2706_v8, %v2715_v30 }
  0xdf   : > { %v567_v55 = vpop.f32.mrf.mxu0 }
  0xe0   : > { %v2406_v38 = vsel %vm1994_vm2, %v2403_v0, %v24857_v24  ;;  %v18510_v33 = vpop.f32.mrf.mxu1  ;;  %v24858_v62 = vmov %v24857_v24 }
  0xe1   : > { %v16035_v61 = vpop.f32.mrf.mxu0  ;;  %v2408_v25 = vsel %vm1994_vm2, %v24858_v62, %v24747_v12 }
  0xe2   : > { %v18527_v0 = vpop.f32.mrf.mxu1 }
  0xe3   : > { %v570_v47 = vpop.f32.mrf.mxu0 }
  0xe4   : > { %v16068_v62 = vpop.f32.mrf.mxu1  ;;  %16271 = vmatmul.mubr.msk.bf16.vlgmr.msra.gmra.mxu1 %vm484_vm1, %v2707_v22 }
  0xe5   : > { %v16038_v24 = vpop.f32.mrf.mxu0  ;;  %16245 = vmatmul.mubr.msk.bf16.gmra.mxu0 %vm484_vm1, %v2406_v38  ;;  %v18535_v9 = vadd.f32 %v16068_v62, %v16034_v7  ;;  %16337 = vmatpush3.bf16.msra.mxu1 %v18233_v45  ;;  %v2724_v38 = vor.u32 %v18396_v35, %v18388_v34  ;;  %v24859_v7 = vrot.slane %v18254_v15, 2  ;;  %v24860_v35 = vrot.slane %v18286_v28, 2 }
  0xe6   : > { %16248 = vmatprep.mubr.msk.bf16.mxu0 %vm484_vm1, %v2408_v25  ;;  %16274 = vmatprep.mubr.msk.bf16.mxu1 %vm484_vm1, %v2716_v29  ;;  %v766_v8 = vpop.f32.mrf.mxu1  ;;  %v2733_v25 = vor.u32 %v18418_v56, %v18416_v44  ;;  %v2790_v44 = vshrl.u32 %v18320_v57, 16  ;;  %v2793_v56 = vshll.u32 %v18320_v57, 16  ;;  %v18561_v15 = vrot.slane %v2781_v40, 2 }
  0xe7   : > { %v583_v50 = vpop.f32.mrf.mxu0  ;;  %16404 = vmatprep.subr.bf16.mxu1 %v18525_v16  ;;  %v18544_v12 = vadd.f32 %v766_v8, %v567_v55  ;;  %v2410_v45 = vsel %vm1994_vm2, %v24859_v7, %v2409_v2  ;;  %v2412_v34 = vsel %vm1994_vm2, %v2409_v2, %v24860_v35  ;;  %v2725_v62 = vsel %vm2681_vm6, %v2715_v30, %v2724_v38  ;;  %v18571_v2 = vld [vmem:[%s17749_s25 + $0xa0] ss:$0 sps:$4 sm:$0x33]  }
  0xe8   : > { %v16069_v22 = vpop.f32.mrf.mxu1  ;;  %v18563_v8 = vrot.slane %v2784_v52, 3  ;;  %v2734_v11 = vsel %vm2681_vm6, %v2724_v38, %v2733_v25  ;;  %v2742_v52 = vor.u32 %v18445_v10, %v18425_v36  ;;  %v24861_v35 = vrot.slane %v18289_v20, 2 }
  0xe9   : > { %v16039_v3 = vpop.f32.mrf.mxu0  ;;  %v18558_v55 = vadd.f32 %v16069_v22, %v16035_v61  ;;  %v18593_v36 = vrot.slane %v2790_v44, 2  ;;  %v18595_v21 = vrot.slane %v2793_v56, 3 }
  0xea   : > { %v769_v7 = vpop.f32.mrf.mxu1 }
  0xeb   : > { %v586_v29 = vpop.f32.mrf.mxu0  ;;  %v18567_v19 = vadd.f32 %v769_v7, %v570_v47  ;;  %v2751_v47 = vor.u32 %v18460_v6, %v18458_v14  ;;  %v2743_v6 = vsel %vm2681_vm6, %v2733_v25, %v2742_v52  ;;  %v2760_v25 = vor.u32 %v18469_v59, %v18467_v17 }
  0xec   : > { %v16072_v61 = vpop.f32.mrf.mxu1  ;;  %16275 = vmatmul.mubr.msk.bf16.gmra.mxu1 %vm484_vm1, %v2725_v62  ;;  %v2799_v59 = vshrl.u32 %v18353_v60, 16 }
  0xed   : > { %v16042_v51 = vpop.f32.mrf.mxu0  ;;  %16249 = vmatmul.mubr.msk.bf16.gmra.mxu0 %vm484_vm1, %v2410_v45  ;;  %v18574_v40 = vadd.f32 %v16072_v61, %v16038_v24  ;;  %16278 = vmatprep.mubr.msk.bf16.mxu1 %vm484_vm1, %v2734_v11  ;;  %v24863_v11 = vrot.slane %v18317_v1, 2  ;;  %v24864_v61 = vmov %v24861_v35  ;;  %v2752_v20 = vsel %vm2681_vm6, %v2742_v52, %v2751_v47 }
  0xee   : > { %16252 = vmatprep.mubr.msk.bf16.mxu0 %vm484_vm1, %v2412_v34  ;;  %v782_v45 = vpop.f32.mrf.mxu1  ;;  %v24862_v34 = vrot.slane %v18286_v28, 2  ;;  %v2423_v28 = vrot.slane %v18391_v39, 2  ;;  %v2769_v52 = vor.u32 %v18497_v37, %v18485_v26  ;;  %v2802_v26 = vshll.u32 %v18353_v60, 16 }
  0xef   : > { %v599_v30 = vpop.f32.mrf.mxu0  ;;  %v18581_v38 = vadd.f32 %v782_v45, %v583_v50  ;;  %v2416_v10 = vsel %vm1994_vm2, %v24864_v61, %v24863_v11  ;;  %v24866_v61 = vrot.slane %v18317_v1, 2  ;;  %v2808_v1 = vshrl.u32 %v18356_v46, 16 }
  0xf0   : > { %v2414_v62 = vsel %vm1994_vm2, %v24862_v34, %v24861_v35  ;;  %v16073_v24 = vpop.f32.mrf.mxu1 }
  0xf1   : > { %v16043_v22 = vpop.f32.mrf.mxu0  ;;  %v18597_v14 = vadd.f32 %v16073_v24, %v16039_v3 }
  0xf2   : > { %v785_v45 = vpop.f32.mrf.mxu1 }
  0xf3   : > { %v602_v7 = vpop.f32.mrf.mxu0  ;;  %v18604_v34 = vadd.f32 %v785_v45, %v586_v29  ;;  %v24867_v45 = vrot.slane %v18353_v60, 2 }
  0xf4   : > { %v16076_v44 = vpop.f32.mrf.mxu1  ;;  %16279 = vmatmul.mubr.msk.bf16.gmra.mxu1 %vm484_vm1, %v2743_v6 }
  0xf5   : > { %v16046_v35 = vpop.f32.mrf.mxu0  ;;  %16253 = vmatmul.mubr.msk.bf16.gmra.mxu0 %vm484_vm1, %v2414_v62  ;;  %v18608_v56 = vadd.f32 %v16076_v44, %v16042_v51  ;;  %16282 = vmatprep.mubr.msk.bf16.mxu1 %vm484_vm1, %v2752_v20  ;;  %v24865_v62 = vrot.slane %v18320_v57, 2  ;;  %v2811_v44 = vshll.u32 %v18356_v46, 16  ;;  %v2770_v57 = vsel %vm2681_vm6, %v2760_v25, %v2769_v52 }
  0xf6   : > { %16256 = vmatprep.mubr.msk.bf16.mxu0 %vm484_vm1, %v2416_v10  ;;  %v798_v24 = vpop.f32.mrf.mxu1 }
  0xf7   : > { %v615_v3 = vpop.f32.mrf.mxu0  ;;  %v18615_v29 = vadd.f32 %v798_v24, %v599_v30  ;;  %v2418_v10 = vsel %vm1994_vm2, %v24866_v61, %v24865_v62  ;;  %v24868_v20 = vmov %v24865_v62  ;;  %v2761_v30 = vsel %vm2681_vm6, %v2751_v47, %v2760_v25 }
  0xf8   : > { %v16077_v51 = vpop.f32.mrf.mxu1  ;;  %v2420_v17 = vsel %vm1994_vm2, %v24868_v20, %v24867_v45  ;;  %v2778_v47 = vor.u32 %v18518_v18, %v18499_v58  ;;  %v2787_v25 = vor.u32 %v18563_v8, %v18561_v15  ;;  %v2801_v18 = vrot.slane %v2799_v59, 2 }
  0xf9   : > { %v16047_v11 = vpop.f32.mrf.mxu0  ;;  %v18629_v37 = vadd.f32 %v16077_v51, %v16043_v22  ;;  %v2817_v8 = vshrl.u32 %v18391_v39, 16 }
  0xfa   : > { %v801_v24 = vpop.f32.mrf.mxu1  ;;  %v2779_v15 = vsel %vm2681_vm6, %v2769_v52, %v2778_v47 }
  0xfb   : > { %v618_v6 = vpop.f32.mrf.mxu0  ;;  %v18636_v61 = vadd.f32 %v801_v24, %v602_v7 }
  0xfc   : > { %v16080_v45 = vpop.f32.mrf.mxu1  ;;  %16283 = vmatmul.mubr.msk.bf16.gmra.mxu1 %vm484_vm1, %v2761_v30 }
  0xfd   : > { %v16050_v62 = vpop.f32.mrf.mxu0  ;;  %16257 = vmatmul.mubr.msk.bf16.gmra.mxu0 %vm484_vm1, %v2418_v10  ;;  %v18640_v51 = vadd.f32 %v16080_v45, %v16046_v35  ;;  %16286 = vmatprep.mubr.msk.bf16.mxu1 %vm484_vm1, %v2770_v57  ;;  %v24869_v10 = vrot.slane %v18356_v46, 2  ;;  %v2804_v45 = vrot.slane %v2802_v26, 3  ;;  %v2788_v46 = vsel %vm2681_vm6, %v2778_v47, %v2787_v25 }
  0xfe   : > { %16260 = vmatprep.mubr.msk.bf16.mxu0 %vm484_vm1, %v2420_v17  ;;  %v814_v20 = vpop.f32.mrf.mxu1  ;;  %v24870_v17 = vrot.slane %v18353_v60, 2  ;;  %v2820_v60 = vshll.u32 %v18391_v39, 16  ;;  %v2796_v26 = vor.u32 %v18595_v21, %v18593_v36  ;;  %v2810_v36 = vrot.slane %v2808_v1, 2 }
  0xff   : > { %v631_v22 = vpop.f32.mrf.mxu0  ;;  %v18647_v7 = vadd.f32 %v814_v20, %v615_v3  ;;  %v24871_v57 = vmov %v24869_v10  ;;  %v2805_v47 = vor.u32 %v2804_v45, %v2801_v18  ;;  %v2819_v45 = vrot.slane %v2817_v8, 2 }
 0x100   : > { %v2422_v30 = vsel %vm1994_vm2, %v24870_v17, %v24869_v10  ;;  %v16081_v35 = vpop.f32.mrf.mxu1  ;;  %v2424_v58 = vsel %vm1994_vm2, %v24871_v57, %v2423_v28  ;;  %v3471_v17 = vld [vmem:[%s17749_s25 + $0x80] sm:$0xf]  ;;  %v24872_v57 = vrot.slane %v18571_v2, 2  ;;  %v2797_v21 = vsel %vm2681_vm6, %v2787_v25, %v2796_v26 }
 0x101   : > { %v16051_v50 = vpop.f32.mrf.mxu0  ;;  %v18659_v49 = vadd.f32 %v16081_v35, %v16047_v11  ;;  %v2806_v2 = vsel %vm2681_vm6, %v2796_v26, %v2805_v47  ;;  %v2826_v8 = vshrl.u32 %v18690_v5, 16 }
 0x102   : > { %v817_v3 = vpop.f32.mrf.mxu1 }
 0x103   : > { %v634_v24 = vpop.f32.mrf.mxu0  ;;  %v18666_v10 = vadd.f32 %v817_v3, %v618_v6 }
 0x104   : > { %v16084_v11 = vpop.f32.mrf.mxu1  ;;  %16287 = vmatmul.mubr.msk.bf16.gmra.mxu1 %vm484_vm1, %v2779_v15 }
 0x105   : > { %v16054_v20 = vpop.f32.mrf.mxu0  ;;  %16261 = vmatmul.mubr.msk.bf16.gmra.mxu0 %vm484_vm1, %v2422_v30  ;;  %v18670_v52 = vadd.f32 %v16084_v11, %v16050_v62  ;;  %16290 = vmatprep.mubr.msk.bf16.mxu1 %vm484_vm1, %v2788_v46  ;;  %v18684_v62 = vld [vmem:[%s17749_s25 + $0x84] sm:$0xf]  ;;  %v2813_v11 = vrot.slane %v2811_v44, 3 }
 0x106   : > { %16264 = vmatprep.mubr.msk.bf16.mxu0 %vm484_vm1, %v2424_v58  ;;  %v830_v30 = vpop.f32.mrf.mxu1  ;;  %v2426_v58 = vsel %vm1994_vm2, %v2423_v28, %v24872_v57  ;;  %24873 = vst [vmem:[#allocation8_spill] sm:$0xff] %v18684_v62  ;;  %v2822_v28 = vrot.slane %v2820_v60, 3  ;;  %v2829_v60 = vshll.u32 %v18690_v5, 16 }
 0x107   : > { %v647_v59 = vpop.f32.mrf.mxu0  ;;  %v18676_v6 = vadd.f32 %v830_v30, %v631_v22  ;;  %v18695_v30 = vcombine.low %v3471_v17, %v18684_v62  ;;  %v2814_v26 = vor.u32 %v2813_v11, %v2810_v36 }
 0x108   : > { %v16085_v15 = vpop.f32.mrf.mxu1 }
 0x109   : > { %v16055_v35 = vpop.f32.mrf.mxu0  ;;  %v18686_v46 = vadd.f32 %v16085_v15, %v16051_v50  ;;  %v2815_v11 = vsel %vm2681_vm6, %v2805_v47, %v2814_v26 }
 0x10a   : > { %v833_v22 = vpop.f32.mrf.mxu1 }
 0x10b   : > { %v650_v3 = vpop.f32.mrf.mxu0  ;;  %v18697_v50 = vadd.f32 %v833_v22, %v634_v24  ;;  %v2823_v24 = vor.u32 %v2822_v28, %v2819_v45  ;;  %v2831_v45 = vrot.slane %v2829_v60, 3 }
 0x10c   : > { %v16088_v1 = vpop.f32.mrf.mxu1  ;;  %16291 = vmatmul.mubr.msk.bf16.gmra.mxu1 %vm484_vm1, %v2797_v21 }
 0x10d   : > { %v16058_v18 = vpop.f32.mrf.mxu0  ;;  %16265 = vmatmul.mubr.msk.bf16.gmra.mxu0 %vm484_vm1, %v2426_v58  ;;  %v18702_v25 = vadd.f32 %v16088_v1, %v16054_v20  ;;  %16294 = vmatprep.mubr.msk.bf16.mxu1 %vm484_vm1, %v2806_v2  ;;  %v18708_v58 = vld [vmem:[%s17749_s25 + $0x88] sm:$0xff]   ;;  %v18716_v20 = vld [vmem:[%s24742_s1 + $0x18] sm:$0xff]   ;;  %v2828_v2 = vrot.slane %v2826_v8, 2 }
 0x10e   : > { %16304 = vmatprep.mubr.msk.bf16.mxu0 %vm484_vm1, %v18181_v31  ;;  %v846_v17 = vpop.f32.mrf.mxu1  ;;  %v3594_v31 = vshll.u32 %v18695_v30, 16  ;;  %v3599_v39 = vshll.u32 %v18708_v58, 16 }
 0x10f   : > { %v663_v44 = vpop.f32.mrf.mxu0  ;;  %v18711_v15 = vadd.f32 %v846_v17, %v647_v59  ;;  %v2824_v59 = vsel %vm2681_vm6, %v2814_v26, %v2823_v24  ;;  %v3592_v17 = vshrl.u32 %v18695_v30, 16  ;;  %v18736_v26 = vld [vmem:[%s17749_s25 + $0x90] sm:$0xff]  }
 0x110   : > { %v16089_v21 = vpop.f32.mrf.mxu1  ;;  %v3596_v62 = vrot.slane %v3594_v31, 1 }
 0x111   : > { %v16059_v57 = vpop.f32.mrf.mxu0  ;;  %v18718_v36 = vadd.f32 %v16089_v21, %v16055_v35  ;;  %v18746_v21 = vld [vmem:[%s17749_s25 + $0x98] sm:$0xff]  }
 0x112   : > { %v849_v28 = vpop.f32.mrf.mxu1  ;;  %v3597_v31 = vor.u32 %v3596_v62, %v3592_v17 }
 0x113   : > { %v666_v22 = vpop.f32.mrf.mxu0  ;;  %v18726_v5 = vadd.f32 %v849_v28, %v650_v3 }
 0x114   : > { %v16092_v47 = vpop.f32.mrf.mxu1  ;;  %16295 = vmatmul.mubr.msk.bf16.gmra.mxu1 %vm484_vm1, %v2815_v11 }
 0x115   : > { %v16102_v1 = vpop.f32.mrf.mxu0  ;;  %16305 = vmatmul.mubr.msk.bf16.vlgmr.msra.gmra.mxu0 %vm484_vm1, %v18186_v41  ;;  %v18739_v8 = vadd.f32 %v16092_v47, %v16058_v18  ;;  %16298 = vmatprep.mubr.msk.bf16.mxu1 %vm484_vm1, %v2824_v59  ;;  %v3607_v47 = vshll.u32 %v18736_v26, 16 }
 0x116   : > { %v18729_v35 = vadd.f32 %v16102_v1, %v18535_v9  ;;  %16371 = vmatpush3.bf16.msra.mxu0 %v18432_v27  ;;  %16308 = vmatprep.mubr.msk.bf16.mxu0 %vm484_vm1, %v18207_v48  ;;  %v2832_v9 = vor.u32 %v2831_v45, %v2828_v2  ;;  %v862_v27 = vpop.f32.mrf.mxu1  ;;  %v3601_v48 = vrot.slane %v3599_v39, 1  ;;  %v3603_v39 = vshrl.u32 %v18708_v58, 16 }
 0x117   : > { %v1022_v41 = vpop.f32.mrf.mxu0  ;;  %16438 = vmatprep.subr.bf16.mxu0 %v18716_v20  ;;  %v18748_v11 = vadd.f32 %v862_v27, %v663_v44  ;;  %v3611_v45 = vshrl.u32 %v18736_v26, 16 }
 0x118   : > { %v18742_v3 = vadd.f32 %v1022_v41, %v18544_v12  ;;  %v16093_v1 = vpop.f32.mrf.mxu1  ;;  %v2833_v62 = vsel %vm2681_vm6, %v2823_v24, %v2832_v9  ;;  %v18775_v9 = vld [vmem:[%s17749_s25 + $0xa0] sm:$0xff]  }
 0x119   : > { %v16103_v60 = vpop.f32.mrf.mxu0  ;;  %v18754_v12 = vadd.f32 %v16093_v1, %v16059_v57  ;;  %v3615_v57 = vshll.u32 %v18746_v21, 16 }
 0x11a   : > { %v18751_v28 = vadd.f32 %v16103_v60, %v18558_v55  ;;  %v865_v2 = vpop.f32.mrf.mxu1  ;;  %v3602_v55 = vsel %vm345_vm0, %v3597_v31, %v3601_v48  ;;  %v3605_v60 = vor.u32 %v3603_v39, %v3601_v48 }
 0x11b   : > { %v1025_v18 = vpop.f32.mrf.mxu0  ;;  %v18766_v17 = vadd.f32 %v865_v2, %v666_v22 }
 0x11c   : > { %v18757_v59 = vadd.f32 %v1025_v18, %v18567_v19  ;;  %v16096_v24 = vpop.f32.mrf.mxu1  ;;  %16299 = vmatmul.mubr.msk.bf16.gmra.mxu1 %vm484_vm1, %v2833_v62  ;;  %v18785_v18 = vld [vmem:[%s17749_s25 + $0xa8] sm:$0xff]  }
 0x11d   : > { %v16106_v44 = vpop.f32.mrf.mxu0  ;;  %16309 = vmatmul.mubr.msk.bf16.gmra.mxu0 %vm484_vm1, %v18211_v13  ;;  %v3609_v13 = vrot.slane %v3607_v47, 1  ;;  %v18778_v27 = vadd.f32 %v16096_v24, %v18491_v42  ;;  %16338 = vmatprep.mubr.msk.bf16.mxu1 %vm484_vm1, %v3602_v55  ;;  %v3619_v55 = vshrl.u32 %v18746_v21, 16 }
 0x11e   : > { %v18769_v19 = vadd.f32 %v16106_v44, %v18574_v40  ;;  %16312 = vmatprep.mubr.msk.bf16.mxu0 %vm484_vm1, %v18239_v43  ;;  %v878_v40 = vpop.f32.mrf.mxu1  ;;  %v3617_v43 = vrot.slane %v3615_v57, 1  ;;  %v3627_v57 = vshrl.u32 %v18775_v9, 16 }
 0x11f   : > { %v1038_v41 = vpop.f32.mrf.mxu0  ;;  %v3613_v1 = vor.u32 %v3611_v45, %v3609_v13  ;;  %v18788_v62 = vadd.f32 %v878_v40, %v18501_v23  ;;  %v3610_v44 = vsel %vm345_vm0, %v3605_v60, %v3609_v13  ;;  %v18822_v40 = vld [vmem:[%s17749_s25 + $0xb0] sm:$0xff]  }
 0x120   : > { %v18781_v22 = vadd.f32 %v1038_v41, %v18581_v38  ;;  %v16097_v42 = vpop.f32.mrf.mxu1  ;;  %v3623_v38 = vshll.u32 %v18775_v9, 16 }
 0x121   : > { %v16107_v31 = vpop.f32.mrf.mxu0  ;;  %v18795_v48 = vadd.f32 %v16097_v42, %v18510_v33  ;;  %v3631_v33 = vshll.u32 %v18785_v18, 16 }
 0x122   : > { %v18791_v47 = vadd.f32 %v16107_v31, %v18597_v14  ;;  %v881_v23 = vpop.f32.mrf.mxu1  ;;  %v3618_v14 = vsel %vm345_vm0, %v3613_v1, %v3617_v43  ;;  %v3625_v60 = vrot.slane %v3623_v38, 1 }
 0x123   : > { %v1041_v2 = vpop.f32.mrf.mxu0  ;;  %v18813_v24 = vadd.f32 %v881_v23, %v18527_v0 }
 0x124   : > { %v18798_v39 = vadd.f32 %v1041_v2, %v18604_v34  ;;  %v18810_v34 = vld [vmem:[%s24742_s1 + $0x20] sm:$0xff]   ;;  %16339 = vmatmul.mubr.msk.bf16.vlgmr.msra.gmra.mxu1 %vm484_vm1, %v3610_v44  ;;  %v3629_v42 = vor.u32 %v3627_v57, %v3625_v60  ;;  %v3633_v2 = vrot.slane %v3631_v33, 1  ;;  %v18833_v44 = vld [vmem:[%s17749_s25 + $0xb8] sm:$0xff]   ;;  %v3643_v33 = vshrl.u32 %v18822_v40, 16 }
 0x125   : > { %v16110_v45 = vpop.f32.mrf.mxu0  ;;  %16313 = vmatmul.mubr.msk.bf16.gmra.mxu0 %vm484_vm1, %v18244_v32  ;;  %v16136_v32 = vpop.f32.mrf.mxu1  ;;  %16405 = vmatpush3.bf16.msra.mxu1 %v18525_v16 }
 0x126   : > { %v18816_v41 = vadd.f32 %v16110_v45, %v18608_v56  ;;  %16316 = vmatprep.mubr.msk.bf16.mxu0 %vm484_vm1, %v18270_v63  ;;  %v18825_v31 = vadd.f32 %v16136_v32, %v18729_v35  ;;  %v3621_v56 = vor.u32 %v3619_v55, %v3617_v43  ;;  %16342 = vmatprep.mubr.msk.bf16.mxu1 %vm484_vm1, %v3618_v14  ;;  %v3639_v43 = vshll.u32 %v18822_v40, 16 }
 0x127   : > { %v1054_v13 = vpop.f32.mrf.mxu0  ;;  %v1421_v1 = vpop.f32.mrf.mxu1  ;;  %16472 = vmatprep.subr.bf16.mxu1 %v18810_v34  ;;  %v3635_v14 = vshrl.u32 %v18785_v18, 16 }
 0x128   : > { %v18829_v0 = vadd.f32 %v1054_v13, %v18615_v29  ;;  %v18837_v38 = vadd.f32 %v1421_v1, %v18742_v3  ;;  %v3626_v45 = vsel %vm345_vm0, %v3621_v56, %v3625_v60  ;;  %v3641_v60 = vrot.slane %v3639_v43, 1  ;;  %v18866_v56 = vld [vmem:[%s17749_s25 + $0xc0] sm:$0xff]  }
 0x129   : > { %v16111_v63 = vpop.f32.mrf.mxu0  ;;  %v16137_v16 = vpop.f32.mrf.mxu1 }
 0x12a   : > { %v18840_v35 = vadd.f32 %v16111_v63, %v18629_v37  ;;  %v18844_v55 = vadd.f32 %v16137_v16, %v18751_v28  ;;  %v3634_v37 = vsel %vm345_vm0, %v3629_v42, %v3633_v2  ;;  %v3647_v28 = vshll.u32 %v18833_v44, 16 }
 0x12b   : > { %v1057_v29 = vpop.f32.mrf.mxu0  ;;  %v1424_v3 = vpop.f32.mrf.mxu1  ;;  %v3637_v63 = vor.u32 %v3635_v14, %v3633_v2  ;;  %v3645_v16 = vor.u32 %v3643_v33, %v3641_v60 }
 0x12c   : > { %v18847_v23 = vadd.f32 %v1057_v29, %v18636_v61  ;;  %v18857_v32 = vadd.f32 %v1424_v3, %v18757_v59  ;;  %16343 = vmatmul.mubr.msk.bf16.gmra.mxu1 %vm484_vm1, %v3626_v45  ;;  %v18876_v29 = vld [vmem:[%s17749_s25 + $0xc8] sm:$0xff]  }
 0x12d   : > { %v16114_v57 = vpop.f32.mrf.mxu0  ;;  %16317 = vmatmul.mubr.msk.bf16.gmra.mxu0 %vm484_vm1, %v18276_v4  ;;  %v16140_v13 = vpop.f32.mrf.mxu1  ;;  %16346 = vmatprep.mubr.msk.bf16.mxu1 %vm484_vm1, %v3634_v37  ;;  %24875 = vst [vmem:[#allocation10_spill] sm:$0xff] %v18876_v29  ;;  %v3651_v37 = vshrl.u32 %v18833_v44, 16 }
 0x12e   : > { %v18860_v61 = vadd.f32 %v16114_v57, %v18640_v51  ;;  %16320 = vmatprep.mubr.msk.bf16.mxu0 %vm484_vm1, %v18300_v54  ;;  %v18869_v1 = vadd.f32 %v16140_v13, %v18769_v19  ;;  %v3649_v54 = vrot.slane %v3647_v28, 1  ;;  %v3642_v57 = vsel %vm345_vm0, %v3637_v63, %v3641_v60 }
 0x12f   : > { %v1070_v4 = vpop.f32.mrf.mxu0  ;;  %v1437_v51 = vpop.f32.mrf.mxu1  ;;  %v3659_v28 = vshrl.u32 %v18866_v56, 16 }
 0x130   : > { %v18872_v59 = vadd.f32 %v1070_v4, %v18647_v7  ;;  %v18879_v45 = vadd.f32 %v1437_v51, %v18781_v22  ;;  %v3655_v7 = vshll.u32 %v18866_v56, 16  ;;  %v24876_v4 = vld [vmem:[#allocation2_spill] sm:$0xff]  ;;  %v18908_v51 = vld [vmem:[%s17749_s25 + $0xd0] sm:$0xff]  }
 0x131   : > { %v16115_v42 = vpop.f32.mrf.mxu0  ;;  %v16141_v19 = vpop.f32.mrf.mxu1  ;;  %24877 = vst [vmem:[#allocation2_spill] sm:$0xff] %v18908_v51 }
 0x132   : > { %v18882_v43 = vadd.f32 %v16115_v42, %v18659_v49  ;;  %v18886_v2 = vadd.f32 %v16141_v19, %v18791_v47  ;;  %v3650_v49 = vsel %vm345_vm0, %v3645_v16, %v3649_v54  ;;  %v3663_v47 = vshll.u32 %v18876_v29, 16 }
 0x133   : > { %v1073_v3 = vpop.f32.mrf.mxu0  ;;  %v1440_v22 = vpop.f32.mrf.mxu1  ;;  %v3657_v63 = vrot.slane %v3655_v7, 1  ;;  %v3653_v16 = vor.u32 %v3651_v37, %v3649_v54 }
 0x134   : > { %v18889_v14 = vadd.f32 %v1073_v3, %v18666_v10  ;;  %v18899_v13 = vadd.f32 %v1440_v22, %v18798_v39  ;;  %16347 = vmatmul.mubr.msk.bf16.gmra.mxu1 %vm484_vm1, %v3642_v57  ;;  %v3665_v22 = vrot.slane %v3663_v47, 1 }
 0x135   : > { %v16118_v33 = vpop.f32.mrf.mxu0  ;;  %16321 = vmatmul.mubr.msk.bf16.gmra.mxu0 %vm484_vm1, %v18305_v53  ;;  %v16144_v60 = vpop.f32.mrf.mxu1  ;;  %16350 = vmatprep.mubr.msk.bf16.mxu1 %vm484_vm1, %v3650_v49  ;;  %v3661_v3 = vor.u32 %v3659_v28, %v3657_v63  ;;  %v3658_v49 = vsel %vm345_vm0, %v3653_v16, %v3657_v63  ;;  %v3667_v28 = vshrl.u32 %v18876_v29, 16  ;;  %v24880_v63 = vld [vmem:[#allocation4_spill] sm:$0xff]  ;;  %v19003_v29 = vld [vmem:[%s17749_s25 + $0xf8] sm:$0xff]  }
 0x136   : > { %v18902_v10 = vadd.f32 %v16118_v33, %v18670_v52  ;;  %16324 = vmatprep.mubr.msk.bf16.mxu0 %vm484_vm1, %v24876_v4  ;;  %v18911_v42 = vadd.f32 %v16144_v60, %v18816_v41  ;;  %v18918_v33 = vld [vmem:[%s17749_s25 + $0xd8] sm:$0xff]   ;;  %v24879_v60 = vld [vmem:[#allocation3_spill] sm:$0xff] }
 0x137   : > { %v1086_v53 = vpop.f32.mrf.mxu0  ;;  %v1453_v52 = vpop.f32.mrf.mxu1  ;;  %24878 = vst [vmem:[#allocation11_spill] sm:$0xff] %v18918_v33 }
 0x138   : > { %v18914_v39 = vadd.f32 %v1086_v53, %v18676_v6  ;;  %v18921_v57 = vadd.f32 %v1453_v52, %v18829_v0  ;;  %v3671_v6 = vshll.u32 %v18908_v51, 16  ;;  %v3675_v53 = vshrl.u32 %v18908_v51, 16  ;;  %v18960_v51 = vld [vmem:[%s17749_s25 + $0xe8] sm:$0xff]  }
 0x139   : > { %v16119_v19 = vpop.f32.mrf.mxu0  ;;  %v16145_v41 = vpop.f32.mrf.mxu1  ;;  %24882 = vst [vmem:[#allocation4_spill] sm:$0xff] %v18960_v51 }
 0x13a   : > { %v18924_v7 = vadd.f32 %v16119_v19, %v18686_v46  ;;  %v18928_v54 = vadd.f32 %v16145_v41, %v18840_v35  ;;  %v3666_v46 = vsel %vm345_vm0, %v3661_v3, %v3665_v22  ;;  %v3679_v35 = vshll.u32 %v18918_v33, 16  ;;  %v18950_v3 = vld [vmem:[%s17749_s25 + $0xe0] sm:$0xff]  }
 0x13b   : > { %v1089_v4 = vpop.f32.mrf.mxu0  ;;  %v1456_v0 = vpop.f32.mrf.mxu1  ;;  %v3673_v41 = vrot.slane %v3671_v6, 1  ;;  %24881 = vst [vmem:[#allocation3_spill] sm:$0xff] %v18950_v3 }
 0x13c   : > { %v18931_v37 = vadd.f32 %v1089_v4, %v18697_v50  ;;  %v18941_v52 = vadd.f32 %v1456_v0, %v18847_v23  ;;  %16351 = vmatmul.mubr.msk.bf16.gmra.mxu1 %vm484_vm1, %v3658_v49  ;;  %v3669_v0 = vor.u32 %v3667_v28, %v3665_v22 }
 0x13d   : > { %v16122_v47 = vpop.f32.mrf.mxu0  ;;  %16325 = vmatmul.mubr.msk.bf16.gmra.mxu0 %vm484_vm1, %v24879_v60  ;;  %v16148_v16 = vpop.f32.mrf.mxu1  ;;  %16354 = vmatprep.mubr.msk.bf16.mxu1 %vm484_vm1, %v3666_v46  ;;  %v3677_v60 = vor.u32 %v3675_v53, %v3673_v41  ;;  %v3683_v53 = vshrl.u32 %v18918_v33, 16 }
 0x13e   : > { %v18944_v50 = vadd.f32 %v16122_v47, %v18702_v25  ;;  %16328 = vmatprep.mubr.msk.bf16.mxu0 %vm484_vm1, %v24880_v63  ;;  %v18953_v4 = vadd.f32 %v16148_v16, %v18860_v61  ;;  %v3681_v63 = vrot.slane %v3679_v35, 1  ;;  %v3674_v46 = vsel %vm345_vm0, %v3669_v0, %v3673_v41  ;;  %v24884_v41 = vld [vmem:[#allocation7_spill] sm:$0xff]  ;;  %v24885_v0 = vld [vmem:[#allocation9_spill] sm:$0xff] }
 0x13f   : > { %v1102_v19 = vpop.f32.mrf.mxu0  ;;  %v1469_v25 = vpop.f32.mrf.mxu1  ;;  %24887 = vst [vmem:[#allocation7_spill] sm:$0xff] %v19003_v29 }
 0x140   : > { %v18956_v23 = vadd.f32 %v1102_v19, %v18711_v15  ;;  %v18963_v49 = vadd.f32 %v1469_v25, %v18872_v59  ;;  %v3687_v15 = vshll.u32 %v18950_v3, 16  ;;  %v24883_v19 = vld [vmem:[#allocation5_spill] sm:$0xff]  ;;  %v3691_v25 = vshrl.u32 %v18950_v3, 16  ;;  %v18993_v3 = vld [vmem:[%s17749_s25 + $0xf0] sm:$0xff]  }
 0x141   : > { %v16123_v47 = vpop.f32.mrf.mxu0  ;;  %v16149_v61 = vpop.f32.mrf.mxu1  ;;  %24886 = vst [vmem:[#allocation5_spill] sm:$0xff] %v18993_v3 }
 0x142   : > { %v18966_v6 = vadd.f32 %v16123_v47, %v18718_v36  ;;  %v18970_v22 = vadd.f32 %v16149_v61, %v18882_v43  ;;  %v3682_v36 = vsel %vm345_vm0, %v3677_v60, %v3681_v63  ;;  %v3695_v43 = vshll.u32 %v18960_v51, 16 }
 0x143   : > { %v1105_v16 = vpop.f32.mrf.mxu0  ;;  %v1472_v59 = vpop.f32.mrf.mxu1  ;;  %v3120_v61 = vrot.slane %v24885_v0, 3 }
 0x144   : > { %v18973_v28 = vadd.f32 %v1105_v16, %v18726_v5  ;;  %v18983_v47 = vadd.f32 %v1472_v59, %v18889_v14  ;;  %16355 = vmatmul.mubr.msk.bf16.gmra.mxu1 %vm484_vm1, %v3674_v46  ;;  %v3697_v0 = vrot.slane %v3695_v43, 1 }
 0x145   : > { %v16126_v35 = vpop.f32.mrf.mxu0  ;;  %16329 = vmatmul.mubr.msk.bf16.gmra.mxu0 %vm484_vm1, %v24883_v19  ;;  %v16152_v16 = vpop.f32.mrf.mxu1  ;;  %v3689_v19 = vrot.slane %v3687_v15, 1  ;;  %16358 = vmatprep.mubr.msk.bf16.mxu1 %vm484_vm1, %v3682_v36  ;;  %v3703_v36 = vshll.u32 %v18993_v3, 16 }
 0x146   : > { %v18986_v5 = vadd.f32 %v16126_v35, %v18739_v8  ;;  %16332 = vmatprep.mubr.msk.bf16.mxu0 %vm484_vm1, %v24884_v41  ;;  %v18996_v33 = vadd.f32 %v16152_v16, %v18902_v10  ;;  %v3685_v8 = vor.u32 %v3683_v53, %v3681_v63  ;;  %v24888_v10 = vld [vmem:[#allocation6_spill] sm:$0xff]  ;;  %v3699_v53 = vshrl.u32 %v18960_v51, 16 }
 0x147   : > { %v1118_v60 = vpop.f32.mrf.mxu0  ;;  %v1485_v59 = vpop.f32.mrf.mxu1  ;;  %v3693_v41 = vor.u32 %v3691_v25, %v3689_v19  ;;  %v24889_v16 = vrot.slane %v24888_v10, 3  ;;  %v3711_v10 = vshll.u32 %v19003_v29, 16 }
 0x148   : > { %v18999_v14 = vadd.f32 %v1118_v60, %v18748_v11  ;;  %v19006_v46 = vadd.f32 %v1485_v59, %v18914_v39 }
 0x149   : > { %v16127_v35 = vpop.f32.mrf.mxu0  ;;  %v3121_v11 = vsel %vm3088_vm5, %v24889_v16, %v3120_v61  ;;  %v16153_v60 = vpop.f32.mrf.mxu1  ;;  %v3698_v61 = vsel %vm345_vm0, %v3693_v41, %v3697_v0  ;;  %v3705_v41 = vrot.slane %v3703_v36, 1  ;;  %v19058_v36 = vld [vmem:[%s17749_s25 + $0x98] sm:$0xff]  }
 0x14a   : > { %v19009_v15 = vadd.f32 %v16127_v35, %v18754_v12  ;;  %v19017_v25 = vadd.f32 %v16153_v60, %v18924_v7  ;;  %v3690_v12 = vsel %vm345_vm0, %v3685_v8, %v3689_v19  ;;  %v3707_v35 = vshrl.u32 %v18993_v3, 16  ;;  %v19065_v3 = vld [vmem:[%s17749_s25 + $0xa0] sm:$0xff]  }
 0x14b   : > { %v1121_v63 = vpop.f32.mrf.mxu0  ;;  %v1488_v39 = vpop.f32.mrf.mxu1  ;;  %v3701_v8 = vor.u32 %v3699_v53, %v3697_v0 }
 0x14c   : > { %v19020_v43 = vadd.f32 %v1121_v63, %v18766_v17  ;;  %v19028_v16 = vadd.f32 %v1488_v39, %v18931_v37  ;;  %16359 = vmatmul.mubr.msk.bf16.gmra.mxu1 %vm484_vm1, %v3690_v12  ;;  %v3709_v63 = vor.u32 %v3707_v35, %v3705_v41  ;;  %v3713_v12 = vrot.slane %v3711_v10, 1  ;;  %v19047_v39 = vld [vmem:[%s17749_s25 + $0x94] sm:$0xf] }
 0x14d   : > { %v16130_v59 = vpop.f32.mrf.mxu0  ;;  %16333 = vmatmul.mubr.msk.bf16.gmra.mxu0 %vm484_vm1, %v3121_v11  ;;  %v16156_v7 = vpop.f32.mrf.mxu1  ;;  %v19037_v11 = vld [vmem:[%s17749_s25 + $0x100] ss:$0 sps:$4 sm:$0x11]   ;;  %16362 = vmatprep.mubr.msk.bf16.mxu1 %vm484_vm1, %v3698_v61  ;;  %24891 = vst [vmem:[#allocation6_spill] sm:$0xff] %v19047_v39  ;;  %v3715_v35 = vshrl.u32 %v19003_v29, 16  ;;  %v24892_v29 = vld [vmem:[#allocation8_spill] sm:$0xff] }
 0x14e   : > { %v19031_v17 = vadd.f32 %v16130_v59, %v18778_v27  ;;  %16372 = vmatprep.mubr.msk.bf16.mxu0 %vm484_vm1, %v18695_v30  ;;  %24890 = vst [vmem:[#allocation9_spill] sm:$0xff] %v19037_v11  ;;  %v19040_v37 = vadd.f32 %v16156_v7, %v18944_v50  ;;  %v5226_v59 = vld [vmem:[%s17749_s25 + $0x90] sm:$0xc]  ;;  %v4137_v50 = vld [vmem:[%s17749_s25 + $0x80] sm:$0xe]  ;;  %v3719_v10 = vshll.u32 %v19037_v11, 16  ;;  %v3714_v11 = vsel %vm345_vm0, %v3709_v63, %v3713_v12 }
 0x14f   : > { %v1134_v19 = vpop.f32.mrf.mxu0  ;;  %v1501_v60 = vpop.f32.mrf.mxu1  ;;  %v14670_v51 = vcombine.low %v4137_v50, %v24892_v29  ;;  %v3717_v63 = vor.u32 %v3715_v35, %v3713_v12 }
 0x150   : > { %v19043_v27 = vadd.f32 %v1134_v19, %v18788_v62  ;;  %v19051_v0 = vadd.f32 %v1501_v60, %v18956_v23  ;;  %v14746_v62 = vcombine.low %v5226_v59, %v19047_v39  ;;  %v3706_v19 = vsel %vm345_vm0, %v3701_v8, %v3705_v41 }
 0x151   : > { %v16131_v30 = vpop.f32.mrf.mxu0  ;;  %v16157_v61 = vpop.f32.mrf.mxu1  ;;  %v5233_v8 = vrot.slane %v19058_v36, 2  ;;  %v5235_v39 = vrot.slane %v19065_v3, 2  ;;  %v3721_v50 = vrot.slane %v3719_v10, 1 }
 0x152   : > { %v19054_v53 = vadd.f32 %v16131_v30, %v18795_v48  ;;  %v19070_v48 = vld [vmem:[%s24742_s1 + $0x28] sm:$0xff]   ;;  %v19073_v23 = vadd.f32 %v16157_v61, %v18966_v6  ;;  %v5232_v30 = vrot.slane %v14746_v62, 2 }
 0x153   : > { %v1137_v7 = vpop.f32.mrf.mxu0  ;;  %v1504_v41 = vpop.f32.mrf.mxu1 }
 0x154   : > { %v19076_v60 = vadd.f32 %v1137_v7, %v18813_v24  ;;  %v19085_v6 = vadd.f32 %v1504_v41, %v18973_v28  ;;  %v19094_v62 = vsel %vm1994_vm2, %v5232_v30, %v5233_v8  ;;  %16363 = vmatmul.mubr.msk.bf16.gmra.mxu1 %vm484_vm1, %v3706_v19  ;;  %v19099_v28 = vsel %vm1994_vm2, %v5233_v8, %v5235_v39 }
 0x155   : > { %v16170_v59 = vpop.f32.mrf.mxu0  ;;  %16373 = vmatmul.mubr.msk.bf16.vlgmr.msra.gmra.mxu0 %vm484_vm1, %v18708_v58  ;;  %v16160_v61 = vpop.f32.mrf.mxu1  ;;  %16366 = vmatprep.mubr.msk.bf16.mxu1 %vm484_vm1, %v3714_v11  ;;  %v4143_v19 = vrot.slane %v14670_v51, 1  ;;  %v4144_v41 = vrot.slane %v18708_v58, 1  ;;  %v3722_v58 = vsel %vm345_vm0, %v3717_v63, %v3721_v50 }
 0x156   : > { %v19088_v24 = vadd.f32 %v16170_v59, %v18825_v31  ;;  %16439 = vmatpush3.bf16.msra.mxu0 %v18716_v20  ;;  %16376 = vmatprep.mubr.msk.bf16.mxu0 %vm484_vm1, %v18736_v26  ;;  %v19102_v31 = vadd.f32 %v16160_v61, %v18986_v5  ;;  %v19116_v5 = vld [vmem:[%s17749_s25 + $0xa8] sm:$0xff]  }
 0x157   : > { %v1828_v29 = vpop.f32.mrf.mxu0  ;;  %16506 = vmatprep.subr.bf16.mxu0 %v19070_v48  ;;  %v1517_v7 = vpop.f32.mrf.mxu1  ;;  %v5237_v51 = vrot.slane %v19116_v5, 2 }
 0x158   : > { %v19105_v20 = vadd.f32 %v1828_v29, %v18837_v38  ;;  %v19110_v59 = vadd.f32 %v1517_v7, %v18999_v14  ;;  %v19119_v29 = vld [vmem:[%s17749_s25 + $0xb0] sm:$0xff]  }
 0x159   : > { %v16171_v30 = vpop.f32.mrf.mxu0  ;;  %v16161_v61 = vpop.f32.mrf.mxu1  ;;  %v5239_v10 = vrot.slane %v19119_v29, 2 }
 0x15a   : > { %v19113_v8 = vadd.f32 %v16171_v30, %v18844_v55  ;;  %v19122_v11 = vadd.f32 %v16161_v61, %v19009_v15  ;;  %v4145_v55 = vsel %vm900_vm3, %v4143_v19, %v4144_v41  ;;  %v4146_v19 = vrot.slane %v18736_v26, 1 }
 0x15b   : > { %v1831_v38 = vpop.f32.mrf.mxu0  ;;  %v1520_v14 = vpop.f32.mrf.mxu1  ;;  %v19146_v30 = vsel %vm1994_vm2, %v5237_v51, %v5239_v10 }
 0x15c   : > { %v19125_v12 = vadd.f32 %v1831_v38, %v18857_v32  ;;  %v19134_v7 = vadd.f32 %v1520_v14, %v19020_v43  ;;  %v19142_v32 = vsel %vm1994_vm2, %v5235_v39, %v5237_v51  ;;  %16367 = vmatmul.mubr.msk.bf16.gmra.mxu1 %vm484_vm1, %v3722_v58  ;;  %24893 = vst [vmem:[#allocation8_spill] sm:$0xff] %v19146_v30  ;;  %v4148_v38 = vrot.slane %v18746_v21, 1  ;;  %v19164_v14 = vld [vmem:[%s17749_s25 + $0xb8] sm:$0xff]  }
 0x15d   : > { %v16174_v35 = vpop.f32.mrf.mxu0  ;;  %16377 = vmatmul.mubr.msk.bf16.gmra.mxu0 %vm484_vm1, %v18746_v21  ;;  %v16164_v63 = vpop.f32.mrf.mxu1  ;;  %16406 = vmatprep.mubr.msk.bf16.mxu1 %vm484_vm1, %v4145_v55  ;;  %v4147_v21 = vsel %vm900_vm3, %v4144_v41, %v4146_v19 }
 0x15e   : > { %v19137_v15 = vadd.f32 %v16174_v35, %v18869_v1  ;;  %16380 = vmatprep.mubr.msk.bf16.mxu0 %vm484_vm1, %v18775_v9  ;;  %v19149_v43 = vadd.f32 %v16164_v63, %v19031_v17 }
 0x15f   : > { %v1844_v50 = vpop.f32.mrf.mxu0  ;;  %v1533_v39 = vpop.f32.mrf.mxu1 }
 0x160   : > { %v19152_v1 = vadd.f32 %v1844_v50, %v18879_v45  ;;  %v19158_v58 = vadd.f32 %v1533_v39, %v19043_v27  ;;  %v19167_v45 = vld [vmem:[%s17749_s25 + $0xc0] sm:$0xff]   ;;  %v5241_v27 = vrot.slane %v19164_v14, 2  ;;  %v19183_v39 = vld [vmem:[%s24742_s1 + $0x30] sm:$0xff]  }
 0x161   : > { %v16175_v61 = vpop.f32.mrf.mxu0  ;;  %v16165_v17 = vpop.f32.mrf.mxu1 }
 0x162   : > { %v19161_v51 = vadd.f32 %v16175_v61, %v18886_v2  ;;  %v19170_v55 = vadd.f32 %v16165_v17, %v19054_v53  ;;  %v4149_v2 = vsel %vm900_vm3, %v4146_v19, %v4148_v38  ;;  %v5243_v53 = vrot.slane %v19167_v45, 2 }
 0x163   : > { %v1847_v35 = vpop.f32.mrf.mxu0  ;;  %v1536_v63 = vpop.f32.mrf.mxu1  ;;  %v19195_v61 = vsel %vm1994_vm2, %v5239_v10, %v5241_v27  ;;  %v4150_v10 = vrot.slane %v18775_v9, 1 }
 0x164   : > { %v19173_v26 = vadd.f32 %v1847_v35, %v18899_v13  ;;  %v19187_v13 = vadd.f32 %v1536_v63, %v19076_v60  ;;  %24894 = vst [vmem:[#allocation12_spill] sm:$0xff] %v19195_v61  ;;  %16407 = vmatmul.mubr.msk.bf16.vlgmr.msra.gmra.mxu1 %vm484_vm1, %v4147_v21  ;;  %v19199_v35 = vsel %vm1994_vm2, %v5241_v27, %v5243_v53  ;;  %v4152_v21 = vrot.slane %v18785_v18, 1 }
 0x165   : > { %v16178_v50 = vpop.f32.mrf.mxu0  ;;  %16381 = vmatmul.mubr.msk.bf16.gmra.mxu0 %vm484_vm1, %v18785_v18  ;;  %v16204_v19 = vpop.f32.mrf.mxu1  ;;  %24895 = vst [vmem:[#allocation13_spill] sm:$0xff] %v19199_v35  ;;  %16473 = vmatpush3.bf16.msra.mxu1 %v18810_v34  ;;  %v19219_v34 = vld [vmem:[%s17749_s25 + $0xc8] sm:$0xff]   ;;  %v4151_v18 = vsel %vm900_vm3, %v4148_v38, %v4150_v10 }
 0x166   : > { %v19190_v41 = vadd.f32 %v16178_v50, %v18911_v42  ;;  %16384 = vmatprep.mubr.msk.bf16.mxu0 %vm484_vm1, %v18822_v40  ;;  %v19202_v60 = vadd.f32 %v16204_v19, %v19088_v24  ;;  %16410 = vmatprep.mubr.msk.bf16.mxu1 %vm484_vm1, %v4149_v2 }
 0x167   : > { %v1860_v17 = vpop.f32.mrf.mxu0  ;;  %v2116_v63 = vpop.f32.mrf.mxu1  ;;  %16540 = vmatprep.subr.bf16.mxu1 %v19183_v39 }
 0x168   : > { %v19206_v42 = vadd.f32 %v1860_v17, %v18921_v57  ;;  %v19213_v27 = vadd.f32 %v2116_v63, %v19105_v20  ;;  %v19222_v17 = vld [vmem:[%s17749_s25 + $0xd0] sm:$0xff]   ;;  %v5245_v20 = vrot.slane %v19219_v34, 2 }
 0x169   : > { %v16179_v50 = vpop.f32.mrf.mxu0  ;;  %v16205_v57 = vpop.f32.mrf.mxu1 }
 0x16a   : > { %v19216_v24 = vadd.f32 %v16179_v50, %v18928_v54  ;;  %v19225_v9 = vadd.f32 %v16205_v57, %v19113_v8  ;;  %v4153_v54 = vsel %vm900_vm3, %v4150_v10, %v4152_v21  ;;  %v5247_v50 = vrot.slane %v19222_v17, 2 }
 0x16b   : > { %v1863_v19 = vpop.f32.mrf.mxu0  ;;  %v2119_v63 = vpop.f32.mrf.mxu1 }
 0x16c   : > { %v19228_v2 = vadd.f32 %v1863_v19, %v18941_v52  ;;  %v19237_v61 = vadd.f32 %v2119_v63, %v19125_v12  ;;  %v19245_v52 = vsel %vm1994_vm2, %v5243_v53, %v5245_v20  ;;  %16411 = vmatmul.mubr.msk.bf16.gmra.mxu1 %vm484_vm1, %v4151_v18  ;;  %v19249_v57 = vsel %vm1994_vm2, %v5245_v20, %v5247_v50 }
 0x16d   : > { %v16182_v35 = vpop.f32.mrf.mxu0  ;;  %16385 = vmatmul.mubr.msk.bf16.gmra.mxu0 %vm484_vm1, %v18833_v44  ;;  %24896 = vst [vmem:[#allocation14_spill] sm:$0xff] %v19245_v52  ;;  %v16208_v38 = vpop.f32.mrf.mxu1  ;;  %24897 = vst [vmem:[#allocation15_spill] sm:$0xff] %v19249_v57  ;;  %16414 = vmatprep.mubr.msk.bf16.mxu1 %vm484_vm1, %v4153_v54  ;;  %v4156_v63 = vrot.slane %v18833_v44, 1  ;;  %v19267_v57 = vld [vmem:[%s17749_s25 + $0xd8] sm:$0xff]  }
 0x16e   : > { %v19240_v8 = vadd.f32 %v16182_v35, %v18953_v4  ;;  %16388 = vmatprep.mubr.msk.bf16.mxu0 %vm484_vm1, %v18866_v56  ;;  %v19252_v12 = vadd.f32 %v16208_v38, %v19137_v15  ;;  %v4154_v35 = vrot.slane %v18822_v40, 1 }
 0x16f   : > { %v1876_v10 = vpop.f32.mrf.mxu0  ;;  %v2132_v53 = vpop.f32.mrf.mxu1 }
 0x170   : > { %v19255_v4 = vadd.f32 %v1876_v10, %v18963_v49  ;;  %v19261_v18 = vadd.f32 %v2132_v53, %v19152_v1  ;;  %v19270_v49 = vld [vmem:[%s17749_s25 + $0xe0] sm:$0xff]   ;;  %v4155_v44 = vsel %vm900_vm3, %v4152_v21, %v4154_v35  ;;  %v5249_v1 = vrot.slane %v19267_v57, 2 }
 0x171   : > { %v16183_v19 = vpop.f32.mrf.mxu0  ;;  %v16209_v15 = vpop.f32.mrf.mxu1  ;;  %v5251_v52 = vrot.slane %v19270_v49, 2 }
 0x172   : > { %v19264_v20 = vadd.f32 %v16183_v19, %v18970_v22  ;;  %v19273_v54 = vadd.f32 %v16209_v15, %v19161_v51  ;;  %v24898_v22 = vld [vmem:[#allocation10_spill] sm:$0xff]  ;;  %v4157_v19 = vsel %vm900_vm3, %v4154_v35, %v4156_v63  ;;  %v19293_v21 = vsel %vm1994_vm2, %v5247_v50, %v5249_v1 }
 0x173   : > { %v1879_v38 = vpop.f32.mrf.mxu0  ;;  %v2135_v10 = vpop.f32.mrf.mxu1  ;;  %24900 = vst [vmem:[#allocation10_spill] sm:$0xff] %v19293_v21  ;;  %v4160_v21 = vrot.slane %v24898_v22, 1 }
 0x174   : > { %v19276_v40 = vadd.f32 %v1879_v38, %v18983_v47  ;;  %v19285_v30 = vadd.f32 %v2135_v10, %v19173_v26  ;;  %v24899_v47 = vld [vmem:[#allocation2_spill] sm:$0xff]  ;;  %16415 = vmatmul.mubr.msk.bf16.gmra.mxu1 %vm484_vm1, %v4155_v44  ;;  %v19297_v38 = vsel %vm1994_vm2, %v5249_v1, %v5251_v52  ;;  %v4158_v10 = vrot.slane %v18866_v56, 1 }
 0x175   : > { %v16186_v53 = vpop.f32.mrf.mxu0  ;;  %16389 = vmatmul.mubr.msk.bf16.gmra.mxu0 %vm484_vm1, %v24898_v22  ;;  %v16212_v15 = vpop.f32.mrf.mxu1  ;;  %24901 = vst [vmem:[#allocation2_spill] sm:$0xff] %v19297_v38  ;;  %16418 = vmatprep.mubr.msk.bf16.mxu1 %vm484_vm1, %v4157_v19  ;;  %v19315_v38 = vld [vmem:[%s17749_s25 + $0xe8] sm:$0xff]  }
 0x176   : > { %v19288_v51 = vadd.f32 %v16186_v53, %v18996_v33  ;;  %16392 = vmatprep.mubr.msk.bf16.mxu0 %vm484_vm1, %v24899_v47  ;;  %v19300_v26 = vadd.f32 %v16212_v15, %v19190_v41  ;;  %v4159_v22 = vsel %vm900_vm3, %v4156_v63, %v4158_v10 }
 0x177   : > { %v1892_v35 = vpop.f32.mrf.mxu0  ;;  %v2148_v50 = vpop.f32.mrf.mxu1 }
 0x178   : > { %v19303_v33 = vadd.f32 %v1892_v35, %v19006_v46  ;;  %v19309_v44 = vadd.f32 %v2148_v50, %v19206_v42  ;;  %v19318_v46 = vld [vmem:[%s17749_s25 + $0xf0] sm:$0xff]   ;;  %v5253_v42 = vrot.slane %v19315_v38, 2 }
 0x179   : > { %v16187_v53 = vpop.f32.mrf.mxu0  ;;  %v16213_v41 = vpop.f32.mrf.mxu1 }
 0x17a   : > { %24902 = vst [vmem:[#allocation16_spill] sm:$0xff] %v19309_v44  ;;  %v19312_v1 = vadd.f32 %v16187_v53, %v19017_v25  ;;  %v19321_v19 = vadd.f32 %v16213_v41, %v19216_v24  ;;  %v24904_v25 = vld [vmem:[#allocation11_spill] sm:$0xff]  ;;  %v4161_v53 = vsel %vm900_vm3, %v4158_v10, %v4160_v21  ;;  %v5255_v44 = vrot.slane %v19318_v46, 2 }
 0x17b   : > { %v1895_v15 = vpop.f32.mrf.mxu0  ;;  %v2151_v35 = vpop.f32.mrf.mxu1  ;;  %v24906_v41 = vld [vmem:[#allocation3_spill] sm:$0xff]  ;;  %v19341_v63 = vsel %vm1994_vm2, %v5251_v52, %v5253_v42  ;;  %v4423_v52 = vld [vmem:[%s17749_s25 + $0x90] sm:$0xe] }
 0x17c   : > { %24903 = vst [vmem:[#allocation17_spill] sm:$0xff] %v19321_v19  ;;  %v19324_v56 = vadd.f32 %v1895_v15, %v19028_v16  ;;  %v19333_v24 = vadd.f32 %v2151_v35, %v19228_v2  ;;  %24907 = vst [vmem:[#allocation3_spill] sm:$0xff] %v19341_v63  ;;  %16419 = vmatmul.mubr.msk.bf16.gmra.mxu1 %vm484_vm1, %v4159_v22  ;;  %v19345_v10 = vsel %vm1994_vm2, %v5253_v42, %v5255_v44 }
 0x17d   : > { %v16190_v50 = vpop.f32.mrf.mxu0  ;;  %16393 = vmatmul.mubr.msk.bf16.gmra.mxu0 %vm484_vm1, %v24904_v25  ;;  %v16216_v15 = vpop.f32.mrf.mxu1  ;;  %24908 = vst [vmem:[#allocation18_spill] sm:$0xff] %v19345_v10  ;;  %16422 = vmatprep.mubr.msk.bf16.mxu1 %vm484_vm1, %v4161_v53  ;;  %v4162_v35 = vrot.slane %v24899_v47, 1  ;;  %v4164_v22 = vrot.slane %v24904_v25, 1  ;;  %v19370_v53 = vld [vmem:[%s17749_s25 + $0x100] sm:$0xff]  }
 0x17e   : > { %24905 = vst [vmem:[#allocation11_spill] sm:$0xff] %v19333_v24  ;;  %v19336_v16 = vadd.f32 %v16190_v50, %v19040_v37  ;;  %16396 = vmatprep.mubr.msk.bf16.mxu0 %vm484_vm1, %v24906_v41  ;;  %v19348_v2 = vadd.f32 %v16216_v15, %v19240_v8  ;;  %v19364_v8 = vld [vmem:[%s17749_s25 + $0xf8] sm:$0xff]  }
 0x17f   : > { %v1908_v19 = vpop.f32.mrf.mxu0  ;;  %v2164_v50 = vpop.f32.mrf.mxu1 }
 0x180   : > { %24909 = vst [vmem:[#allocation19_spill] sm:$0xff] %v19348_v2  ;;  %v19351_v37 = vadd.f32 %v1908_v19, %v19051_v0  ;;  %v19358_v24 = vadd.f32 %v2164_v50, %v19255_v4  ;;  %v24911_v19 = vld [vmem:[#allocation6_spill] sm:$0xff]  ;;  %v4163_v4 = vsel %vm900_vm3, %v4160_v21, %v4162_v35 }
 0x181   : > { %v16191_v63 = vpop.f32.mrf.mxu0  ;;  %v16217_v15 = vpop.f32.mrf.mxu1  ;;  %v19367_v10 = vcombine.low %v4423_v52, %v24911_v19  ;;  %v4165_v52 = vsel %vm900_vm3, %v4162_v35, %v4164_v22  ;;  %v5259_v19 = vrot.slane %v19370_v53, 2 }
 0x182   : > { %24910 = vst [vmem:[#allocation20_spill] sm:$0xff] %v19358_v24  ;;  %v19361_v42 = vadd.f32 %v16191_v63, %v19073_v23  ;;  %v19373_v47 = vadd.f32 %v16217_v15, %v19264_v20  ;;  %v5257_v23 = vrot.slane %v19364_v8, 2  ;;  %v24913_v24 = vld [vmem:[#allocation4_spill] sm:$0xff] }
 0x183   : > { %v1911_v0 = vpop.f32.mrf.mxu0  ;;  %v2167_v63 = vpop.f32.mrf.mxu1  ;;  %v4541_v35 = vrot.slane %v19367_v10, 1 }
 0x184   : > { %24912 = vst [vmem:[#allocation6_spill] sm:$0xff] %v19373_v47  ;;  %v19376_v25 = vadd.f32 %v1911_v0, %v19085_v6  ;;  %v19385_v2 = vadd.f32 %v2167_v63, %v19276_v40  ;;  %v24915_v6 = vld [vmem:[#allocation5_spill] sm:$0xff]  ;;  %v19393_v21 = vsel %vm1994_vm2, %v5255_v44, %v5257_v23  ;;  %16423 = vmatmul.mubr.msk.bf16.gmra.mxu1 %vm484_vm1, %v4163_v4  ;;  %v4542_v47 = vrot.slane %v19058_v36, 1 }
 0x185   : > { %v16194_v50 = vpop.f32.mrf.mxu0  ;;  %16397 = vmatmul.mubr.msk.bf16.gmra.mxu0 %vm484_vm1, %v24913_v24  ;;  %24916 = vst [vmem:[#allocation5_spill] sm:$0xff] %v19393_v21  ;;  %v16220_v15 = vpop.f32.mrf.mxu1  ;;  %v19399_v40 = vsel %vm1994_vm2, %v5257_v23, %v5259_v19  ;;  %16426 = vmatprep.mubr.msk.bf16.mxu1 %vm484_vm1, %v4165_v52  ;;  %v4166_v44 = vrot.slane %v24906_v41, 1  ;;  %v4168_v21 = vrot.slane %v24913_v24, 1 }
 0x186   : > { %24914 = vst [vmem:[#allocation4_spill] sm:$0xff] %v19385_v2  ;;  %v19388_v20 = vadd.f32 %v16194_v50, %v19102_v31  ;;  %16400 = vmatprep.mubr.msk.bf16.mxu0 %vm484_vm1, %v24915_v6  ;;  %24917 = vst [vmem:[#allocation21_spill] sm:$0xff] %v19399_v40  ;;  %v19402_v31 = vadd.f32 %v16220_v15, %v19288_v51  ;;  %v19417_v40 = vld [vmem:[%s17749_s25 + $0x108] sm:$0xff]  }
 0x187   : > { %v1924_v0 = vpop.f32.mrf.mxu0  ;;  %v2180_v50 = vpop.f32.mrf.mxu1  ;;  %24920 = vst [vmem:[#allocation24_spill] sm:$0xff] %v19417_v40  ;;  %v4167_v24 = vsel %vm900_vm3, %v4164_v22, %v4166_v44 }
 0x188   : > { %24918 = vst [vmem:[#allocation22_spill] sm:$0xff] %v19402_v31  ;;  %v19405_v63 = vadd.f32 %v1924_v0, %v19110_v59  ;;  %v19411_v2 = vadd.f32 %v2180_v50, %v19303_v33  ;;  %v4543_v59 = vsel %vm900_vm3, %v4541_v35, %v4542_v47  ;;  %v24767_v33 = vrot.slane %v19417_v40, 2 }
 0x189   : > { %v16195_v4 = vpop.f32.mrf.mxu0  ;;  %v16221_v51 = vpop.f32.mrf.mxu1 }
 0x18a   : > { %24919 = vst [vmem:[#allocation23_spill] sm:$0xff] %v19411_v2  ;;  %v19414_v23 = vadd.f32 %v16195_v4, %v19122_v11  ;;  %v19421_v52 = vadd.f32 %v16221_v51, %v19312_v1  ;;  %v24922_v11 = vld [vmem:[#allocation7_spill] sm:$0xff]  ;;  %v4169_v4 = vsel %vm900_vm3, %v4166_v44, %v4168_v21  ;;  %v19442_v22 = vsel %vm1994_vm2, %v5259_v19, %v24767_v33 }
 0x18b   : > { %v1927_v15 = vpop.f32.mrf.mxu0  ;;  %v2183_v0 = vpop.f32.mrf.mxu1  ;;  %24924 = vst [vmem:[#allocation26_spill] sm:$0xff] %v19442_v22  ;;  %v4546_v44 = vrot.slane %v19116_v5, 1  ;;  %v4836_v33 = vshrl.u32 %v19058_v36, 16 }
 0x18c   : > { %24921 = vst [vmem:[#allocation25_spill] sm:$0xff] %v19421_v52  ;;  %v19424_v41 = vadd.f32 %v1927_v15, %v19134_v7  ;;  %v19432_v2 = vadd.f32 %v2183_v0, %v19324_v56  ;;  %v4544_v7 = vrot.slane %v19065_v3, 1  ;;  %16427 = vmatmul.mubr.msk.bf16.gmra.mxu1 %vm484_vm1, %v4167_v24  ;;  %v4170_v15 = vrot.slane %v24915_v6, 1 }
 0x18d   : > { %v16198_v50 = vpop.f32.mrf.mxu0  ;;  %16401 = vmatmul.mubr.msk.bf16.gmra.mxu0 %vm484_vm1, %v24922_v11  ;;  %v16224_v35 = vpop.f32.mrf.mxu1  ;;  %16430 = vmatprep.mubr.msk.bf16.mxu1 %vm484_vm1, %v4169_v4  ;;  %v4831_v24 = vshll.u32 %v19367_v10, 16 }
 0x18e   : > { %24923 = vst [vmem:[#allocation7_spill] sm:$0xff] %v19432_v2  ;;  %v19435_v1 = vadd.f32 %v16198_v50, %v19149_v43  ;;  %16440 = vmatprep.mubr.msk.bf16.mxu0 %vm484_vm1, %v4543_v59  ;;  %v19447_v56 = vadd.f32 %v16224_v35, %v19336_v16  ;;  %v4172_v59 = vrot.slane %v24922_v11, 1  ;;  %v4828_v50 = vshrl.u32 %v19367_v10, 16  ;;  %v19470_v10 = vld [vmem:[%s24742_s1 + $0x38] sm:$0xff]  }
 0x18f   : > { %v1940_v51 = vpop.f32.mrf.mxu0  ;;  %v2196_v19 = vpop.f32.mrf.mxu1  ;;  %v4839_v16 = vshll.u32 %v19058_v36, 16  ;;  %v4545_v6 = vsel %vm900_vm3, %v4542_v47, %v4544_v7 }
 0x190   : > { %24925 = vst [vmem:[#allocation27_spill] sm:$0xff] %v19447_v56  ;;  %v19450_v43 = vadd.f32 %v1940_v51, %v19158_v58  ;;  %v19460_v35 = vadd.f32 %v2196_v19, %v19351_v37  ;;  %v4547_v51 = vsel %vm900_vm3, %v4544_v7, %v4546_v44  ;;  %v4173_v37 = vsel %vm900_vm3, %v4170_v15, %v4172_v59 }
 0x191   : > { %v16199_v0 = vpop.f32.mrf.mxu0  ;;  %v16225_v4 = vpop.f32.mrf.mxu1  ;;  %v4830_v7 = vrot.slane %v4828_v50, 1  ;;  %v4841_v56 = vrot.slane %v4839_v16, 2  ;;  %v4845_v50 = vshrl.u32 %v19065_v3, 16 }
 0x192   : > { %24926 = vst [vmem:[#allocation28_spill] sm:$0xff] %v19460_v35  ;;  %v19463_v58 = vadd.f32 %v16199_v0, %v19170_v55  ;;  %v19473_v22 = vadd.f32 %v16225_v4, %v19361_v42  ;;  %v4171_v55 = vsel %vm900_vm3, %v4168_v21, %v4170_v15  ;;  %v4833_v0 = vrot.slane %v4831_v24, 2 }
 0x193   : > { %v1943_v11 = vpop.f32.mrf.mxu0  ;;  %v2199_v47 = vpop.f32.mrf.mxu1  ;;  %v4838_v35 = vrot.slane %v4836_v33, 1  ;;  %v4550_v15 = vrot.slane %v19164_v14, 1  ;;  %v4848_v33 = vshll.u32 %v19065_v3, 16 }
 0x194   : > { %24927 = vst [vmem:[#allocation29_spill] sm:$0xff] %v19473_v22  ;;  %v19476_v36 = vadd.f32 %v1943_v11, %v19187_v13  ;;  %v19484_v2 = vadd.f32 %v2199_v47, %v19376_v25  ;;  %v4548_v13 = vrot.slane %v19119_v29, 1  ;;  %16431 = vmatmul.mubr.msk.bf16.gmra.mxu1 %vm484_vm1, %v4171_v55  ;;  %v4834_v4 = vor.u32 %v4833_v0, %v4830_v7 }
 0x195   : > { %v19480_v19 = vpop.f32.mrf.mxu0  ;;  %16441 = vmatmul.mubr.msk.bf16.vlgmr.msra.gmra.mxu0 %vm484_vm1, %v4545_v6  ;;  %v16228_v42 = vpop.f32.mrf.mxu1  ;;  %16434 = vmatprep.mubr.msk.bf16.mxu1 %vm484_vm1, %v4173_v37  ;;  %v4842_v11 = vor.u32 %v4841_v56, %v4838_v35  ;;  %v4857_v55 = vshll.u32 %v19116_v5, 16 }
 0x196   : > { %24928 = vst [vmem:[#allocation30_spill] sm:$0xff] %v19484_v2  ;;  %16507 = vmatpush3.bf16.msra.mxu0 %v19070_v48  ;;  %16444 = vmatprep.mubr.msk.bf16.mxu0 %vm484_vm1, %v4547_v51  ;;  %v19497_v25 = vadd.f32 %v16228_v42, %v19388_v20  ;;  %v24930_v48 = vld [vmem:[#allocation9_spill] sm:$0xff]  ;;  %v4854_v51 = vshrl.u32 %v19116_v5, 16  ;;  %v4549_v47 = vsel %vm900_vm3, %v4546_v44, %v4548_v13 }
 0x197   : > { %v19490_v21 = vpop.f32.mrf.mxu0  ;;  %16574 = vmatprep.subr.bf16.mxu0 %v19470_v10  ;;  %v4174_v24 = vrot.slane %v24930_v48, 1  ;;  %v2212_v16 = vpop.f32.mrf.mxu1  ;;  %v4551_v37 = vsel %vm900_vm3, %v4548_v13, %v4550_v15  ;;  %v4847_v48 = vrot.slane %v4845_v50, 1  ;;  %v4843_v5 = vsel %vm1587_vm4, %v4834_v4, %v4842_v11  ;;  %v19536_v4 = vld [vmem:[%s17749_s25 + $0xa4] sm:$0xf] }
 0x198   : > { %24929 = vst [vmem:[#allocation31_spill] sm:$0xff] %v19497_v25  ;;  %v19506_v3 = vadd.f32 %v2212_v16, %v19405_v63  ;;  %v4850_v25 = vrot.slane %v4848_v33, 2  ;;  %v4856_v63 = vrot.slane %v4854_v51, 1  ;;  %v4859_v44 = vrot.slane %v4857_v55, 2  ;;  %v6315_v51 = vld [vmem:[%s17749_s25 + $0xa0] sm:$0x8] }
 0x199   : > { %v19501_v6 = vpop.f32.mrf.mxu0  ;;  %v16229_v20 = vpop.f32.mrf.mxu1  ;;  %v4175_v56 = vsel %vm900_vm3, %v4172_v59, %v4174_v24  ;;  %v4554_v33 = vrot.slane %v19219_v34, 1  ;;  %v4866_v16 = vshll.u32 %v19119_v29, 16 }
 0x19a   : > { %24931 = vst [vmem:[#allocation9_spill] sm:$0xff] %v19506_v3  ;;  %v19513_v2 = vadd.f32 %v16229_v20, %v19414_v23  ;;  %v4552_v23 = vrot.slane %v19167_v45, 1  ;;  %v4851_v50 = vor.u32 %v4850_v25, %v4847_v48  ;;  %v4860_v20 = vor.u32 %v4859_v44, %v4856_v63  ;;  %v19544_v48 = vld [vmem:[%s17749_s25 + $0xa8] sm:$0xff]  }
 0x19b   : > { %v19509_v42 = vpop.f32.mrf.mxu0  ;;  %v2215_v35 = vpop.f32.mrf.mxu1  ;;  %v4872_v25 = vshrl.u32 %v19164_v14, 16 }
 0x19c   : > { %24932 = vst [vmem:[#allocation32_spill] sm:$0xff] %v19513_v2  ;;  %v19521_v0 = vadd.f32 %v2215_v35, %v19424_v41  ;;  %16435 = vmatmul.mubr.msk.bf16.gmra.mxu1 %vm484_vm1, %v4175_v56  ;;  %v4863_v41 = vshrl.u32 %v19119_v29, 16  ;;  %v4553_v29 = vsel %vm900_vm3, %v4550_v15, %v4552_v23  ;;  %v19552_v35 = vld [vmem:[%s17749_s25 + $0xb0] sm:$0xff]   ;;  %v4852_v63 = vsel %vm1587_vm4, %v4842_v11, %v4851_v50 }
 0x19d   : > { %v19516_v7 = vpop.f32.mrf.mxu0  ;;  %16445 = vmatmul.mubr.msk.bf16.gmra.mxu0 %vm484_vm1, %v4549_v47  ;;  %v16232_v13 = vpop.f32.mrf.mxu1  ;;  %16474 = vmatprep.mubr.msk.bf16.mxu1 %vm484_vm1, %v4843_v5  ;;  %v4555_v44 = vsel %vm900_vm3, %v4552_v23, %v4554_v33  ;;  %v4861_v2 = vsel %vm1587_vm4, %v4851_v50, %v4860_v20  ;;  %v4874_v11 = vrot.slane %v4872_v25, 1  ;;  %v19570_v23 = vld [vmem:[%s24742_s1 + $0x40] sm:$0xff]  }
 0x19e   : > { %24933 = vst [vmem:[#allocation33_spill] sm:$0xff] %v19521_v0  ;;  %16448 = vmatprep.mubr.msk.bf16.mxu0 %vm484_vm1, %v4551_v37  ;;  %v19530_v24 = vadd.f32 %v16232_v13, %v19435_v1  ;;  %v4875_v37 = vshll.u32 %v19164_v14, 16  ;;  %v14822_v1 = vcombine.low %v6315_v51, %v19536_v4  ;;  %v6322_v14 = vrot.slane %v19544_v48, 3  ;;  %24937 = vst [vmem:[#allocation37_spill] sm:$0xff] %v19570_v23 }
 0x19f   : > { %v19526_v59 = vpop.f32.mrf.mxu0  ;;  %v2228_v55 = vpop.f32.mrf.mxu1  ;;  %v4865_v51 = vrot.slane %v4863_v41, 1 }
 0x1a0   : > { %24934 = vst [vmem:[#allocation34_spill] sm:$0xff] %v19530_v24  ;;  %v19548_v56 = vadd.f32 %v2228_v55, %v19450_v43  ;;  %v6321_v24 = vrot.slane %v14822_v1, 3  ;;  %v4868_v43 = vrot.slane %v4866_v16, 2  ;;  %v6324_v55 = vrot.slane %v19552_v35, 3 }
 0x1a1   : > { %v19539_v47 = vpop.f32.mrf.mxu0  ;;  %v16233_v5 = vpop.f32.mrf.mxu1  ;;  %v4877_v3 = vrot.slane %v4875_v37, 2  ;;  %v4556_v16 = vrot.slane %v19222_v17, 1  ;;  %v4881_v37 = vshrl.u32 %v19167_v45, 16 }
 0x1a2   : > { %24935 = vst [vmem:[#allocation35_spill] sm:$0xff] %v19548_v56  ;;  %v19560_v0 = vadd.f32 %v16233_v5, %v19463_v58  ;;  %v19573_v58 = vsel %vm3088_vm5, %v6321_v24, %v6322_v14  ;;  %v19581_v1 = vsel %vm3088_vm5, %v6322_v14, %v6324_v55  ;;  %v4558_v24 = vrot.slane %v19267_v57, 1 }
 0x1a3   : > { %v19554_v13 = vpop.f32.mrf.mxu0  ;;  %v2231_v15 = vpop.f32.mrf.mxu1  ;;  %24938 = vst [vmem:[#allocation38_spill] sm:$0xff] %v19573_v58  ;;  %24940 = vst [vmem:[#allocation40_spill] sm:$0xff] %v19581_v1  ;;  %v4878_v14 = vor.u32 %v4877_v3, %v4874_v11  ;;  %v19601_v1 = vld [vmem:[%s17749_s25 + $0xb8] sm:$0xff]   ;;  %v4883_v58 = vrot.slane %v4881_v37, 1 }
 0x1a4   : > { %24936 = vst [vmem:[#allocation36_spill] sm:$0xff] %v19560_v0  ;;  %v19576_v41 = vadd.f32 %v2231_v15, %v19476_v36  ;;  %16475 = vmatmul.mubr.msk.bf16.vlgmr.msra.gmra.mxu1 %vm484_vm1, %v4852_v63  ;;  %v4869_v36 = vor.u32 %v4868_v43, %v4865_v51  ;;  %v4890_v63 = vshrl.u32 %v19219_v34, 16  ;;  %v4893_v15 = vshll.u32 %v19219_v34, 16 }
 0x1a5   : > { %v19563_v56 = vpop.f32.mrf.mxu0  ;;  %16449 = vmatmul.mubr.msk.bf16.gmra.mxu0 %vm484_vm1, %v4553_v29  ;;  %v19583_v50 = vpop.f32.mrf.mxu1  ;;  %16541 = vmatpush3.bf16.msra.mxu1 %v19183_v39  ;;  %v4884_v29 = vshll.u32 %v19167_v45, 16  ;;  %v4557_v39 = vsel %vm900_vm3, %v4554_v33, %v4556_v16  ;;  %v4559_v43 = vsel %vm900_vm3, %v4556_v16, %v4558_v24  ;;  %v6326_v3 = vrot.slane %v19601_v1, 3 }
 0x1a6   : > { %24939 = vst [vmem:[#allocation39_spill] sm:$0xff] %v19576_v41  ;;  %16452 = vmatprep.mubr.msk.bf16.mxu0 %vm484_vm1, %v4555_v44  ;;  %16478 = vmatprep.mubr.msk.bf16.mxu1 %vm484_vm1, %v4861_v2  ;;  %v19605_v2 = vld [vmem:[%s17749_s25 + $0xc0] sm:$0xff]   ;;  %v4870_v11 = vsel %vm1587_vm4, %v4860_v20, %v4869_v36  ;;  %v4879_v33 = vsel %vm1587_vm4, %v4869_v36, %v4878_v14  ;;  %v4892_v52 = vrot.slane %v4890_v63, 1  ;;  %v4895_v31 = vrot.slane %v4893_v15, 2 }
 0x1a7   : > { %v19586_v25 = vpop.f32.mrf.mxu0  ;;  %v19593_v5 = vpop.f32.mrf.mxu1  ;;  %16608 = vmatprep.subr.bf16.mxu1 %v19570_v23  ;;  %24942 = vst [vmem:[#allocation42_spill] sm:$0xff] %v19605_v2  ;;  %v4886_v34 = vrot.slane %v4884_v29, 2  ;;  %v6328_v41 = vrot.slane %v19605_v2, 3  ;;  %v19622_v16 = vsel %vm3088_vm5, %v6324_v55, %v6326_v3  ;;  %v4560_v20 = vrot.slane %v19270_v49, 1  ;;  %v19649_v23 = vld [vmem:[%s17749_s25 + $0xd0] sm:$0xff]  }
 0x1a8   : > { %24945 = vst [vmem:[#allocation45_spill] sm:$0xff] %v19622_v16  ;;  %v4562_v36 = vrot.slane %v19315_v38, 1  ;;  %v4899_v63 = vshrl.u32 %v19222_v17, 16  ;;  %v4902_v15 = vshll.u32 %v19222_v17, 16  ;;  %v4908_v16 = vshrl.u32 %v19267_v57, 16  ;;  %24950 = vst [vmem:[#allocation50_spill] sm:$0xff] %v19649_v23 }
 0x1a9   : > { %v19595_v44 = vpop.f32.mrf.mxu0  ;;  %v19607_v51 = vpop.f32.mrf.mxu1  ;;  %v19627_v37 = vsel %vm3088_vm5, %v6326_v3, %v6328_v41  ;;  %v4887_v55 = vor.u32 %v4886_v34, %v4883_v58 }
 0x1aa   : > { %24941 = vst [vmem:[#allocation41_spill] sm:$0xff] %v19595_v44  ;;  %24946 = vst [vmem:[#allocation46_spill] sm:$0xff] %v19627_v37  ;;  %v4896_v37 = vor.u32 %v4895_v31, %v4892_v52  ;;  %v4563_v17 = vsel %vm900_vm3, %v4560_v20, %v4562_v36  ;;  %v4901_v52 = vrot.slane %v4899_v63, 1  ;;  %v4910_v44 = vrot.slane %v4908_v16, 1 }
 0x1ab   : > { %v19609_v45 = vpop.f32.mrf.mxu0  ;;  %v19615_v0 = vpop.f32.mrf.mxu1  ;;  %v4888_v31 = vsel %vm1587_vm4, %v4878_v14, %v4887_v55  ;;  %v4564_v14 = vrot.slane %v19318_v46, 1  ;;  %v4566_v16 = vrot.slane %v19364_v8, 1 }
 0x1ac   : > { %24943 = vst [vmem:[#allocation43_spill] sm:$0xff] %v19609_v45  ;;  %16479 = vmatmul.mubr.msk.bf16.gmra.mxu1 %vm484_vm1, %v4870_v11  ;;  %v4911_v11 = vshll.u32 %v19267_v57, 16  ;;  %v6332_v57 = vrot.slane %v19649_v23, 3  ;;  %v19693_v23 = vld [vmem:[%s17749_s25 + $0xe0] sm:$0xff]  }
 0x1ad   : > { %v19617_v22 = vpop.f32.mrf.mxu0  ;;  %16453 = vmatmul.mubr.msk.bf16.gmra.mxu0 %vm484_vm1, %v4557_v39  ;;  %v19629_v29 = vpop.f32.mrf.mxu1  ;;  %16482 = vmatprep.mubr.msk.bf16.mxu1 %vm484_vm1, %v4879_v33  ;;  %24959 = vst [vmem:[#allocation59_spill] sm:$0xff] %v19693_v23 }
 0x1ae   : > { %24944 = vst [vmem:[#allocation44_spill] sm:$0xff] %v19617_v22  ;;  %16456 = vmatprep.mubr.msk.bf16.mxu0 %vm484_vm1, %v4559_v43  ;;  %v19645_v22 = vld [vmem:[%s17749_s25 + $0xc8] sm:$0xff]  }
 0x1af   : > { %v19632_v39 = vpop.f32.mrf.mxu0  ;;  %v19638_v43 = vpop.f32.mrf.mxu1  ;;  %24949 = vst [vmem:[#allocation49_spill] sm:$0xff] %v19645_v22  ;;  %v6330_v33 = vrot.slane %v19645_v22, 3 }
 0x1b0   : > { %24947 = vst [vmem:[#allocation47_spill] sm:$0xff] %v19632_v39  ;;  %v4561_v39 = vsel %vm900_vm3, %v4558_v24, %v4560_v20  ;;  %v4897_v24 = vsel %vm1587_vm4, %v4887_v55, %v4896_v37  ;;  %v4917_v55 = vshrl.u32 %v19270_v49, 16 }
 0x1b1   : > { %v19640_v3 = vpop.f32.mrf.mxu0  ;;  %v19651_v58 = vpop.f32.mrf.mxu1  ;;  %v19666_v20 = vsel %vm3088_vm5, %v6328_v41, %v6330_v33  ;;  %v19671_v63 = vsel %vm3088_vm5, %v6330_v33, %v6332_v57 }
 0x1b2   : > { %24948 = vst [vmem:[#allocation48_spill] sm:$0xff] %v19640_v3  ;;  %v4904_v3 = vrot.slane %v4902_v15, 2  ;;  %24953 = vst [vmem:[#allocation53_spill] sm:$0xff] %v19666_v20  ;;  %v4926_v20 = vshrl.u32 %v19315_v38, 16 }
 0x1b3   : > { %v19653_v34 = vpop.f32.mrf.mxu0  ;;  %v19659_v2 = vpop.f32.mrf.mxu1  ;;  %24954 = vst [vmem:[#allocation54_spill] sm:$0xff] %v19671_v63 }
 0x1b4   : > { %24951 = vst [vmem:[#allocation51_spill] sm:$0xff] %v19653_v34  ;;  %v4913_v34 = vrot.slane %v4911_v11, 2  ;;  %16483 = vmatmul.mubr.msk.bf16.gmra.mxu1 %vm484_vm1, %v4888_v31  ;;  %v4905_v41 = vor.u32 %v4904_v3, %v4901_v52  ;;  %v4920_v11 = vshll.u32 %v19270_v49, 16  ;;  %v4929_v31 = vshll.u32 %v19315_v38, 16 }
 0x1b5   : > { %v19661_v45 = vpop.f32.mrf.mxu0  ;;  %16457 = vmatmul.mubr.msk.bf16.gmra.mxu0 %vm484_vm1, %v4561_v39  ;;  %v19673_v15 = vpop.f32.mrf.mxu1  ;;  %16486 = vmatprep.mubr.msk.bf16.mxu1 %vm484_vm1, %v4897_v24  ;;  %v4567_v49 = vsel %vm900_vm3, %v4564_v14, %v4566_v16  ;;  %v6336_v38 = vrot.slane %v19693_v23, 3  ;;  %v17478_v23 = vld [vmem:[%s17749_s25 + $0x110] ss:$0 sps:$4 sm:$0x11]  }
 0x1b6   : > { %24952 = vst [vmem:[#allocation52_spill] sm:$0xff] %v19661_v45  ;;  %16460 = vmatprep.mubr.msk.bf16.mxu0 %vm484_vm1, %v4563_v17  ;;  %v4914_v63 = vor.u32 %v4913_v34, %v4910_v44  ;;  %v19689_v45 = vld [vmem:[%s17749_s25 + $0xd8] sm:$0xff]   ;;  %v4906_v44 = vsel %vm1587_vm4, %v4896_v37, %v4905_v41  ;;  %v4919_v34 = vrot.slane %v4917_v55, 1  ;;  %v4568_v37 = vrot.slane %v19370_v53, 1 }
 0x1b7   : > { %v19676_v39 = vpop.f32.mrf.mxu0  ;;  %v19682_v17 = vpop.f32.mrf.mxu1  ;;  %24958 = vst [vmem:[#allocation58_spill] sm:$0xff] %v19689_v45  ;;  %v6334_v24 = vrot.slane %v19689_v45, 3 }
 0x1b8   : > { %24955 = vst [vmem:[#allocation55_spill] sm:$0xff] %v19676_v39  ;;  %24956 = vst [vmem:[#allocation56_spill] sm:$0xff] %v19682_v17  ;;  %v4565_v39 = vsel %vm900_vm3, %v4562_v36, %v4564_v14  ;;  %v4915_v36 = vsel %vm1587_vm4, %v4905_v41, %v4914_v63  ;;  %v4935_v41 = vshrl.u32 %v19318_v46, 16 }
 0x1b9   : > { %v19684_v33 = vpop.f32.mrf.mxu0  ;;  %v19695_v3 = vpop.f32.mrf.mxu1  ;;  %v19710_v14 = vsel %vm3088_vm5, %v6332_v57, %v6334_v24  ;;  %v19715_v55 = vsel %vm3088_vm5, %v6334_v24, %v6336_v38 }
 0x1ba   : > { %24957 = vst [vmem:[#allocation57_spill] sm:$0xff] %v19684_v33  ;;  %24960 = vst [vmem:[#allocation60_spill] sm:$0xff] %v19695_v3  ;;  %v4922_v33 = vrot.slane %v4920_v11, 2  ;;  %v4928_v3 = vrot.slane %v4926_v20, 1  ;;  %v4570_v20 = vrot.slane %v19417_v40, 1 }
 0x1bb   : > { %v19697_v52 = vpop.f32.mrf.mxu0  ;;  %v19703_v22 = vpop.f32.mrf.mxu1  ;;  %24963 = vst [vmem:[#allocation63_spill] sm:$0xff] %v19710_v14  ;;  %24964 = vst [vmem:[#allocation64_spill] sm:$0xff] %v19715_v55  ;;  %v4944_v14 = vshrl.u32 %v19364_v8, 16 }
 0x1bc   : > { %24961 = vst [vmem:[#allocation61_spill] sm:$0xff] %v19697_v52  ;;  %v4931_v52 = vrot.slane %v4929_v31, 2  ;;  %16487 = vmatmul.mubr.msk.bf16.gmra.mxu1 %vm484_vm1, %v4906_v44  ;;  %v4923_v57 = vor.u32 %v4922_v33, %v4919_v34  ;;  %v4938_v31 = vshll.u32 %v19318_v46, 16  ;;  %v4947_v44 = vshll.u32 %v19364_v8, 16 }
 0x1bd   : > { %v19705_v17 = vpop.f32.mrf.mxu0  ;;  %16461 = vmatmul.mubr.msk.bf16.gmra.mxu0 %vm484_vm1, %v4565_v39  ;;  %v19717_v11 = vpop.f32.mrf.mxu1  ;;  %16490 = vmatprep.mubr.msk.bf16.mxu1 %vm484_vm1, %v4915_v36  ;;  %v19738_v36 = vld [vmem:[%s17749_s25 + $0xf0] sm:$0xff]   ;;  %v4571_v46 = vsel %vm900_vm3, %v4568_v37, %v4570_v20 }
 0x1be   : > { %24962 = vst [vmem:[#allocation62_spill] sm:$0xff] %v19705_v17  ;;  %16464 = vmatprep.mubr.msk.bf16.mxu0 %vm484_vm1, %v4567_v49  ;;  %24965 = vst [vmem:[#allocation65_spill] sm:$0xff] %v19717_v11  ;;  %v4932_v55 = vor.u32 %v4931_v52, %v4928_v3  ;;  %v19733_v17 = vld [vmem:[%s17749_s25 + $0xe8] sm:$0xff]   ;;  %v4924_v3 = vsel %vm1587_vm4, %v4914_v63, %v4923_v57  ;;  %v4937_v52 = vrot.slane %v4935_v41, 1  ;;  %v4940_v45 = vrot.slane %v4938_v31, 2 }
 0x1bf   : > { %v19720_v39 = vpop.f32.mrf.mxu0  ;;  %v19726_v49 = vpop.f32.mrf.mxu1  ;;  %24969 = vst [vmem:[#allocation69_spill] sm:$0xff] %v19738_v36  ;;  %v6340_v8 = vrot.slane %v19738_v36, 3  ;;  %v4946_v11 = vrot.slane %v4944_v14, 1  ;;  %v4572_v63 = vrot.slane %v17478_v23, 1 }
 0x1c0   : > { %24966 = vst [vmem:[#allocation66_spill] sm:$0xff] %v19720_v39  ;;  %24967 = vst [vmem:[#allocation67_spill] sm:$0xff] %v19726_v49  ;;  %v4569_v39 = vsel %vm900_vm3, %v4566_v16, %v4568_v37  ;;  %v4941_v14 = vor.u32 %v4940_v45, %v4937_v52 }
 0x1c1   : > { %v19728_v24 = vpop.f32.mrf.mxu0  ;;  %v19740_v33 = vpop.f32.mrf.mxu1 }
 0x1c2   : > { %24968 = vst [vmem:[#allocation68_spill] sm:$0xff] %v19728_v24  ;;  %24970 = vst [vmem:[#allocation70_spill] sm:$0xff] %v19740_v33  ;;  %v6338_v24 = vrot.slane %v19733_v17, 3  ;;  %v4933_v33 = vsel %vm1587_vm4, %v4923_v57, %v4932_v55  ;;  %v4956_v57 = vshll.u32 %v19370_v53, 16 }
 0x1c3   : > { %v19742_v34 = vpop.f32.mrf.mxu0  ;;  %v19748_v49 = vpop.f32.mrf.mxu1 }
 0x1c4   : > { %24971 = vst [vmem:[#allocation71_spill] sm:$0xff] %v19742_v34  ;;  %v4949_v34 = vrot.slane %v4947_v44, 2  ;;  %v19755_v37 = vsel %vm3088_vm5, %v6336_v38, %v6338_v24  ;;  %v19759_v41 = vsel %vm3088_vm5, %v6338_v24, %v6340_v8  ;;  %16491 = vmatmul.mubr.msk.bf16.gmra.mxu1 %vm484_vm1, %v4924_v3  ;;  %v4953_v38 = vshrl.u32 %v19370_v53, 16  ;;  %v19776_v3 = vld [vmem:[%s17749_s25 + $0xf8] sm:$0xff]  }
 0x1c5   : > { %v19750_v16 = vpop.f32.mrf.mxu0  ;;  %16465 = vmatmul.mubr.msk.bf16.gmra.mxu0 %vm484_vm1, %v4569_v39  ;;  %24973 = vst [vmem:[#allocation73_spill] sm:$0xff] %v19755_v37  ;;  %24974 = vst [vmem:[#allocation74_spill] sm:$0xff] %v19759_v41  ;;  %v19761_v31 = vpop.f32.mrf.mxu1  ;;  %16494 = vmatprep.mubr.msk.bf16.mxu1 %vm484_vm1, %v4933_v33  ;;  %v4965_v41 = vshll.u32 %v19417_v40, 16  ;;  %v4573_v37 = vsel %vm900_vm3, %v4570_v20, %v4572_v63  ;;  %v19787_v53 = vld [vmem:[%s17749_s25 + $0x110] ss:$0 sps:$4 sm:$0x33]  }
 0x1c6   : > { %24972 = vst [vmem:[#allocation72_spill] sm:$0xff] %v19750_v16  ;;  %16468 = vmatprep.mubr.msk.bf16.mxu0 %vm484_vm1, %v4571_v46  ;;  %v4950_v24 = vor.u32 %v4949_v34, %v4946_v11  ;;  %v4962_v46 = vshrl.u32 %v19417_v40, 16  ;;  %v6342_v52 = vrot.slane %v19776_v3, 3  ;;  %v4942_v11 = vsel %vm1587_vm4, %v4932_v55, %v4941_v14 }
 0x1c7   : > { %v19764_v39 = vpop.f32.mrf.mxu0  ;;  %v19769_v44 = vpop.f32.mrf.mxu1  ;;  %v4955_v34 = vrot.slane %v4953_v38, 1 }
 0x1c8   : > { %24975 = vst [vmem:[#allocation75_spill] sm:$0xff] %v19764_v39  ;;  %v19780_v39 = vld [vmem:[%s17749_s25 + $0x100] sm:$0xff]   ;;  %v4951_v20 = vsel %vm1587_vm4, %v4941_v14, %v4950_v24  ;;  %v4964_v63 = vrot.slane %v4962_v46, 1  ;;  %v4971_v14 = vshrl.u32 %v19787_v53, 16 }
 0x1c9   : > { %v19771_v23 = vpop.f32.mrf.mxu0  ;;  %v19782_v45 = vpop.f32.mrf.mxu1  ;;  %v6344_v16 = vrot.slane %v19780_v39, 3 }
 0x1ca   : > { %24976 = vst [vmem:[#allocation76_spill] sm:$0xff] %v19771_v23  ;;  %24977 = vst [vmem:[#allocation77_spill] sm:$0xff] %v19782_v45  ;;  %v4958_v23 = vrot.slane %v4956_v57, 2  ;;  %v19799_v45 = vsel %vm3088_vm5, %v6340_v8, %v6342_v52 }
 0x1cb   : > { %v19784_v33 = vpop.f32.mrf.mxu0  ;;  %v19792_v40 = vpop.f32.mrf.mxu1  ;;  %24980 = vst [vmem:[#allocation80_spill] sm:$0xff] %v19799_v45  ;;  %v19804_v55 = vsel %vm3088_vm5, %v6342_v52, %v6344_v16  ;;  %v19819_v52 = vld [vmem:[%s17749_s25 + $0x108] sm:$0xff]   ;;  %v19825_v45 = vld [vmem:[%s17749_s25 + $0x110] sm:$0xff]  }
 0x1cc   : > { %24978 = vst [vmem:[#allocation78_spill] sm:$0xff] %v19784_v33  ;;  %v4967_v33 = vrot.slane %v4965_v41, 2  ;;  %24981 = vst [vmem:[#allocation81_spill] sm:$0xff] %v19804_v55  ;;  %16495 = vmatmul.mubr.msk.bf16.gmra.mxu1 %vm484_vm1, %v4942_v11  ;;  %v4974_v41 = vshll.u32 %v19787_v53, 16  ;;  %v4959_v8 = vor.u32 %v4958_v23, %v4955_v34  ;;  %v2644_v11 = vadd.f32 %v19480_v19, %v19202_v60  ;;  %v5512_v55 = vld [vmem:[%s17749_s25 + $0xa0] sm:$0xc] }
 0x1cd   : > { %v19794_v36 = vpop.f32.mrf.mxu0  ;;  %16469 = vmatmul.mubr.msk.bf16.gmra.mxu0 %vm484_vm1, %v4573_v37  ;;  %v19806_v38 = vpop.f32.mrf.mxu1  ;;  %16498 = vmatprep.mubr.msk.bf16.mxu1 %vm484_vm1, %v4951_v20  ;;  %24984 = vst [vmem:[#allocation84_spill] sm:$0xff] %v19819_v52  ;;  %v4973_v20 = vrot.slane %v4971_v14, 1  ;;  %v19834_v34 = vld [vmem:[%s24742_s1 + $0x8] sm:$0xff]   ;;  %v2645_v14 = vadd.f32 %v19501_v6, %v19225_v9 }
 0x1ce   : > { %24979 = vst [vmem:[#allocation79_spill] sm:$0xff] %v19794_v36  ;;  %16508 = vmatprep.mubr.msk.bf16.mxu0 %vm484_vm1, %v19094_v62  ;;  %v4968_v62 = vor.u32 %v4967_v33, %v4964_v63  ;;  %v4976_v23 = vrot.slane %v4974_v41, 2  ;;  %v6346_v33 = vrot.slane %v19819_v52, 3  ;;  %v2642_v63 = vadd.f32 %v19490_v21, %v19213_v27 }
 0x1cf   : > { %v19809_v37 = vpop.f32.mrf.mxu0  ;;  %v19814_v57 = vpop.f32.mrf.mxu1  ;;  %v3051_v60 = vadd.f32 %v19583_v50, %v2644_v11  ;;  %v4960_v19 = vsel %vm1587_vm4, %v4950_v24, %v4959_v8  ;;  %v19856_v21 = vcombine.low %v5512_v55, %v19536_v4 }
 0x1d0   : > { %24982 = vst [vmem:[#allocation82_spill] sm:$0xff] %v19809_v37  ;;  %v4969_v27 = vsel %vm1587_vm4, %v4959_v8, %v4968_v62  ;;  %v19859_v50 = vsel %vm3088_vm5, %v6344_v16, %v6346_v33  ;;  %v3049_v9 = vadd.f32 %v19593_v5, %v2642_v63  ;;  %v4977_v55 = vor.u32 %v4976_v23, %v4973_v20 }
 0x1d1   : > { %v19816_v46 = vpop.f32.mrf.mxu0  ;;  %v19827_v37 = vpop.f32.mrf.mxu1  ;;  %24986 = vst [vmem:[#allocation86_spill] sm:$0xff] %v19859_v50  ;;  %v2643_v5 = vadd.f32 %v19509_v42, %v19237_v61  ;;  %v2648_v8 = vadd.f32 %v19516_v7, %v19252_v12  ;;  %v5630_v61 = vrot.slane %v19856_v21, 2  ;;  %v5631_v42 = vrot.slane %v19544_v48, 2 }
 0x1d2   : > { %24983 = vst [vmem:[#allocation83_spill] sm:$0xff] %v19816_v46  ;;  %v6348_v46 = vrot.slane %v19825_v45, 3 }
 0x1d3   : > { %v19829_v36 = vpop.f32.mrf.mxu0  ;;  %v19844_v41 = vpop.f32.mrf.mxu1  ;;  %v3050_v20 = vadd.f32 %v19615_v0, %v2643_v5 }
 0x1d4   : > { %24985 = vst [vmem:[#allocation85_spill] sm:$0xff] %v19829_v36  ;;  %v19850_v36 = vld [vmem:[%s24743_s2] ss:$0 sm:$0xff]  ;;  %v19866_v24 = vsel %vm3088_vm5, %v6346_v33, %v6348_v46  ;;  %16499 = vmatmul.mubr.msk.bf16.gmra.mxu1 %vm484_vm1, %v4960_v19  ;;  %v2646_v33 = vadd.f32 %v19526_v59, %v19261_v18  ;;  %v4978_v19 = vsel %vm1587_vm4, %v4968_v62, %v4977_v55  ;;  %v24988_v59 = vld [vmem:[#allocation8_spill] sm:$0xff] }
 0x1d5   : > { %v16306_v52 = vpop.f32.mrf.mxu0  ;;  %16509 = vmatmul.mubr.msk.bf16.vlgmr.msra.gmra.mxu0 %vm484_vm1, %v19099_v28  ;;  %24987 = vst [vmem:[#allocation87_spill] sm:$0xff] %v19866_v24  ;;  %v19868_v28 = vpop.f32.mrf.mxu1  ;;  %16502 = vmatprep.mubr.msk.bf16.mxu1 %vm484_vm1, %v4969_v27  ;;  %v3055_v27 = vadd.f32 %v19629_v29, %v2648_v8  ;;  %v5632_v62 = vsel %vm1994_vm2, %v5630_v61, %v5631_v42 }
 0x1d6   : > { %v3339_v6 = vadd.f32 %v16306_v52, %v3051_v60  ;;  %16575 = vmatpush3.bf16.msra.mxu0 %v19470_v10  ;;  %16512 = vmatprep.mubr.msk.bf16.mxu0 %vm484_vm1, %v19142_v32  ;;  %v3052_v10 = vadd.f32 %v19607_v51, %v2645_v14  ;;  %v19889_v51 = vld [vmem:[%s17749_s25 + $0x118] sm:$0xff]   ;;  %v3053_v55 = vadd.f32 %v19638_v43, %v2646_v33 }
 0x1d7   : > { %v3210_v4 = vpop.f32.mrf.mxu0  ;;  %16642 = vmatprep.subr.bf16.mxu0 %v19834_v34  ;;  %v19884_v52 = vpop.f32.mrf.mxu1  ;;  %v24783_v14 = vrot.slane %v19889_v51, 3 }
 0x1d8   : > { %v3377_v16 = vadd.f32 %v19850_v36, %v3339_v6  ;;  %v3337_v32 = vadd.f32 %v3210_v4, %v3049_v9  ;;  %v2649_v4 = vadd.f32 %v19539_v47, %v19273_v54 }
 0x1d9   : > { %v16307_v11 = vpop.f32.mrf.mxu0  ;;  %v19895_v63 = vpop.f32.mrf.mxu1  ;;  %v19912_v29 = vsel %vm3088_vm5, %v6348_v46, %v24783_v14 }
 0x1da   : > { %v3409_v23 = vmax.f32 %v3377_v16, 0.0  ;;  %v3375_v12 = vadd.f32 %v19850_v36, %v3337_v32  ;;  %v3340_v7 = vadd.f32 %v16307_v11, %v3052_v10  ;;  %24989 = vst [vmem:[#allocation8_spill] sm:$0xff] %v19912_v29  ;;  %v24990_v16 = vld [vmem:[#allocation12_spill] sm:$0xff]  ;;  %v2647_v32 = vadd.f32 %v19554_v13, %v19285_v30  ;;  %v25026_v29 = vld [vmem:[#allocation59_spill] sm:$0xff] }
 0x1db   : > { %v3213_v60 = vpop.f32.mrf.mxu0  ;;  %v19904_v5 = vpop.f32.mrf.mxu1  ;;  %v5633_v11 = vrot.slane %v19552_v35, 2  ;;  %v3056_v43 = vadd.f32 %v19651_v58, %v2649_v4  ;;  %v2652_v30 = vadd.f32 %v19563_v56, %v19300_v26 }
 0x1dc   : > { %3441 = vst [vmem:[%s19882_s17 + $0x10] sm:$0xff] %v3409_v23  ;;  %v3407_v9 = vmax.f32 %v3375_v12, 0.0  ;;  %v3378_v0 = vadd.f32 %v19850_v36, %v3340_v7  ;;  %v3338_v6 = vadd.f32 %v3213_v60, %v3050_v20  ;;  %16503 = vmatmul.mubr.msk.bf16.gmra.mxu1 %vm484_vm1, %v4978_v19  ;;  %v5635_v7 = vrot.slane %v19601_v1, 2 }
 0x1dd   : > { %v16310_v18 = vpop.f32.mrf.mxu0  ;;  %16513 = vmatmul.mubr.msk.bf16.gmra.mxu0 %vm484_vm1, %v24988_v59  ;;  %v19921_v8 = vpop.f32.mrf.mxu1  ;;  %16542 = vmatprep.mubr.msk.bf16.mxu1 %vm484_vm1, %v5632_v62  ;;  %v3054_v33 = vadd.f32 %v19659_v2, %v2647_v32  ;;  %v5634_v26 = vsel %vm1994_vm2, %v5631_v42, %v5633_v11  ;;  %v3059_v56 = vadd.f32 %v19673_v15, %v2652_v30  ;;  %v24992_v59 = vld [vmem:[#allocation17_spill] sm:$0xff]  ;;  %v19955_v15 = vld [vmem:[%s24742_s1] sm:$0xff]   ;;  %v24996_v42 = vld [vmem:[#allocation56_spill] sm:$0xff] }
 0x1de   : > { %3439 = vst [vmem:[%s19882_s17] sm:$0xff] %v3407_v9  ;;  %v3410_v10 = vmax.f32 %v3378_v0, 0.0  ;;  %v3376_v54 = vadd.f32 %v19850_v36, %v3338_v6  ;;  %v3343_v47 = vadd.f32 %v16310_v18, %v3055_v27  ;;  %16516 = vmatprep.mubr.msk.bf16.mxu0 %vm484_vm1, %v24990_v16  ;;  %v24991_v27 = vld [vmem:[#allocation16_spill] sm:$0xff]  ;;  %v24993_v62 = vld [vmem:[#allocation41_spill] sm:$0xff]  ;;  %24995 = vst [vmem:[#allocation12_spill] sm:$0xff] %v19955_v15 }
 0x1df   : > { %v3226_v46 = vpop.f32.mrf.mxu0  ;;  %v19931_v13 = vpop.f32.mrf.mxu1  ;;  %v2650_v9 = vadd.f32 %v19586_v25, %v24991_v27  ;;  %v24994_v25 = vld [vmem:[#allocation13_spill] sm:$0xff] }
 0x1e0   : > { %3442 = vst [vmem:[%s19882_s17 + $0x18] sm:$0xff] %v3410_v10  ;;  %v3408_v61 = vmax.f32 %v3376_v54, 0.0  ;;  %v3381_v20 = vadd.f32 %v19850_v36, %v3343_v47  ;;  %v3341_v23 = vadd.f32 %v3226_v46, %v3053_v55  ;;  %v2653_v55 = vadd.f32 %v24993_v62, %v24992_v59  ;;  %v25005_v62 = vld [vmem:[#allocation49_spill] sm:$0xff] }
 0x1e1   : > { %v16311_v12 = vpop.f32.mrf.mxu0  ;;  %v19939_v0 = vpop.f32.mrf.mxu1  ;;  %v5636_v47 = vsel %vm1994_vm2, %v5633_v11, %v5635_v7  ;;  %v3057_v16 = vadd.f32 %v24996_v42, %v2650_v9 }
 0x1e2   : > { %3440 = vst [vmem:[%s19882_s17 + $0x8] sm:$0xff] %v3408_v61  ;;  %v3413_v58 = vmax.f32 %v3381_v20, 0.0  ;;  %v3379_v60 = vadd.f32 %v19850_v36, %v3341_v23  ;;  %v3344_v19 = vadd.f32 %v16311_v12, %v3056_v43  ;;  %v24997_v61 = vld [vmem:[#allocation14_spill] sm:$0xff]  ;;  %v24998_v20 = vld [vmem:[#allocation11_spill] sm:$0xff] }
 0x1e3   : > { %v3229_v6 = vpop.f32.mrf.mxu0  ;;  %v19947_v10 = vpop.f32.mrf.mxu1  ;;  %v24999_v23 = vld [vmem:[#allocation43_spill] sm:$0xff] }
 0x1e4   : > { %3445 = vst [vmem:[%s19882_s17 + $0x30] sm:$0xff] %v3413_v58  ;;  %v3411_v4 = vmax.f32 %v3379_v60, 0.0  ;;  %v3382_v2 = vadd.f32 %v19850_v36, %v3344_v19  ;;  %v3342_v18 = vadd.f32 %v3229_v6, %v3054_v33  ;;  %v2651_v30 = vadd.f32 %v24999_v23, %v24998_v20  ;;  %16543 = vmatmul.mubr.msk.bf16.vlgmr.msra.gmra.mxu1 %vm484_vm1, %v5634_v26  ;;  %v25000_v33 = vld [vmem:[#allocation42_spill] sm:$0xff]  ;;  %v25001_v60 = vld [vmem:[#allocation60_spill] sm:$0xff]  ;;  %v25002_v6 = vld [vmem:[#allocation37_spill] sm:$0xff] }
 0x1e5   : > { %v16314_v54 = vpop.f32.mrf.mxu0  ;;  %16517 = vmatmul.mubr.msk.bf16.gmra.mxu0 %vm484_vm1, %v24994_v25  ;;  %v19964_v12 = vpop.f32.mrf.mxu1  ;;  %v5637_v58 = vrot.slane %v25000_v33, 2  ;;  %v3060_v19 = vadd.f32 %v25001_v60, %v2653_v55  ;;  %16609 = vmatpush3.bf16.msra.mxu1 %v25002_v6  ;;  %v25008_v23 = vld [vmem:[#allocation65_spill] sm:$0xff] }
 0x1e6   : > { %3443 = vst [vmem:[%s19882_s17 + $0x20] sm:$0xff] %v3411_v4  ;;  %v3414_v32 = vmax.f32 %v3382_v2, 0.0  ;;  %v3380_v46 = vadd.f32 %v19850_v36, %v3342_v18  ;;  %v3347_v43 = vadd.f32 %v16314_v54, %v3059_v56  ;;  %16520 = vmatprep.mubr.msk.bf16.mxu0 %vm484_vm1, %v24997_v61  ;;  %16546 = vmatprep.mubr.msk.bf16.mxu1 %vm484_vm1, %v5636_v47  ;;  %v25003_v4 = vld [vmem:[#allocation19_spill] sm:$0xff]  ;;  %v25004_v2 = vld [vmem:[#allocation44_spill] sm:$0xff]  ;;  %v5639_v54 = vrot.slane %v25005_v62, 2 }
 0x1e7   : > { %v3242_v11 = vpop.f32.mrf.mxu0  ;;  %v2656_v18 = vadd.f32 %v25004_v2, %v25003_v4  ;;  %v19975_v26 = vpop.f32.mrf.mxu1  ;;  %16676 = vmatprep.subr.bf16.mxu1 %v19955_v15  ;;  %v3058_v55 = vadd.f32 %v19703_v22, %v2651_v30  ;;  %v25007_v47 = vld [vmem:[#allocation47_spill] sm:$0xff]  ;;  %v5638_v20 = vsel %vm1994_vm2, %v5635_v7, %v5637_v58 }
 0x1e8   : > { %3446 = vst [vmem:[%s19882_s17 + $0x38] sm:$0xff] %v3414_v32  ;;  %v3412_v27 = vmax.f32 %v3380_v46, 0.0  ;;  %v3385_v9 = vadd.f32 %v19850_v36, %v3347_v43  ;;  %v3345_v56 = vadd.f32 %v3242_v11, %v3057_v16  ;;  %v25006_v32 = vld [vmem:[#allocation20_spill] sm:$0xff]  ;;  %v25011_v4 = vld [vmem:[#allocation15_spill] sm:$0xff]  ;;  %v5640_v2 = vsel %vm1994_vm2, %v5637_v58, %v5639_v54  ;;  %v25016_v58 = vld [vmem:[#allocation50_spill] sm:$0xff] }
 0x1e9   : > { %v16315_v59 = vpop.f32.mrf.mxu0  ;;  %v2654_v46 = vadd.f32 %v25007_v47, %v25006_v32  ;;  %v19984_v43 = vpop.f32.mrf.mxu1  ;;  %v3063_v11 = vadd.f32 %v25008_v23, %v2656_v18  ;;  %v25012_v7 = vld [vmem:[#allocation67_spill] sm:$0xff] }
 0x1ea   : > { %3444 = vst [vmem:[%s19882_s17 + $0x28] sm:$0xff] %v3412_v27  ;;  %v3417_v25 = vmax.f32 %v3385_v9, 0.0  ;;  %v3383_v42 = vadd.f32 %v19850_v36, %v3345_v56  ;;  %v3348_v16 = vadd.f32 %v16315_v59, %v3060_v19  ;;  %v25009_v27 = vld [vmem:[#allocation6_spill] sm:$0xff]  ;;  %v25010_v9 = vld [vmem:[#allocation48_spill] sm:$0xff]  ;;  %v25015_v32 = vld [vmem:[#allocation51_spill] sm:$0xff] }
 0x1eb   : > { %v3245_v61 = vpop.f32.mrf.mxu0  ;;  %v2657_v6 = vadd.f32 %v25010_v9, %v25009_v27  ;;  %v19992_v19 = vpop.f32.mrf.mxu1  ;;  %v3061_v59 = vadd.f32 %v25012_v7, %v2654_v46  ;;  %v5641_v27 = vrot.slane %v25016_v58, 2  ;;  %v25017_v46 = vld [vmem:[#allocation70_spill] sm:$0xff] }
 0x1ec   : > { %3449 = vst [vmem:[%s19882_s17 + $0x50] sm:$0xff] %v3417_v25  ;;  %v3415_v60 = vmax.f32 %v3383_v42, 0.0  ;;  %v3386_v22 = vadd.f32 %v19850_v36, %v3348_v16  ;;  %v3346_v30 = vadd.f32 %v3245_v61, %v3058_v55  ;;  %v25013_v55 = vld [vmem:[#allocation10_spill] sm:$0xff]  ;;  %v25014_v16 = vld [vmem:[#allocation4_spill] sm:$0xff]  ;;  %16547 = vmatmul.mubr.msk.bf16.gmra.mxu1 %vm484_vm1, %v5638_v20 }
 0x1ed   : > { %v16318_v56 = vpop.f32.mrf.mxu0  ;;  %16521 = vmatmul.mubr.msk.bf16.gmra.mxu0 %vm484_vm1, %v25011_v4  ;;  %v2655_v47 = vadd.f32 %v25015_v32, %v25014_v16  ;;  %v20004_v61 = vpop.f32.mrf.mxu1  ;;  %16550 = vmatprep.mubr.msk.bf16.mxu1 %vm484_vm1, %v5640_v2  ;;  %v25018_v9 = vld [vmem:[#allocation22_spill] sm:$0xff] }
 0x1ee   : > { %3447 = vst [vmem:[%s19882_s17 + $0x40] sm:$0xff] %v3415_v60  ;;  %v3418_v18 = vmax.f32 %v3386_v22, 0.0  ;;  %v3384_v25 = vadd.f32 %v19850_v36, %v3346_v30  ;;  %v3351_v42 = vadd.f32 %v16318_v56, %v3063_v11  ;;  %16524 = vmatprep.mubr.msk.bf16.mxu0 %vm484_vm1, %v25013_v55  ;;  %v3064_v60 = vadd.f32 %v25017_v46, %v2657_v6  ;;  %v25019_v56 = vld [vmem:[#allocation52_spill] sm:$0xff]  ;;  %v25020_v20 = vld [vmem:[#allocation58_spill] sm:$0xff] }
 0x1ef   : > { %v3258_v23 = vpop.f32.mrf.mxu0  ;;  %v2660_v4 = vadd.f32 %v25019_v56, %v25018_v9  ;;  %v20014_v7 = vpop.f32.mrf.mxu1  ;;  %v5643_v16 = vrot.slane %v25020_v20, 2  ;;  %v3062_v32 = vadd.f32 %v19748_v49, %v2655_v47  ;;  %v5642_v9 = vsel %vm1994_vm2, %v5639_v54, %v5641_v27 }
 0x1f0   : > { %3450 = vst [vmem:[%s19882_s17 + $0x58] sm:$0xff] %v3418_v18  ;;  %v3416_v22 = vmax.f32 %v3384_v25, 0.0  ;;  %v3389_v11 = vadd.f32 %v19850_v36, %v3351_v42  ;;  %v3349_v30 = vadd.f32 %v3258_v23, %v3061_v59  ;;  %v25021_v42 = vld [vmem:[#allocation23_spill] sm:$0xff]  ;;  %v5645_v54 = vrot.slane %v25026_v29, 2 }
 0x1f1   : > { %v16319_v55 = vpop.f32.mrf.mxu0  ;;  %v25022_v59 = vld [vmem:[#allocation55_spill] sm:$0xff]  ;;  %v20022_v46 = vpop.f32.mrf.mxu1  ;;  %v3067_v56 = vadd.f32 %v19761_v31, %v2660_v4  ;;  %v5647_v31 = vrot.slane %v19733_v17, 2 }
 0x1f2   : > { %3448 = vst [vmem:[%s19882_s17 + $0x48] sm:$0xff] %v3416_v22  ;;  %v3421_v6 = vmax.f32 %v3389_v11, 0.0  ;;  %v3387_v18 = vadd.f32 %v19850_v36, %v3349_v30  ;;  %v3352_v25 = vadd.f32 %v16319_v55, %v3064_v60  ;;  %v2658_v23 = vadd.f32 %v25022_v59, %v25021_v42  ;;  %v25023_v22 = vld [vmem:[#allocation25_spill] sm:$0xff]  ;;  %v25025_v42 = vld [vmem:[#allocation2_spill] sm:$0xff] }
 0x1f3   : > { %v3261_v2 = vpop.f32.mrf.mxu0  ;;  %v25024_v11 = vld [vmem:[#allocation57_spill] sm:$0xff]  ;;  %v20030_v60 = vpop.f32.mrf.mxu1  ;;  %v5644_v59 = vsel %vm1994_vm2, %v5641_v27, %v5643_v16  ;;  %v5646_v50 = vsel %vm1994_vm2, %v5643_v16, %v5645_v54  ;;  %v5648_v15 = vsel %vm1994_vm2, %v5645_v54, %v5647_v31 }
 0x1f4   : > { %3453 = vst [vmem:[%s19882_s17 + $0x70] sm:$0xff] %v3421_v6  ;;  %v3419_v14 = vmax.f32 %v3387_v18, 0.0  ;;  %v3390_v49 = vadd.f32 %v19850_v36, %v3352_v25  ;;  %v3350_v47 = vadd.f32 %v3261_v2, %v3062_v32  ;;  %v2661_v30 = vadd.f32 %v25024_v11, %v25023_v22  ;;  %v25027_v25 = vld [vmem:[#allocation3_spill] sm:$0xff]  ;;  %v25029_v22 = vld [vmem:[#allocation61_spill] sm:$0xff]  ;;  %16551 = vmatmul.mubr.msk.bf16.gmra.mxu1 %vm484_vm1, %v5642_v9 }
 0x1f5   : > { %v16322_v55 = vpop.f32.mrf.mxu0  ;;  %16525 = vmatmul.mubr.msk.bf16.gmra.mxu0 %vm484_vm1, %v25025_v42  ;;  %v3065_v4 = vadd.f32 %v19769_v44, %v2658_v23  ;;  %v25028_v2 = vld [vmem:[#allocation7_spill] sm:$0xff]  ;;  %v20044_v42 = vpop.f32.mrf.mxu1  ;;  %v25030_v27 = vld [vmem:[#allocation69_spill] sm:$0xff]  ;;  %v5651_v44 = vrot.slane %v19776_v3, 2  ;;  %16554 = vmatprep.mubr.msk.bf16.mxu1 %vm484_vm1, %v5644_v59 }
 0x1f6   : > { %3451 = vst [vmem:[%s19882_s17 + $0x60] sm:$0xff] %v3419_v14  ;;  %v3422_v32 = vmax.f32 %v3390_v49, 0.0  ;;  %v3388_v6 = vadd.f32 %v19850_v36, %v3350_v47  ;;  %v3355_v18 = vadd.f32 %v16322_v55, %v3067_v56  ;;  %16528 = vmatprep.mubr.msk.bf16.mxu0 %vm484_vm1, %v25027_v25  ;;  %v2659_v11 = vadd.f32 %v25029_v22, %v25028_v2  ;;  %v25031_v14 = vld [vmem:[#allocation77_spill] sm:$0xff]  ;;  %v25032_v55 = vld [vmem:[#allocation27_spill] sm:$0xff]  ;;  %v25033_v25 = vld [vmem:[#allocation62_spill] sm:$0xff] }
 0x1f7   : > { %v3274_v29 = vpop.f32.mrf.mxu0  ;;  %v5649_v24 = vrot.slane %v25030_v27, 2  ;;  %v3068_v23 = vadd.f32 %v25031_v14, %v2661_v30  ;;  %v2664_v2 = vadd.f32 %v25033_v25, %v25032_v55  ;;  %v20055_v22 = vpop.f32.mrf.mxu1  ;;  %v24785_v30 = vrot.slane %v19780_v39, 2 }
 0x1f8   : > { %3454 = vst [vmem:[%s19882_s17 + $0x78] sm:$0xff] %v3422_v32  ;;  %v3420_v56 = vmax.f32 %v3388_v6, 0.0  ;;  %v3393_v49 = vadd.f32 %v19850_v36, %v3355_v18  ;;  %v3353_v47 = vadd.f32 %v3274_v29, %v3065_v4  ;;  %25034 = vst [vmem:[#allocation16_spill] sm:$0xff] %v20055_v22  ;;  %v3066_v32 = vadd.f32 %v19792_v40, %v2659_v11  ;;  %v25035_v18 = vld [vmem:[#allocation28_spill] sm:$0xff]  ;;  %v25036_v29 = vld [vmem:[#allocation66_spill] sm:$0xff] }
 0x1f9   : > { %v16323_v9 = vpop.f32.mrf.mxu0  ;;  %v2662_v14 = vadd.f32 %v25036_v29, %v25035_v18  ;;  %v20065_v55 = vpop.f32.mrf.mxu1  ;;  %v20068_v22 = vsel %vm1994_vm2, %v5647_v31, %v5649_v24  ;;  %v20071_v16 = vsel %vm1994_vm2, %v5649_v24, %v5651_v44  ;;  %v5263_v40 = vrot.slane %v19787_v53, 2  ;;  %v25039_v29 = vld [vmem:[#allocation18_spill] sm:$0xff] }
 0x1fa   : > { %3452 = vst [vmem:[%s19882_s17 + $0x68] sm:$0xff] %v3420_v56  ;;  %v3425_v6 = vmax.f32 %v3393_v49, 0.0  ;;  %v3391_v4 = vadd.f32 %v19850_v36, %v3353_v47  ;;  %v3356_v59 = vadd.f32 %v16323_v9, %v3068_v23  ;;  %v3071_v54 = vadd.f32 %v19806_v38, %v2664_v2  ;;  %v25037_v49 = vld [vmem:[#allocation29_spill] sm:$0xff]  ;;  %v25038_v47 = vld [vmem:[#allocation68_spill] sm:$0xff] }
 0x1fb   : > { %v3277_v25 = vpop.f32.mrf.mxu0  ;;  %v2665_v9 = vadd.f32 %v25038_v47, %v25037_v49  ;;  %v20079_v18 = vpop.f32.mrf.mxu1  ;;  %v20086_v53 = vsel %vm1994_vm2, %v5651_v44, %v24785_v30  ;;  %v5917_v38 = vshrl.u32 %v19856_v21, 16  ;;  %v5920_v24 = vshll.u32 %v19856_v21, 16  ;;  %v25042_v49 = vld [vmem:[#allocation71_spill] sm:$0xff]  ;;  %v25043_v30 = vld [vmem:[#allocation24_spill] sm:$0xff] }
 0x1fc   : > { %3457 = vst [vmem:[%s19882_s17 + $0x90] sm:$0xff] %v3425_v6  ;;  %v3423_v11 = vmax.f32 %v3391_v4, 0.0  ;;  %v3394_v23 = vadd.f32 %v19850_v36, %v3356_v59  ;;  %v3354_v56 = vadd.f32 %v3277_v25, %v3066_v32  ;;  %v3069_v2 = vadd.f32 %v19814_v57, %v2662_v14  ;;  %v25040_v59 = vld [vmem:[#allocation5_spill] sm:$0xff]  ;;  %v25041_v25 = vld [vmem:[#allocation30_spill] sm:$0xff]  ;;  %16555 = vmatmul.mubr.msk.bf16.gmra.mxu1 %vm484_vm1, %v5646_v50  ;;  %v25045_v50 = vld [vmem:[#allocation31_spill] sm:$0xff] }
 0x1fd   : > { %v16326_v31 = vpop.f32.mrf.mxu0  ;;  %16529 = vmatmul.mubr.msk.bf16.gmra.mxu0 %vm484_vm1, %v25039_v29  ;;  %v2663_v47 = vadd.f32 %v25042_v49, %v25041_v25  ;;  %v20097_v44 = vpop.f32.mrf.mxu1  ;;  %v25044_v21 = vrot.slane %v25043_v30, 2  ;;  %v5925_v14 = vshrl.u32 %v19544_v48, 16  ;;  %16558 = vmatprep.mubr.msk.bf16.mxu1 %vm484_vm1, %v5648_v15  ;;  %v5919_v49 = vrot.slane %v5917_v38, 2  ;;  %v25049_v15 = vld [vmem:[#allocation75_spill] sm:$0xff] }
 0x1fe   : > { %3455 = vst [vmem:[%s19882_s17 + $0x80] sm:$0xff] %v3423_v11  ;;  %v3426_v32 = vmax.f32 %v3394_v23, 0.0  ;;  %v3392_v6 = vadd.f32 %v19850_v36, %v3354_v56  ;;  %v3359_v4 = vadd.f32 %v16326_v31, %v3071_v54  ;;  %16532 = vmatprep.mubr.msk.bf16.mxu0 %vm484_vm1, %v25040_v59  ;;  %v5928_v54 = vshll.u32 %v19544_v48, 16  ;;  %v25046_v59 = vld [vmem:[#allocation72_spill] sm:$0xff] }
 0x1ff   : > { %v3290_v29 = vpop.f32.mrf.mxu0  ;;  %v20103_v57 = vsel %vm1994_vm2, %v25044_v21, %v5263_v40  ;;  %v3072_v11 = vadd.f32 %v19827_v37, %v2665_v9  ;;  %v2668_v30 = vadd.f32 %v25046_v59, %v25045_v50  ;;  %v20113_v25 = vpop.f32.mrf.mxu1  ;;  %v5922_v21 = vrot.slane %v5920_v24, 3 }
 0x200   : > { %3458 = vst [vmem:[%s19882_s17 + $0x98] sm:$0xff] %v3426_v32  ;;  %v3424_v23 = vmax.f32 %v3392_v6, 0.0  ;;  %v3397_v56 = vadd.f32 %v19850_v36, %v3359_v4  ;;  %v3357_v31 = vadd.f32 %v3290_v29, %v3069_v2  ;;  %25047 = vst [vmem:[#allocation17_spill] sm:$0xff] %v20113_v25  ;;  %v5934_v48 = vshrl.u32 %v19552_v35, 16  ;;  %v25048_v6 = vld [vmem:[#allocation9_spill] sm:$0xff] }
 0x201   : > { %v16327_v40 = vpop.f32.mrf.mxu0  ;;  %v3070_v37 = vadd.f32 %v19844_v41, %v2663_v47  ;;  %v2666_v4 = vadd.f32 %v25049_v15, %v25048_v6  ;;  %v20121_v29 = vpop.f32.mrf.mxu1  ;;  %v5927_v59 = vrot.slane %v5925_v14, 2  ;;  %v5930_v25 = vrot.slane %v5928_v54, 3  ;;  %v25053_v15 = vld [vmem:[#allocation21_spill] sm:$0xff]  ;;  %v25054_v14 = vld [vmem:[#allocation84_spill] sm:$0xff] }
 0x202   : > { %3456 = vst [vmem:[%s19882_s17 + $0x88] sm:$0xff] %v3424_v23  ;;  %v3429_v9 = vmax.f32 %v3397_v56, 0.0  ;;  %v3395_v32 = vadd.f32 %v19850_v36, %v3357_v31  ;;  %v3360_v2 = vadd.f32 %v16327_v40, %v3072_v11  ;;  %25050 = vst [vmem:[#allocation41_spill] sm:$0xff] %v20121_v29  ;;  %v5937_v38 = vshll.u32 %v19552_v35, 16  ;;  %v25051_v56 = vld [vmem:[#allocation32_spill] sm:$0xff] }
 0x203   : > { %v3293_v50 = vpop.f32.mrf.mxu0  ;;  %v3075_v24 = vadd.f32 %v19868_v28, %v2668_v30  ;;  %v25052_v11 = vld [vmem:[#allocation76_spill] sm:$0xff]  ;;  %v20129_v40 = vpop.f32.mrf.mxu1  ;;  %v5655_v54 = vrot.slane %v25054_v14, 2  ;;  %v5923_v29 = vor.u32 %v5922_v21, %v5919_v49  ;;  %v5936_v35 = vrot.slane %v5934_v48, 2 }
 0x204   : > { %3461 = vst [vmem:[%s19882_s17 + $0xb0] sm:$0xff] %v3429_v9  ;;  %v3427_v41 = vmax.f32 %v3395_v32, 0.0  ;;  %v3398_v47 = vadd.f32 %v19850_v36, %v3360_v2  ;;  %v3358_v23 = vadd.f32 %v3293_v50, %v3070_v37  ;;  %v2669_v31 = vadd.f32 %v25052_v11, %v25051_v56  ;;  %v25055_v32 = vld [vmem:[#allocation26_spill] sm:$0xff]  ;;  %v25056_v2 = vld [vmem:[#allocation33_spill] sm:$0xff]  ;;  %16559 = vmatmul.mubr.msk.bf16.gmra.mxu1 %vm484_vm1, %v20068_v22 }
 0x205   : > { %v16330_v6 = vpop.f32.mrf.mxu0  ;;  %16533 = vmatmul.mubr.msk.bf16.gmra.mxu0 %vm484_vm1, %v25053_v15  ;;  %v3073_v28 = vadd.f32 %v19884_v52, %v2666_v4  ;;  %v25057_v50 = vld [vmem:[#allocation78_spill] sm:$0xff]  ;;  %v20141_v11 = vpop.f32.mrf.mxu1  ;;  %v5931_v21 = vor.u32 %v5930_v25, %v5927_v59  ;;  %v5943_v52 = vshrl.u32 %v19601_v1, 16  ;;  %v5946_v48 = vshll.u32 %v19601_v1, 16  ;;  %16562 = vmatprep.mubr.msk.bf16.mxu1 %vm484_vm1, %v20071_v16 }
 0x206   : > { %3459 = vst [vmem:[%s19882_s17 + $0xa0] sm:$0xff] %v3427_v41  ;;  %v3430_v30 = vmax.f32 %v3398_v47, 0.0  ;;  %v3396_v37 = vadd.f32 %v19850_v36, %v3358_v23  ;;  %v3363_v9 = vadd.f32 %v16330_v6, %v3075_v24  ;;  %16536 = vmatprep.mubr.msk.bf16.mxu0 %vm484_vm1, %v25055_v32  ;;  %v2667_v56 = vadd.f32 %v25057_v50, %v25056_v2  ;;  %v25058_v23 = vld [vmem:[#allocation34_spill] sm:$0xff]  ;;  %v25059_v6 = vld [vmem:[#allocation79_spill] sm:$0xff] }
 0x207   : > { %v3306_v49 = vpop.f32.mrf.mxu0  ;;  %v3076_v4 = vadd.f32 %v19895_v63, %v2669_v31  ;;  %v2672_v22 = vadd.f32 %v25059_v6, %v25058_v23  ;;  %v20154_v15 = vpop.f32.mrf.mxu1  ;;  %v25060_v1 = vrot.slane %v19780_v39, 2  ;;  %v5657_v59 = vrot.slane %v19825_v45, 2  ;;  %v25062_v32 = vld [vmem:[#allocation82_spill] sm:$0xff] }
 0x208   : > { %3462 = vst [vmem:[%s19882_s17 + $0xb8] sm:$0xff] %v3430_v30  ;;  %v3428_v24 = vmax.f32 %v3396_v37, 0.0  ;;  %v3401_v41 = vadd.f32 %v19850_v36, %v3363_v9  ;;  %v3361_v47 = vadd.f32 %v3306_v49, %v3073_v28  ;;  %v5939_v31 = vrot.slane %v5937_v38, 3  ;;  %v25061_v9 = vld [vmem:[#allocation35_spill] sm:$0xff] }
 0x209   : > { %v16331_v25 = vpop.f32.mrf.mxu0  ;;  %v5656_v63 = vsel %vm1994_vm2, %v25060_v1, %v5655_v54  ;;  %v3074_v28 = vadd.f32 %v19904_v5, %v2667_v56  ;;  %v2670_v2 = vadd.f32 %v25062_v32, %v25061_v9  ;;  %v20167_v50 = vpop.f32.mrf.mxu1  ;;  %v5932_v23 = vsel %vm2681_vm6, %v5923_v29, %v5931_v21 }
 0x20a   : > { %3460 = vst [vmem:[%s19882_s17 + $0xa8] sm:$0xff] %v3428_v24  ;;  %v3433_v16 = vmax.f32 %v3401_v41, 0.0  ;;  %v3399_v30 = vadd.f32 %v19850_v36, %v3361_v47  ;;  %v3364_v37 = vadd.f32 %v16331_v25, %v3076_v4  ;;  %v5945_v6 = vrot.slane %v5943_v52, 2  ;;  %v25063_v41 = vld [vmem:[#allocation36_spill] sm:$0xff]  ;;  %v25064_v4 = vld [vmem:[#allocation83_spill] sm:$0xff] }
 0x20b   : > { %v3309_v49 = vpop.f32.mrf.mxu0  ;;  %v5948_v1 = vrot.slane %v5946_v48, 3  ;;  %v3079_v38 = vadd.f32 %v19921_v8, %v2672_v22  ;;  %v2673_v47 = vadd.f32 %v25064_v4, %v25063_v41  ;;  %v20175_v25 = vpop.f32.mrf.mxu1  ;;  %v5940_v29 = vor.u32 %v5939_v31, %v5936_v35 }
 0x20c   : > { %3465 = vst [vmem:[%s19882_s17 + $0xd0] sm:$0xff] %v3433_v16  ;;  %v3431_v5 = vmax.f32 %v3399_v30, 0.0  ;;  %v3402_v56 = vadd.f32 %v19850_v36, %v3364_v37  ;;  %v3362_v24 = vadd.f32 %v3309_v49, %v3074_v28  ;;  %v5952_v52 = vshrl.u32 %v25000_v33, 16  ;;  %v25065_v30 = vld [vmem:[#allocation39_spill] sm:$0xff]  ;;  %v25066_v37 = vld [vmem:[#allocation85_spill] sm:$0xff]  ;;  %16563 = vmatmul.mubr.msk.bf16.gmra.mxu1 %vm484_vm1, %v20086_v53 }
 0x20d   : > { %v16334_v9 = vpop.f32.mrf.mxu0  ;;  %16537 = vmatmul.mubr.msk.bf16.gmra.mxu0 %vm484_vm1, %v20103_v57  ;;  %v5955_v8 = vshll.u32 %v25000_v33, 16  ;;  %v3077_v48 = vadd.f32 %v19931_v13, %v2670_v2  ;;  %v2671_v32 = vadd.f32 %v25066_v37, %v25065_v30  ;;  %v20187_v49 = vpop.f32.mrf.mxu1  ;;  %v20191_v35 = vor.u32 %v5948_v1, %v5945_v6  ;;  %16566 = vmatprep.mubr.msk.bf16.mxu1 %vm484_vm1, %v5656_v63 }
 0x20e   : > { %3463 = vst [vmem:[%s19882_s17 + $0xc0] sm:$0xff] %v3431_v5  ;;  %v3434_v22 = vmax.f32 %v3402_v56, 0.0  ;;  %v3400_v28 = vadd.f32 %v19850_v36, %v3362_v24  ;;  %v3367_v16 = vadd.f32 %v16334_v9, %v3079_v38  ;;  %16576 = vmatprep.mubr.msk.bf16.mxu0 %vm484_vm1, %v5932_v23  ;;  %v5961_v13 = vshrl.u32 %v25005_v62, 16 }
 0x20f   : > { %v3322_v57 = vpop.f32.mrf.mxu0  ;;  %v5964_v33 = vshll.u32 %v25005_v62, 16  ;;  %v3080_v31 = vadd.f32 %v19939_v0, %v2673_v47  ;;  %v20199_v5 = vpop.f32.mrf.mxu1  ;;  %v5941_v6 = vsel %vm2681_vm6, %v5931_v21, %v5940_v29  ;;  %v5659_v1 = vrot.slane %v19889_v51, 2 }
 0x210   : > { %3466 = vst [vmem:[%s19882_s17 + $0xd8] sm:$0xff] %v3434_v22  ;;  %v3432_v2 = vmax.f32 %v3400_v28, 0.0  ;;  %v3405_v23 = vadd.f32 %v19850_v36, %v3367_v16  ;;  %v3365_v38 = vadd.f32 %v3322_v57, %v3077_v48  ;;  %v5954_v56 = vrot.slane %v5952_v52, 2  ;;  %v20213_v52 = vld [vmem:[%s24742_s1 + $0x10] sm:$0xff]  }
 0x211   : > { %v16335_v53 = vpop.f32.mrf.mxu0  ;;  %v5957_v24 = vrot.slane %v5955_v8, 3  ;;  %v3078_v62 = vadd.f32 %v19947_v10, %v2671_v32  ;;  %v20206_v47 = vpop.f32.mrf.mxu1  ;;  %v5950_v9 = vsel %vm2681_vm6, %v5940_v29, %v20191_v35  ;;  %v5963_v21 = vrot.slane %v5961_v13, 2  ;;  %v17500_v28 = vld [vmem:[%s17749_s25 + $0x120] ss:$0 sps:$4 sm:$0x33]  }
 0x212   : > { %3464 = vst [vmem:[%s19882_s17 + $0xc8] sm:$0xff] %v3432_v2  ;;  %v3437_v0 = vmax.f32 %v3405_v23, 0.0  ;;  %v3403_v41 = vadd.f32 %v19850_v36, %v3365_v38  ;;  %v3368_v4 = vadd.f32 %v16335_v53, %v3080_v31  ;;  %v5966_v48 = vrot.slane %v5964_v33, 3  ;;  %v17661_v31 = vld [vmem:[%s17749_s25 + $0xd0] sm:$0xff]  }
 0x213   : > { %v3325_v63 = vpop.f32.mrf.mxu0  ;;  %v5658_v29 = vsel %vm1994_vm2, %v5655_v54, %v5657_v59  ;;  %v20223_v16 = vpop.f32.mrf.mxu1  ;;  %v5660_v37 = vsel %vm1994_vm2, %v5657_v59, %v5659_v1  ;;  %v5958_v32 = vor.u32 %v5957_v24, %v5954_v56  ;;  %v5970_v57 = vshrl.u32 %v25016_v58, 16 }
 0x214   : > { %3469 = vst [vmem:[%s19882_s17 + $0xf0] sm:$0xff] %v3437_v0  ;;  %v3435_v10 = vmax.f32 %v3403_v41, 0.0  ;;  %v3406_v8 = vadd.f32 %v19850_v36, %v3368_v4  ;;  %v3366_v22 = vadd.f32 %v3325_v63, %v3078_v62  ;;  %v5973_v2 = vshll.u32 %v17661_v31, 16  ;;  %16567 = vmatmul.mubr.msk.bf16.gmra.mxu1 %vm484_vm1, %v5658_v29 }
 0x215   : > { %v16374_v30 = vpop.f32.mrf.mxu0  ;;  %16577 = vmatmul.mubr.msk.bf16.vlgmr.msra.gmra.mxu0 %vm484_vm1, %v5941_v6  ;;  %v20238_v23 = vpop.f32.mrf.mxu1  ;;  %v5967_v59 = vor.u32 %v5966_v48, %v5963_v21  ;;  %v5979_v38 = vshrl.u32 %v25020_v20, 16  ;;  %16570 = vmatprep.mubr.msk.bf16.mxu1 %vm484_vm1, %v5660_v37  ;;  %v5661_v53 = vrot.slane %v17500_v28, 2  ;;  %v5972_v62 = vrot.slane %v5970_v57, 2 }
 0x216   : > { %3467 = vst [vmem:[%s19882_s17 + $0xe0] sm:$0xff] %v3435_v10  ;;  %v3438_v13 = vmax.f32 %v3406_v8, 0.0  ;;  %v3404_v33 = vadd.f32 %v19850_v36, %v3366_v22  ;;  %v20233_v54 = vadd.f32 %v16374_v30, %v19964_v12  ;;  %16643 = vmatpush3.bf16.msra.mxu0 %v19834_v34  ;;  %16580 = vmatprep.mubr.msk.bf16.mxu0 %vm484_vm1, %v5950_v9  ;;  %v5982_v36 = vshll.u32 %v25020_v20, 16  ;;  %v17662_v22 = vld [vmem:[%s17749_s25 + $0xe0] sm:$0xff]  }
 0x217   : > { %v4010_v58 = vpop.f32.mrf.mxu0  ;;  %16710 = vmatprep.subr.bf16.mxu0 %v20213_v52  ;;  %v20249_v6 = vpop.f32.mrf.mxu1  ;;  %v5959_v20 = vsel %vm2681_vm6, %v20191_v35, %v5958_v32  ;;  %v5975_v0 = vrot.slane %v5973_v2, 3  ;;  %v5968_v4 = vsel %vm2681_vm6, %v5958_v32, %v5967_v59  ;;  %v5981_v63 = vrot.slane %v5979_v38, 2 }
 0x218   : > { %3470 = vst [vmem:[%s19882_s17 + $0xf8] sm:$0xff] %v3438_v13  ;;  %v3436_v12 = vmax.f32 %v3404_v33, 0.0  ;;  %v20246_v34 = vadd.f32 %v4010_v58, %v19975_v26  ;;  %v5984_v9 = vrot.slane %v5982_v36, 3  ;;  %v5662_v48 = vsel %vm1994_vm2, %v5659_v1, %v5661_v53 }
 0x219   : > { %v16375_v56 = vpop.f32.mrf.mxu0  ;;  %v20257_v41 = vpop.f32.mrf.mxu1  ;;  %v5976_v8 = vor.u32 %v5975_v0, %v5972_v62  ;;  %v5988_v29 = vshrl.u32 %v17662_v22, 16  ;;  %v5991_v28 = vshll.u32 %v17662_v22, 16  ;;  %v5997_v37 = vshrl.u32 %v19733_v17, 16  ;;  %v20302_v0 = vld [vmem:[%s24742_s1 + $0x18] sm:$0xff]   ;;  %v25069_v22 = vld [vmem:[#allocation12_spill] sm:$0xff] }
 0x21a   : > { %3468 = vst [vmem:[%s19882_s17 + $0xe8] sm:$0xff] %v3436_v12  ;;  %v20253_v24 = vadd.f32 %v16375_v56, %v19984_v43  ;;  %v5985_v1 = vor.u32 %v5984_v9, %v5981_v63  ;;  %v6000_v32 = vshll.u32 %v19733_v17, 16  ;;  %v25068_v63 = vld [vmem:[#allocation40_spill] sm:$0xff] }
 0x21b   : > { %v4013_v26 = vpop.f32.mrf.mxu0  ;;  %v20264_v43 = vpop.f32.mrf.mxu1  ;;  %v5977_v2 = vsel %vm2681_vm6, %v5967_v59, %v5976_v8  ;;  %v5990_v58 = vrot.slane %v5988_v29, 2  ;;  %v5993_v38 = vrot.slane %v5991_v28, 3  ;;  %v6009_v59 = vshll.u32 %v25030_v27, 16  ;;  %v25071_v28 = vld [vmem:[#allocation45_spill] sm:$0xff] }
 0x21c   : > { %v20261_v21 = vadd.f32 %v4013_v26, %v19992_v19  ;;  %16571 = vmatmul.mubr.msk.bf16.gmra.mxu1 %vm484_vm1, %v5662_v48  ;;  %v5986_v17 = vsel %vm2681_vm6, %v5976_v8, %v5985_v1  ;;  %v6002_v53 = vrot.slane %v6000_v32, 3 }
 0x21d   : > { %v16378_v10 = vpop.f32.mrf.mxu0  ;;  %16581 = vmatmul.mubr.msk.bf16.gmra.mxu0 %vm484_vm1, %v5959_v20  ;;  %v20272_v30 = vpop.f32.mrf.mxu1 }
 0x21e   : > { %v20268_v35 = vadd.f32 %v16378_v10, %v20004_v61  ;;  %16584 = vmatprep.mubr.msk.bf16.mxu0 %vm484_vm1, %v5968_v4  ;;  %v25067_v61 = vld [vmem:[#allocation38_spill] sm:$0xff]  ;;  %v6015_v10 = vshrl.u32 %v19776_v3, 16 }
 0x21f   : > { %v4026_v19 = vpop.f32.mrf.mxu0  ;;  %16610 = vmatprep.mubr.msk.bf16.mxu1 %vm484_vm1, %v25067_v61  ;;  %v20282_v13 = vpop.f32.mrf.mxu1  ;;  %v6011_v61 = vrot.slane %v6009_v59, 3  ;;  %v6024_v59 = vshrl.u32 %v19780_v39, 16 }
 0x220   : > { %v20278_v57 = vadd.f32 %v4026_v19, %v20014_v7  ;;  %v5999_v7 = vrot.slane %v5997_v37, 2 }
 0x221   : > { %v16379_v33 = vpop.f32.mrf.mxu0  ;;  %v20288_v36 = vpop.f32.mrf.mxu1 }
 0x222   : > { %v20285_v31 = vadd.f32 %v16379_v33, %v20022_v46  ;;  %v6006_v46 = vshrl.u32 %v25030_v27, 16  ;;  %v6003_v48 = vor.u32 %v6002_v53, %v5999_v7  ;;  %v6018_v27 = vshll.u32 %v19776_v3, 16 }
 0x223   : > { %v4029_v12 = vpop.f32.mrf.mxu0  ;;  %v20294_v20 = vpop.f32.mrf.mxu1 }
 0x224   : > { %v20292_v56 = vadd.f32 %v4029_v12, %v20030_v60  ;;  %v5994_v60 = vor.u32 %v5993_v38, %v5990_v58  ;;  %16611 = vmatmul.mubr.msk.bf16.vlgmr.msra.gmra.mxu1 %vm484_vm1, %v25068_v63  ;;  %v6008_v32 = vrot.slane %v6006_v46, 2  ;;  %v6017_v12 = vrot.slane %v6015_v10, 2 }
 0x225   : > { %v16382_v62 = vpop.f32.mrf.mxu0  ;;  %16585 = vmatmul.mubr.msk.bf16.gmra.mxu0 %vm484_vm1, %v5977_v2  ;;  %v16408_v4 = vpop.f32.mrf.mxu1  ;;  %16677 = vmatpush3.bf16.msra.mxu1 %v25069_v22  ;;  %v6033_v10 = vshrl.u32 %v25054_v14, 16 }
 0x226   : > { %v20305_v26 = vadd.f32 %v16382_v62, %v20044_v42  ;;  %16588 = vmatprep.mubr.msk.bf16.mxu0 %vm484_vm1, %v5986_v17  ;;  %v20313_v8 = vadd.f32 %v16408_v4, %v20233_v54  ;;  %v25070_v42 = vld [vmem:[#allocation16_spill] sm:$0xff]  ;;  %16614 = vmatprep.mubr.msk.bf16.mxu1 %vm484_vm1, %v25071_v28  ;;  %v5995_v54 = vsel %vm2681_vm6, %v5985_v1, %v5994_v60  ;;  %v6020_v17 = vrot.slane %v6018_v27, 3 }
 0x227   : > { %v4042_v9 = vpop.f32.mrf.mxu0  ;;  %v4264_v19 = vpop.f32.mrf.mxu1  ;;  %16744 = vmatprep.subr.bf16.mxu1 %v20302_v0  ;;  %v6004_v38 = vsel %vm2681_vm6, %v5994_v60, %v6003_v48 }
 0x228   : > { %v20317_v29 = vadd.f32 %v4042_v9, %v25070_v42  ;;  %v20323_v33 = vadd.f32 %v4264_v19, %v20246_v34  ;;  %v6021_v9 = vor.u32 %v6020_v17, %v6017_v12  ;;  %v25074_v42 = vld [vmem:[#allocation53_spill] sm:$0xff] }
 0x229   : > { %v16383_v37 = vpop.f32.mrf.mxu0  ;;  %v16409_v2 = vpop.f32.mrf.mxu1 }
 0x22a   : > { %v20326_v3 = vadd.f32 %v16383_v37, %v20065_v55  ;;  %v20331_v7 = vadd.f32 %v16409_v2, %v20253_v24  ;;  %v6012_v55 = vor.u32 %v6011_v61, %v6008_v32  ;;  %v17663_v24 = vld [vmem:[%s17749_s25 + $0x100] sm:$0xff]   ;;  %v25075_v32 = vld [vmem:[#allocation41_spill] sm:$0xff] }
 0x22b   : > { %v4045_v58 = vpop.f32.mrf.mxu0  ;;  %v4267_v34 = vpop.f32.mrf.mxu1  ;;  %v6027_v60 = vshll.u32 %v17663_v24, 16 }
 0x22c   : > { %v20334_v53 = vadd.f32 %v4045_v58, %v20079_v18  ;;  %v20338_v1 = vadd.f32 %v4267_v34, %v20261_v21  ;;  %v25072_v18 = vld [vmem:[#allocation46_spill] sm:$0xff]  ;;  %v6036_v21 = vshll.u32 %v25054_v14, 16  ;;  %v6013_v19 = vsel %vm2681_vm6, %v6003_v48, %v6012_v55 }
 0x22d   : > { %v16386_v62 = vpop.f32.mrf.mxu0  ;;  %16589 = vmatmul.mubr.msk.bf16.gmra.mxu0 %vm484_vm1, %v5995_v54  ;;  %v16412_v4 = vpop.f32.mrf.mxu1  ;;  %16615 = vmatmul.mubr.msk.bf16.gmra.mxu1 %vm484_vm1, %v25072_v18  ;;  %v6026_v14 = vrot.slane %v6024_v59, 2  ;;  %v6029_v54 = vrot.slane %v6027_v60, 3  ;;  %v6022_v58 = vsel %vm2681_vm6, %v6012_v55, %v6021_v9  ;;  %v6045_v59 = vshll.u32 %v19825_v45, 16  ;;  %v25076_v60 = vld [vmem:[#allocation54_spill] sm:$0xff] }
 0x22e   : > { %v20341_v46 = vadd.f32 %v16386_v62, %v20097_v44  ;;  %16592 = vmatprep.mubr.msk.bf16.mxu0 %vm484_vm1, %v6004_v38  ;;  %v20351_v27 = vadd.f32 %v16412_v4, %v20268_v35  ;;  %v25073_v44 = vld [vmem:[#allocation17_spill] sm:$0xff]  ;;  %16618 = vmatprep.mubr.msk.bf16.mxu1 %vm484_vm1, %v25074_v42  ;;  %v6035_v38 = vrot.slane %v6033_v10, 2  ;;  %v6038_v12 = vrot.slane %v6036_v21, 3  ;;  %v25077_v10 = vld [vmem:[#allocation63_spill] sm:$0xff]  ;;  %v6697_v21 = vld [vmem:[%s17749_s25 + $0x100] sm:$0xf] }
 0x22f   : > { %v4058_v63 = vpop.f32.mrf.mxu0  ;;  %v4280_v39 = vpop.f32.mrf.mxu1  ;;  %v6042_v62 = vshrl.u32 %v19825_v45, 16  ;;  %v6054_v45 = vshll.u32 %v19889_v51, 16 }
 0x230   : > { %v20354_v22 = vadd.f32 %v4058_v63, %v25073_v44  ;;  %v20360_v37 = vadd.f32 %v4280_v39, %v20278_v57  ;;  %v6039_v18 = vor.u32 %v6038_v12, %v6035_v38  ;;  %v6051_v63 = vshrl.u32 %v19889_v51, 16  ;;  %v20396_v44 = vld [vmem:[%s17749_s25 + $0x104] sm:$0xf] }
 0x231   : > { %v16387_v28 = vpop.f32.mrf.mxu0  ;;  %v16413_v35 = vpop.f32.mrf.mxu1  ;;  %v6056_v38 = vrot.slane %v6054_v45, 3  ;;  %v20410_v12 = vcombine.low %v6697_v21, %v20396_v44 }
 0x232   : > { %v20363_v61 = vadd.f32 %v16387_v28, %v25075_v32  ;;  %v20367_v17 = vadd.f32 %v16413_v35, %v20285_v31  ;;  %v6044_v28 = vrot.slane %v6042_v62, 2 }
 0x233   : > { %v4061_v2 = vpop.f32.mrf.mxu0  ;;  %v4283_v48 = vpop.f32.mrf.mxu1 }
 0x234   : > { %v20370_v34 = vadd.f32 %v4061_v2, %v20129_v40  ;;  %v20376_v55 = vadd.f32 %v4283_v48, %v20292_v56  ;;  %v6030_v40 = vor.u32 %v6029_v54, %v6026_v14 }
 0x235   : > { %v16390_v57 = vpop.f32.mrf.mxu0  ;;  %16593 = vmatmul.mubr.msk.bf16.gmra.mxu0 %vm484_vm1, %v6013_v19  ;;  %v16416_v31 = vpop.f32.mrf.mxu1  ;;  %16619 = vmatmul.mubr.msk.bf16.gmra.mxu1 %vm484_vm1, %v25076_v60  ;;  %v6047_v19 = vrot.slane %v6045_v59, 3 }
 0x236   : > { %v20379_v24 = vadd.f32 %v16390_v57, %v20141_v11  ;;  %16596 = vmatprep.mubr.msk.bf16.mxu0 %vm484_vm1, %v6022_v58  ;;  %v20387_v56 = vadd.f32 %v16416_v31, %v20305_v26  ;;  %16622 = vmatprep.mubr.msk.bf16.mxu1 %vm484_vm1, %v25077_v10  ;;  %v6031_v26 = vsel %vm2681_vm6, %v6021_v9, %v6030_v40  ;;  %v6053_v58 = vrot.slane %v6051_v63, 2  ;;  %v20431_v63 = vld [vmem:[%s17749_s25 + $0x108] sm:$0xff]   ;;  %v25079_v10 = vld [vmem:[#allocation73_spill] sm:$0xff] }
 0x237   : > { %v4074_v4 = vpop.f32.mrf.mxu0  ;;  %v4296_v42 = vpop.f32.mrf.mxu1  ;;  %v6040_v2 = vsel %vm2681_vm6, %v6030_v40, %v6039_v18  ;;  %v6048_v57 = vor.u32 %v6047_v19, %v6044_v28 }
 0x238   : > { %v20390_v11 = vadd.f32 %v4074_v4, %v20154_v15  ;;  %v20399_v32 = vadd.f32 %v4296_v42, %v20317_v29  ;;  %v20406_v15 = vld [vmem:[%s17749_s25 + $0x120] ss:$0 sps:$4 sm:$0x77]   ;;  %v6057_v4 = vor.u32 %v6056_v38, %v6053_v58  ;;  %v6825_v38 = vshll.u32 %v20431_v63, 16 }
 0x239   : > { %v16391_v39 = vpop.f32.mrf.mxu0  ;;  %v16417_v54 = vpop.f32.mrf.mxu1  ;;  %v6060_v40 = vshrl.u32 %v20406_v15, 16 }
 0x23a   : > { %v20402_v14 = vadd.f32 %v16391_v39, %v20167_v50  ;;  %v20413_v29 = vadd.f32 %v16417_v54, %v20326_v3  ;;  %v6063_v3 = vshll.u32 %v20406_v15, 16  ;;  %v6049_v39 = vsel %vm2681_vm6, %v6039_v18, %v6048_v57 }
 0x23b   : > { %v4077_v35 = vpop.f32.mrf.mxu0  ;;  %v4299_v48 = vpop.f32.mrf.mxu1 }
 0x23c   : > { %v20416_v50 = vadd.f32 %v4077_v35, %v20175_v25  ;;  %v20420_v62 = vadd.f32 %v4299_v48, %v20334_v53  ;;  %v25078_v25 = vld [vmem:[#allocation64_spill] sm:$0xff]  ;;  %v6820_v53 = vshll.u32 %v20410_v12, 16 }
 0x23d   : > { %v16394_v9 = vpop.f32.mrf.mxu0  ;;  %16597 = vmatmul.mubr.msk.bf16.gmra.mxu0 %vm484_vm1, %v6031_v26  ;;  %v16420_v31 = vpop.f32.mrf.mxu1  ;;  %16623 = vmatmul.mubr.msk.bf16.gmra.mxu1 %vm484_vm1, %v25078_v25  ;;  %v6062_v26 = vrot.slane %v6060_v40, 2 }
 0x23e   : > { %v20423_v59 = vadd.f32 %v16394_v9, %v20187_v49  ;;  %16600 = vmatprep.mubr.msk.bf16.mxu0 %vm484_vm1, %v6040_v2  ;;  %v20435_v45 = vadd.f32 %v16420_v31, %v20341_v46  ;;  %16626 = vmatprep.mubr.msk.bf16.mxu1 %vm484_vm1, %v25079_v10  ;;  %v6065_v46 = vrot.slane %v6063_v3, 3  ;;  %v6818_v2 = vshrl.u32 %v20410_v12, 16  ;;  %v20460_v9 = vld [vmem:[%s17749_s25 + $0x110] sm:$0xff]   ;;  %v25080_v31 = vld [vmem:[#allocation74_spill] sm:$0xff] }
 0x23f   : > { %v4090_v60 = vpop.f32.mrf.mxu0  ;;  %v4312_v21 = vpop.f32.mrf.mxu1  ;;  %v6822_v58 = vrot.slane %v6820_v53, 1  ;;  %v20472_v53 = vld [vmem:[%s17749_s25 + $0x118] sm:$0xff]  }
 0x240   : > { %v20438_v49 = vadd.f32 %v4090_v60, %v20199_v5  ;;  %v20444_v28 = vadd.f32 %v4312_v21, %v20354_v22  ;;  %v6058_v5 = vsel %vm2681_vm6, %v6048_v57, %v6057_v4  ;;  %v6066_v3 = vor.u32 %v6065_v46, %v6062_v26 }
 0x241   : > { %v16395_v42 = vpop.f32.mrf.mxu0  ;;  %v16421_v54 = vpop.f32.mrf.mxu1  ;;  %v6823_v25 = vor.u32 %v6822_v58, %v6818_v2  ;;  %v6827_v60 = vrot.slane %v6825_v38, 1  ;;  %v6837_v2 = vshrl.u32 %v20460_v9, 16  ;;  %v6841_v58 = vshll.u32 %v20472_v53, 16 }
 0x242   : > { %v20447_v19 = vadd.f32 %v16395_v42, %v20206_v47  ;;  %v20453_v18 = vadd.f32 %v16421_v54, %v20363_v61  ;;  %v6829_v54 = vshrl.u32 %v20431_v63, 16 }
 0x243   : > { %v4093_v35 = vpop.f32.mrf.mxu0  ;;  %v4315_v47 = vpop.f32.mrf.mxu1 }
 0x244   : > { %v20456_v22 = vadd.f32 %v4093_v35, %v20223_v16  ;;  %v20463_v57 = vadd.f32 %v4315_v47, %v20370_v34 }
 0x245   : > { %v16398_v48 = vpop.f32.mrf.mxu0  ;;  %16601 = vmatmul.mubr.msk.bf16.gmra.mxu0 %vm484_vm1, %v6049_v39  ;;  %v16424_v61 = vpop.f32.mrf.mxu1  ;;  %16627 = vmatmul.mubr.msk.bf16.gmra.mxu1 %vm484_vm1, %v25080_v31  ;;  %v6833_v39 = vshll.u32 %v20460_v9, 16  ;;  %v6831_v31 = vor.u32 %v6829_v54, %v6827_v60 }
 0x246   : > { %v20466_v40 = vadd.f32 %v16398_v48, %v20238_v23  ;;  %16604 = vmatprep.mubr.msk.bf16.mxu0 %vm484_vm1, %v6058_v5  ;;  %v20475_v10 = vadd.f32 %v16424_v61, %v20379_v24  ;;  %v25081_v23 = vld [vmem:[#allocation80_spill] sm:$0xff]  ;;  %v6067_v24 = vsel %vm2681_vm6, %v6057_v4, %v6066_v3  ;;  %v6828_v5 = vsel %vm345_vm0, %v6823_v25, %v6827_v60  ;;  %v20502_v48 = vld [vmem:[%s17749_s25 + $0x120] sm:$0xff]  }
 0x247   : > { %v4106_v16 = vpop.f32.mrf.mxu0  ;;  %16630 = vmatprep.mubr.msk.bf16.mxu1 %vm484_vm1, %v25081_v23  ;;  %v4328_v21 = vpop.f32.mrf.mxu1  ;;  %v6835_v4 = vrot.slane %v6833_v39, 1  ;;  %v6843_v23 = vrot.slane %v6841_v58, 1  ;;  %v6849_v54 = vshll.u32 %v20502_v48, 16  ;;  %v6853_v58 = vshrl.u32 %v20502_v48, 16 }
 0x248   : > { %v20478_v34 = vadd.f32 %v4106_v16, %v20249_v6  ;;  %v20484_v26 = vadd.f32 %v4328_v21, %v20390_v11  ;;  %v25082_v16 = vld [vmem:[#allocation81_spill] sm:$0xff]  ;;  %v20514_v21 = vld [vmem:[%s17749_s25 + $0x128] sm:$0xff]  }
 0x249   : > { %v16399_v42 = vpop.f32.mrf.mxu0  ;;  %v16425_v6 = vpop.f32.mrf.mxu1  ;;  %v6839_v25 = vor.u32 %v6837_v2, %v6835_v4 }
 0x24a   : > { %v20487_v46 = vadd.f32 %v16399_v42, %v20257_v41  ;;  %v20495_v38 = vadd.f32 %v16425_v6, %v20402_v14 }
 0x24b   : > { %v4109_v35 = vpop.f32.mrf.mxu0  ;;  %v4331_v41 = vpop.f32.mrf.mxu1  ;;  %v6844_v2 = vsel %vm345_vm0, %v6839_v25, %v6843_v23 }
 0x24c   : > { %v20498_v11 = vadd.f32 %v4109_v35, %v20264_v43  ;;  %v20505_v3 = vadd.f32 %v4331_v41, %v20416_v50  ;;  %v6857_v41 = vshll.u32 %v20514_v21, 16 }
 0x24d   : > { %v16402_v47 = vpop.f32.mrf.mxu0  ;;  %16605 = vmatmul.mubr.msk.bf16.gmra.mxu0 %vm484_vm1, %v6067_v24  ;;  %v16428_v14 = vpop.f32.mrf.mxu1  ;;  %16631 = vmatmul.mubr.msk.bf16.gmra.mxu1 %vm484_vm1, %v25082_v16  ;;  %v6845_v24 = vshrl.u32 %v20472_v53, 16 }
 0x24e   : > { %v20508_v61 = vadd.f32 %v16402_v47, %v20272_v30  ;;  %16644 = vmatprep.mubr.msk.bf16.mxu0 %vm484_vm1, %v6828_v5  ;;  %v20517_v42 = vadd.f32 %v16428_v14, %v20423_v59  ;;  %v25083_v30 = vld [vmem:[#allocation86_spill] sm:$0xff]  ;;  %v6836_v59 = vsel %vm345_vm0, %v6831_v31, %v6835_v4  ;;  %v20548_v4 = vld [vmem:[%s17749_s25 + $0x130] sm:$0xff]  }
 0x24f   : > { %v4122_v43 = vpop.f32.mrf.mxu0  ;;  %16634 = vmatprep.mubr.msk.bf16.mxu1 %vm484_vm1, %v25083_v30  ;;  %v4344_v60 = vpop.f32.mrf.mxu1  ;;  %v20539_v47 = vld [vmem:[%s24742_s1 + $0x20] sm:$0xff]   ;;  %v6847_v16 = vor.u32 %v6845_v24, %v6843_v23  ;;  %v6859_v23 = vrot.slane %v6857_v41, 1  ;;  %v6352_v24 = vrot.slane %v20406_v15, 3  ;;  %v6869_v41 = vshrl.u32 %v20548_v4, 16 }
 0x250   : > { %v20520_v50 = vadd.f32 %v4122_v43, %v20282_v13  ;;  %v20527_v6 = vadd.f32 %v4344_v60, %v20438_v49  ;;  %25084 = vst [vmem:[#allocation13_spill] sm:$0xff] %v20539_v47  ;;  %v6851_v43 = vrot.slane %v6849_v54, 1  ;;  %v25085_v60 = vld [vmem:[#allocation87_spill] sm:$0xff]  ;;  %v6865_v54 = vshll.u32 %v20548_v4, 16 }
 0x251   : > { %v16403_v39 = vpop.f32.mrf.mxu0  ;;  %v16429_v13 = vpop.f32.mrf.mxu1 }
 0x252   : > { %v20530_v35 = vadd.f32 %v16403_v39, %v20288_v36  ;;  %v20542_v49 = vadd.f32 %v16429_v13, %v20447_v19 }
 0x253   : > { %v4125_v5 = vpop.f32.mrf.mxu0  ;;  %v4347_v31 = vpop.f32.mrf.mxu1 }
 0x254   : > { %v20545_v36 = vadd.f32 %v4125_v5, %v20294_v20  ;;  %v20552_v25 = vadd.f32 %v4347_v31, %v20456_v22  ;;  %v20560_v20 = vld [vmem:[%s17749_s25 + $0x138] sm:$0xff]  }
 0x255   : > { %v16442_v14 = vpop.f32.mrf.mxu0  ;;  %16645 = vmatmul.mubr.msk.bf16.vlgmr.msra.gmra.mxu0 %vm484_vm1, %v6836_v59  ;;  %v16432_v19 = vpop.f32.mrf.mxu1  ;;  %16635 = vmatmul.mubr.msk.bf16.gmra.mxu1 %vm484_vm1, %v25085_v60  ;;  %v6855_v59 = vor.u32 %v6853_v58, %v6851_v43  ;;  %v6861_v58 = vshrl.u32 %v20514_v21, 16  ;;  %v6873_v31 = vshll.u32 %v20560_v20, 16 }
 0x256   : > { %v20555_v30 = vadd.f32 %v16442_v14, %v20313_v8  ;;  %16711 = vmatpush3.bf16.msra.mxu0 %v20213_v52  ;;  %16648 = vmatprep.mubr.msk.bf16.mxu0 %vm484_vm1, %v6844_v2  ;;  %v20566_v22 = vadd.f32 %v16432_v19, %v20466_v40  ;;  %v25086_v52 = vld [vmem:[#allocation8_spill] sm:$0xff]  ;;  %v6852_v2 = vsel %vm345_vm0, %v6847_v16, %v6851_v43  ;;  %v6867_v43 = vrot.slane %v6865_v54, 1 }
 0x257   : > { %v4662_v39 = vpop.f32.mrf.mxu0  ;;  %16778 = vmatprep.subr.bf16.mxu0 %v20539_v47  ;;  %16638 = vmatprep.mubr.msk.bf16.mxu1 %vm484_vm1, %v25086_v52  ;;  %v4360_v13 = vpop.f32.mrf.mxu1  ;;  %v6860_v19 = vsel %vm345_vm0, %v6855_v59, %v6859_v23  ;;  %v20597_v59 = vld [vmem:[%s17749_s25 + $0x140] sm:$0xff]  }
 0x258   : > { %v20569_v8 = vadd.f32 %v4662_v39, %v20323_v33  ;;  %v20578_v40 = vadd.f32 %v4360_v13, %v20478_v34  ;;  %v25087_v34 = vrot.slane %v19889_v51, 3  ;;  %v6863_v13 = vor.u32 %v6861_v58, %v6859_v23  ;;  %v8452_v58 = vld [vmem:[%s17749_s25 + $0x110] sm:$0xc] }
 0x259   : > { %v16443_v5 = vpop.f32.mrf.mxu0  ;;  %v16433_v15 = vpop.f32.mrf.mxu1  ;;  %v6871_v51 = vor.u32 %v6869_v41, %v6867_v43 }
 0x25a   : > { %v20581_v33 = vadd.f32 %v16443_v5, %v20331_v7  ;;  %v20587_v60 = vadd.f32 %v16433_v15, %v20487_v46  ;;  %v6353_v7 = vsel %vm3088_vm5, %v25087_v34, %v6352_v24  ;;  %v6875_v24 = vrot.slane %v6873_v31, 1 }
 0x25b   : > { %v4665_v14 = vpop.f32.mrf.mxu0  ;;  %v4363_v39 = vpop.f32.mrf.mxu1  ;;  %v6868_v15 = vsel %vm345_vm0, %v6863_v13, %v6867_v43  ;;  %v6885_v13 = vshrl.u32 %v20597_v59, 16 }
 0x25c   : > { %v20590_v16 = vadd.f32 %v4665_v14, %v20338_v1  ;;  %v20600_v46 = vadd.f32 %v4363_v39, %v20498_v11  ;;  %v6881_v14 = vshll.u32 %v20597_v59, 16  ;;  %v20637_v39 = vld [vmem:[%s17749_s25 + $0x120] sm:$0xff]  }
 0x25d   : > { %v16446_v52 = vpop.f32.mrf.mxu0  ;;  %16649 = vmatmul.mubr.msk.bf16.gmra.mxu0 %vm484_vm1, %v6852_v2  ;;  %v16436_v54 = vpop.f32.mrf.mxu1  ;;  %16639 = vmatmul.mubr.msk.bf16.gmra.mxu1 %vm484_vm1, %v6353_v7  ;;  %v20608_v2 = vld [vmem:[%s17749_s25 + $0x148] sm:$0xff]   ;;  %v6877_v7 = vshrl.u32 %v20560_v20, 16  ;;  %25090 = vst [vmem:[#allocation11_spill] sm:$0xff] %v20637_v39 }
 0x25e   : > { %v20603_v1 = vadd.f32 %v16446_v52, %v20351_v27  ;;  %16652 = vmatprep.mubr.msk.bf16.mxu0 %vm484_vm1, %v6860_v19  ;;  %v20611_v23 = vadd.f32 %v16436_v54, %v20508_v61  ;;  %16678 = vmatprep.mubr.msk.bf16.mxu1 %vm484_vm1, %v20410_v12  ;;  %v20619_v27 = vld [vmem:[%s17749_s25 + $0x114] sm:$0xf]  ;;  %v20625_v19 = vld [vmem:[%s17749_s25 + $0x118] sm:$0xff]   ;;  %v6876_v12 = vsel %vm345_vm0, %v6871_v51, %v6875_v24  ;;  %v6889_v54 = vshll.u32 %v20608_v2, 16 }
 0x25f   : > { %v4678_v5 = vpop.f32.mrf.mxu0  ;;  %25088 = vst [vmem:[#allocation56_spill] sm:$0xff] %v20619_v27  ;;  %v4376_v41 = vpop.f32.mrf.mxu1  ;;  %25089 = vst [vmem:[#allocation14_spill] sm:$0xff] %v20625_v19  ;;  %v14971_v61 = vcombine.low %v8452_v58, %v20619_v27  ;;  %v8461_v51 = vrot.slane %v20637_v39, 2  ;;  %v6883_v47 = vrot.slane %v6881_v14, 1  ;;  %v20651_v27 = vld [vmem:[%s17749_s25 + $0x150] sm:$0xff]  }
 0x260   : > { %v20614_v11 = vadd.f32 %v4678_v5, %v20360_v37  ;;  %v20629_v34 = vadd.f32 %v4376_v41, %v20520_v50  ;;  %v8459_v50 = vrot.slane %v20625_v19, 2  ;;  %v20714_v19 = vld [vmem:[%s17749_s25 + $0x160] sm:$0xff]  }
 0x261   : > { %v16447_v31 = vpop.f32.mrf.mxu0  ;;  %v16437_v43 = vpop.f32.mrf.mxu1  ;;  %v8458_v5 = vrot.slane %v14971_v61, 2  ;;  %v20656_v61 = vld [vmem:[%s24742_s1 + $0x28] sm:$0xff]  }
 0x262   : > { %v20632_v37 = vadd.f32 %v16447_v31, %v20367_v17  ;;  %v20643_v58 = vadd.f32 %v16437_v43, %v20530_v35  ;;  %25091 = vst [vmem:[#allocation43_spill] sm:$0xff] %v20656_v61 }
 0x263   : > { %v4681_v52 = vpop.f32.mrf.mxu0  ;;  %v4379_v41 = vpop.f32.mrf.mxu1  ;;  %v20659_v35 = vsel %vm1994_vm2, %v8458_v5, %v8459_v50  ;;  %v6887_v5 = vor.u32 %v6885_v13, %v6883_v47  ;;  %v20688_v13 = vld [vmem:[%s17749_s25 + $0x128] sm:$0xff]  }
 0x264   : > { %v20646_v17 = vadd.f32 %v4681_v52, %v20376_v55  ;;  %25092 = vst [vmem:[#allocation42_spill] sm:$0xff] %v20659_v35  ;;  %v20662_v55 = vadd.f32 %v4379_v41, %v20545_v36  ;;  %v6879_v52 = vor.u32 %v6877_v7, %v6875_v24  ;;  %v6891_v35 = vrot.slane %v6889_v54, 1  ;;  %v20674_v36 = vld [vmem:[%s17749_s25 + $0x158] sm:$0xff]   ;;  %25094 = vst [vmem:[#allocation37_spill] sm:$0xff] %v20688_v13 }
 0x265   : > { %v16450_v31 = vpop.f32.mrf.mxu0  ;;  %16653 = vmatmul.mubr.msk.bf16.gmra.mxu0 %vm484_vm1, %v6868_v15  ;;  %v20669_v15 = vsel %vm1994_vm2, %v8459_v50, %v8461_v51  ;;  %v16476_v14 = vpop.f32.mrf.mxu1  ;;  %16679 = vmatmul.mubr.msk.bf16.vlgmr.msra.gmra.mxu1 %vm484_vm1, %v20431_v63  ;;  %v6897_v50 = vshll.u32 %v20651_v27, 16 }
 0x266   : > { %v20665_v43 = vadd.f32 %v16450_v31, %v20387_v56  ;;  %16656 = vmatprep.mubr.msk.bf16.mxu0 %vm484_vm1, %v6876_v12  ;;  %25093 = vst [vmem:[#allocation60_spill] sm:$0xff] %v20669_v15  ;;  %v20677_v56 = vadd.f32 %v16476_v14, %v20555_v30  ;;  %16745 = vmatpush3.bf16.msra.mxu1 %v20302_v0  ;;  %v6901_v15 = vshrl.u32 %v20651_v27, 16 }
 0x267   : > { %v4694_v39 = vpop.f32.mrf.mxu0  ;;  %16682 = vmatprep.mubr.msk.bf16.mxu1 %vm484_vm1, %v20460_v9  ;;  %v5067_v12 = vpop.f32.mrf.mxu1  ;;  %16812 = vmatprep.subr.bf16.mxu1 %v20656_v61  ;;  %v6884_v0 = vsel %vm345_vm0, %v6879_v52, %v6883_v47  ;;  %v6892_v14 = vsel %vm345_vm0, %v6887_v5, %v6891_v35  ;;  %v6905_v61 = vshll.u32 %v20674_v36, 16  ;;  %v6899_v5 = vrot.slane %v6897_v50, 1 }
 0x268   : > { %v20681_v24 = vadd.f32 %v4694_v39, %v20399_v32  ;;  %v20691_v54 = vadd.f32 %v5067_v12, %v20569_v8  ;;  %v6893_v32 = vshrl.u32 %v20608_v2, 16  ;;  %v20699_v39 = vld [vmem:[%s17749_s25 + $0x130] sm:$0xff]   ;;  %v8463_v8 = vrot.slane %v20688_v13, 2 }
 0x269   : > { %v16451_v7 = vpop.f32.mrf.mxu0  ;;  %25096 = vst [vmem:[#allocation44_spill] sm:$0xff] %v20699_v39  ;;  %v16477_v41 = vpop.f32.mrf.mxu1  ;;  %v8465_v52 = vrot.slane %v20699_v39, 2  ;;  %v6903_v50 = vor.u32 %v6901_v15, %v6899_v5 }
 0x26a   : > { %25095 = vst [vmem:[#allocation19_spill] sm:$0xff] %v20691_v54  ;;  %v20694_v30 = vadd.f32 %v16451_v7, %v20413_v29  ;;  %v20706_v29 = vadd.f32 %v16477_v41, %v20581_v33  ;;  %v20717_v54 = vsel %vm1994_vm2, %v8461_v51, %v8463_v8 }
 0x26b   : > { %v4697_v31 = vpop.f32.mrf.mxu0  ;;  %v5070_v12 = vpop.f32.mrf.mxu1  ;;  %25097 = vst [vmem:[#allocation49_spill] sm:$0xff] %v20717_v54  ;;  %v20727_v41 = vsel %vm1994_vm2, %v8463_v8, %v8465_v52  ;;  %v6913_v8 = vshll.u32 %v20714_v19, 16  ;;  %v6917_v54 = vshrl.u32 %v20714_v19, 16 }
 0x26c   : > { %v20709_v47 = vadd.f32 %v4697_v31, %v20420_v62  ;;  %v20720_v13 = vadd.f32 %v5070_v12, %v20590_v16  ;;  %v6895_v62 = vor.u32 %v6893_v32, %v6891_v35  ;;  %25098 = vst [vmem:[#allocation20_spill] sm:$0xff] %v20727_v41  ;;  %v6907_v31 = vrot.slane %v6905_v61, 1  ;;  %v20732_v16 = vld [vmem:[%s17749_s25 + $0x168] sm:$0xff]   ;;  %v20744_v12 = vld [vmem:[%s17749_s25 + $0x138] sm:$0xff]  }
 0x26d   : > { %v16454_v7 = vpop.f32.mrf.mxu0  ;;  %16657 = vmatmul.mubr.msk.bf16.gmra.mxu0 %vm484_vm1, %v6884_v0  ;;  %v16480_v0 = vpop.f32.mrf.mxu1  ;;  %16683 = vmatmul.mubr.msk.bf16.gmra.mxu1 %vm484_vm1, %v20472_v53  ;;  %25100 = vst [vmem:[#allocation65_spill] sm:$0xff] %v20744_v12  ;;  %v6921_v39 = vshll.u32 %v20732_v16, 16 }
 0x26e   : > { %v20723_v33 = vadd.f32 %v16454_v7, %v20435_v45  ;;  %16660 = vmatprep.mubr.msk.bf16.mxu0 %vm484_vm1, %v6892_v14  ;;  %v20735_v45 = vadd.f32 %v16480_v0, %v20603_v1  ;;  %16686 = vmatprep.mubr.msk.bf16.mxu1 %vm484_vm1, %v20502_v48  ;;  %v6900_v1 = vsel %vm345_vm0, %v6895_v62, %v6899_v5  ;;  %v20755_v7 = vld [vmem:[%s17749_s25 + $0x140] sm:$0xff]  }
 0x26f   : > { %v4710_v51 = vpop.f32.mrf.mxu0  ;;  %v5083_v32 = vpop.f32.mrf.mxu1  ;;  %25102 = vst [vmem:[#allocation48_spill] sm:$0xff] %v20755_v7  ;;  %v6908_v41 = vsel %vm345_vm0, %v6903_v50, %v6907_v31  ;;  %v8469_v62 = vrot.slane %v20755_v7, 2  ;;  %v6915_v50 = vrot.slane %v6913_v8, 1 }
 0x270   : > { %25099 = vst [vmem:[#allocation47_spill] sm:$0xff] %v20735_v45  ;;  %v20738_v35 = vadd.f32 %v4710_v51, %v20444_v28  ;;  %v20747_v15 = vadd.f32 %v5083_v32, %v20614_v11  ;;  %v6909_v28 = vshrl.u32 %v20674_v36, 16  ;;  %v8467_v11 = vrot.slane %v20744_v12, 2 }
 0x271   : > { %v16455_v14 = vpop.f32.mrf.mxu0  ;;  %v16481_v0 = vpop.f32.mrf.mxu1  ;;  %v6919_v8 = vor.u32 %v6917_v54, %v6915_v50 }
 0x272   : > { %25101 = vst [vmem:[#allocation6_spill] sm:$0xff] %v20747_v15  ;;  %v20750_v61 = vadd.f32 %v16455_v14, %v20453_v18  ;;  %v20762_v18 = vadd.f32 %v16481_v0, %v20632_v37  ;;  %v20770_v15 = vld [vmem:[%s17749_s25 + $0x170] sm:$0xff]   ;;  %v20773_v45 = vsel %vm1994_vm2, %v8465_v52, %v8467_v11  ;;  %v20783_v0 = vsel %vm1994_vm2, %v8467_v11, %v8469_v62 }
 0x273   : > { %v4713_v51 = vpop.f32.mrf.mxu0  ;;  %v5086_v32 = vpop.f32.mrf.mxu1  ;;  %25103 = vst [vmem:[#allocation15_spill] sm:$0xff] %v20773_v45  ;;  %25104 = vst [vmem:[#allocation67_spill] sm:$0xff] %v20783_v0  ;;  %v6929_v11 = vshll.u32 %v20770_v15, 16  ;;  %v6933_v45 = vshrl.u32 %v20770_v15, 16 }
 0x274   : > { %v20765_v5 = vadd.f32 %v4713_v51, %v20463_v57  ;;  %v20776_v12 = vadd.f32 %v5086_v32, %v20646_v17  ;;  %v6911_v57 = vor.u32 %v6909_v28, %v6907_v31  ;;  %v6923_v51 = vrot.slane %v6921_v39, 1  ;;  %v20788_v17 = vld [vmem:[%s17749_s25 + $0x178] sm:$0xff]   ;;  %v20800_v32 = vld [vmem:[%s17749_s25 + $0x148] sm:$0xff]  }
 0x275   : > { %v16458_v14 = vpop.f32.mrf.mxu0  ;;  %16661 = vmatmul.mubr.msk.bf16.gmra.mxu0 %vm484_vm1, %v6900_v1  ;;  %v16484_v1 = vpop.f32.mrf.mxu1  ;;  %16687 = vmatmul.mubr.msk.bf16.gmra.mxu1 %vm484_vm1, %v20514_v21  ;;  %25106 = vst [vmem:[#allocation4_spill] sm:$0xff] %v20800_v32  ;;  %v6937_v7 = vshll.u32 %v20788_v17, 16 }
 0x276   : > { %v20779_v37 = vadd.f32 %v16458_v14, %v20475_v10  ;;  %16664 = vmatprep.mubr.msk.bf16.mxu0 %vm484_vm1, %v6908_v41  ;;  %v20791_v10 = vadd.f32 %v16484_v1, %v20665_v43  ;;  %16690 = vmatprep.mubr.msk.bf16.mxu1 %vm484_vm1, %v20548_v4  ;;  %v6916_v43 = vsel %vm345_vm0, %v6911_v57, %v6915_v50  ;;  %v20811_v14 = vld [vmem:[%s17749_s25 + $0x150] sm:$0xff]  }
 0x277   : > { %v4726_v52 = vpop.f32.mrf.mxu0  ;;  %v5099_v41 = vpop.f32.mrf.mxu1  ;;  %25108 = vst [vmem:[#allocation50_spill] sm:$0xff] %v20811_v14  ;;  %v6924_v0 = vsel %vm345_vm0, %v6919_v8, %v6923_v51  ;;  %v8473_v57 = vrot.slane %v20811_v14, 2  ;;  %v6931_v8 = vrot.slane %v6929_v11, 1 }
 0x278   : > { %25105 = vst [vmem:[#allocation10_spill] sm:$0xff] %v20791_v10  ;;  %v20794_v31 = vadd.f32 %v4726_v52, %v20484_v26  ;;  %v20803_v54 = vadd.f32 %v5099_v41, %v20681_v24  ;;  %v6925_v26 = vshrl.u32 %v20732_v16, 16  ;;  %v8471_v24 = vrot.slane %v20800_v32, 2 }
 0x279   : > { %v16459_v28 = vpop.f32.mrf.mxu0  ;;  %v16485_v1 = vpop.f32.mrf.mxu1 }
 0x27a   : > { %25107 = vst [vmem:[#allocation51_spill] sm:$0xff] %v20803_v54  ;;  %v20806_v39 = vadd.f32 %v16459_v28, %v20495_v38  ;;  %v20818_v38 = vadd.f32 %v16485_v1, %v20694_v30  ;;  %v20826_v54 = vsel %vm1994_vm2, %v8469_v62, %v8471_v24  ;;  %v6927_v1 = vor.u32 %v6925_v26, %v6923_v51 }
 0x27b   : > { %v4729_v52 = vpop.f32.mrf.mxu0  ;;  %v5102_v41 = vpop.f32.mrf.mxu1  ;;  %25109 = vst [vmem:[#allocation70_spill] sm:$0xff] %v20826_v54 }
 0x27c   : > { %v20821_v50 = vadd.f32 %v4729_v52, %v20505_v3  ;;  %v20829_v10 = vadd.f32 %v5102_v41, %v20709_v47  ;;  %v20836_v3 = vld [vmem:[%s17749_s25 + $0x180] ss:$0 sps:$4 sm:$0x11]   ;;  %v20839_v52 = vsel %vm1994_vm2, %v8471_v24, %v8473_v57  ;;  %v6935_v47 = vor.u32 %v6933_v45, %v6931_v8 }
 0x27d   : > { %v16462_v28 = vpop.f32.mrf.mxu0  ;;  %16665 = vmatmul.mubr.msk.bf16.gmra.mxu0 %vm484_vm1, %v6916_v43  ;;  %25110 = vst [vmem:[#allocation22_spill] sm:$0xff] %v20836_v3  ;;  %25111 = vst [vmem:[#allocation52_spill] sm:$0xff] %v20839_v52  ;;  %v16488_v11 = vpop.f32.mrf.mxu1  ;;  %16691 = vmatmul.mubr.msk.bf16.gmra.mxu1 %vm484_vm1, %v20560_v20  ;;  %v6939_v43 = vrot.slane %v6937_v7, 1  ;;  %v6941_v41 = vshrl.u32 %v20788_v17, 16  ;;  %v20865_v7 = vld [vmem:[%s17749_s25 + $0x160] sm:$0xff]  }
 0x27e   : > { %v20832_v30 = vadd.f32 %v16462_v28, %v20517_v42  ;;  %16668 = vmatprep.mubr.msk.bf16.mxu0 %vm484_vm1, %v6924_v0  ;;  %v20844_v42 = vadd.f32 %v16488_v11, %v20723_v33  ;;  %16694 = vmatprep.mubr.msk.bf16.mxu1 %vm484_vm1, %v20597_v59  ;;  %v7363_v0 = vld [vmem:[%s17749_s25 + $0x100] sm:$0xe]  ;;  %v20854_v28 = vld [vmem:[%s17749_s25 + $0x158] sm:$0xff]   ;;  %v6932_v33 = vsel %vm345_vm0, %v6927_v1, %v6931_v8  ;;  %v8477_v8 = vrot.slane %v20865_v7, 2 }
 0x27f   : > { %v4742_v62 = vpop.f32.mrf.mxu0  ;;  %v5115_v26 = vpop.f32.mrf.mxu1  ;;  %v6940_v54 = vsel %vm345_vm0, %v6935_v47, %v6939_v43  ;;  %v14895_v14 = vcombine.low %v7363_v0, %v20396_v44  ;;  %v8475_v32 = vrot.slane %v20854_v28, 2 }
 0x280   : > { %v20847_v51 = vadd.f32 %v4742_v62, %v20527_v6  ;;  %v20857_v52 = vadd.f32 %v5115_v26, %v20738_v35  ;;  %v6945_v6 = vshll.u32 %v20836_v3, 16 }
 0x281   : > { %v16463_v24 = vpop.f32.mrf.mxu0  ;;  %v16489_v11 = vpop.f32.mrf.mxu1  ;;  %v20879_v3 = vsel %vm1994_vm2, %v8473_v57, %v8475_v32  ;;  %v20889_v47 = vsel %vm1994_vm2, %v8475_v32, %v8477_v8 }
 0x282   : > { %v20860_v45 = vadd.f32 %v16463_v24, %v20542_v49  ;;  %v20871_v35 = vadd.f32 %v16489_v11, %v20750_v61  ;;  %v6943_v24 = vor.u32 %v6941_v41, %v6939_v43  ;;  %25112 = vst [vmem:[#allocation58_spill] sm:$0xff] %v20879_v3  ;;  %25113 = vst [vmem:[#allocation23_spill] sm:$0xff] %v20889_v47  ;;  %v7369_v43 = vrot.slane %v14895_v14, 1 }
 0x283   : > { %v4745_v62 = vpop.f32.mrf.mxu0  ;;  %v5118_v1 = vpop.f32.mrf.mxu1  ;;  %v7370_v41 = vrot.slane %v20431_v63, 1 }
 0x284   : > { %v20874_v49 = vadd.f32 %v4745_v62, %v20552_v25  ;;  %v20882_v44 = vadd.f32 %v5118_v1, %v20765_v5  ;;  %v6947_v25 = vrot.slane %v6945_v6, 1 }
 0x285   : > { %v16466_v26 = vpop.f32.mrf.mxu0  ;;  %16669 = vmatmul.mubr.msk.bf16.gmra.mxu0 %vm484_vm1, %v6932_v33  ;;  %v16492_v0 = vpop.f32.mrf.mxu1  ;;  %16695 = vmatmul.mubr.msk.bf16.gmra.mxu1 %vm484_vm1, %v20608_v2  ;;  %v20903_v33 = vld [vmem:[%s17749_s25 + $0x168] sm:$0xff]   ;;  %v7371_v62 = vsel %vm900_vm3, %v7369_v43, %v7370_v41 }
 0x286   : > { %v20885_v61 = vadd.f32 %v16466_v26, %v20566_v22  ;;  %16672 = vmatprep.mubr.msk.bf16.mxu0 %vm484_vm1, %v6940_v54  ;;  %v20895_v5 = vadd.f32 %v16492_v0, %v20779_v37  ;;  %16698 = vmatprep.mubr.msk.bf16.mxu1 %vm484_vm1, %v20651_v27  ;;  %v6948_v63 = vsel %vm345_vm0, %v6943_v24, %v6947_v25  ;;  %v20913_v37 = vld [vmem:[%s17749_s25 + $0x170] sm:$0xff]   ;;  %v8479_v1 = vrot.slane %v20903_v33, 2 }
 0x287   : > { %v4758_v57 = vpop.f32.mrf.mxu0  ;;  %v5131_v54 = vpop.f32.mrf.mxu1 }
 0x288   : > { %v20898_v22 = vadd.f32 %v4758_v57, %v20578_v40  ;;  %v20906_v6 = vadd.f32 %v5131_v54, %v20794_v31  ;;  %v8481_v31 = vrot.slane %v20913_v37, 2  ;;  %v20926_v24 = vsel %vm1994_vm2, %v8477_v8, %v8479_v1 }
 0x289   : > { %v16467_v32 = vpop.f32.mrf.mxu0  ;;  %v16493_v11 = vpop.f32.mrf.mxu1  ;;  %25114 = vst [vmem:[#allocation55_spill] sm:$0xff] %v20926_v24 }
 0x28a   : > { %v20909_v14 = vadd.f32 %v16467_v32, %v20587_v60  ;;  %v20918_v26 = vadd.f32 %v16493_v11, %v20806_v39  ;;  %v20937_v39 = vsel %vm1994_vm2, %v8479_v1, %v8481_v31  ;;  %v20951_v11 = vld [vmem:[%s17749_s25 + $0x178] sm:$0xff]  }
 0x28b   : > { %v4761_v40 = vpop.f32.mrf.mxu0  ;;  %v5134_v60 = vpop.f32.mrf.mxu1  ;;  %25115 = vst [vmem:[#allocation25_spill] sm:$0xff] %v20937_v39 }
 0x28c   : > { %v20921_v0 = vadd.f32 %v4761_v40, %v20600_v46  ;;  %v20929_v25 = vadd.f32 %v5134_v60, %v20821_v50  ;;  %v7372_v46 = vrot.slane %v20460_v9, 1  ;;  %v7374_v50 = vrot.slane %v20472_v53, 1 }
 0x28d   : > { %v16470_v57 = vpop.f32.mrf.mxu0  ;;  %16673 = vmatmul.mubr.msk.bf16.gmra.mxu0 %vm484_vm1, %v6948_v63  ;;  %v16496_v54 = vpop.f32.mrf.mxu1  ;;  %16699 = vmatmul.mubr.msk.bf16.gmra.mxu1 %vm484_vm1, %v20674_v36 }
 0x28e   : > { %v20932_v43 = vadd.f32 %v16470_v57, %v20611_v23  ;;  %16712 = vmatprep.mubr.msk.bf16.mxu0 %vm484_vm1, %v7371_v62  ;;  %v20943_v32 = vadd.f32 %v16496_v54, %v20832_v30  ;;  %16702 = vmatprep.mubr.msk.bf16.mxu1 %vm484_vm1, %v20714_v19  ;;  %v7373_v53 = vsel %vm900_vm3, %v7370_v41, %v7372_v46  ;;  %v7649_v30 = vld [vmem:[%s17749_s25 + $0x110] sm:$0xe]  ;;  %v20963_v57 = vld [vmem:[%s17749_s25 + $0x180] sm:$0xff]  }
 0x28f   : > { %v4774_v8 = vpop.f32.mrf.mxu0  ;;  %v5147_v9 = vpop.f32.mrf.mxu1  ;;  %v20968_v54 = vld [vmem:[%s24742_s1 + $0x30] sm:$0xff]   ;;  %v8485_v24 = vrot.slane %v20963_v57, 2 }
 0x290   : > { %v20946_v23 = vadd.f32 %v4774_v8, %v20629_v34  ;;  %v20954_v40 = vadd.f32 %v5147_v9, %v20847_v51  ;;  %v7375_v34 = vsel %vm900_vm3, %v7372_v46, %v7374_v50  ;;  %v8483_v51 = vrot.slane %v20951_v11, 2  ;;  %v25116_v46 = vld [vmem:[#allocation56_spill] sm:$0xff] }
 0x291   : > { %v16471_v63 = vpop.f32.mrf.mxu0  ;;  %v16497_v1 = vpop.f32.mrf.mxu1 }
 0x292   : > { %v20957_v62 = vadd.f32 %v16471_v63, %v20643_v58  ;;  %v20972_v8 = vadd.f32 %v16497_v1, %v20860_v45  ;;  %v20979_v63 = vcombine.low %v7649_v30, %v25116_v46  ;;  %v20982_v39 = vsel %vm1994_vm2, %v8481_v31, %v8483_v51  ;;  %v25123_v46 = vld [vmem:[#allocation14_spill] sm:$0xff] }
 0x293   : > { %v4777_v60 = vpop.f32.mrf.mxu0  ;;  %v5150_v41 = vpop.f32.mrf.mxu1  ;;  %25117 = vst [vmem:[#allocation57_spill] sm:$0xff] %v20982_v39  ;;  %v7378_v1 = vrot.slane %v20514_v21, 1  ;;  %v7768_v21 = vrot.slane %v25123_v46, 1 }
 0x294   : > { %v20975_v58 = vadd.f32 %v4777_v60, %v20662_v55  ;;  %v20986_v47 = vadd.f32 %v5150_v41, %v20874_v49  ;;  %v25119_v55 = vld [vmem:[#allocation13_spill] sm:$0xff]  ;;  %v20999_v49 = vsel %vm1994_vm2, %v8483_v51, %v8485_v24  ;;  %v25121_v60 = vld [vmem:[#allocation19_spill] sm:$0xff] }
 0x295   : > { %v16510_v9 = vpop.f32.mrf.mxu0  ;;  %16713 = vmatmul.mubr.msk.bf16.vlgmr.msra.gmra.mxu0 %vm484_vm1, %v7373_v53  ;;  %v7376_v53 = vrot.slane %v20502_v48, 1  ;;  %v16500_v30 = vpop.f32.mrf.mxu1  ;;  %16703 = vmatmul.mubr.msk.bf16.gmra.mxu1 %vm484_vm1, %v20732_v16  ;;  %25120 = vst [vmem:[#allocation59_spill] sm:$0xff] %v20999_v49 }
 0x296   : > { %v20989_v45 = vadd.f32 %v16510_v9, %v20677_v56  ;;  %16779 = vmatpush3.bf16.msra.mxu0 %v25119_v55  ;;  %16716 = vmatprep.mubr.msk.bf16.mxu0 %vm484_vm1, %v7375_v34  ;;  %v21002_v56 = vadd.f32 %v16500_v30, %v20885_v61  ;;  %v7767_v9 = vrot.slane %v20979_v63, 1  ;;  %v21012_v55 = vld [vmem:[%s17749_s25 + $0x188] sm:$0xff]  }
 0x297   : > { %v5353_v31 = vpop.f32.mrf.mxu0  ;;  %16846 = vmatprep.subr.bf16.mxu0 %v20968_v54  ;;  %16706 = vmatprep.mubr.msk.bf16.mxu1 %vm484_vm1, %v20770_v15  ;;  %v5163_v48 = vpop.f32.mrf.mxu1  ;;  %v7377_v30 = vsel %vm900_vm3, %v7374_v50, %v7376_v53  ;;  %v7379_v49 = vsel %vm900_vm3, %v7376_v53, %v7378_v1  ;;  %v24806_v39 = vrot.slane %v21012_v55, 2 }
 0x298   : > { %25118 = vst [vmem:[#allocation2_spill] sm:$0xff] %v20989_v45  ;;  %v21005_v41 = vadd.f32 %v5353_v31, %v25121_v60  ;;  %v21015_v51 = vadd.f32 %v5163_v48, %v20898_v22  ;;  %v25125_v48 = vld [vmem:[#allocation47_spill] sm:$0xff] }
 0x299   : > { %v16511_v34 = vpop.f32.mrf.mxu0  ;;  %v16501_v31 = vpop.f32.mrf.mxu1  ;;  %v21034_v50 = vsel %vm1994_vm2, %v8485_v24, %v24806_v39 }
 0x29a   : > { %25122 = vst [vmem:[#allocation3_spill] sm:$0xff] %v21005_v41  ;;  %v21018_v61 = vadd.f32 %v16511_v34, %v20706_v29  ;;  %v21024_v3 = vadd.f32 %v16501_v31, %v20909_v14  ;;  %v7769_v29 = vsel %vm900_vm3, %v7767_v9, %v7768_v21  ;;  %25124 = vst [vmem:[#allocation7_spill] sm:$0xff] %v21034_v50  ;;  %v25127_v31 = vld [vmem:[#allocation6_spill] sm:$0xff] }
 0x29b   : > { %v5356_v60 = vpop.f32.mrf.mxu0  ;;  %v5166_v45 = vpop.f32.mrf.mxu1 }
 0x29c   : > { %v21027_v41 = vadd.f32 %v5356_v60, %v20720_v13  ;;  %v21037_v53 = vadd.f32 %v5166_v45, %v20921_v0  ;;  %v7380_v13 = vrot.slane %v20548_v4, 1  ;;  %v25129_v45 = vld [vmem:[#allocation11_spill] sm:$0xff]  ;;  %v25130_v4 = vld [vmem:[#allocation37_spill] sm:$0xff] }
 0x29d   : > { %v16514_v22 = vpop.f32.mrf.mxu0  ;;  %16717 = vmatmul.mubr.msk.bf16.gmra.mxu0 %vm484_vm1, %v7377_v30  ;;  %v16504_v34 = vpop.f32.mrf.mxu1  ;;  %16707 = vmatmul.mubr.msk.bf16.gmra.mxu1 %vm484_vm1, %v20788_v17  ;;  %v7382_v30 = vrot.slane %v20560_v20, 1  ;;  %v7770_v60 = vrot.slane %v25129_v45, 1 }
 0x29e   : > { %v21040_v14 = vadd.f32 %v16514_v22, %v25125_v48  ;;  %16720 = vmatprep.mubr.msk.bf16.mxu0 %vm484_vm1, %v7379_v49  ;;  %v21048_v24 = vadd.f32 %v16504_v34, %v20932_v43  ;;  %16746 = vmatprep.mubr.msk.bf16.mxu1 %vm484_vm1, %v7769_v29  ;;  %v7772_v48 = vrot.slane %v25130_v4, 1  ;;  %v7381_v20 = vsel %vm900_vm3, %v7378_v1, %v7380_v13  ;;  %v21076_v1 = vld [vmem:[%s24742_s1 + $0x38] sm:$0xff]  }
 0x29f   : > { %v5369_v9 = vpop.f32.mrf.mxu0  ;;  %v5179_v49 = vpop.f32.mrf.mxu1 }
 0x2a0   : > { %25126 = vst [vmem:[#allocation61_spill] sm:$0xff] %v21040_v14  ;;  %v21051_v0 = vadd.f32 %v5369_v9, %v25127_v31  ;;  %v21057_v39 = vadd.f32 %v5179_v49, %v20946_v23  ;;  %v7383_v9 = vsel %vm900_vm3, %v7380_v13, %v7382_v30 }
 0x2a1   : > { %v16515_v22 = vpop.f32.mrf.mxu0  ;;  %v16505_v43 = vpop.f32.mrf.mxu1 }
 0x2a2   : > { %25128 = vst [vmem:[#allocation69_spill] sm:$0xff] %v21051_v0  ;;  %v21060_v50 = vadd.f32 %v16515_v22, %v20762_v18  ;;  %v21065_v29 = vadd.f32 %v16505_v43, %v20957_v62  ;;  %v7771_v0 = vsel %vm900_vm3, %v7768_v21, %v7770_v60  ;;  %v7773_v18 = vsel %vm900_vm3, %v7770_v60, %v7772_v48  ;;  %v25132_v62 = vld [vmem:[#allocation10_spill] sm:$0xff]  ;;  %v25135_v43 = vld [vmem:[#allocation51_spill] sm:$0xff] }
 0x2a3   : > { %v5372_v34 = vpop.f32.mrf.mxu0  ;;  %v5182_v14 = vpop.f32.mrf.mxu1  ;;  %v7386_v22 = vrot.slane %v20608_v2, 1 }
 0x2a4   : > { %v21068_v31 = vadd.f32 %v5372_v34, %v20776_v12  ;;  %v21079_v13 = vadd.f32 %v5182_v14, %v20975_v58  ;;  %v7384_v12 = vrot.slane %v20597_v59, 1  ;;  %v25137_v58 = vld [vmem:[#allocation44_spill] sm:$0xff]  ;;  %v25138_v59 = vld [vmem:[#allocation65_spill] sm:$0xff] }
 0x2a5   : > { %v16518_v23 = vpop.f32.mrf.mxu0  ;;  %16721 = vmatmul.mubr.msk.bf16.gmra.mxu0 %vm484_vm1, %v7381_v20  ;;  %v21086_v21 = vpop.f32.mrf.mxu1  ;;  %16747 = vmatmul.mubr.msk.bf16.vlgmr.msra.gmra.mxu1 %vm484_vm1, %v7771_v0  ;;  %v25134_v20 = vld [vmem:[#allocation43_spill] sm:$0xff]  ;;  %v7774_v14 = vrot.slane %v25137_v58, 1 }
 0x2a6   : > { %25131 = vst [vmem:[#allocation77_spill] sm:$0xff] %v21068_v31  ;;  %v21082_v49 = vadd.f32 %v16518_v23, %v25132_v62  ;;  %16724 = vmatprep.mubr.msk.bf16.mxu0 %vm484_vm1, %v7383_v9  ;;  %16813 = vmatpush3.bf16.msra.mxu1 %v25134_v20  ;;  %v7776_v62 = vrot.slane %v25138_v59, 1  ;;  %v7385_v2 = vsel %vm900_vm3, %v7382_v30, %v7384_v12  ;;  %v7388_v30 = vrot.slane %v20651_v27, 1 }
 0x2a7   : > { %v5385_v60 = vpop.f32.mrf.mxu0  ;;  %16750 = vmatprep.mubr.msk.bf16.mxu1 %vm484_vm1, %v7773_v18  ;;  %v21096_v23 = vpop.f32.mrf.mxu1  ;;  %16880 = vmatprep.subr.bf16.mxu1 %v21076_v1 }
 0x2a8   : > { %25133 = vst [vmem:[#allocation27_spill] sm:$0xff] %v21082_v49  ;;  %v21092_v34 = vadd.f32 %v5385_v60, %v25135_v43  ;;  %v7387_v43 = vsel %vm900_vm3, %v7384_v12, %v7386_v22 }
 0x2a9   : > { %v16519_v9 = vpop.f32.mrf.mxu0  ;;  %v21104_v20 = vpop.f32.mrf.mxu1 }
 0x2aa   : > { %25136 = vst [vmem:[#allocation62_spill] sm:$0xff] %v21092_v34  ;;  %v21101_v0 = vadd.f32 %v16519_v9, %v20818_v38  ;;  %v7775_v34 = vsel %vm900_vm3, %v7772_v48, %v7774_v14  ;;  %v7777_v38 = vsel %vm900_vm3, %v7774_v14, %v7776_v62  ;;  %v7390_v48 = vrot.slane %v20674_v36, 1  ;;  %v25143_v14 = vld [vmem:[#allocation48_spill] sm:$0xff] }
 0x2ab   : > { %v5388_v60 = vpop.f32.mrf.mxu0  ;;  %v21111_v49 = vpop.f32.mrf.mxu1 }
 0x2ac   : > { %25139 = vst [vmem:[#allocation28_spill] sm:$0xff] %v21101_v0  ;;  %v21108_v18 = vadd.f32 %v5388_v60, %v20829_v10 }
 0x2ad   : > { %v16522_v31 = vpop.f32.mrf.mxu0  ;;  %16725 = vmatmul.mubr.msk.bf16.gmra.mxu0 %vm484_vm1, %v7385_v2  ;;  %v21120_v12 = vpop.f32.mrf.mxu1  ;;  %16751 = vmatmul.mubr.msk.bf16.gmra.mxu1 %vm484_vm1, %v7775_v34  ;;  %v7778_v2 = vrot.slane %v25143_v14, 1  ;;  %v7389_v34 = vsel %vm900_vm3, %v7386_v22, %v7388_v30  ;;  %v7392_v22 = vrot.slane %v20714_v19, 1 }
 0x2ae   : > { %25140 = vst [vmem:[#allocation66_spill] sm:$0xff] %v21108_v18  ;;  %v21116_v9 = vadd.f32 %v16522_v31, %v20844_v42  ;;  %16728 = vmatprep.mubr.msk.bf16.mxu0 %vm484_vm1, %v7387_v43  ;;  %16754 = vmatprep.mubr.msk.bf16.mxu1 %vm484_vm1, %v7777_v38  ;;  %v25144_v43 = vld [vmem:[#allocation4_spill] sm:$0xff] }
 0x2af   : > { %v5401_v10 = vpop.f32.mrf.mxu0  ;;  %v21129_v42 = vpop.f32.mrf.mxu1  ;;  %v7779_v38 = vsel %vm900_vm3, %v7776_v62, %v7778_v2  ;;  %v7394_v62 = vrot.slane %v20732_v16, 1 }
 0x2b0   : > { %25141 = vst [vmem:[#allocation29_spill] sm:$0xff] %v21116_v9  ;;  %v21125_v60 = vadd.f32 %v5401_v10, %v20857_v52  ;;  %v7780_v9 = vrot.slane %v25144_v43, 1  ;;  %v7391_v52 = vsel %vm900_vm3, %v7388_v30, %v7390_v48 }
 0x2b1   : > { %v16523_v31 = vpop.f32.mrf.mxu0  ;;  %v21136_v18 = vpop.f32.mrf.mxu1 }
 0x2b2   : > { %25142 = vst [vmem:[#allocation68_spill] sm:$0xff] %v21125_v60  ;;  %v21133_v27 = vadd.f32 %v16523_v31, %v20871_v35  ;;  %v7781_v35 = vsel %vm900_vm3, %v7778_v2, %v7780_v9  ;;  %v25149_v2 = vld [vmem:[#allocation50_spill] sm:$0xff] }
 0x2b3   : > { %v5404_v36 = vpop.f32.mrf.mxu0  ;;  %v21143_v60 = vpop.f32.mrf.mxu1 }
 0x2b4   : > { %25145 = vst [vmem:[#allocation18_spill] sm:$0xff] %v21133_v27  ;;  %v21140_v10 = vadd.f32 %v5404_v36, %v20882_v44 }
 0x2b5   : > { %v16526_v0 = vpop.f32.mrf.mxu0  ;;  %16729 = vmatmul.mubr.msk.bf16.gmra.mxu0 %vm484_vm1, %v7389_v34  ;;  %v21152_v30 = vpop.f32.mrf.mxu1  ;;  %16755 = vmatmul.mubr.msk.bf16.gmra.mxu1 %vm484_vm1, %v7779_v38  ;;  %v7782_v34 = vrot.slane %v25149_v2, 1  ;;  %v7393_v38 = vsel %vm900_vm3, %v7390_v48, %v7392_v22  ;;  %v7396_v48 = vrot.slane %v20770_v15, 1  ;;  %v7786_v15 = vrot.slane %v20865_v7, 1 }
 0x2b6   : > { %25146 = vst [vmem:[#allocation5_spill] sm:$0xff] %v21140_v10  ;;  %v21148_v31 = vadd.f32 %v16526_v0, %v20895_v5  ;;  %16732 = vmatprep.mubr.msk.bf16.mxu0 %vm484_vm1, %v7391_v52  ;;  %16758 = vmatprep.mubr.msk.bf16.mxu1 %vm484_vm1, %v7781_v35  ;;  %v7784_v52 = vrot.slane %v20854_v28, 1 }
 0x2b7   : > { %v5417_v44 = vpop.f32.mrf.mxu0  ;;  %v21161_v5 = vpop.f32.mrf.mxu1  ;;  %v7783_v35 = vsel %vm900_vm3, %v7780_v9, %v7782_v34 }
 0x2b8   : > { %25147 = vst [vmem:[#allocation30_spill] sm:$0xff] %v21148_v31  ;;  %v21157_v36 = vadd.f32 %v5417_v44, %v20906_v6  ;;  %v7395_v6 = vsel %vm900_vm3, %v7392_v22, %v7394_v62  ;;  %v7398_v22 = vrot.slane %v20788_v17, 1 }
 0x2b9   : > { %v16527_v0 = vpop.f32.mrf.mxu0  ;;  %v21168_v31 = vpop.f32.mrf.mxu1 }
 0x2ba   : > { %25148 = vst [vmem:[#allocation71_spill] sm:$0xff] %v21157_v36  ;;  %v21165_v19 = vadd.f32 %v16527_v0, %v20918_v26  ;;  %v7785_v26 = vsel %vm900_vm3, %v7782_v34, %v7784_v52  ;;  %v8062_v34 = vshrl.u32 %v25123_v46, 16 }
 0x2bb   : > { %v5420_v16 = vpop.f32.mrf.mxu0  ;;  %v21175_v36 = vpop.f32.mrf.mxu1 }
 0x2bc   : > { %25150 = vst [vmem:[#allocation24_spill] sm:$0xff] %v21165_v19  ;;  %v21172_v44 = vadd.f32 %v5420_v16, %v20929_v25  ;;  %v8054_v16 = vshrl.u32 %v20979_v63, 16 }
 0x2bd   : > { %v16530_v10 = vpop.f32.mrf.mxu0  ;;  %16733 = vmatmul.mubr.msk.bf16.gmra.mxu0 %vm484_vm1, %v7393_v38  ;;  %v21185_v25 = vpop.f32.mrf.mxu1  ;;  %16759 = vmatmul.mubr.msk.bf16.gmra.mxu1 %vm484_vm1, %v7783_v35  ;;  %v8057_v38 = vshll.u32 %v20979_v63, 16  ;;  %v7788_v35 = vrot.slane %v20903_v33, 1  ;;  %v7397_v63 = vsel %vm900_vm3, %v7394_v62, %v7396_v48 }
 0x2be   : > { %25151 = vst [vmem:[#allocation31_spill] sm:$0xff] %v21172_v44  ;;  %v21180_v0 = vadd.f32 %v16530_v10, %v20943_v32  ;;  %16736 = vmatprep.mubr.msk.bf16.mxu0 %vm484_vm1, %v7395_v6  ;;  %25153 = vst [vmem:[#allocation9_spill] sm:$0xff] %v21185_v25  ;;  %v8065_v32 = vshll.u32 %v25123_v46, 16  ;;  %16762 = vmatprep.mubr.msk.bf16.mxu1 %vm484_vm1, %v7785_v26  ;;  %v7399_v44 = vsel %vm900_vm3, %v7396_v48, %v7398_v22 }
 0x2bf   : > { %v5433_v9 = vpop.f32.mrf.mxu0  ;;  %v21197_v17 = vpop.f32.mrf.mxu1  ;;  %v8064_v26 = vrot.slane %v8062_v34, 1  ;;  %v7789_v62 = vsel %vm900_vm3, %v7786_v15, %v7788_v35  ;;  %v8071_v48 = vshrl.u32 %v25129_v45, 16 }
 0x2c0   : > { %25152 = vst [vmem:[#allocation72_spill] sm:$0xff] %v21180_v0  ;;  %v21193_v10 = vadd.f32 %v5433_v9, %v20954_v40  ;;  %25155 = vst [vmem:[#allocation32_spill] sm:$0xff] %v21197_v17  ;;  %v8056_v9 = vrot.slane %v8054_v16, 1  ;;  %v8067_v19 = vrot.slane %v8065_v32, 2  ;;  %v7787_v17 = vsel %vm900_vm3, %v7784_v52, %v7786_v15 }
 0x2c1   : > { %v16531_v6 = vpop.f32.mrf.mxu0  ;;  %v21205_v46 = vpop.f32.mrf.mxu1  ;;  %v8080_v15 = vshrl.u32 %v25130_v4, 16 }
 0x2c2   : > { %25154 = vst [vmem:[#allocation75_spill] sm:$0xff] %v21193_v10  ;;  %v21201_v0 = vadd.f32 %v16531_v6, %v20972_v8  ;;  %v8059_v10 = vrot.slane %v8057_v38, 2  ;;  %v8074_v6 = vshll.u32 %v25129_v45, 16 }
 0x2c3   : > { %v5436_v40 = vpop.f32.mrf.mxu0  ;;  %v21211_v25 = vpop.f32.mrf.mxu1 }
 0x2c4   : > { %25156 = vst [vmem:[#allocation76_spill] sm:$0xff] %v21201_v0  ;;  %v21208_v27 = vadd.f32 %v5436_v40, %v20986_v47  ;;  %v25159_v47 = vld [vmem:[#allocation22_spill] sm:$0xff]  ;;  %v8060_v32 = vor.u32 %v8059_v10, %v8056_v9  ;;  %v8083_v40 = vshll.u32 %v25130_v4, 16 }
 0x2c5   : > { %v16534_v8 = vpop.f32.mrf.mxu0  ;;  %16737 = vmatmul.mubr.msk.bf16.gmra.mxu0 %vm484_vm1, %v7397_v63  ;;  %v7400_v38 = vrot.slane %v25159_v47, 1  ;;  %v21222_v34 = vpop.f32.mrf.mxu1  ;;  %16763 = vmatmul.mubr.msk.bf16.gmra.mxu1 %vm484_vm1, %v7787_v17  ;;  %v8068_v63 = vor.u32 %v8067_v19, %v8064_v26  ;;  %v7792_v47 = vrot.slane %v20951_v11, 1  ;;  %v8073_v17 = vrot.slane %v8071_v48, 1 }
 0x2c6   : > { %25157 = vst [vmem:[#allocation21_spill] sm:$0xff] %v21208_v27  ;;  %v21218_v16 = vadd.f32 %v16534_v8, %v21002_v56  ;;  %16740 = vmatprep.mubr.msk.bf16.mxu0 %vm484_vm1, %v7399_v44  ;;  %16766 = vmatprep.mubr.msk.bf16.mxu1 %vm484_vm1, %v7789_v62  ;;  %v7790_v56 = vrot.slane %v20913_v37, 1  ;;  %v8082_v26 = vrot.slane %v8080_v15, 1  ;;  %v8085_v62 = vrot.slane %v8083_v40, 2 }
 0x2c7   : > { %v5449_v52 = vpop.f32.mrf.mxu0  ;;  %v21232_v44 = vpop.f32.mrf.mxu1  ;;  %v7401_v10 = vsel %vm900_vm3, %v7398_v22, %v7400_v38  ;;  %v8069_v9 = vsel %vm1587_vm4, %v8060_v32, %v8068_v63  ;;  %v8092_v38 = vshll.u32 %v25137_v58, 16 }
 0x2c8   : > { %25158 = vst [vmem:[#allocation84_spill] sm:$0xff] %v21218_v16  ;;  %v21228_v45 = vadd.f32 %v5449_v52, %v21015_v51  ;;  %v8076_v16 = vrot.slane %v8074_v6, 2  ;;  %v8089_v6 = vshrl.u32 %v25137_v58, 16  ;;  %v8086_v40 = vor.u32 %v8085_v62, %v8082_v26 }
 0x2c9   : > { %v16535_v8 = vpop.f32.mrf.mxu0  ;;  %v21239_v4 = vpop.f32.mrf.mxu1 }
 0x2ca   : > { %25160 = vst [vmem:[#allocation26_spill] sm:$0xff] %v21228_v45  ;;  %v21236_v19 = vadd.f32 %v16535_v8, %v21024_v3  ;;  %v7791_v45 = vsel %vm900_vm3, %v7788_v35, %v7790_v56  ;;  %v7793_v3 = vsel %vm900_vm3, %v7790_v56, %v7792_v47  ;;  %v8077_v22 = vor.u32 %v8076_v16, %v8073_v17 }
 0x2cb   : > { %v5452_v51 = vpop.f32.mrf.mxu0  ;;  %v21246_v27 = vpop.f32.mrf.mxu1  ;;  %v8101_v35 = vshll.u32 %v25138_v59, 16  ;;  %v7796_v56 = vrot.slane %v21012_v55, 1 }
 0x2cc   : > { %25161 = vst [vmem:[#allocation33_spill] sm:$0xff] %v21236_v19  ;;  %v21243_v52 = vadd.f32 %v5452_v51, %v21037_v53  ;;  %v8098_v53 = vshrl.u32 %v25138_v59, 16  ;;  %v8078_v17 = vsel %vm1587_vm4, %v8068_v63, %v8077_v22  ;;  %v21271_v51 = vld [vmem:[%s17749_s25 + $0x124] sm:$0xf]  ;;  %v8087_v63 = vsel %vm1587_vm4, %v8077_v22, %v8086_v40 }
 0x2cd   : > { %v16538_v48 = vpop.f32.mrf.mxu0  ;;  %16741 = vmatmul.mubr.msk.bf16.gmra.mxu0 %vm484_vm1, %v7401_v10  ;;  %v21258_v15 = vpop.f32.mrf.mxu1  ;;  %16767 = vmatmul.mubr.msk.bf16.gmra.mxu1 %vm484_vm1, %v7791_v45  ;;  %v8091_v10 = vrot.slane %v8089_v6, 1  ;;  %v8094_v45 = vrot.slane %v8092_v38, 2  ;;  %v8103_v62 = vrot.slane %v8101_v35, 2  ;;  %v21285_v6 = vld [vmem:[%s17749_s25 + $0x130] sm:$0xff]   ;;  %v21290_v38 = vld [vmem:[%s24742_s1 + $0x40] sm:$0xff]   ;;  %v8107_v19 = vshrl.u32 %v25143_v14, 16 }
 0x2ce   : > { %25162 = vst [vmem:[#allocation78_spill] sm:$0xff] %v21243_v52  ;;  %v21253_v32 = vadd.f32 %v16538_v48, %v21048_v24  ;;  %16780 = vmatprep.mubr.msk.bf16.mxu0 %vm484_vm1, %v8069_v9  ;;  %25164 = vst [vmem:[#allocation79_spill] sm:$0xff] %v21258_v15  ;;  %16770 = vmatprep.mubr.msk.bf16.mxu1 %vm484_vm1, %v7793_v3  ;;  %v7794_v24 = vrot.slane %v20963_v57, 1  ;;  %v9541_v9 = vld [vmem:[%s17749_s25 + $0x120] sm:$0x8]  ;;  %v8100_v26 = vrot.slane %v8098_v53, 1 }
 0x2cf   : > { %v5465_v16 = vpop.f32.mrf.mxu0  ;;  %v21267_v8 = vpop.f32.mrf.mxu1  ;;  %v21278_v48 = vld [vmem:[%s17749_s25 + $0x128] sm:$0xff]   ;;  %v15047_v3 = vcombine.low %v9541_v9, %v21271_v51  ;;  %25169 = vst [vmem:[#allocation39_spill] sm:$0xff] %v21290_v38  ;;  %v17543_v35 = vld [vmem:[%s17749_s25 + $0x190] ss:$0 sps:$4 sm:$0x11]   ;;  %v8095_v52 = vor.u32 %v8094_v45, %v8091_v10  ;;  %v8119_v10 = vshll.u32 %v25144_v43, 16 }
 0x2d0   : > { %25163 = vst [vmem:[#allocation34_spill] sm:$0xff] %v21253_v32  ;;  %v21262_v58 = vadd.f32 %v5465_v16, %v21057_v39  ;;  %25166 = vst [vmem:[#allocation82_spill] sm:$0xff] %v21267_v8  ;;  %v7795_v53 = vsel %vm900_vm3, %v7792_v47, %v7794_v24  ;;  %v9548_v9 = vrot.slane %v21278_v48, 3  ;;  %v7797_v22 = vsel %vm900_vm3, %v7794_v24, %v7796_v56 }
 0x2d1   : > { %v16539_v59 = vpop.f32.mrf.mxu0  ;;  %v21281_v16 = vpop.f32.mrf.mxu1  ;;  %v8104_v47 = vor.u32 %v8103_v62, %v8100_v26  ;;  %v8096_v62 = vsel %vm1587_vm4, %v8086_v40, %v8095_v52  ;;  %v8137_v40 = vshll.u32 %v20854_v28, 16 }
 0x2d2   : > { %25165 = vst [vmem:[#allocation35_spill] sm:$0xff] %v21262_v58  ;;  %v21275_v39 = vadd.f32 %v16539_v59, %v21065_v29  ;;  %25168 = vst [vmem:[#allocation83_spill] sm:$0xff] %v21281_v16  ;;  %v9547_v59 = vrot.slane %v15047_v3, 3 }
 0x2d3   : > { %v5468_v58 = vpop.f32.mrf.mxu0 }
 0x2d4   : > { %25167 = vst [vmem:[#allocation36_spill] sm:$0xff] %v21275_v39  ;;  %v21293_v29 = vadd.f32 %v5468_v58, %v21079_v13  ;;  %v21298_v39 = vpop.f32.mrf.mxu1  ;;  %v9550_v13 = vrot.slane %v21285_v6, 3  ;;  %v8110_v58 = vshll.u32 %v25143_v14, 16  ;;  %v21310_v3 = vsel %vm3088_vm5, %v9547_v59, %v9548_v9 }
 0x2d5   : > { %25171 = vst [vmem:[#allocation38_spill] sm:$0xff] %v21298_v39  ;;  %v21300_v32 = vpop.f32.mrf.mxu0  ;;  %16781 = vmatmul.mubr.msk.bf16.vlgmr.msra.gmra.mxu0 %vm484_vm1, %v8078_v17  ;;  %25172 = vst [vmem:[#allocation40_spill] sm:$0xff] %v21310_v3  ;;  %16771 = vmatmul.mubr.msk.bf16.gmra.mxu1 %vm484_vm1, %v7795_v53  ;;  %v8116_v17 = vshrl.u32 %v25144_v43, 16  ;;  %v7798_v14 = vrot.slane %v17543_v35, 1  ;;  %v8105_v53 = vsel %vm1587_vm4, %v8095_v52, %v8104_v47  ;;  %v8125_v43 = vshrl.u32 %v25149_v2, 16 }
 0x2d6   : > { %25170 = vst [vmem:[#allocation85_spill] sm:$0xff] %v21293_v29  ;;  %16847 = vmatpush3.bf16.msra.mxu0 %v20968_v54  ;;  %16784 = vmatprep.mubr.msk.bf16.mxu0 %vm484_vm1, %v8087_v63  ;;  %v21312_v29 = vpop.f32.mrf.mxu1  ;;  %v21321_v54 = vsel %vm3088_vm5, %v9548_v9, %v9550_v13  ;;  %v8109_v63 = vrot.slane %v8107_v19, 1  ;;  %v8112_v59 = vrot.slane %v8110_v58, 2  ;;  %v8128_v3 = vshll.u32 %v25149_v2, 16  ;;  %v21333_v9 = vld [vmem:[%s17749_s25 + $0x138] sm:$0xff]   ;;  %v21342_v19 = vld [vmem:[%s17749_s25 + $0x140] sm:$0xff]  }
 0x2d7   : > { %25173 = vst [vmem:[#allocation12_spill] sm:$0xff] %v21312_v29  ;;  %v21315_v24 = vpop.f32.mrf.mxu0  ;;  %16914 = vmatprep.subr.bf16.mxu0 %v21290_v38  ;;  %25174 = vst [vmem:[#allocation16_spill] sm:$0xff] %v21321_v54  ;;  %16774 = vmatprep.mubr.msk.bf16.mxu1 %vm484_vm1, %v7797_v22  ;;  %v8118_v22 = vrot.slane %v8116_v17, 1  ;;  %v8121_v38 = vrot.slane %v8119_v10, 2  ;;  %v7799_v52 = vsel %vm900_vm3, %v7796_v56, %v7798_v14  ;;  %v8143_v58 = vshrl.u32 %v20865_v7, 16 }
 0x2d8   : > { %v21324_v45 = vpop.f32.mrf.mxu1  ;;  %25177 = vst [vmem:[#allocation17_spill] sm:$0xff] %v21342_v19  ;;  %v8146_v2 = vshll.u32 %v20865_v7, 16  ;;  %v9552_v29 = vrot.slane %v21333_v9, 3  ;;  %v8152_v17 = vshrl.u32 %v20903_v33, 16  ;;  %v9554_v10 = vrot.slane %v21342_v19, 3 }
 0x2d9   : > { %25175 = vst [vmem:[#allocation45_spill] sm:$0xff] %v21324_v45  ;;  %v21326_v26 = vpop.f32.mrf.mxu0  ;;  %v8134_v45 = vshrl.u32 %v20854_v28, 16  ;;  %v8155_v28 = vshll.u32 %v20903_v33, 16  ;;  %v8113_v56 = vor.u32 %v8112_v59, %v8109_v63  ;;  %v8127_v14 = vrot.slane %v8125_v43, 1 }
 0x2da   : > { %v21335_v54 = vpop.f32.mrf.mxu1  ;;  %v8130_v16 = vrot.slane %v8128_v3, 2  ;;  %v21358_v7 = vsel %vm3088_vm5, %v9550_v13, %v9552_v29  ;;  %v8139_v33 = vrot.slane %v8137_v40, 2  ;;  %v21366_v19 = vsel %vm3088_vm5, %v9552_v29, %v9554_v10  ;;  %v21378_v29 = vld [vmem:[%s17749_s25 + $0x148] sm:$0xff]  }
 0x2db   : > { %25176 = vst [vmem:[#allocation46_spill] sm:$0xff] %v21335_v54  ;;  %v21337_v35 = vpop.f32.mrf.mxu0  ;;  %25179 = vst [vmem:[#allocation41_spill] sm:$0xff] %v21358_v7  ;;  %v8136_v8 = vrot.slane %v8134_v45, 1  ;;  %v8145_v3 = vrot.slane %v8143_v58, 1  ;;  %v8148_v13 = vrot.slane %v8146_v2, 2  ;;  %v8154_v43 = vrot.slane %v8152_v17, 1 }
 0x2dc   : > { %v21348_v39 = vpop.f32.mrf.mxu1  ;;  %25181 = vst [vmem:[#allocation63_spill] sm:$0xff] %v21366_v19  ;;  %v8161_v7 = vshrl.u32 %v20913_v37, 16  ;;  %v8114_v45 = vsel %vm1587_vm4, %v8104_v47, %v8113_v56  ;;  %v8131_v2 = vor.u32 %v8130_v16, %v8127_v14  ;;  %v21386_v19 = vld [vmem:[%s17749_s25 + $0x150] sm:$0xff]   ;;  %v25185_v17 = vld [vmem:[#allocation2_spill] sm:$0xff]  ;;  %v25186_v16 = vld [vmem:[#allocation3_spill] sm:$0xff] }
 0x2dd   : > { %25178 = vst [vmem:[#allocation53_spill] sm:$0xff] %v21348_v39  ;;  %v21350_v54 = vpop.f32.mrf.mxu0  ;;  %16785 = vmatmul.mubr.msk.bf16.gmra.mxu0 %vm484_vm1, %v8096_v62  ;;  %16775 = vmatmul.mubr.msk.bf16.gmra.mxu1 %vm484_vm1, %v7799_v52  ;;  %v8122_v39 = vor.u32 %v8121_v38, %v8118_v22  ;;  %v8157_v52 = vrot.slane %v8155_v28, 2  ;;  %v8164_v38 = vshll.u32 %v20913_v37, 16  ;;  %v5880_v28 = vadd.f32 %v21086_v21, %v25185_v17 }
 0x2de   : > { %16788 = vmatprep.mubr.msk.bf16.mxu0 %vm484_vm1, %v8105_v53  ;;  %v21360_v0 = vpop.f32.mrf.mxu1  ;;  %v25182_v53 = vld [vmem:[#allocation42_spill] sm:$0xff]  ;;  %v9556_v37 = vrot.slane %v21378_v29, 3  ;;  %v8163_v15 = vrot.slane %v8161_v7, 1  ;;  %v9558_v21 = vrot.slane %v21386_v19, 3  ;;  %v5878_v14 = vadd.f32 %v21096_v23, %v25186_v16  ;;  %v25187_v7 = vld [vmem:[#allocation60_spill] sm:$0xff]  ;;  %v25190_v16 = vld [vmem:[#allocation61_spill] sm:$0xff] }
 0x2df   : > { %25180 = vst [vmem:[#allocation54_spill] sm:$0xff] %v21360_v0  ;;  %v21363_v62 = vpop.f32.mrf.mxu0  ;;  %16814 = vmatprep.mubr.msk.bf16.mxu1 %vm484_vm1, %v25182_v53  ;;  %v8123_v58 = vsel %vm1587_vm4, %v8113_v56, %v8122_v39  ;;  %v8140_v53 = vor.u32 %v8139_v33, %v8136_v8  ;;  %v8166_v56 = vrot.slane %v8164_v38, 2  ;;  %v21401_v8 = vld [vmem:[%s24742_s1 + $0x8] sm:$0xff]   ;;  %v6285_v33 = vadd.f32 %v21300_v32, %v5880_v28 }
 0x2e0   : > { %v21370_v63 = vpop.f32.mrf.mxu1  ;;  %v5881_v23 = vadd.f32 %v21104_v20, %v21018_v61  ;;  %v6283_v32 = vadd.f32 %v21315_v24, %v5878_v14  ;;  %v8170_v20 = vshrl.u32 %v20951_v11, 16 }
 0x2e1   : > { %25183 = vst [vmem:[#allocation64_spill] sm:$0xff] %v21370_v63  ;;  %v21372_v59 = vpop.f32.mrf.mxu0  ;;  %v8149_v63 = vor.u32 %v8148_v13, %v8145_v3  ;;  %v21409_v3 = vsel %vm3088_vm5, %v9554_v10, %v9556_v37  ;;  %v8141_v38 = vsel %vm1587_vm4, %v8131_v2, %v8140_v53  ;;  %v21435_v61 = vor.u32 %v8166_v56, %v8163_v15 }
 0x2e2   : > { %v21380_v22 = vpop.f32.mrf.mxu1  ;;  %v6286_v24 = vadd.f32 %v21326_v26, %v5881_v23  ;;  %v5884_v15 = vadd.f32 %v21120_v12, %v25190_v16  ;;  %v21456_v26 = vld [vmem:[%s17749_s25 + $0x158] sm:$0xff]   ;;  %v8172_v16 = vrot.slane %v8170_v20, 1 }
 0x2e3   : > { %25184 = vst [vmem:[#allocation73_spill] sm:$0xff] %v21380_v22  ;;  %v21382_v40 = vpop.f32.mrf.mxu0  ;;  %v21396_v22 = vor.u32 %v8157_v52, %v8154_v43  ;;  %v8132_v52 = vsel %vm1587_vm4, %v8122_v39, %v8131_v2  ;;  %v21429_v39 = vsel %vm1587_vm4, %v8140_v53, %v8149_v63  ;;  %v21445_v53 = vld [vmem:[%s24743_s2] ss:$0 sm:$0xff] }
 0x2e4   : > { %v21391_v0 = vpop.f32.mrf.mxu1 }
 0x2e5   : > { %v21393_v47 = vpop.f32.mrf.mxu0  ;;  %16789 = vmatmul.mubr.msk.bf16.gmra.mxu0 %vm484_vm1, %v8114_v45  ;;  %16815 = vmatmul.mubr.msk.bf16.vlgmr.msra.gmra.mxu1 %vm484_vm1, %v25187_v7  ;;  %v21418_v45 = vsel %vm3088_vm5, %v9556_v37, %v9558_v21  ;;  %v21433_v2 = vsel %vm1587_vm4, %v8149_v63, %v21396_v22 }
 0x2e6   : > { %16792 = vmatprep.mubr.msk.bf16.mxu0 %vm484_vm1, %v8123_v58  ;;  %v16612_v13 = vpop.f32.mrf.mxu1  ;;  %25188 = vst [vmem:[#allocation74_spill] sm:$0xff] %v21418_v45  ;;  %16881 = vmatpush3.bf16.msra.mxu1 %v21076_v1  ;;  %v25189_v58 = vld [vmem:[#allocation49_spill] sm:$0xff]  ;;  %v5879_v1 = vadd.f32 %v21111_v49, %v21027_v41  ;;  %v8179_v41 = vshrl.u32 %v20963_v57, 16  ;;  %v8182_v49 = vshll.u32 %v20963_v57, 16  ;;  %v9560_v57 = vrot.slane %v21456_v26, 3 }
 0x2e7   : > { %v21413_v43 = vpop.f32.mrf.mxu0  ;;  %v6571_v10 = vadd.f32 %v16612_v13, %v6285_v33  ;;  %16818 = vmatprep.mubr.msk.bf16.mxu1 %vm484_vm1, %v25189_v58  ;;  %16948 = vmatprep.subr.bf16.mxu1 %v21401_v8  ;;  %v8173_v33 = vshll.u32 %v20951_v11, 16  ;;  %v21459_v13 = vld [vmem:[%s17749_s25 + $0x160] sm:$0xff]  }
 0x2e8   : > { %v6442_v17 = vpop.f32.mrf.mxu1  ;;  %v6284_v7 = vadd.f32 %v21337_v35, %v5879_v1  ;;  %v9562_v45 = vrot.slane %v21459_v13, 3  ;;  %v6289_v35 = vadd.f32 %v21350_v54, %v5884_v15  ;;  %v21481_v54 = vsel %vm3088_vm5, %v9558_v21, %v9560_v57 }
 0x2e9   : > { %v21426_v28 = vpop.f32.mrf.mxu0  ;;  %v6603_v63 = vadd.f32 %v21445_v53, %v6571_v10  ;;  %v6569_v37 = vadd.f32 %v6442_v17, %v6283_v32  ;;  %v25191_v10 = vld [vmem:[#allocation69_spill] sm:$0xff] }
 0x2ea   : > { %v16613_v56 = vpop.f32.mrf.mxu1  ;;  %v5882_v58 = vadd.f32 %v21129_v42, %v25191_v10  ;;  %v5885_v42 = vadd.f32 %v21136_v18, %v21060_v50  ;;  %v21486_v15 = vsel %vm3088_vm5, %v9560_v57, %v9562_v45  ;;  %v21500_v10 = vsel %vm1587_vm4, %v21396_v22, %v21435_v61 }
 0x2eb   : > { %v21450_v14 = vpop.f32.mrf.mxu0  ;;  %v6635_v23 = vmax.f32 %v6603_v63, 0.0  ;;  %v6601_v32 = vadd.f32 %v21445_v53, %v6569_v37  ;;  %v6572_v12 = vadd.f32 %v16613_v56, %v6286_v24  ;;  %v8175_v56 = vrot.slane %v8173_v33, 2  ;;  %v25194_v33 = vld [vmem:[#allocation77_spill] sm:$0xff] }
 0x2ec   : > { %v6445_v17 = vpop.f32.mrf.mxu1  ;;  %v5883_v21 = vadd.f32 %v21143_v60, %v25194_v33  ;;  %v6290_v57 = vadd.f32 %v21372_v59, %v5885_v42  ;;  %v21520_v59 = vld [vmem:[%s17749_s25 + $0x170] sm:$0xff]  }
 0x2ed   : > { %v21465_v11 = vpop.f32.mrf.mxu0  ;;  %16793 = vmatmul.mubr.msk.bf16.gmra.mxu0 %vm484_vm1, %v8132_v52  ;;  %6667 = vst [vmem:[%s19882_s17 + $0x110] sm:$0xff] %v6635_v23  ;;  %v6633_v1 = vmax.f32 %v6601_v32, 0.0  ;;  %v6604_v24 = vadd.f32 %v21445_v53, %v6572_v12  ;;  %v6570_v63 = vadd.f32 %v6445_v17, %v6284_v7  ;;  %v25192_v52 = vld [vmem:[#allocation20_spill] sm:$0xff]  ;;  %v25193_v23 = vld [vmem:[#allocation15_spill] sm:$0xff]  ;;  %v21512_v22 = vor.u32 %v8175_v56, %v8172_v16 }
 0x2ee   : > { %16796 = vmatprep.mubr.msk.bf16.mxu0 %vm484_vm1, %v8141_v38  ;;  %v16616_v37 = vpop.f32.mrf.mxu1  ;;  %16819 = vmatmul.mubr.msk.bf16.gmra.mxu1 %vm484_vm1, %v25192_v52  ;;  %v6287_v38 = vadd.f32 %v21363_v62, %v5882_v58  ;;  %v8181_v62 = vrot.slane %v8179_v41, 1  ;;  %v8184_v58 = vrot.slane %v8182_v49, 2  ;;  %v21503_v17 = vld [vmem:[%s17749_s25 + $0x190] ss:$0 sps:$4 sm:$0x33]   ;;  %v8188_v41 = vshrl.u32 %v21012_v55, 16 }
 0x2ef   : > { %v21478_v20 = vpop.f32.mrf.mxu0  ;;  %6665 = vst [vmem:[%s19882_s17 + $0x100] sm:$0xff] %v6633_v1  ;;  %v6636_v50 = vmax.f32 %v6604_v24, 0.0  ;;  %v6602_v18 = vadd.f32 %v21445_v53, %v6570_v63  ;;  %v6575_v7 = vadd.f32 %v16616_v37, %v6289_v35  ;;  %16822 = vmatprep.mubr.msk.bf16.mxu1 %vm484_vm1, %v25193_v23  ;;  %v25195_v24 = vld [vmem:[#allocation27_spill] sm:$0xff]  ;;  %v8191_v49 = vshll.u32 %v21012_v55, 16 }
 0x2f0   : > { %v6458_v32 = vpop.f32.mrf.mxu1  ;;  %v5888_v63 = vadd.f32 %v21152_v30, %v25195_v24  ;;  %v21517_v23 = vld [vmem:[%s17749_s25 + $0x168] sm:$0xff]   ;;  %v6288_v42 = vadd.f32 %v21382_v40, %v5883_v21  ;;  %v8197_v33 = vshrl.u32 %v21503_v17, 16  ;;  %v24810_v40 = vrot.slane %v21520_v59, 3 }
 0x2f1   : > { %v21495_v12 = vpop.f32.mrf.mxu0  ;;  %6668 = vst [vmem:[%s19882_s17 + $0x118] sm:$0xff] %v6636_v50  ;;  %v6634_v35 = vmax.f32 %v6602_v18, 0.0  ;;  %v6607_v60 = vadd.f32 %v21445_v53, %v6575_v7  ;;  %v6573_v1 = vadd.f32 %v6458_v32, %v6287_v38  ;;  %v25196_v18 = vld [vmem:[#allocation62_spill] sm:$0xff]  ;;  %v9564_v32 = vrot.slane %v21517_v23, 3  ;;  %v25198_v24 = vld [vmem:[#allocation67_spill] sm:$0xff] }
 0x2f2   : > { %v16617_v37 = vpop.f32.mrf.mxu1  ;;  %v5886_v16 = vadd.f32 %v21161_v5, %v25196_v18  ;;  %v6293_v21 = vadd.f32 %v21393_v47, %v5888_v63  ;;  %v8200_v18 = vshll.u32 %v21503_v17, 16 }
 0x2f3   : > { %v21510_v52 = vpop.f32.mrf.mxu0  ;;  %6666 = vst [vmem:[%s19882_s17 + $0x108] sm:$0xff] %v6634_v35  ;;  %v6639_v38 = vmax.f32 %v6607_v60, 0.0  ;;  %v6605_v30 = vadd.f32 %v21445_v53, %v6573_v1  ;;  %v6576_v50 = vadd.f32 %v16617_v37, %v6290_v57  ;;  %v25197_v60 = vld [vmem:[#allocation28_spill] sm:$0xff]  ;;  %v21549_v47 = vsel %vm3088_vm5, %v9562_v45, %v9564_v32 }
 0x2f4   : > { %v6461_v56 = vpop.f32.mrf.mxu1 }
 0x2f5   : > { %v21527_v7 = vpop.f32.mrf.mxu0  ;;  %16797 = vmatmul.mubr.msk.bf16.gmra.mxu0 %vm484_vm1, %v21429_v39  ;;  %6671 = vst [vmem:[%s19882_s17 + $0x130] sm:$0xff] %v6639_v38  ;;  %v6637_v57 = vmax.f32 %v6605_v30, 0.0  ;;  %v6608_v35 = vadd.f32 %v21445_v53, %v6576_v50  ;;  %v6574_v5 = vadd.f32 %v6461_v56, %v6288_v42  ;;  %v5889_v39 = vadd.f32 %v21168_v31, %v25197_v60  ;;  %v25199_v30 = vld [vmem:[#allocation70_spill] sm:$0xff] }
 0x2f6   : > { %16800 = vmatprep.mubr.msk.bf16.mxu0 %vm484_vm1, %v21433_v2  ;;  %v16620_v1 = vpop.f32.mrf.mxu1  ;;  %16823 = vmatmul.mubr.msk.bf16.gmra.mxu1 %vm484_vm1, %v25198_v24  ;;  %v21554_v2 = vsel %vm3088_vm5, %v9564_v32, %v24810_v40  ;;  %v6291_v31 = vadd.f32 %v21413_v43, %v5886_v16  ;;  %v25200_v50 = vld [vmem:[#allocation66_spill] sm:$0xff]  ;;  %v8185_v32 = vor.u32 %v8184_v58, %v8181_v62  ;;  %v8190_v24 = vrot.slane %v8188_v41, 1 }
 0x2f7   : > { %v21543_v37 = vpop.f32.mrf.mxu0  ;;  %6669 = vst [vmem:[%s19882_s17 + $0x120] sm:$0xff] %v6637_v57  ;;  %v6640_v63 = vmax.f32 %v6608_v35, 0.0  ;;  %v6606_v42 = vadd.f32 %v21445_v53, %v6574_v5  ;;  %v6579_v38 = vadd.f32 %v16620_v1, %v6293_v21  ;;  %16826 = vmatprep.mubr.msk.bf16.mxu1 %vm484_vm1, %v25199_v30  ;;  %v5887_v56 = vadd.f32 %v21175_v36, %v25200_v50  ;;  %v25201_v5 = vld [vmem:[#allocation29_spill] sm:$0xff] }
 0x2f8   : > { %v6474_v45 = vpop.f32.mrf.mxu1  ;;  %v8193_v43 = vrot.slane %v8191_v49, 2  ;;  %v6294_v16 = vadd.f32 %v21426_v28, %v5889_v39  ;;  %v25202_v1 = vld [vmem:[#allocation9_spill] sm:$0xff]  ;;  %v8177_v62 = vsel %vm1587_vm4, %v21435_v61, %v21512_v22  ;;  %v21575_v58 = vrot.slane %v8197_v33, 1  ;;  %v21583_v49 = vld [vmem:[%s17749_s25 + $0x180] sm:$0xff]  }
 0x2f9   : > { %v21563_v60 = vpop.f32.mrf.mxu0  ;;  %6672 = vst [vmem:[%s19882_s17 + $0x138] sm:$0xff] %v6640_v63  ;;  %v6638_v57 = vmax.f32 %v6606_v42, 0.0  ;;  %v6611_v21 = vadd.f32 %v21445_v53, %v6579_v38  ;;  %v6577_v35 = vadd.f32 %v6474_v45, %v6291_v31  ;;  %v5892_v36 = vadd.f32 %v25202_v1, %v25201_v5  ;;  %v21580_v28 = vld [vmem:[%s17749_s25 + $0x178] sm:$0xff]   ;;  %v8738_v38 = vld [vmem:[%s17749_s25 + $0x120] sm:$0xc]  ;;  %v25203_v45 = vld [vmem:[#allocation68_spill] sm:$0xff] }
 0x2fa   : > { %v16621_v30 = vpop.f32.mrf.mxu1  ;;  %v21577_v41 = vrot.slane %v8200_v18, 2  ;;  %v6292_v39 = vadd.f32 %v21450_v14, %v5887_v56  ;;  %v25204_v5 = vld [vmem:[#allocation32_spill] sm:$0xff]  ;;  %v21595_v18 = vor.u32 %v8193_v43, %v8190_v24  ;;  %v9568_v40 = vrot.slane %v21580_v28, 3 }
 0x2fb   : > { %v21570_v50 = vpop.f32.mrf.mxu0  ;;  %6670 = vst [vmem:[%s19882_s17 + $0x128] sm:$0xff] %v6638_v57  ;;  %v6643_v31 = vmax.f32 %v6611_v21, 0.0  ;;  %v6609_v63 = vadd.f32 %v21445_v53, %v6577_v35  ;;  %v6580_v42 = vadd.f32 %v16621_v30, %v6294_v16  ;;  %v5890_v61 = vadd.f32 %v25204_v5, %v25203_v45  ;;  %v25205_v35 = vld [vmem:[#allocation18_spill] sm:$0xff]  ;;  %v25206_v24 = vld [vmem:[#allocation52_spill] sm:$0xff] }
 0x2fc   : > { %v6477_v33 = vpop.f32.mrf.mxu1  ;;  %v9570_v14 = vrot.slane %v21583_v49, 3  ;;  %v6297_v56 = vadd.f32 %v21465_v11, %v5892_v36  ;;  %v5893_v30 = vadd.f32 %v21205_v46, %v25205_v35  ;;  %v21610_v45 = vcombine.low %v8738_v38, %v21271_v51  ;;  %v25208_v51 = vld [vmem:[#allocation58_spill] sm:$0xff] }
 0x2fd   : > { %v21591_v1 = vpop.f32.mrf.mxu0  ;;  %16801 = vmatmul.mubr.msk.bf16.gmra.mxu0 %vm484_vm1, %v21500_v10  ;;  %6675 = vst [vmem:[%s19882_s17 + $0x150] sm:$0xff] %v6643_v31  ;;  %v6641_v16 = vmax.f32 %v6609_v63, 0.0  ;;  %v6612_v57 = vadd.f32 %v21445_v53, %v6580_v42  ;;  %v6578_v21 = vadd.f32 %v6477_v33, %v6292_v39  ;;  %v25207_v11 = vrot.slane %v21520_v59, 3  ;;  %v25209_v42 = vld [vmem:[#allocation5_spill] sm:$0xff] }
 0x2fe   : > { %16804 = vmatprep.mubr.msk.bf16.mxu0 %vm484_vm1, %v8177_v62  ;;  %v16624_v10 = vpop.f32.mrf.mxu1  ;;  %16827 = vmatmul.mubr.msk.bf16.gmra.mxu1 %vm484_vm1, %v25206_v24  ;;  %v21620_v62 = vsel %vm3088_vm5, %v9568_v40, %v9570_v14  ;;  %v6295_v46 = vadd.f32 %v21478_v20, %v5890_v61  ;;  %v5891_v38 = vadd.f32 %v21211_v25, %v25209_v42  ;;  %v24811_v42 = vrot.slane %v21333_v9, 2 }
 0x2ff   : > { %v21607_v43 = vpop.f32.mrf.mxu0  ;;  %v21615_v36 = vsel %vm3088_vm5, %v25207_v11, %v9568_v40  ;;  %6673 = vst [vmem:[%s19882_s17 + $0x140] sm:$0xff] %v6641_v16  ;;  %v6644_v39 = vmax.f32 %v6612_v57, 0.0  ;;  %v6610_v31 = vadd.f32 %v21445_v53, %v6578_v21  ;;  %v6583_v63 = vadd.f32 %v16624_v10, %v6297_v56  ;;  %16830 = vmatprep.mubr.msk.bf16.mxu1 %vm484_vm1, %v25208_v51  ;;  %v25210_v21 = vld [vmem:[#allocation30_spill] sm:$0xff] }
 0x300   : > { %v6490_v5 = vpop.f32.mrf.mxu1  ;;  %v8186_v40 = vsel %vm1587_vm4, %v21512_v22, %v8185_v32  ;;  %v8195_v20 = vsel %vm1587_vm4, %v8185_v32, %v21595_v18  ;;  %v8203_v61 = vor.u32 %v21577_v41, %v21575_v58  ;;  %v6298_v56 = vadd.f32 %v21495_v12, %v5893_v30  ;;  %v21648_v58 = vld [vmem:[%s17749_s25 + $0x188] sm:$0xff]   ;;  %v21651_v12 = vld [vmem:[%s17749_s25 + $0x190] sm:$0xff]  }
 0x301   : > { %v21629_v33 = vpop.f32.mrf.mxu0  ;;  %6676 = vst [vmem:[%s19882_s17 + $0x158] sm:$0xff] %v6644_v39  ;;  %v6642_v16 = vmax.f32 %v6610_v31, 0.0  ;;  %v6615_v25 = vadd.f32 %v21445_v53, %v6583_v63  ;;  %v6581_v57 = vadd.f32 %v6490_v5, %v6295_v46  ;;  %v5896_v35 = vadd.f32 %v21222_v34, %v25210_v21  ;;  %v25211_v39 = vld [vmem:[#allocation71_spill] sm:$0xff] }
 0x302   : > { %v16625_v10 = vpop.f32.mrf.mxu1  ;;  %v8856_v22 = vrot.slane %v21610_v45, 2  ;;  %v8857_v32 = vrot.slane %v21278_v48, 2  ;;  %v8859_v11 = vrot.slane %v21285_v6, 2  ;;  %v6296_v41 = vadd.f32 %v21510_v52, %v5891_v38  ;;  %v25213_v21 = vld [vmem:[#allocation23_spill] sm:$0xff] }
 0x303   : > { %v21642_v24 = vpop.f32.mrf.mxu0  ;;  %6674 = vst [vmem:[%s19882_s17 + $0x148] sm:$0xff] %v6642_v16  ;;  %v6647_v30 = vmax.f32 %v6615_v25, 0.0  ;;  %v6613_v34 = vadd.f32 %v21445_v53, %v6581_v57  ;;  %v6584_v46 = vadd.f32 %v16625_v10, %v6298_v56  ;;  %v5894_v31 = vadd.f32 %v21232_v44, %v25211_v39  ;;  %v25212_v44 = vld [vmem:[#allocation24_spill] sm:$0xff] }
 0x304   : > { %v6493_v63 = vpop.f32.mrf.mxu1  ;;  %v9572_v5 = vrot.slane %v21648_v58, 3  ;;  %v9574_v52 = vrot.slane %v21651_v12, 3  ;;  %v6301_v38 = vadd.f32 %v21527_v7, %v5896_v35  ;;  %v5897_v57 = vadd.f32 %v21239_v4, %v25212_v44  ;;  %v25218_v44 = vld [vmem:[#allocation79_spill] sm:$0xff] }
 0x305   : > { %v21658_v51 = vpop.f32.mrf.mxu0  ;;  %16805 = vmatmul.mubr.msk.bf16.gmra.mxu0 %vm484_vm1, %v8186_v40  ;;  %6679 = vst [vmem:[%s19882_s17 + $0x170] sm:$0xff] %v6647_v30  ;;  %v6645_v16 = vmax.f32 %v6613_v34, 0.0  ;;  %v6616_v56 = vadd.f32 %v21445_v53, %v6584_v46  ;;  %v6582_v25 = vadd.f32 %v6493_v63, %v6296_v41  ;;  %v8489_v39 = vrot.slane %v21503_v17, 2  ;;  %v25215_v34 = vld [vmem:[#allocation55_spill] sm:$0xff] }
 0x306   : > { %16808 = vmatprep.mubr.msk.bf16.mxu0 %vm484_vm1, %v8195_v20  ;;  %v16628_v40 = vpop.f32.mrf.mxu1  ;;  %16831 = vmatmul.mubr.msk.bf16.gmra.mxu1 %vm484_vm1, %v25213_v21  ;;  %v21678_v7 = vsel %vm3088_vm5, %v9570_v14, %v9572_v5  ;;  %v21683_v20 = vsel %vm3088_vm5, %v9572_v5, %v9574_v52  ;;  %v6299_v4 = vadd.f32 %v21543_v37, %v5894_v31  ;;  %v25216_v17 = vld [vmem:[#allocation31_spill] sm:$0xff] }
 0x307   : > { %v21672_v10 = vpop.f32.mrf.mxu0  ;;  %25214 = vst [vmem:[#allocation80_spill] sm:$0xff] %v21683_v20  ;;  %6677 = vst [vmem:[%s19882_s17 + $0x160] sm:$0xff] %v6645_v16  ;;  %v6648_v35 = vmax.f32 %v6616_v56, 0.0  ;;  %v6614_v41 = vadd.f32 %v21445_v53, %v6582_v25  ;;  %v6587_v30 = vadd.f32 %v16628_v40, %v6301_v38  ;;  %16834 = vmatprep.mubr.msk.bf16.mxu1 %vm484_vm1, %v25215_v34  ;;  %v25217_v25 = vld [vmem:[#allocation72_spill] sm:$0xff] }
 0x308   : > { %v5895_v46 = vadd.f32 %v21246_v27, %v25216_v17  ;;  %v6506_v14 = vpop.f32.mrf.mxu1  ;;  %v8204_v5 = vsel %vm1587_vm4, %v21595_v18, %v8203_v61  ;;  %v8858_v37 = vsel %vm1994_vm2, %v8856_v22, %v8857_v32  ;;  %v21698_v31 = vsel %vm1994_vm2, %v8857_v32, %v8859_v11  ;;  %v25220_v22 = vld [vmem:[#allocation17_spill] sm:$0xff]  ;;  %v25222_v17 = vld [vmem:[#allocation75_spill] sm:$0xff] }
 0x309   : > { %v21692_v63 = vpop.f32.mrf.mxu0  ;;  %v6302_v38 = vadd.f32 %v21563_v60, %v5897_v57  ;;  %6680 = vst [vmem:[%s19882_s17 + $0x178] sm:$0xff] %v6648_v35  ;;  %v6646_v16 = vmax.f32 %v6614_v41, 0.0  ;;  %v6619_v56 = vadd.f32 %v21445_v53, %v6587_v30  ;;  %v6585_v27 = vadd.f32 %v6506_v14, %v6299_v4  ;;  %v21719_v57 = vld [vmem:[%s17749_s25 + $0x198] sm:$0xff]  }
 0x30a   : > { %v5900_v40 = vadd.f32 %v25218_v44, %v25217_v25  ;;  %v16629_v21 = vpop.f32.mrf.mxu1  ;;  %v21710_v18 = vsel %vm1994_vm2, %v8859_v11, %v24811_v42  ;;  %v25219_v61 = vrot.slane %v21012_v55, 2  ;;  %v24813_v32 = vrot.slane %v25220_v22, 2  ;;  %25221 = vst [vmem:[#allocation81_spill] sm:$0xff] %v21719_v57  ;;  %v25223_v11 = vld [vmem:[#allocation82_spill] sm:$0xff] }
 0x30b   : > { %v21705_v34 = vpop.f32.mrf.mxu0  ;;  %v6300_v4 = vadd.f32 %v21570_v50, %v5895_v46  ;;  %6678 = vst [vmem:[%s19882_s17 + $0x168] sm:$0xff] %v6646_v16  ;;  %v6651_v35 = vmax.f32 %v6619_v56, 0.0  ;;  %v6617_v41 = vadd.f32 %v21445_v53, %v6585_v27  ;;  %v6588_v30 = vadd.f32 %v16629_v21, %v6302_v38  ;;  %v25224_v27 = vld [vmem:[#allocation76_spill] sm:$0xff]  ;;  %v25225_v21 = vld [vmem:[#allocation83_spill] sm:$0xff] }
 0x30c   : > { %v21715_v60 = vsel %vm1994_vm2, %v25219_v61, %v8489_v39  ;;  %v5898_v14 = vadd.f32 %v25223_v11, %v25222_v17  ;;  %v6509_v25 = vpop.f32.mrf.mxu1  ;;  %v9143_v39 = vshrl.u32 %v21610_v45, 16  ;;  %v9146_v44 = vshll.u32 %v21610_v45, 16  ;;  %v25226_v17 = vld [vmem:[#allocation25_spill] sm:$0xff] }
 0x30d   : > { %v21726_v55 = vpop.f32.mrf.mxu0  ;;  %16809 = vmatmul.mubr.msk.bf16.gmra.mxu0 %vm484_vm1, %v8204_v5  ;;  %v24812_v50 = vrot.slane %v21719_v57, 3  ;;  %v6305_v46 = vadd.f32 %v21591_v1, %v5900_v40  ;;  %6683 = vst [vmem:[%s19882_s17 + $0x190] sm:$0xff] %v6651_v35  ;;  %v6649_v16 = vmax.f32 %v6617_v41, 0.0  ;;  %v6620_v38 = vadd.f32 %v21445_v53, %v6588_v30  ;;  %v25228_v30 = vld [vmem:[#allocation57_spill] sm:$0xff] }
 0x30e   : > { %v6586_v56 = vadd.f32 %v6509_v25, %v6300_v4  ;;  %16848 = vmatprep.mubr.msk.bf16.mxu0 %vm484_vm1, %v8858_v37  ;;  %v5901_v61 = vadd.f32 %v25225_v21, %v25224_v27  ;;  %v16632_v5 = vpop.f32.mrf.mxu1  ;;  %16835 = vmatmul.mubr.msk.bf16.gmra.mxu1 %vm484_vm1, %v25226_v17  ;;  %v9151_v11 = vshrl.u32 %v21278_v48, 16  ;;  %v9154_v1 = vshll.u32 %v21278_v48, 16  ;;  %v25229_v25 = vld [vmem:[#allocation21_spill] sm:$0xff]  ;;  %v25230_v27 = vld [vmem:[#allocation38_spill] sm:$0xff] }
 0x30f   : > { %v21740_v45 = vpop.f32.mrf.mxu0  ;;  %v21749_v37 = vsel %vm3088_vm5, %v9574_v52, %v24812_v50  ;;  %v6303_v40 = vadd.f32 %v21607_v43, %v5898_v14  ;;  %6681 = vst [vmem:[%s19882_s17 + $0x180] sm:$0xff] %v6649_v16  ;;  %v6652_v4 = vmax.f32 %v6620_v38, 0.0  ;;  %v6591_v41 = vadd.f32 %v16632_v5, %v6305_v46  ;;  %16838 = vmatprep.mubr.msk.bf16.mxu1 %vm484_vm1, %v25228_v30  ;;  %v25232_v5 = vld [vmem:[#allocation12_spill] sm:$0xff] }
 0x310   : > { %25227 = vst [vmem:[#allocation86_spill] sm:$0xff] %v21749_v37  ;;  %v6618_v35 = vadd.f32 %v21445_v53, %v6586_v56  ;;  %v5899_v48 = vadd.f32 %v25230_v27, %v25229_v25  ;;  %v6522_v21 = vpop.f32.mrf.mxu1  ;;  %v21760_v42 = vrot.slane %v9143_v39, 2  ;;  %v21762_v52 = vrot.slane %v9146_v44, 3  ;;  %v25231_v56 = vld [vmem:[#allocation84_spill] sm:$0xff] }
 0x311   : > { %v21758_v17 = vpop.f32.mrf.mxu0  ;;  %v9160_v43 = vshrl.u32 %v21285_v6, 16  ;;  %v6306_v14 = vadd.f32 %v21629_v33, %v5901_v61  ;;  %6684 = vst [vmem:[%s19882_s17 + $0x198] sm:$0xff] %v6652_v4  ;;  %v6623_v16 = vadd.f32 %v21445_v53, %v6591_v41  ;;  %v6589_v38 = vadd.f32 %v6522_v21, %v6303_v40  ;;  %v21776_v33 = vld [vmem:[%s24742_s1] sm:$0xff]   ;;  %v25234_v21 = vld [vmem:[#allocation45_spill] sm:$0xff] }
 0x312   : > { %v6650_v46 = vmax.f32 %v6618_v35, 0.0  ;;  %v5904_v30 = vadd.f32 %v25232_v5, %v25231_v56  ;;  %v16633_v25 = vpop.f32.mrf.mxu1  ;;  %v9153_v39 = vrot.slane %v9151_v11, 2  ;;  %v9156_v50 = vrot.slane %v9154_v1, 3  ;;  %v25233_v41 = vld [vmem:[#allocation26_spill] sm:$0xff] }
 0x313   : > { %v21770_v27 = vpop.f32.mrf.mxu0  ;;  %v9163_v44 = vshll.u32 %v21285_v6, 16  ;;  %v6304_v61 = vadd.f32 %v21642_v24, %v5899_v48  ;;  %v6655_v40 = vmax.f32 %v6623_v16, 0.0  ;;  %v6621_v4 = vadd.f32 %v21445_v53, %v6589_v38 }
 0x314   : > { %6682 = vst [vmem:[%s19882_s17 + $0x188] sm:$0xff] %v6650_v46  ;;  %v6592_v35 = vadd.f32 %v16633_v25, %v6306_v14  ;;  %v5902_v56 = vadd.f32 %v25234_v21, %v25233_v41  ;;  %v6525_v11 = vpop.f32.mrf.mxu1  ;;  %v25235_v6 = vrot.slane %v21333_v9, 2  ;;  %v9149_v48 = vor.u32 %v21762_v52, %v21760_v42  ;;  %v25236_v25 = vld [vmem:[#allocation39_spill] sm:$0xff]  ;;  %v25238_v41 = vld [vmem:[#allocation46_spill] sm:$0xff] }
 0x315   : > { %v21783_v1 = vpop.f32.mrf.mxu0  ;;  %16849 = vmatmul.mubr.msk.bf16.vlgmr.msra.gmra.mxu0 %vm484_vm1, %v21698_v31  ;;  %v9162_v46 = vrot.slane %v9160_v43, 2  ;;  %v6309_v14 = vadd.f32 %v21658_v51, %v5904_v30  ;;  %6687 = vst [vmem:[%s19882_s17 + $0x1b0] sm:$0xff] %v6655_v40  ;;  %v6653_v16 = vmax.f32 %v6621_v4, 0.0  ;;  %v6590_v5 = vadd.f32 %v6525_v11, %v6304_v61  ;;  %v25237_v31 = vld [vmem:[#allocation33_spill] sm:$0xff]  ;;  %v25240_v4 = vld [vmem:[#allocation7_spill] sm:$0xff] }
 0x316   : > { %v8864_v24 = vsel %vm1994_vm2, %v25235_v6, %v24813_v32  ;;  %v6624_v38 = vadd.f32 %v21445_v53, %v6592_v35  ;;  %16915 = vmatpush3.bf16.msra.mxu0 %v25236_v25  ;;  %16852 = vmatprep.mubr.msk.bf16.mxu0 %vm484_vm1, %v21710_v18  ;;  %v5905_v21 = vadd.f32 %v25238_v41, %v25237_v31  ;;  %v16636_v6 = vpop.f32.mrf.mxu1  ;;  %v25239_v32 = vld [vmem:[#allocation59_spill] sm:$0xff]  ;;  %v8865_v51 = vrot.slane %v21378_v29, 2  ;;  %v25242_v35 = vld [vmem:[#allocation53_spill] sm:$0xff]  ;;  %v25244_v31 = vld [vmem:[#allocation54_spill] sm:$0xff] }
 0x317   : > { %16839 = vmatmul.mubr.msk.bf16.gmra.mxu1 %vm484_vm1, %v25239_v32  ;;  %v21804_v42 = vpop.f32.mrf.mxu0  ;;  %v21807_v52 = vor.u32 %v9156_v50, %v9153_v39  ;;  %v9165_v43 = vrot.slane %v9163_v44, 3  ;;  %16982 = vmatprep.subr.bf16.mxu0 %v21776_v33  ;;  %v6307_v30 = vadd.f32 %v21672_v10, %v5902_v56  ;;  %6685 = vst [vmem:[%s19882_s17 + $0x1a0] sm:$0xff] %v6653_v16  ;;  %v25241_v32 = vld [vmem:[#allocation78_spill] sm:$0xff]  ;;  %v8867_v39 = vrot.slane %v21386_v19, 2 }
 0x318   : > { %v6656_v18 = vmax.f32 %v6624_v38, 0.0  ;;  %v6622_v61 = vadd.f32 %v21445_v53, %v6590_v5  ;;  %v6595_v40 = vadd.f32 %v16636_v6, %v6309_v14  ;;  %16842 = vmatprep.mubr.msk.bf16.mxu1 %vm484_vm1, %v25240_v4  ;;  %v5903_v11 = vadd.f32 %v25242_v35, %v25241_v32  ;;  %v6538_v25 = vpop.f32.mrf.mxu1  ;;  %v25243_v5 = vld [vmem:[#allocation34_spill] sm:$0xff] }
 0x319   : > { %v21817_v50 = vpop.f32.mrf.mxu0  ;;  %v9169_v44 = vshrl.u32 %v21333_v9, 16  ;;  %v9172_v10 = vshll.u32 %v21333_v9, 16  ;;  %v6310_v56 = vadd.f32 %v21692_v63, %v5905_v21  ;;  %v6593_v38 = vadd.f32 %v6538_v25, %v6307_v30  ;;  %v25247_v25 = vld [vmem:[#allocation64_spill] sm:$0xff] }
 0x31a   : > { %6688 = vst [vmem:[%s19882_s17 + $0x1b8] sm:$0xff] %v6656_v18  ;;  %v6654_v14 = vmax.f32 %v6622_v61, 0.0  ;;  %v6627_v16 = vadd.f32 %v21445_v53, %v6595_v40  ;;  %v5908_v41 = vadd.f32 %v25244_v31, %v25243_v5  ;;  %v16637_v6 = vpop.f32.mrf.mxu1  ;;  %v25245_v32 = vrot.slane %v25220_v22, 2  ;;  %v25246_v40 = vld [vmem:[#allocation35_spill] sm:$0xff] }
 0x31b   : > { %v21827_v4 = vpop.f32.mrf.mxu0  ;;  %v9158_v9 = vsel %vm2681_vm6, %v9149_v48, %v21807_v52  ;;  %v9166_v63 = vor.u32 %v9165_v43, %v9162_v46  ;;  %v6308_v21 = vadd.f32 %v21705_v34, %v5903_v11  ;;  %v6625_v30 = vadd.f32 %v21445_v53, %v6593_v38 }
 0x31c   : > { %v8866_v35 = vsel %vm1994_vm2, %v25245_v32, %v8865_v51  ;;  %6686 = vst [vmem:[%s19882_s17 + $0x1a8] sm:$0xff] %v6654_v14  ;;  %v6659_v18 = vmax.f32 %v6627_v16, 0.0  ;;  %v6596_v61 = vadd.f32 %v16637_v6, %v6310_v56  ;;  %v5906_v5 = vadd.f32 %v25247_v25, %v25246_v40  ;;  %v6541_v31 = vpop.f32.mrf.mxu1  ;;  %v25248_v56 = vld [vmem:[#allocation36_spill] sm:$0xff]  ;;  %v25249_v14 = vld [vmem:[#allocation73_spill] sm:$0xff] }
 0x31d   : > { %v21839_v37 = vpop.f32.mrf.mxu0  ;;  %16853 = vmatmul.mubr.msk.bf16.gmra.mxu0 %vm484_vm1, %v8864_v24  ;;  %v8868_v32 = vsel %vm1994_vm2, %v8865_v51, %v8867_v39  ;;  %v9171_v20 = vrot.slane %v9169_v44, 2  ;;  %v9174_v48 = vrot.slane %v9172_v10, 3  ;;  %v6313_v34 = vadd.f32 %v21726_v55, %v5908_v41 }
 0x31e   : > { %6691 = vst [vmem:[%s19882_s17 + $0x1d0] sm:$0xff] %v6659_v18  ;;  %v6657_v46 = vmax.f32 %v6625_v30, 0.0  ;;  %v6628_v43 = vadd.f32 %v21445_v53, %v6596_v61  ;;  %v6594_v11 = vadd.f32 %v6541_v31, %v6308_v21  ;;  %16856 = vmatprep.mubr.msk.bf16.mxu0 %vm484_vm1, %v8866_v35  ;;  %v5909_v16 = vadd.f32 %v25249_v14, %v25248_v56  ;;  %v16640_v38 = vpop.f32.mrf.mxu1  ;;  %v25250_v21 = vld [vmem:[#allocation85_spill] sm:$0xff] }
 0x31f   : > { %16843 = vmatmul.mubr.msk.bf16.gmra.mxu1 %vm484_vm1, %v21715_v60  ;;  %v21851_v24 = vpop.f32.mrf.mxu0  ;;  %v8869_v51 = vrot.slane %v21456_v26, 2  ;;  %v9178_v55 = vshrl.u32 %v25220_v22, 16  ;;  %v9181_v44 = vshll.u32 %v25220_v22, 16  ;;  %v6311_v10 = vadd.f32 %v21740_v45, %v5906_v5 }
 0x320   : > { %6689 = vst [vmem:[%s19882_s17 + $0x1c0] sm:$0xff] %v6657_v46  ;;  %v6660_v41 = vmax.f32 %v6628_v43, 0.0  ;;  %v6626_v6 = vadd.f32 %v21445_v53, %v6594_v11  ;;  %v6599_v35 = vadd.f32 %v16640_v38, %v6313_v34  ;;  %16882 = vmatprep.mubr.msk.bf16.mxu1 %vm484_vm1, %v9158_v9  ;;  %v5907_v60 = vadd.f32 %v21391_v0, %v25250_v21  ;;  %v6554_v18 = vpop.f32.mrf.mxu1 }
 0x321   : > { %v21862_v30 = vpop.f32.mrf.mxu0  ;;  %v9175_v61 = vor.u32 %v9174_v48, %v9171_v20  ;;  %v9187_v40 = vshrl.u32 %v21378_v29, 16  ;;  %v9190_v22 = vshll.u32 %v21378_v29, 16  ;;  %v6314_v45 = vadd.f32 %v21758_v17, %v5909_v16 }
 0x322   : > { %6692 = vst [vmem:[%s19882_s17 + $0x1d8] sm:$0xff] %v6660_v41  ;;  %v6658_v25 = vmax.f32 %v6626_v6, 0.0  ;;  %v6631_v5 = vadd.f32 %v21445_v53, %v6599_v35  ;;  %v6597_v31 = vadd.f32 %v6554_v18, %v6311_v10  ;;  %v16641_v9 = vpop.f32.mrf.mxu1  ;;  %v9167_v0 = vsel %vm2681_vm6, %v21807_v52, %v9166_v63 }
 0x323   : > { %v21869_v34 = vpop.f32.mrf.mxu0  ;;  %v8870_v20 = vsel %vm1994_vm2, %v8867_v39, %v8869_v51  ;;  %v9180_v48 = vrot.slane %v9178_v55, 2  ;;  %v9183_v29 = vrot.slane %v9181_v44, 3  ;;  %v6312_v17 = vadd.f32 %v21770_v27, %v5907_v60  ;;  %v21886_v39 = vld [vmem:[%s24742_s1 + $0x10] sm:$0xff]  }
 0x324   : > { %6690 = vst [vmem:[%s19882_s17 + $0x1c8] sm:$0xff] %v6658_v25  ;;  %v6663_v46 = vmax.f32 %v6631_v5, 0.0  ;;  %v6629_v43 = vadd.f32 %v21445_v53, %v6597_v31  ;;  %v6600_v11 = vadd.f32 %v16641_v9, %v6314_v45  ;;  %v6557_v56 = vpop.f32.mrf.mxu1  ;;  %v9176_v52 = vsel %vm2681_vm6, %v9166_v63, %v9175_v61 }
 0x325   : > { %v21879_v14 = vpop.f32.mrf.mxu0  ;;  %16857 = vmatmul.mubr.msk.bf16.gmra.mxu0 %vm484_vm1, %v8868_v32  ;;  %v9189_v16 = vrot.slane %v9187_v40, 2  ;;  %v9192_v38 = vrot.slane %v9190_v22, 3  ;;  %v6598_v44 = vadd.f32 %v6557_v56, %v6312_v17  ;;  %v8871_v10 = vrot.slane %v21459_v13, 2 }
 0x326   : > { %6695 = vst [vmem:[%s19882_s17 + $0x1f0] sm:$0xff] %v6663_v46  ;;  %v6661_v27 = vmax.f32 %v6629_v43, 0.0  ;;  %v6632_v55 = vadd.f32 %v21445_v53, %v6600_v11  ;;  %16860 = vmatprep.mubr.msk.bf16.mxu0 %vm484_vm1, %v8870_v20  ;;  %v16680_v32 = vpop.f32.mrf.mxu1  ;;  %v9184_v41 = vor.u32 %v9183_v29, %v9180_v48  ;;  %v8873_v6 = vrot.slane %v21517_v23, 2 }
 0x327   : > { %16883 = vmatmul.mubr.msk.bf16.vlgmr.msra.gmra.mxu1 %vm484_vm1, %v9167_v0  ;;  %v21893_v63 = vpop.f32.mrf.mxu0  ;;  %v9196_v35 = vshrl.u32 %v21386_v19, 16  ;;  %v6630_v60 = vadd.f32 %v21445_v53, %v6598_v44  ;;  %v21900_v18 = vadd.f32 %v16680_v32, %v21783_v1  ;;  %v9199_v40 = vshll.u32 %v21386_v19, 16 }
 0x328   : > { %6693 = vst [vmem:[%s19882_s17 + $0x1e0] sm:$0xff] %v6661_v27  ;;  %v6664_v21 = vmax.f32 %v6632_v55, 0.0  ;;  %16949 = vmatpush3.bf16.msra.mxu1 %v21401_v8  ;;  %16886 = vmatprep.mubr.msk.bf16.mxu1 %vm484_vm1, %v9176_v52  ;;  %v7236_v22 = vpop.f32.mrf.mxu1  ;;  %v9193_v25 = vor.u32 %v9192_v38, %v9189_v16  ;;  %v9205_v5 = vshrl.u32 %v21456_v26, 16  ;;  %v9208_v31 = vshll.u32 %v21456_v26, 16 }
 0x329   : > { %v21905_v45 = vpop.f32.mrf.mxu0  ;;  %17016 = vmatprep.subr.bf16.mxu1 %v21886_v39  ;;  %v6662_v53 = vmax.f32 %v6630_v60, 0.0  ;;  %v21912_v1 = vadd.f32 %v7236_v22, %v21804_v42  ;;  %v8872_v8 = vsel %vm1994_vm2, %v8869_v51, %v8871_v10  ;;  %v8874_v0 = vsel %vm1994_vm2, %v8871_v10, %v8873_v6 }
 0x32a   : > { %6696 = vst [vmem:[%s19882_s17 + $0x1f8] sm:$0xff] %v6664_v21  ;;  %v16681_v19 = vpop.f32.mrf.mxu1  ;;  %v9185_v48 = vsel %vm2681_vm6, %v9175_v61, %v9184_v41  ;;  %v9198_v29 = vrot.slane %v9196_v35, 2  ;;  %v9201_v17 = vrot.slane %v9199_v40, 3  ;;  %v9194_v26 = vsel %vm2681_vm6, %v9184_v41, %v9193_v25 }
 0x32b   : > { %v21917_v9 = vpop.f32.mrf.mxu0  ;;  %6694 = vst [vmem:[%s19882_s17 + $0x1e8] sm:$0xff] %v6662_v53  ;;  %v21922_v20 = vadd.f32 %v16681_v19, %v21817_v50  ;;  %v9207_v51 = vrot.slane %v9205_v5, 2  ;;  %v9210_v43 = vrot.slane %v9208_v31, 3  ;;  %v8875_v50 = vrot.slane %v21520_v59, 2 }
 0x32c   : > { %v7239_v46 = vpop.f32.mrf.mxu1  ;;  %v8877_v52 = vrot.slane %v21580_v28, 2  ;;  %v9202_v38 = vor.u32 %v9201_v17, %v9198_v29  ;;  %v9217_v27 = vshll.u32 %v21459_v13, 16  ;;  %v9223_v32 = vshrl.u32 %v21517_v23, 16 }
 0x32d   : > { %v21925_v42 = vpop.f32.mrf.mxu0  ;;  %16861 = vmatmul.mubr.msk.bf16.gmra.mxu0 %vm484_vm1, %v8872_v8  ;;  %v21930_v11 = vadd.f32 %v7239_v46, %v21827_v4  ;;  %v9214_v4 = vshrl.u32 %v21459_v13, 16  ;;  %v9211_v10 = vor.u32 %v9210_v43, %v9207_v51  ;;  %v9226_v41 = vshll.u32 %v21517_v23, 16 }
 0x32e   : > { %16864 = vmatprep.mubr.msk.bf16.mxu0 %vm484_vm1, %v8874_v0  ;;  %v16684_v56 = vpop.f32.mrf.mxu1  ;;  %v8878_v40 = vsel %vm1994_vm2, %v8875_v50, %v8877_v52  ;;  %v9203_v22 = vsel %vm2681_vm6, %v9193_v25, %v9202_v38  ;;  %v9219_v31 = vrot.slane %v9217_v27, 3  ;;  %v9235_v46 = vshll.u32 %v21520_v59, 16 }
 0x32f   : > { %16887 = vmatmul.mubr.msk.bf16.gmra.mxu1 %vm484_vm1, %v9185_v48  ;;  %v21935_v61 = vpop.f32.mrf.mxu0  ;;  %v21939_v16 = vadd.f32 %v16684_v56, %v21839_v37  ;;  %v8876_v37 = vsel %vm1994_vm2, %v8873_v6, %v8875_v50  ;;  %v9216_v5 = vrot.slane %v9214_v4, 2  ;;  %v9212_v23 = vsel %vm2681_vm6, %v9202_v38, %v9211_v10 }
 0x330   : > { %16890 = vmatprep.mubr.msk.bf16.mxu1 %vm484_vm1, %v9194_v26  ;;  %v7252_v55 = vpop.f32.mrf.mxu1  ;;  %v9228_v6 = vrot.slane %v9226_v41, 3  ;;  %v8881_v48 = vrot.slane %v21648_v58, 2  ;;  %v9241_v50 = vshrl.u32 %v21580_v28, 16  ;;  %v9244_v56 = vshll.u32 %v21580_v28, 16 }
 0x331   : > { %v21944_v44 = vpop.f32.mrf.mxu0  ;;  %v21949_v35 = vadd.f32 %v7252_v55, %v21851_v24  ;;  %v9225_v24 = vrot.slane %v9223_v32, 2  ;;  %v9220_v17 = vor.u32 %v9219_v31, %v9216_v5  ;;  %v8885_v31 = vrot.slane %v21719_v57, 2 }
 0x332   : > { %v16685_v21 = vpop.f32.mrf.mxu1 }
 0x333   : > { %v21952_v60 = vpop.f32.mrf.mxu0  ;;  %v21956_v13 = vadd.f32 %v16685_v21, %v21862_v30  ;;  %v8879_v30 = vrot.slane %v21583_v49, 2  ;;  %v9229_v43 = vor.u32 %v9228_v6, %v9225_v24  ;;  %v9221_v32 = vsel %vm2681_vm6, %v9211_v10, %v9220_v17 }
 0x334   : > { %v7255_v53 = vpop.f32.mrf.mxu1  ;;  %v9253_v24 = vshll.u32 %v21583_v49, 16 }
 0x335   : > { %v21959_v8 = vpop.f32.mrf.mxu0  ;;  %16865 = vmatmul.mubr.msk.bf16.gmra.mxu0 %vm484_vm1, %v8876_v37  ;;  %v21964_v19 = vadd.f32 %v7255_v53, %v21869_v34  ;;  %v9232_v34 = vshrl.u32 %v21520_v59, 16  ;;  %v8882_v55 = vsel %vm1994_vm2, %v8879_v30, %v8881_v48  ;;  %v9237_v37 = vrot.slane %v9235_v46, 3 }
 0x336   : > { %16868 = vmatprep.mubr.msk.bf16.mxu0 %vm484_vm1, %v8878_v40  ;;  %v16688_v0 = vpop.f32.mrf.mxu1  ;;  %v9230_v28 = vsel %vm2681_vm6, %v9220_v17, %v9229_v43  ;;  %v9259_v17 = vshrl.u32 %v21648_v58, 16 }
 0x337   : > { %16891 = vmatmul.mubr.msk.bf16.gmra.mxu1 %vm484_vm1, %v9203_v22  ;;  %v21969_v25 = vpop.f32.mrf.mxu0  ;;  %v21973_v29 = vadd.f32 %v16688_v0, %v21879_v14  ;;  %v8880_v14 = vsel %vm1994_vm2, %v8877_v52, %v8879_v30  ;;  %v9234_v41 = vrot.slane %v9232_v34, 2  ;;  %v9246_v52 = vrot.slane %v9244_v56, 3 }
 0x338   : > { %16894 = vmatprep.mubr.msk.bf16.mxu1 %vm484_vm1, %v9212_v23  ;;  %v7268_v26 = vpop.f32.mrf.mxu1  ;;  %v9262_v34 = vshll.u32 %v21648_v58, 16 }
 0x339   : > { %v21978_v51 = vpop.f32.mrf.mxu0  ;;  %v21983_v38 = vadd.f32 %v7268_v26, %v21893_v63  ;;  %v9243_v63 = vrot.slane %v9241_v50, 2  ;;  %v9238_v23 = vor.u32 %v9237_v37, %v9234_v41  ;;  %v17565_v26 = vld [vmem:[%s17749_s25 + $0x1a0] ss:$0 sps:$4 sm:$0x33]  }
 0x33a   : > { %v16689_v4 = vpop.f32.mrf.mxu1  ;;  %v9264_v37 = vrot.slane %v9262_v34, 3  ;;  %v9923_v34 = vld [vmem:[%s17749_s25 + $0x180] sm:$0xf] }
 0x33b   : > { %v21986_v27 = vpop.f32.mrf.mxu0  ;;  %v21990_v59 = vadd.f32 %v16689_v4, %v21905_v45  ;;  %v8883_v45 = vrot.slane %v21651_v12, 2  ;;  %v9247_v0 = vor.u32 %v9246_v52, %v9243_v63  ;;  %v9239_v4 = vsel %vm2681_vm6, %v9229_v43, %v9238_v23 }
 0x33c   : > { %v7271_v21 = vpop.f32.mrf.mxu1 }
 0x33d   : > { %v21993_v40 = vpop.f32.mrf.mxu0  ;;  %16869 = vmatmul.mubr.msk.bf16.gmra.mxu0 %vm484_vm1, %v8880_v14  ;;  %v21998_v22 = vadd.f32 %v7271_v21, %v21917_v9  ;;  %v9250_v9 = vshrl.u32 %v21583_v49, 16  ;;  %v8886_v14 = vsel %vm1994_vm2, %v8883_v45, %v8885_v31 }
 0x33e   : > { %16872 = vmatprep.mubr.msk.bf16.mxu0 %vm484_vm1, %v8882_v55  ;;  %v16692_v5 = vpop.f32.mrf.mxu1 }
 0x33f   : > { %16895 = vmatmul.mubr.msk.bf16.gmra.mxu1 %vm484_vm1, %v9221_v32  ;;  %v22003_v10 = vpop.f32.mrf.mxu0  ;;  %v22007_v53 = vadd.f32 %v16692_v5, %v21925_v42  ;;  %v8884_v42 = vsel %vm1994_vm2, %v8881_v48, %v8883_v45  ;;  %v9252_v55 = vrot.slane %v9250_v9, 2  ;;  %v9255_v32 = vrot.slane %v9253_v24, 3 }
 0x340   : > { %16898 = vmatprep.mubr.msk.bf16.mxu1 %vm484_vm1, %v9230_v28  ;;  %v7284_v6 = vpop.f32.mrf.mxu1  ;;  %v9261_v48 = vrot.slane %v9259_v17, 2  ;;  %v9268_v45 = vshrl.u32 %v21651_v12, 16  ;;  %v9277_v24 = vshrl.u32 %v21719_v57, 16 }
 0x341   : > { %v22012_v30 = vpop.f32.mrf.mxu0  ;;  %v22017_v46 = vadd.f32 %v7284_v6, %v21935_v61  ;;  %v9248_v61 = vsel %vm2681_vm6, %v9238_v23, %v9247_v0  ;;  %v9256_v52 = vor.u32 %v9255_v32, %v9252_v55  ;;  %v9280_v6 = vshll.u32 %v21719_v57, 16  ;;  %v22064_v32 = vld [vmem:[%s17749_s25 + $0x1a0] ss:$0 sps:$4 sm:$0x77]  }
 0x342   : > { %v16693_v50 = vpop.f32.mrf.mxu1  ;;  %v9265_v9 = vor.u32 %v9264_v37, %v9261_v48 }
 0x343   : > { %v22021_v56 = vpop.f32.mrf.mxu0  ;;  %v22025_v49 = vadd.f32 %v16693_v50, %v21944_v44  ;;  %v8887_v44 = vrot.slane %v17565_v26, 2  ;;  %v9282_v48 = vrot.slane %v9280_v6, 3 }
 0x344   : > { %v7287_v41 = vpop.f32.mrf.mxu1 }
 0x345   : > { %v22028_v58 = vpop.f32.mrf.mxu0  ;;  %16873 = vmatmul.mubr.msk.bf16.gmra.mxu0 %vm484_vm1, %v8884_v42  ;;  %v22033_v21 = vadd.f32 %v7287_v41, %v21952_v60  ;;  %v9271_v60 = vshll.u32 %v21651_v12, 16  ;;  %v22055_v42 = vld [vmem:[%s17749_s25 + $0x184] sm:$0xf] }
 0x346   : > { %16876 = vmatprep.mubr.msk.bf16.mxu0 %vm484_vm1, %v8886_v14  ;;  %v16696_v28 = vpop.f32.mrf.mxu1  ;;  %25251 = vst [vmem:[#allocation87_spill] sm:$0xff] %v22055_v42  ;;  %v9257_v14 = vsel %vm2681_vm6, %v9247_v0, %v9256_v52  ;;  %v22071_v37 = vcombine.low %v9923_v34, %v22055_v42  ;;  %v25252_v0 = vld [vmem:[#allocation40_spill] sm:$0xff] }
 0x347   : > { %16899 = vmatmul.mubr.msk.bf16.gmra.mxu1 %vm484_vm1, %v9239_v4  ;;  %v22037_v43 = vpop.f32.mrf.mxu0  ;;  %v22040_v63 = vadd.f32 %v16696_v28, %v21959_v8  ;;  %v8888_v8 = vsel %vm1994_vm2, %v8885_v31, %v8887_v44  ;;  %v9270_v4 = vrot.slane %v9268_v45, 2  ;;  %v9273_v55 = vrot.slane %v9271_v60, 3 }
 0x348   : > { %16902 = vmatprep.mubr.msk.bf16.mxu1 %vm484_vm1, %v9248_v61  ;;  %v7300_v5 = vpop.f32.mrf.mxu1  ;;  %v9266_v31 = vsel %vm2681_vm6, %v9256_v52, %v9265_v9  ;;  %v9279_v61 = vrot.slane %v9277_v24, 2  ;;  %v9286_v60 = vshrl.u32 %v22064_v32, 16  ;;  %v10046_v34 = vshll.u32 %v22071_v37, 16 }
 0x349   : > { %v22045_v23 = vpop.f32.mrf.mxu0  ;;  %v22050_v17 = vadd.f32 %v7300_v5, %v21969_v25  ;;  %v9274_v52 = vor.u32 %v9273_v55, %v9270_v4  ;;  %v9289_v5 = vshll.u32 %v22064_v32, 16  ;;  %v22101_v4 = vld [vmem:[%s24742_s1 + $0x18] sm:$0xff]  }
 0x34a   : > { %v16697_v26 = vpop.f32.mrf.mxu1  ;;  %v9283_v6 = vor.u32 %v9282_v48, %v9279_v61  ;;  %25253 = vst [vmem:[#allocation8_spill] sm:$0xff] %v22101_v4  ;;  %v10048_v42 = vrot.slane %v10046_v34, 1 }
 0x34b   : > { %v22057_v50 = vpop.f32.mrf.mxu0  ;;  %v22060_v12 = vadd.f32 %v16697_v26, %v21978_v51  ;;  %v9291_v61 = vrot.slane %v9289_v5, 3 }
 0x34c   : > { %v7303_v41 = vpop.f32.mrf.mxu1 }
 0x34d   : > { %v22066_v25 = vpop.f32.mrf.mxu0  ;;  %16877 = vmatmul.mubr.msk.bf16.gmra.mxu0 %vm484_vm1, %v8888_v8  ;;  %v22074_v51 = vadd.f32 %v7303_v41, %v21986_v27  ;;  %v22090_v8 = vld [vmem:[%s17749_s25 + $0x188] sm:$0xff]   ;;  %v9275_v41 = vsel %vm2681_vm6, %v9265_v9, %v9274_v52 }
 0x34e   : > { %16916 = vmatprep.mubr.msk.bf16.mxu0 %vm484_vm1, %v25252_v0  ;;  %v16700_v44 = vpop.f32.mrf.mxu1  ;;  %v10051_v57 = vshll.u32 %v22090_v8, 16 }
 0x34f   : > { %16903 = vmatmul.mubr.msk.bf16.gmra.mxu1 %vm484_vm1, %v9257_v14  ;;  %v22079_v28 = vpop.f32.mrf.mxu0  ;;  %v22082_v45 = vadd.f32 %v16700_v44, %v21993_v40  ;;  %v9284_v44 = vsel %vm2681_vm6, %v9274_v52, %v9283_v6 }
 0x350   : > { %16906 = vmatprep.mubr.msk.bf16.mxu1 %vm484_vm1, %v9266_v31  ;;  %v7316_v27 = vpop.f32.mrf.mxu1  ;;  %v9288_v31 = vrot.slane %v9286_v60, 2  ;;  %v25255_v60 = vld [vmem:[#allocation41_spill] sm:$0xff] }
 0x351   : > { %v22087_v24 = vpop.f32.mrf.mxu0  ;;  %v22094_v26 = vadd.f32 %v7316_v27, %v22003_v10  ;;  %v25254_v10 = vld [vmem:[#allocation16_spill] sm:$0xff]  ;;  %v10044_v27 = vshrl.u32 %v22071_v37, 16 }
 0x352   : > { %v16701_v40 = vpop.f32.mrf.mxu1 }
 0x353   : > { %v22096_v14 = vpop.f32.mrf.mxu0  ;;  %v22104_v55 = vadd.f32 %v16701_v40, %v22012_v30  ;;  %v22123_v40 = vld [vmem:[%s17749_s25 + $0x190] sm:$0xff]  }
 0x354   : > { %v7319_v48 = vpop.f32.mrf.mxu1 }
 0x355   : > { %v16714_v0 = vpop.f32.mrf.mxu0  ;;  %16917 = vmatmul.mubr.msk.bf16.vlgmr.msra.gmra.mxu0 %vm484_vm1, %v25254_v10  ;;  %v22113_v30 = vadd.f32 %v7319_v48, %v22021_v56  ;;  %v10053_v10 = vrot.slane %v10051_v57, 1 }
 0x356   : > { %v22116_v9 = vadd.f32 %v16714_v0, %v21900_v18  ;;  %16983 = vmatpush3.bf16.msra.mxu0 %v21776_v33  ;;  %16920 = vmatprep.mubr.msk.bf16.mxu0 %vm484_vm1, %v25255_v60  ;;  %v16704_v5 = vpop.f32.mrf.mxu1  ;;  %v9292_v33 = vor.u32 %v9291_v61, %v9288_v31  ;;  %v10049_v0 = vor.u32 %v10048_v42, %v10044_v27  ;;  %v22134_v60 = vld [vmem:[%s17749_s25 + $0x198] sm:$0xff]   ;;  %v10055_v42 = vshrl.u32 %v22090_v8, 16 }
 0x357   : > { %16907 = vmatmul.mubr.msk.bf16.gmra.mxu1 %vm484_vm1, %v9275_v41  ;;  %v7490_v52 = vpop.f32.mrf.mxu0  ;;  %17050 = vmatprep.subr.bf16.mxu0 %v22101_v4  ;;  %v22127_v56 = vadd.f32 %v16704_v5, %v22028_v58  ;;  %v10063_v27 = vshrl.u32 %v22123_v40, 16 }
 0x358   : > { %v22130_v18 = vadd.f32 %v7490_v52, %v21912_v1  ;;  %16910 = vmatprep.mubr.msk.bf16.mxu1 %vm484_vm1, %v9284_v44  ;;  %v7332_v34 = vpop.f32.mrf.mxu1  ;;  %v10059_v1 = vshll.u32 %v22123_v40, 16  ;;  %v9293_v57 = vsel %vm2681_vm6, %v9283_v6, %v9292_v33  ;;  %v25256_v44 = vld [vmem:[#allocation63_spill] sm:$0xff] }
 0x359   : > { %v16715_v48 = vpop.f32.mrf.mxu0  ;;  %v22137_v41 = vadd.f32 %v7332_v34, %v22037_v43 }
 0x35a   : > { %v22140_v4 = vadd.f32 %v16715_v48, %v21922_v20  ;;  %v16705_v58 = vpop.f32.mrf.mxu1  ;;  %v10054_v20 = vsel %vm345_vm0, %v10049_v0, %v10053_v10  ;;  %v10061_v48 = vrot.slane %v10059_v1, 1  ;;  %v22166_v0 = vld [vmem:[%s17749_s25 + $0x1a0] sm:$0xff]  }
 0x35b   : > { %v7493_v5 = vpop.f32.mrf.mxu0  ;;  %v22144_v52 = vadd.f32 %v16705_v58, %v22045_v23  ;;  %v10067_v23 = vshll.u32 %v22134_v60, 16  ;;  %25257 = vst [vmem:[#allocation56_spill] sm:$0xff] %v22166_v0 }
 0x35c   : > { %v22147_v31 = vadd.f32 %v7493_v5, %v21930_v11  ;;  %v7335_v43 = vpop.f32.mrf.mxu1  ;;  %v10057_v5 = vor.u32 %v10055_v42, %v10053_v10 }
 0x35d   : > { %v16718_v61 = vpop.f32.mrf.mxu0  ;;  %16921 = vmatmul.mubr.msk.bf16.gmra.mxu0 %vm484_vm1, %v25256_v44  ;;  %v22157_v34 = vadd.f32 %v7335_v43, %v22057_v50  ;;  %v22176_v44 = vld [vmem:[%s17749_s25 + $0x1a8] sm:$0xff]  }
 0x35e   : > { %v22160_v11 = vadd.f32 %v16718_v61, %v21939_v16  ;;  %16924 = vmatprep.mubr.msk.bf16.mxu0 %vm484_vm1, %v21409_v3  ;;  %v16708_v6 = vpop.f32.mrf.mxu1  ;;  %v10065_v61 = vor.u32 %v10063_v27, %v10061_v48  ;;  %v10069_v3 = vrot.slane %v10067_v23, 1  ;;  %v10071_v27 = vshrl.u32 %v22134_v60, 16 }
 0x35f   : > { %16911 = vmatmul.mubr.msk.bf16.gmra.mxu1 %vm484_vm1, %v9293_v57  ;;  %v7506_v33 = vpop.f32.mrf.mxu0  ;;  %v22169_v58 = vadd.f32 %v16708_v6, %v22066_v25 }
 0x360   : > { %v22172_v50 = vadd.f32 %v7506_v33, %v21949_v35  ;;  %16950 = vmatprep.mubr.msk.bf16.mxu1 %vm484_vm1, %v10054_v20  ;;  %v7348_v16 = vpop.f32.mrf.mxu1  ;;  %v10075_v35 = vshll.u32 %v22166_v0, 16  ;;  %v10062_v20 = vsel %vm345_vm0, %v10057_v5, %v10061_v48  ;;  %v25258_v33 = vld [vmem:[#allocation74_spill] sm:$0xff] }
 0x361   : > { %v16719_v43 = vpop.f32.mrf.mxu0  ;;  %v22179_v57 = vadd.f32 %v7348_v16, %v22079_v28  ;;  %v10079_v16 = vshrl.u32 %v22166_v0, 16 }
 0x362   : > { %v22182_v1 = vadd.f32 %v16719_v43, %v21956_v13  ;;  %v16709_v25 = vpop.f32.mrf.mxu1  ;;  %v10070_v13 = vsel %vm345_vm0, %v10065_v61, %v10069_v3 }
 0x363   : > { %v7509_v6 = vpop.f32.mrf.mxu0  ;;  %v22186_v10 = vadd.f32 %v16709_v25, %v22087_v24  ;;  %v10083_v24 = vshll.u32 %v22176_v44, 16  ;;  %v10077_v25 = vrot.slane %v10075_v35, 1 }
 0x364   : > { %v22189_v42 = vadd.f32 %v7509_v6, %v21964_v19  ;;  %v7351_v28 = vpop.f32.mrf.mxu1  ;;  %v22201_v19 = vld [vmem:[%s24742_s1 + $0x20] sm:$0xff]   ;;  %v22213_v6 = vld [vmem:[%s17749_s25 + $0x1b0] sm:$0xff]  }
 0x365   : > { %v16722_v23 = vpop.f32.mrf.mxu0  ;;  %16925 = vmatmul.mubr.msk.bf16.gmra.mxu0 %vm484_vm1, %v25258_v33  ;;  %v22204_v48 = vadd.f32 %v7351_v28, %v22096_v14  ;;  %v10085_v0 = vrot.slane %v10083_v24, 1  ;;  %v10087_v24 = vshrl.u32 %v22176_v44, 16 }
 0x366   : > { %v22207_v5 = vadd.f32 %v16722_v23, %v21973_v29  ;;  %16928 = vmatprep.mubr.msk.bf16.mxu0 %vm484_vm1, %v21481_v54  ;;  %v16748_v43 = vpop.f32.mrf.mxu1  ;;  %v10073_v29 = vor.u32 %v10071_v27, %v10069_v3  ;;  %v10081_v23 = vor.u32 %v10079_v16, %v10077_v25  ;;  %v10091_v3 = vshll.u32 %v22213_v6, 16 }
 0x367   : > { %16951 = vmatmul.mubr.msk.bf16.vlgmr.msra.gmra.mxu1 %vm484_vm1, %v10062_v20  ;;  %v7522_v61 = vpop.f32.mrf.mxu0  ;;  %v22216_v33 = vadd.f32 %v16748_v43, %v22116_v9  ;;  %v22224_v20 = vld [vmem:[%s17749_s25 + $0x1b8] sm:$0xff]  }
 0x368   : > { %17017 = vmatpush3.bf16.msra.mxu1 %v21886_v39  ;;  %v22220_v14 = vadd.f32 %v7522_v61, %v21983_v38  ;;  %16954 = vmatprep.mubr.msk.bf16.mxu1 %vm484_vm1, %v10070_v13  ;;  %v7888_v28 = vpop.f32.mrf.mxu1  ;;  %v10078_v16 = vsel %vm345_vm0, %v10073_v29, %v10077_v25  ;;  %v10095_v61 = vshrl.u32 %v22213_v6, 16  ;;  %v10093_v29 = vrot.slane %v10091_v3, 1 }
 0x369   : > { %v16723_v54 = vpop.f32.mrf.mxu0  ;;  %17084 = vmatprep.subr.bf16.mxu1 %v22201_v19  ;;  %v22228_v35 = vadd.f32 %v7888_v28, %v22130_v18 }
 0x36a   : > { %v22231_v9 = vadd.f32 %v16723_v54, %v21990_v59  ;;  %v16749_v39 = vpop.f32.mrf.mxu1  ;;  %v10086_v59 = vsel %vm345_vm0, %v10081_v23, %v10085_v0  ;;  %v22257_v54 = vld [vmem:[%s17749_s25 + $0x1c0] sm:$0xff]  }
 0x36b   : > { %v7525_v38 = vpop.f32.mrf.mxu0  ;;  %v22235_v27 = vadd.f32 %v16749_v39, %v22140_v4  ;;  %v10099_v4 = vshll.u32 %v22224_v20, 16  ;;  %v10089_v39 = vor.u32 %v10087_v24, %v10085_v0 }
 0x36c   : > { %v22238_v13 = vadd.f32 %v7525_v38, %v21998_v22  ;;  %v7891_v18 = vpop.f32.mrf.mxu1 }
 0x36d   : > { %v16726_v43 = vpop.f32.mrf.mxu0  ;;  %16929 = vmatmul.mubr.msk.bf16.gmra.mxu0 %vm484_vm1, %v21486_v15  ;;  %v22248_v28 = vadd.f32 %v7891_v18, %v22147_v31  ;;  %v10097_v18 = vor.u32 %v10095_v61, %v10093_v29  ;;  %v10103_v61 = vshrl.u32 %v22224_v20, 16 }
 0x36e   : > { %v22251_v22 = vadd.f32 %v16726_v43, %v22007_v53  ;;  %16932 = vmatprep.mubr.msk.bf16.mxu0 %vm484_vm1, %v21549_v47  ;;  %v16752_v25 = vpop.f32.mrf.mxu1  ;;  %v10101_v47 = vrot.slane %v10099_v4, 1  ;;  %v22267_v43 = vld [vmem:[%s17749_s25 + $0x1c8] sm:$0xff]  }
 0x36f   : > { %16955 = vmatmul.mubr.msk.bf16.gmra.mxu1 %vm484_vm1, %v10078_v16  ;;  %v7538_v15 = vpop.f32.mrf.mxu0  ;;  %v22260_v23 = vadd.f32 %v16752_v25, %v22160_v11 }
 0x370   : > { %v22263_v31 = vadd.f32 %v7538_v15, %v22017_v46  ;;  %16958 = vmatprep.mubr.msk.bf16.mxu1 %vm484_vm1, %v10086_v59  ;;  %v7904_v53 = vpop.f32.mrf.mxu1  ;;  %v10107_v46 = vshll.u32 %v22257_v54, 16  ;;  %v10094_v59 = vsel %vm345_vm0, %v10089_v39, %v10093_v29  ;;  %v10111_v15 = vshrl.u32 %v22257_v54, 16 }
 0x371   : > { %v16727_v38 = vpop.f32.mrf.mxu0  ;;  %v22270_v16 = vadd.f32 %v7904_v53, %v22172_v50 }
 0x372   : > { %v22273_v3 = vadd.f32 %v16727_v38, %v22025_v49  ;;  %v16753_v11 = vpop.f32.mrf.mxu1  ;;  %v10102_v49 = vsel %vm345_vm0, %v10097_v18, %v10101_v47  ;;  %v10109_v39 = vrot.slane %v10107_v46, 1  ;;  %v22299_v38 = vld [vmem:[%s17749_s25 + $0x1d0] sm:$0xff]  }
 0x373   : > { %v7541_v25 = vpop.f32.mrf.mxu0  ;;  %v22277_v0 = vadd.f32 %v16753_v11, %v22182_v1  ;;  %v10115_v1 = vshll.u32 %v22267_v43, 16  ;;  %v10105_v11 = vor.u32 %v10103_v61, %v10101_v47 }
 0x374   : > { %v22280_v24 = vadd.f32 %v7541_v25, %v22033_v21  ;;  %v7907_v50 = vpop.f32.mrf.mxu1 }
 0x375   : > { %v16730_v4 = vpop.f32.mrf.mxu0  ;;  %16933 = vmatmul.mubr.msk.bf16.gmra.mxu0 %vm484_vm1, %v21554_v2  ;;  %v22290_v53 = vadd.f32 %v7907_v50, %v22189_v42  ;;  %v10113_v50 = vor.u32 %v10111_v15, %v10109_v39  ;;  %v10119_v15 = vshrl.u32 %v22267_v43, 16 }
 0x376   : > { %v22293_v21 = vadd.f32 %v16730_v4, %v22040_v63  ;;  %16936 = vmatprep.mubr.msk.bf16.mxu0 %vm484_vm1, %v21615_v36  ;;  %v16756_v29 = vpop.f32.mrf.mxu1  ;;  %v10117_v36 = vrot.slane %v10115_v1, 1  ;;  %v22309_v4 = vld [vmem:[%s17749_s25 + $0x1d8] sm:$0xff]  }
 0x377   : > { %16959 = vmatmul.mubr.msk.bf16.gmra.mxu1 %vm484_vm1, %v10094_v59  ;;  %v7554_v2 = vpop.f32.mrf.mxu0  ;;  %v22302_v18 = vadd.f32 %v16756_v29, %v22207_v5  ;;  %25259 = vst [vmem:[#allocation13_spill] sm:$0xff] %v22309_v4 }
 0x378   : > { %v22305_v42 = vadd.f32 %v7554_v2, %v22050_v17  ;;  %16962 = vmatprep.mubr.msk.bf16.mxu1 %vm484_vm1, %v10102_v49  ;;  %v7920_v63 = vpop.f32.mrf.mxu1  ;;  %v10123_v17 = vshll.u32 %v22299_v38, 16  ;;  %v10110_v49 = vsel %vm345_vm0, %v10105_v11, %v10109_v39  ;;  %v10127_v2 = vshrl.u32 %v22299_v38, 16 }
 0x379   : > { %v16731_v25 = vpop.f32.mrf.mxu0  ;;  %v22312_v59 = vadd.f32 %v7920_v63, %v22220_v14 }
 0x37a   : > { %v22315_v46 = vadd.f32 %v16731_v25, %v22060_v12  ;;  %v16757_v5 = vpop.f32.mrf.mxu1  ;;  %v10118_v12 = vsel %vm345_vm0, %v10113_v50, %v10117_v36  ;;  %v10125_v11 = vrot.slane %v10123_v17, 1  ;;  %v22341_v25 = vld [vmem:[%s17749_s25 + $0x1e0] sm:$0xff]  }
 0x37b   : > { %v7557_v29 = vpop.f32.mrf.mxu0  ;;  %v22319_v47 = vadd.f32 %v16757_v5, %v22231_v9  ;;  %v10131_v9 = vshll.u32 %v22309_v4, 16  ;;  %25260 = vst [vmem:[#allocation19_spill] sm:$0xff] %v22341_v25  ;;  %v10121_v5 = vor.u32 %v10119_v15, %v10117_v36 }
 0x37c   : > { %v22322_v61 = vadd.f32 %v7557_v29, %v22074_v51  ;;  %v7923_v14 = vpop.f32.mrf.mxu1 }
 0x37d   : > { %v16734_v1 = vpop.f32.mrf.mxu0  ;;  %16937 = vmatmul.mubr.msk.bf16.gmra.mxu0 %vm484_vm1, %v21620_v62  ;;  %v22332_v63 = vadd.f32 %v7923_v14, %v22238_v13  ;;  %v10129_v14 = vor.u32 %v10127_v2, %v10125_v11  ;;  %v10135_v2 = vshrl.u32 %v22309_v4, 16  ;;  %v22394_v4 = vld [vmem:[%s17749_s25 + $0x1f8] sm:$0xff]  }
 0x37e   : > { %v22335_v51 = vadd.f32 %v16734_v1, %v22082_v45  ;;  %16940 = vmatprep.mubr.msk.bf16.mxu0 %vm484_vm1, %v21678_v7  ;;  %v16760_v39 = vpop.f32.mrf.mxu1  ;;  %v10133_v7 = vrot.slane %v10131_v9, 1  ;;  %v22351_v1 = vld [vmem:[%s17749_s25 + $0x1e8] sm:$0xff]   ;;  %25265 = vst [vmem:[#allocation6_spill] sm:$0xff] %v22394_v4 }
 0x37f   : > { %16963 = vmatmul.mubr.msk.bf16.gmra.mxu1 %vm484_vm1, %v10110_v49  ;;  %v7570_v62 = vpop.f32.mrf.mxu0  ;;  %v22344_v50 = vadd.f32 %v16760_v39, %v22251_v22  ;;  %25261 = vst [vmem:[#allocation14_spill] sm:$0xff] %v22351_v1 }
 0x380   : > { %v22347_v13 = vadd.f32 %v7570_v62, %v22094_v26  ;;  %16966 = vmatprep.mubr.msk.bf16.mxu1 %vm484_vm1, %v10118_v12  ;;  %v7936_v45 = vpop.f32.mrf.mxu1  ;;  %v10139_v26 = vshll.u32 %v22341_v25, 16  ;;  %v10126_v12 = vsel %vm345_vm0, %v10121_v5, %v10125_v11  ;;  %v25262_v62 = vld [vmem:[#allocation80_spill] sm:$0xff]  ;;  %v25263_v11 = vld [vmem:[#allocation86_spill] sm:$0xff]  ;;  %v9578_v5 = vrot.slane %v22064_v32, 3 }
 0x381   : > { %v16735_v29 = vpop.f32.mrf.mxu0  ;;  %v22354_v49 = vadd.f32 %v7936_v45, %v22263_v31  ;;  %v10143_v45 = vshrl.u32 %v22341_v25, 16 }
 0x382   : > { %v22357_v17 = vadd.f32 %v16735_v29, %v22104_v55  ;;  %v16761_v22 = vpop.f32.mrf.mxu1  ;;  %v10134_v55 = vsel %vm345_vm0, %v10129_v14, %v10133_v7 }
 0x383   : > { %v7573_v39 = vpop.f32.mrf.mxu0  ;;  %v22361_v36 = vadd.f32 %v16761_v22, %v22273_v3  ;;  %v10147_v3 = vshll.u32 %v22351_v1, 16 }
 0x384   : > { %v22364_v15 = vadd.f32 %v7573_v39, %v22113_v30  ;;  %v7939_v31 = vpop.f32.mrf.mxu1  ;;  %v10141_v39 = vrot.slane %v10139_v26, 1 }
 0x385   : > { %v16738_v9 = vpop.f32.mrf.mxu0  ;;  %16941 = vmatmul.mubr.msk.bf16.gmra.mxu0 %vm484_vm1, %v25262_v62  ;;  %v22374_v29 = vadd.f32 %v7939_v31, %v22280_v24  ;;  %v22384_v62 = vld [vmem:[%s17749_s25 + $0x1f0] sm:$0xff]   ;;  %v10149_v32 = vrot.slane %v10147_v3, 1 }
 0x386   : > { %v22377_v30 = vadd.f32 %v16738_v9, %v22127_v56  ;;  %16944 = vmatprep.mubr.msk.bf16.mxu0 %vm484_vm1, %v25263_v11  ;;  %v16764_v22 = vpop.f32.mrf.mxu1  ;;  %25264 = vst [vmem:[#allocation47_spill] sm:$0xff] %v22384_v62  ;;  %v10137_v56 = vor.u32 %v10135_v2, %v10133_v7  ;;  %v10145_v11 = vor.u32 %v10143_v45, %v10141_v39  ;;  %v10151_v2 = vshrl.u32 %v22351_v1, 16 }
 0x387   : > { %16967 = vmatmul.mubr.msk.bf16.gmra.mxu1 %vm484_vm1, %v10126_v12  ;;  %v7586_v14 = vpop.f32.mrf.mxu0  ;;  %v22387_v25 = vadd.f32 %v16764_v22, %v22293_v21  ;;  %v25266_v21 = vld [vmem:[#allocation81_spill] sm:$0xff] }
 0x388   : > { %v22390_v24 = vadd.f32 %v7586_v14, %v22137_v41  ;;  %16970 = vmatprep.mubr.msk.bf16.mxu1 %vm484_vm1, %v10134_v55  ;;  %v7952_v31 = vpop.f32.mrf.mxu1  ;;  %v25267_v22 = vrot.slane %v25266_v21, 3  ;;  %v10155_v55 = vshll.u32 %v22384_v62, 16  ;;  %v10163_v21 = vshll.u32 %v22394_v4, 16 }
 0x389   : > { %v16739_v9 = vpop.f32.mrf.mxu0  ;;  %v22397_v12 = vadd.f32 %v7952_v31, %v22305_v42 }
 0x38a   : > { %v22400_v26 = vadd.f32 %v16739_v9, %v22144_v52  ;;  %v9579_v41 = vsel %vm3088_vm5, %v25267_v22, %v9578_v5  ;;  %v16765_v14 = vpop.f32.mrf.mxu1  ;;  %v10142_v52 = vsel %vm345_vm0, %v10137_v56, %v10141_v39  ;;  %v10150_v5 = vsel %vm345_vm0, %v10145_v11, %v10149_v32 }
 0x38b   : > { %v7589_v7 = vpop.f32.mrf.mxu0  ;;  %v22408_v45 = vadd.f32 %v16765_v14, %v22315_v46  ;;  %v10159_v9 = vshrl.u32 %v22384_v62, 16  ;;  %v10153_v56 = vor.u32 %v10151_v2, %v10149_v32  ;;  %v10157_v11 = vrot.slane %v10155_v55, 1  ;;  %v22449_v55 = vld [vmem:[%s17749_s25 + $0x198] sm:$0xff]   ;;  %v22456_v62 = vld [vmem:[%s17749_s25 + $0x1a0] sm:$0xff]  }
 0x38c   : > { %v22411_v3 = vadd.f32 %v7589_v7, %v22157_v34  ;;  %v7955_v42 = vpop.f32.mrf.mxu1 }
 0x38d   : > { %v16742_v31 = vpop.f32.mrf.mxu0  ;;  %16945 = vmatmul.mubr.msk.bf16.gmra.mxu0 %vm484_vm1, %v9579_v41  ;;  %v22419_v22 = vadd.f32 %v7955_v42, %v22322_v61  ;;  %v22428_v41 = vld [vmem:[%s17749_s25 + $0x200] ss:$0 sps:$4 sm:$0x11]   ;;  %v10161_v7 = vor.u32 %v10159_v9, %v10157_v11  ;;  %v22438_v42 = vld [vmem:[%s17749_s25 + $0x194] sm:$0xf]  ;;  %v10167_v9 = vshrl.u32 %v22394_v4, 16 }
 0x38e   : > { %v22422_v34 = vadd.f32 %v16742_v31, %v22169_v58  ;;  %16984 = vmatprep.mubr.msk.bf16.mxu0 %vm484_vm1, %v22071_v37  ;;  %v16768_v46 = vpop.f32.mrf.mxu1  ;;  %25268 = vst [vmem:[#allocation11_spill] sm:$0xff] %v22428_v41  ;;  %25269 = vst [vmem:[#allocation37_spill] sm:$0xff] %v22438_v42  ;;  %v11678_v31 = vld [vmem:[%s17749_s25 + $0x190] sm:$0xc]  ;;  %v25270_v4 = vld [vmem:[#allocation87_spill] sm:$0xff] }
 0x38f   : > { %16971 = vmatmul.mubr.msk.bf16.gmra.mxu1 %vm484_vm1, %v10142_v52  ;;  %v7602_v39 = vpop.f32.mrf.mxu0  ;;  %v22431_v61 = vadd.f32 %v16768_v46, %v22335_v51  ;;  %v10165_v52 = vrot.slane %v10163_v21, 1  ;;  %v10589_v51 = vld [vmem:[%s17749_s25 + $0x180] sm:$0xe]  ;;  %v10171_v21 = vshll.u32 %v22428_v41, 16 }
 0x390   : > { %v22434_v58 = vadd.f32 %v7602_v39, %v22179_v57  ;;  %16974 = vmatprep.mubr.msk.bf16.mxu1 %vm484_vm1, %v10150_v5  ;;  %v7968_v14 = vpop.f32.mrf.mxu1  ;;  %v15196_v57 = vcombine.low %v11678_v31, %v22438_v42  ;;  %v10158_v39 = vsel %vm345_vm0, %v10153_v56, %v10157_v11  ;;  %v11685_v56 = vrot.slane %v22449_v55, 2 }
 0x391   : > { %v16743_v37 = vpop.f32.mrf.mxu0  ;;  %v22442_v32 = vadd.f32 %v7968_v14, %v22347_v13  ;;  %v10166_v41 = vsel %vm345_vm0, %v10161_v7, %v10165_v52  ;;  %v15120_v1 = vcombine.low %v10589_v51, %v25270_v4  ;;  %v11687_v42 = vrot.slane %v22456_v62, 2 }
 0x392   : > { %v22445_v2 = vadd.f32 %v16743_v37, %v22186_v10  ;;  %v16769_v5 = vpop.f32.mrf.mxu1  ;;  %v22461_v10 = vld [vmem:[%s24742_s1 + $0x28] sm:$0xff]   ;;  %v11684_v37 = vrot.slane %v15196_v57, 2  ;;  %v25271_v57 = vld [vmem:[#allocation8_spill] sm:$0xff]  ;;  %v10169_v51 = vor.u32 %v10167_v9, %v10165_v52 }
 0x393   : > { %v7605_v46 = vpop.f32.mrf.mxu0  ;;  %v22464_v13 = vadd.f32 %v16769_v5, %v22357_v17 }
 0x394   : > { %v22467_v14 = vadd.f32 %v7605_v46, %v22204_v48  ;;  %v7971_v11 = vpop.f32.mrf.mxu1  ;;  %v22485_v5 = vsel %vm1994_vm2, %v11684_v37, %v11685_v56  ;;  %v10173_v37 = vrot.slane %v10171_v21, 1 }
 0x395   : > { %v16782_v31 = vpop.f32.mrf.mxu0  ;;  %16985 = vmatmul.mubr.msk.bf16.vlgmr.msra.gmra.mxu0 %vm484_vm1, %v22090_v8  ;;  %v22476_v17 = vadd.f32 %v7971_v11, %v22364_v15  ;;  %25272 = vst [vmem:[#allocation10_spill] sm:$0xff] %v22485_v5  ;;  %v22490_v15 = vsel %vm1994_vm2, %v11685_v56, %v11687_v42 }
 0x396   : > { %v22479_v48 = vadd.f32 %v16782_v31, %v22216_v33  ;;  %17051 = vmatpush3.bf16.msra.mxu0 %v25271_v57  ;;  %16988 = vmatprep.mubr.msk.bf16.mxu0 %vm484_vm1, %v22123_v40  ;;  %v16772_v46 = vpop.f32.mrf.mxu1  ;;  %v10596_v57 = vrot.slane %v22090_v8, 1  ;;  %v10174_v8 = vsel %vm345_vm0, %v10169_v51, %v10173_v37 }
 0x397   : > { %16975 = vmatmul.mubr.msk.bf16.gmra.mxu1 %vm484_vm1, %v10158_v39  ;;  %v8293_v4 = vpop.f32.mrf.mxu0  ;;  %17118 = vmatprep.subr.bf16.mxu0 %v22461_v10  ;;  %v22493_v33 = vadd.f32 %v16772_v46, %v22377_v30  ;;  %v10595_v39 = vrot.slane %v15120_v1, 1  ;;  %v22507_v30 = vld [vmem:[%s17749_s25 + $0x1a8] sm:$0xff]  }
 0x398   : > { %v22496_v7 = vadd.f32 %v8293_v4, %v22228_v35  ;;  %16978 = vmatprep.mubr.msk.bf16.mxu1 %vm484_vm1, %v10166_v41  ;;  %v7984_v11 = vpop.f32.mrf.mxu1  ;;  %v22510_v4 = vld [vmem:[%s17749_s25 + $0x1b0] sm:$0xff]   ;;  %v11689_v1 = vrot.slane %v22507_v30, 2 }
 0x399   : > { %v16783_v31 = vpop.f32.mrf.mxu0  ;;  %v22501_v5 = vadd.f32 %v7984_v11, %v22390_v24  ;;  %v11691_v21 = vrot.slane %v22510_v4, 2 }
 0x39a   : > { %v22504_v56 = vadd.f32 %v16783_v31, %v22235_v27  ;;  %v16773_v46 = vpop.f32.mrf.mxu1  ;;  %v10597_v27 = vsel %vm900_vm3, %v10595_v39, %v10596_v57  ;;  %v22533_v51 = vsel %vm1994_vm2, %v11687_v42, %v11689_v1 }
 0x39b   : > { %v8296_v35 = vpop.f32.mrf.mxu0  ;;  %v22513_v41 = vadd.f32 %v16773_v46, %v22400_v26  ;;  %v22537_v39 = vsel %vm1994_vm2, %v11689_v1, %v11691_v21  ;;  %v10598_v46 = vrot.slane %v22123_v40, 1 }
 0x39c   : > { %v22516_v52 = vadd.f32 %v8296_v35, %v22248_v28  ;;  %v7987_v24 = vpop.f32.mrf.mxu1  ;;  %v25273_v28 = vld [vmem:[#allocation56_spill] sm:$0xff]  ;;  %25274 = vst [vmem:[#allocation43_spill] sm:$0xff] %v22537_v39 }
 0x39d   : > { %v16786_v9 = vpop.f32.mrf.mxu0  ;;  %16989 = vmatmul.mubr.msk.bf16.gmra.mxu0 %vm484_vm1, %v22134_v60  ;;  %v22525_v11 = vadd.f32 %v7987_v24, %v22411_v3  ;;  %v10600_v24 = vrot.slane %v22134_v60, 1  ;;  %v10599_v60 = vsel %vm900_vm3, %v10596_v57, %v10598_v46 }
 0x39e   : > { %v22528_v26 = vadd.f32 %v16786_v9, %v22260_v23  ;;  %16992 = vmatprep.mubr.msk.bf16.mxu0 %vm484_vm1, %v25273_v28  ;;  %v16776_v37 = vpop.f32.mrf.mxu1  ;;  %v22555_v9 = vld [vmem:[%s17749_s25 + $0x1b8] sm:$0xff]  }
 0x39f   : > { %16979 = vmatmul.mubr.msk.bf16.gmra.mxu1 %vm484_vm1, %v10174_v8  ;;  %v8309_v31 = vpop.f32.mrf.mxu0  ;;  %v22540_v3 = vadd.f32 %v16776_v37, %v22422_v34 }
 0x3a0   : > { %v22543_v23 = vadd.f32 %v8309_v31, %v22270_v16  ;;  %17018 = vmatprep.mubr.msk.bf16.mxu1 %vm484_vm1, %v10597_v27  ;;  %v8000_v42 = vpop.f32.mrf.mxu1  ;;  %v22558_v16 = vld [vmem:[%s17749_s25 + $0x1c0] sm:$0xff]  }
 0x3a1   : > { %v16787_v35 = vpop.f32.mrf.mxu0  ;;  %v22549_v8 = vadd.f32 %v8000_v42, %v22434_v58  ;;  %v11693_v58 = vrot.slane %v22555_v9, 2 }
 0x3a2   : > { %v22552_v1 = vadd.f32 %v16787_v35, %v22277_v0  ;;  %v16777_v34 = vpop.f32.mrf.mxu1  ;;  %v10601_v0 = vsel %vm900_vm3, %v10598_v46, %v10600_v24  ;;  %v22574_v35 = vld [vmem:[%s24742_s1 + $0x30] sm:$0xff]  }
 0x3a3   : > { %v8312_v37 = vpop.f32.mrf.mxu0  ;;  %v22561_v27 = vadd.f32 %v16777_v34, %v22445_v2  ;;  %v11695_v2 = vrot.slane %v22558_v16, 2  ;;  %v22586_v34 = vsel %vm1994_vm2, %v11691_v21, %v11693_v58  ;;  %v10602_v21 = vrot.slane %v25273_v28, 1 }
 0x3a4   : > { %v22564_v40 = vadd.f32 %v8312_v37, %v22290_v53  ;;  %v8003_v31 = vpop.f32.mrf.mxu1  ;;  %25275 = vst [vmem:[#allocation51_spill] sm:$0xff] %v22586_v34 }
 0x3a5   : > { %v16790_v42 = vpop.f32.mrf.mxu0  ;;  %16993 = vmatmul.mubr.msk.bf16.gmra.mxu0 %vm484_vm1, %v22176_v44  ;;  %v22578_v53 = vadd.f32 %v8003_v31, %v22467_v14  ;;  %v22590_v39 = vsel %vm1994_vm2, %v11693_v58, %v11695_v2 }
 0x3a6   : > { %v22581_v57 = vadd.f32 %v16790_v42, %v22302_v18  ;;  %16996 = vmatprep.mubr.msk.bf16.mxu0 %vm484_vm1, %v22213_v6  ;;  %v16816_v46 = vpop.f32.mrf.mxu1  ;;  %25276 = vst [vmem:[#allocation44_spill] sm:$0xff] %v22590_v39 }
 0x3a7   : > { %17019 = vmatmul.mubr.msk.bf16.vlgmr.msra.gmra.mxu1 %vm484_vm1, %v10599_v60  ;;  %v8325_v37 = vpop.f32.mrf.mxu0  ;;  %v22593_v14 = vadd.f32 %v16816_v46, %v22479_v48  ;;  %v10604_v60 = vrot.slane %v22176_v44, 1  ;;  %v10603_v44 = vsel %vm900_vm3, %v10600_v24, %v10602_v21 }
 0x3a8   : > { %17085 = vmatpush3.bf16.msra.mxu1 %v22201_v19  ;;  %v22597_v18 = vadd.f32 %v8325_v37, %v22312_v59  ;;  %17022 = vmatprep.mubr.msk.bf16.mxu1 %vm484_vm1, %v10601_v0  ;;  %v8579_v31 = vpop.f32.mrf.mxu1  ;;  %v22610_v19 = vld [vmem:[%s17749_s25 + $0x1c8] sm:$0xff]   ;;  %v22613_v37 = vld [vmem:[%s17749_s25 + $0x1d0] sm:$0xff]  }
 0x3a9   : > { %v16791_v42 = vpop.f32.mrf.mxu0  ;;  %17152 = vmatprep.subr.bf16.mxu1 %v22574_v35  ;;  %v22604_v58 = vadd.f32 %v8579_v31, %v22496_v7  ;;  %v11697_v7 = vrot.slane %v22610_v19, 2 }
 0x3aa   : > { %v22607_v48 = vadd.f32 %v16791_v42, %v22319_v47  ;;  %v16817_v59 = vpop.f32.mrf.mxu1  ;;  %v10605_v47 = vsel %vm900_vm3, %v10602_v21, %v10604_v60  ;;  %v11699_v42 = vrot.slane %v22613_v37, 2 }
 0x3ab   : > { %v8328_v46 = vpop.f32.mrf.mxu0  ;;  %v22616_v28 = vadd.f32 %v16817_v59, %v22504_v56 }
 0x3ac   : > { %v22619_v0 = vadd.f32 %v8328_v46, %v22332_v63  ;;  %v8582_v31 = vpop.f32.mrf.mxu1  ;;  %v22636_v63 = vsel %vm1994_vm2, %v11695_v2, %v11697_v7  ;;  %v22640_v59 = vsel %vm1994_vm2, %v11697_v7, %v11699_v42 }
 0x3ad   : > { %v16794_v39 = vpop.f32.mrf.mxu0  ;;  %16997 = vmatmul.mubr.msk.bf16.gmra.mxu0 %vm484_vm1, %v22224_v20  ;;  %v22628_v34 = vadd.f32 %v8582_v31, %v22516_v52  ;;  %25277 = vst [vmem:[#allocation65_spill] sm:$0xff] %v22636_v63  ;;  %25278 = vst [vmem:[#allocation48_spill] sm:$0xff] %v22640_v59  ;;  %v10608_v31 = vrot.slane %v22224_v20, 1  ;;  %v22658_v59 = vld [vmem:[%s17749_s25 + $0x1d8] sm:$0xff]  }
 0x3ae   : > { %v22631_v56 = vadd.f32 %v16794_v39, %v22344_v50  ;;  %17000 = vmatprep.mubr.msk.bf16.mxu0 %vm484_vm1, %v22257_v54  ;;  %v16820_v24 = vpop.f32.mrf.mxu1  ;;  %v10606_v39 = vrot.slane %v22213_v6, 1 }
 0x3af   : > { %17023 = vmatmul.mubr.msk.bf16.gmra.mxu1 %vm484_vm1, %v10603_v44  ;;  %v8341_v21 = vpop.f32.mrf.mxu0  ;;  %v22643_v52 = vadd.f32 %v16820_v24, %v22528_v26 }
 0x3b0   : > { %v22646_v50 = vadd.f32 %v8341_v21, %v22354_v49  ;;  %17026 = vmatprep.mubr.msk.bf16.mxu1 %vm484_vm1, %v10605_v47  ;;  %v8595_v2 = vpop.f32.mrf.mxu1  ;;  %v22661_v49 = vld [vmem:[%s17749_s25 + $0x1e0] sm:$0xff]   ;;  %v10607_v20 = vsel %vm900_vm3, %v10604_v60, %v10606_v39 }
 0x3b1   : > { %v16795_v46 = vpop.f32.mrf.mxu0  ;;  %v22652_v44 = vadd.f32 %v8595_v2, %v22543_v23  ;;  %v11701_v23 = vrot.slane %v22658_v59, 2 }
 0x3b2   : > { %v22655_v7 = vadd.f32 %v16795_v46, %v22361_v36  ;;  %v16821_v26 = vpop.f32.mrf.mxu1  ;;  %v10609_v36 = vsel %vm900_vm3, %v10606_v39, %v10608_v31  ;;  %v11703_v46 = vrot.slane %v22661_v49, 2 }
 0x3b3   : > { %v8344_v24 = vpop.f32.mrf.mxu0  ;;  %v22664_v47 = vadd.f32 %v16821_v26, %v22552_v1 }
 0x3b4   : > { %v22667_v6 = vadd.f32 %v8344_v24, %v22374_v29  ;;  %v8598_v21 = vpop.f32.mrf.mxu1  ;;  %v22684_v29 = vsel %vm1994_vm2, %v11699_v42, %v11701_v23  ;;  %v22688_v26 = vsel %vm1994_vm2, %v11701_v23, %v11703_v46  ;;  %v10610_v24 = vrot.slane %v22257_v54, 1 }
 0x3b5   : > { %v16798_v2 = vpop.f32.mrf.mxu0  ;;  %17001 = vmatmul.mubr.msk.bf16.gmra.mxu0 %vm484_vm1, %v22267_v43  ;;  %v22676_v63 = vadd.f32 %v8598_v21, %v22564_v40  ;;  %25279 = vst [vmem:[#allocation4_spill] sm:$0xff] %v22684_v29  ;;  %25280 = vst [vmem:[#allocation50_spill] sm:$0xff] %v22688_v26  ;;  %v22706_v26 = vld [vmem:[%s17749_s25 + $0x1e8] sm:$0xff]  }
 0x3b6   : > { %v22679_v1 = vadd.f32 %v16798_v2, %v22387_v25  ;;  %17004 = vmatprep.mubr.msk.bf16.mxu0 %vm484_vm1, %v22299_v38  ;;  %v16824_v60 = vpop.f32.mrf.mxu1  ;;  %v10612_v2 = vrot.slane %v22267_v43, 1  ;;  %v10611_v43 = vsel %vm900_vm3, %v10608_v31, %v10610_v24 }
 0x3b7   : > { %17027 = vmatmul.mubr.msk.bf16.gmra.mxu1 %vm484_vm1, %v10607_v20  ;;  %v8357_v39 = vpop.f32.mrf.mxu0  ;;  %v22691_v40 = vadd.f32 %v16824_v60, %v22581_v57 }
 0x3b8   : > { %v22694_v25 = vadd.f32 %v8357_v39, %v22397_v12  ;;  %17030 = vmatprep.mubr.msk.bf16.mxu1 %vm484_vm1, %v10609_v36  ;;  %v8611_v42 = vpop.f32.mrf.mxu1  ;;  %v22709_v12 = vld [vmem:[%s17749_s25 + $0x1f0] sm:$0xff]  }
 0x3b9   : > { %v16799_v21 = vpop.f32.mrf.mxu0  ;;  %v22700_v20 = vadd.f32 %v8611_v42, %v22597_v18  ;;  %v11705_v18 = vrot.slane %v22706_v26, 2  ;;  %v11707_v29 = vrot.slane %v22709_v12, 2 }
 0x3ba   : > { %v22703_v23 = vadd.f32 %v16799_v21, %v22408_v45  ;;  %v16825_v57 = vpop.f32.mrf.mxu1  ;;  %v25282_v45 = vld [vmem:[#allocation13_spill] sm:$0xff]  ;;  %v10613_v21 = vsel %vm900_vm3, %v10610_v24, %v10612_v2 }
 0x3bb   : > { %v8360_v60 = vpop.f32.mrf.mxu0  ;;  %v22712_v36 = vadd.f32 %v16825_v57, %v22607_v48  ;;  %v25284_v57 = vld [vmem:[#allocation19_spill] sm:$0xff]  ;;  %v22732_v31 = vsel %vm1994_vm2, %v11703_v46, %v11705_v18  ;;  %v22736_v24 = vsel %vm1994_vm2, %v11705_v18, %v11707_v29  ;;  %v10875_v46 = vld [vmem:[%s17749_s25 + $0x190] sm:$0xe] }
 0x3bc   : > { %v22715_v54 = vadd.f32 %v8360_v60, %v22419_v22  ;;  %v8614_v39 = vpop.f32.mrf.mxu1  ;;  %25285 = vst [vmem:[#allocation2_spill] sm:$0xff] %v22732_v31  ;;  %25286 = vst [vmem:[#allocation3_spill] sm:$0xff] %v22736_v24 }
 0x3bd   : > { %25281 = vst [vmem:[#allocation22_spill] sm:$0xff] %v22712_v36  ;;  %v16802_v42 = vpop.f32.mrf.mxu0  ;;  %17005 = vmatmul.mubr.msk.bf16.gmra.mxu0 %vm484_vm1, %v25282_v45  ;;  %v22724_v48 = vadd.f32 %v8614_v39, %v22619_v0  ;;  %v10614_v39 = vrot.slane %v22299_v38, 1 }
 0x3be   : > { %v22727_v22 = vadd.f32 %v16802_v42, %v22431_v61  ;;  %17008 = vmatprep.mubr.msk.bf16.mxu0 %vm484_vm1, %v25284_v57  ;;  %v16828_v60 = vpop.f32.mrf.mxu1 }
 0x3bf   : > { %25283 = vst [vmem:[#allocation42_spill] sm:$0xff] %v22724_v48  ;;  %17031 = vmatmul.mubr.msk.bf16.gmra.mxu1 %vm484_vm1, %v10611_v43  ;;  %v8373_v36 = vpop.f32.mrf.mxu0  ;;  %v22739_v0 = vadd.f32 %v16828_v60, %v22631_v56  ;;  %v10616_v43 = vrot.slane %v25282_v45, 1  ;;  %v22755_v56 = vld [vmem:[%s17749_s25 + $0x1f8] sm:$0xff]  }
 0x3c0   : > { %v22742_v61 = vadd.f32 %v8373_v36, %v22442_v32  ;;  %17034 = vmatprep.mubr.msk.bf16.mxu1 %vm484_vm1, %v10613_v21  ;;  %v8627_v42 = vpop.f32.mrf.mxu1  ;;  %v25289_v36 = vld [vmem:[#allocation37_spill] sm:$0xff]  ;;  %v22761_v21 = vld [vmem:[%s17749_s25 + $0x200] sm:$0xff]  }
 0x3c1   : > { %25287 = vst [vmem:[#allocation60_spill] sm:$0xff] %v22739_v0  ;;  %v16803_v31 = vpop.f32.mrf.mxu0  ;;  %v22749_v48 = vadd.f32 %v8627_v42, %v22646_v50  ;;  %v22758_v24 = vcombine.low %v10875_v46, %v25289_v36  ;;  %v10615_v50 = vsel %vm900_vm3, %v10612_v2, %v10614_v39  ;;  %v10617_v46 = vsel %vm900_vm3, %v10614_v39, %v10616_v43 }
 0x3c2   : > { %v22752_v18 = vadd.f32 %v16803_v31, %v22464_v13  ;;  %v16829_v60 = vpop.f32.mrf.mxu1  ;;  %v11709_v13 = vrot.slane %v22755_v56, 2  ;;  %v11711_v36 = vrot.slane %v22761_v21, 2 }
 0x3c3   : > { %25288 = vst [vmem:[#allocation49_spill] sm:$0xff] %v22749_v48  ;;  %v8376_v32 = vpop.f32.mrf.mxu0  ;;  %v22764_v38 = vadd.f32 %v16829_v60, %v22655_v7  ;;  %v25291_v48 = vld [vmem:[#allocation14_spill] sm:$0xff]  ;;  %v10993_v39 = vrot.slane %v22758_v24, 1 }
 0x3c4   : > { %v22767_v45 = vadd.f32 %v8376_v32, %v22476_v17  ;;  %v8630_v31 = vpop.f32.mrf.mxu1  ;;  %v25293_v17 = vld [vmem:[#allocation47_spill] sm:$0xff]  ;;  %v22784_v2 = vsel %vm1994_vm2, %v11707_v29, %v11709_v13  ;;  %v10618_v29 = vrot.slane %v25284_v57, 1 }
 0x3c5   : > { %25290 = vst [vmem:[#allocation61_spill] sm:$0xff] %v22764_v38  ;;  %v16806_v42 = vpop.f32.mrf.mxu0  ;;  %17009 = vmatmul.mubr.msk.bf16.gmra.mxu0 %vm484_vm1, %v25291_v48  ;;  %v22776_v0 = vadd.f32 %v8630_v31, %v22667_v6  ;;  %25294 = vst [vmem:[#allocation20_spill] sm:$0xff] %v22784_v2  ;;  %v10994_v38 = vrot.slane %v22449_v55, 1  ;;  %v22790_v6 = vsel %vm1994_vm2, %v11709_v13, %v11711_v36  ;;  %v10620_v2 = vrot.slane %v25291_v48, 1 }
 0x3c6   : > { %v22779_v7 = vadd.f32 %v16806_v42, %v22493_v33  ;;  %17012 = vmatprep.mubr.msk.bf16.mxu0 %vm484_vm1, %v25293_v17  ;;  %v16832_v60 = vpop.f32.mrf.mxu1  ;;  %25295 = vst [vmem:[#allocation15_spill] sm:$0xff] %v22790_v6  ;;  %v22808_v6 = vld [vmem:[%s17749_s25 + $0x208] sm:$0xff]   ;;  %v10619_v48 = vsel %vm900_vm3, %v10616_v43, %v10618_v29 }
 0x3c7   : > { %25292 = vst [vmem:[#allocation69_spill] sm:$0xff] %v22776_v0  ;;  %17035 = vmatmul.mubr.msk.bf16.gmra.mxu1 %vm484_vm1, %v10615_v50  ;;  %v8389_v32 = vpop.f32.mrf.mxu0  ;;  %v22793_v33 = vadd.f32 %v16832_v60, %v22679_v1  ;;  %25298 = vst [vmem:[#allocation62_spill] sm:$0xff] %v22808_v6 }
 0x3c8   : > { %v22796_v31 = vadd.f32 %v8389_v32, %v22501_v5  ;;  %17038 = vmatprep.mubr.msk.bf16.mxu1 %vm484_vm1, %v10617_v46  ;;  %v8643_v42 = vpop.f32.mrf.mxu1  ;;  %v10995_v5 = vsel %vm900_vm3, %v10993_v39, %v10994_v38 }
 0x3c9   : > { %25296 = vst [vmem:[#allocation77_spill] sm:$0xff] %v22793_v33  ;;  %v16807_v50 = vpop.f32.mrf.mxu0  ;;  %v22802_v0 = vadd.f32 %v8643_v42, %v22694_v25  ;;  %v24831_v25 = vrot.slane %v22808_v6, 2 }
 0x3ca   : > { %v22805_v13 = vadd.f32 %v16807_v50, %v22513_v41  ;;  %v16833_v1 = vpop.f32.mrf.mxu1  ;;  %v25300_v41 = vld [vmem:[#allocation6_spill] sm:$0xff]  ;;  %v10621_v50 = vsel %vm900_vm3, %v10618_v29, %v10620_v2  ;;  %v10998_v29 = vrot.slane %v22507_v30, 1 }
 0x3cb   : > { %25297 = vst [vmem:[#allocation27_spill] sm:$0xff] %v22802_v0  ;;  %v8392_v60 = vpop.f32.mrf.mxu0  ;;  %v22812_v46 = vadd.f32 %v16833_v1, %v22703_v23  ;;  %v22833_v43 = vsel %vm1994_vm2, %v11711_v36, %v24831_v25  ;;  %v11288_v25 = vshrl.u32 %v22449_v55, 16 }
 0x3cc   : > { %v22815_v57 = vadd.f32 %v8392_v60, %v22525_v11  ;;  %v8646_v32 = vpop.f32.mrf.mxu1  ;;  %v10996_v11 = vrot.slane %v22456_v62, 1  ;;  %25302 = vst [vmem:[#allocation70_spill] sm:$0xff] %v22833_v43  ;;  %v10622_v60 = vrot.slane %v25293_v17, 1 }
 0x3cd   : > { %25299 = vst [vmem:[#allocation28_spill] sm:$0xff] %v22812_v46  ;;  %v16810_v42 = vpop.f32.mrf.mxu0  ;;  %17013 = vmatmul.mubr.msk.bf16.gmra.mxu0 %vm484_vm1, %v25300_v41  ;;  %v22823_v0 = vadd.f32 %v8646_v32, %v22715_v54 }
 0x3ce   : > { %v22826_v23 = vadd.f32 %v16810_v42, %v22540_v3  ;;  %17052 = vmatprep.mubr.msk.bf16.mxu0 %vm484_vm1, %v10995_v5  ;;  %v16836_v39 = vpop.f32.mrf.mxu1  ;;  %v10624_v5 = vrot.slane %v25300_v41, 1  ;;  %v11280_v42 = vshrl.u32 %v22758_v24, 16  ;;  %v10997_v17 = vsel %vm900_vm3, %v10994_v38, %v10996_v11 }
 0x3cf   : > { %25301 = vst [vmem:[#allocation67_spill] sm:$0xff] %v22823_v0  ;;  %17039 = vmatmul.mubr.msk.bf16.gmra.mxu1 %vm484_vm1, %v10619_v48  ;;  %v8405_v1 = vpop.f32.mrf.mxu0  ;;  %v22838_v54 = vadd.f32 %v16836_v39, %v22727_v22  ;;  %v11283_v48 = vshll.u32 %v22758_v24, 16  ;;  %v11291_v22 = vshll.u32 %v22449_v55, 16  ;;  %v22861_v24 = vld [vmem:[%s24742_s1 + $0x38] sm:$0xff]  }
 0x3d0   : > { %v22841_v3 = vadd.f32 %v8405_v1, %v22549_v8  ;;  %17042 = vmatprep.mubr.msk.bf16.mxu1 %vm484_vm1, %v10621_v50  ;;  %v8659_v36 = vpop.f32.mrf.mxu1  ;;  %v10999_v1 = vsel %vm900_vm3, %v10996_v11, %v10998_v29  ;;  %v11282_v11 = vrot.slane %v11280_v42, 1  ;;  %v11297_v42 = vshrl.u32 %v22456_v62, 16 }
 0x3d1   : > { %25303 = vst [vmem:[#allocation66_spill] sm:$0xff] %v22838_v54  ;;  %v16811_v32 = vpop.f32.mrf.mxu0  ;;  %v22851_v39 = vadd.f32 %v8659_v36, %v22742_v61  ;;  %v10625_v61 = vsel %vm900_vm3, %v10622_v60, %v10624_v5  ;;  %v11293_v54 = vrot.slane %v11291_v22, 2 }
 0x3d2   : > { %v22854_v8 = vadd.f32 %v16811_v32, %v22561_v27  ;;  %v16837_v50 = vpop.f32.mrf.mxu1  ;;  %v10623_v27 = vsel %vm900_vm3, %v10620_v2, %v10622_v60  ;;  %v11285_v32 = vrot.slane %v11283_v48, 2  ;;  %v11002_v60 = vrot.slane %v22555_v9, 1 }
 0x3d3   : > { %25304 = vst [vmem:[#allocation29_spill] sm:$0xff] %v22851_v39  ;;  %v8408_v41 = vpop.f32.mrf.mxu0  ;;  %v22864_v43 = vadd.f32 %v16837_v50, %v22752_v18  ;;  %v11290_v39 = vrot.slane %v11288_v25, 1  ;;  %v11300_v25 = vshll.u32 %v22456_v62, 16 }
 0x3d4   : > { %v22867_v55 = vadd.f32 %v8408_v41, %v22578_v53  ;;  %v8662_v38 = vpop.f32.mrf.mxu1  ;;  %v11000_v53 = vrot.slane %v22510_v4, 1  ;;  %v11286_v50 = vor.u32 %v11285_v32, %v11282_v11 }
 0x3d5   : > { %25305 = vst [vmem:[#allocation9_spill] sm:$0xff] %v22864_v43  ;;  %v22871_v36 = vpop.f32.mrf.mxu0  ;;  %17053 = vmatmul.mubr.msk.bf16.vlgmr.msra.gmra.mxu0 %vm484_vm1, %v10997_v17  ;;  %v22875_v0 = vadd.f32 %v8662_v38, %v22767_v45  ;;  %v11294_v41 = vor.u32 %v11293_v54, %v11290_v39 }
 0x3d6   : > { %17119 = vmatpush3.bf16.msra.mxu0 %v22461_v10  ;;  %17056 = vmatprep.mubr.msk.bf16.mxu0 %vm484_vm1, %v10999_v1  ;;  %v25308_v10 = vld [vmem:[#allocation11_spill] sm:$0xff]  ;;  %v11306_v1 = vshrl.u32 %v22507_v30, 16  ;;  %v11001_v38 = vsel %vm900_vm3, %v10998_v29, %v11000_v53 }
 0x3d7   : > { %25306 = vst [vmem:[#allocation68_spill] sm:$0xff] %v22875_v0  ;;  %v16840_v18 = vpop.f32.mrf.mxu1  ;;  %17043 = vmatmul.mubr.msk.bf16.gmra.mxu1 %vm484_vm1, %v10623_v27  ;;  %v22881_v2 = vpop.f32.mrf.mxu0  ;;  %17186 = vmatprep.subr.bf16.mxu0 %v22861_v24  ;;  %v10626_v48 = vrot.slane %v25308_v10, 1  ;;  %v11309_v27 = vshll.u32 %v22507_v30, 16  ;;  %v11299_v10 = vrot.slane %v11297_v42, 1  ;;  %v11295_v30 = vsel %vm1587_vm4, %v11286_v50, %v11294_v41  ;;  %v22927_v50 = vld [vmem:[%s17749_s25 + $0x1a4] sm:$0xf] }
 0x3d8   : > { %v22888_v45 = vadd.f32 %v16840_v18, %v22779_v7  ;;  %17046 = vmatprep.mubr.msk.bf16.mxu1 %vm484_vm1, %v10625_v61  ;;  %v11003_v61 = vsel %vm900_vm3, %v11000_v53, %v11002_v60 }
 0x3d9   : > { %v8675_v22 = vpop.f32.mrf.mxu1  ;;  %v22892_v17 = vpop.f32.mrf.mxu0  ;;  %v10627_v54 = vsel %vm900_vm3, %v10624_v5, %v10626_v48  ;;  %v11311_v29 = vrot.slane %v11309_v27, 2 }
 0x3da   : > { %25307 = vst [vmem:[#allocation32_spill] sm:$0xff] %v22888_v45  ;;  %v22897_v62 = vadd.f32 %v8675_v22, %v22796_v31  ;;  %v11302_v45 = vrot.slane %v11300_v25, 2  ;;  %v11308_v31 = vrot.slane %v11306_v1, 1  ;;  %v11006_v25 = vrot.slane %v22610_v19, 1  ;;  %v12767_v1 = vld [vmem:[%s17749_s25 + $0x1a0] sm:$0x8] }
 0x3db   : > { %v16841_v7 = vpop.f32.mrf.mxu1  ;;  %v22900_v18 = vpop.f32.mrf.mxu0  ;;  %v11318_v22 = vshll.u32 %v22510_v4, 16 }
 0x3dc   : > { %25309 = vst [vmem:[#allocation18_spill] sm:$0xff] %v22897_v62  ;;  %v22904_v0 = vadd.f32 %v16841_v7, %v22805_v13  ;;  %v11004_v13 = vrot.slane %v22558_v16, 1  ;;  %v11303_v42 = vor.u32 %v11302_v45, %v11299_v10  ;;  %v11312_v7 = vor.u32 %v11311_v29, %v11308_v31  ;;  %v22935_v10 = vld [vmem:[%s17749_s25 + $0x1a8] sm:$0xff]  }
 0x3dd   : > { %v8678_v39 = vpop.f32.mrf.mxu1  ;;  %v22907_v11 = vpop.f32.mrf.mxu0  ;;  %17057 = vmatmul.mubr.msk.bf16.gmra.mxu0 %vm484_vm1, %v11001_v38  ;;  %v11324_v45 = vshrl.u32 %v22555_v9, 16 }
 0x3de   : > { %25310 = vst [vmem:[#allocation52_spill] sm:$0xff] %v22904_v0  ;;  %v22912_v32 = vadd.f32 %v8678_v39, %v22815_v57  ;;  %17060 = vmatprep.mubr.msk.bf16.mxu0 %vm484_vm1, %v11003_v61  ;;  %v11315_v57 = vshrl.u32 %v22510_v4, 16  ;;  %v11327_v61 = vshll.u32 %v22555_v9, 16  ;;  %v11005_v4 = vsel %vm900_vm3, %v11002_v60, %v11004_v13  ;;  %v22943_v39 = vld [vmem:[%s17749_s25 + $0x1b0] sm:$0xff]  }
 0x3df   : > { %v16844_v53 = vpop.f32.mrf.mxu1  ;;  %17047 = vmatmul.mubr.msk.bf16.gmra.mxu1 %vm484_vm1, %v10627_v54  ;;  %v22917_v5 = vpop.f32.mrf.mxu0  ;;  %v11304_v31 = vsel %vm1587_vm4, %v11294_v41, %v11303_v42  ;;  %v11007_v29 = vsel %vm900_vm3, %v11004_v13, %v11006_v25  ;;  %v12774_v9 = vrot.slane %v22935_v10, 3  ;;  %v11313_v0 = vsel %vm1587_vm4, %v11303_v42, %v11312_v7  ;;  %v22961_v13 = vld [vmem:[%s24742_s1 + $0x40] sm:$0xff]  }
 0x3e0   : > { %25311 = vst [vmem:[#allocation58_spill] sm:$0xff] %v22912_v32  ;;  %v22921_v48 = vadd.f32 %v16844_v53, %v22826_v23  ;;  %17086 = vmatprep.mubr.msk.bf16.mxu1 %vm484_vm1, %v11295_v30  ;;  %v15272_v23 = vcombine.low %v12767_v1, %v22927_v50  ;;  %v11317_v1 = vrot.slane %v11315_v57, 1  ;;  %v11326_v41 = vrot.slane %v11324_v45, 1  ;;  %25315 = vst [vmem:[#allocation24_spill] sm:$0xff] %v22961_v13 }
 0x3e1   : > { %v8691_v27 = vpop.f32.mrf.mxu1  ;;  %v22930_v38 = vpop.f32.mrf.mxu0  ;;  %v11329_v62 = vrot.slane %v11327_v61, 2  ;;  %v11333_v61 = vshrl.u32 %v22558_v16, 16 }
 0x3e2   : > { %25312 = vst [vmem:[#allocation5_spill] sm:$0xff] %v22921_v48  ;;  %v22939_v54 = vadd.f32 %v8691_v27, %v22841_v3  ;;  %v12773_v48 = vrot.slane %v15272_v23, 3  ;;  %v11320_v3 = vrot.slane %v11318_v22, 2  ;;  %v12776_v27 = vrot.slane %v22943_v39, 3 }
 0x3e3   : > { %v16845_v30 = vpop.f32.mrf.mxu1  ;;  %v22945_v53 = vpop.f32.mrf.mxu0  ;;  %v11008_v22 = vrot.slane %v22613_v37, 1 }
 0x3e4   : > { %25313 = vst [vmem:[#allocation30_spill] sm:$0xff] %v22939_v54  ;;  %v22951_v32 = vadd.f32 %v16845_v30, %v22854_v8  ;;  %v22964_v8 = vsel %vm3088_vm5, %v12773_v48, %v12774_v9  ;;  %v22972_v23 = vsel %vm3088_vm5, %v12774_v9, %v12776_v27  ;;  %v11010_v48 = vrot.slane %v22658_v59, 1 }
 0x3e5   : > { %v8694_v60 = vpop.f32.mrf.mxu1  ;;  %v22954_v54 = vpop.f32.mrf.mxu0  ;;  %17061 = vmatmul.mubr.msk.bf16.gmra.mxu0 %vm484_vm1, %v11005_v4  ;;  %25316 = vst [vmem:[#allocation23_spill] sm:$0xff] %v22964_v8  ;;  %25318 = vst [vmem:[#allocation31_spill] sm:$0xff] %v22972_v23  ;;  %v11336_v4 = vshll.u32 %v22558_v16, 16  ;;  %v11330_v9 = vor.u32 %v11329_v62, %v11326_v41  ;;  %v22992_v23 = vld [vmem:[%s17749_s25 + $0x1b8] sm:$0xff]   ;;  %v11335_v8 = vrot.slane %v11333_v61, 1 }
 0x3e6   : > { %25314 = vst [vmem:[#allocation71_spill] sm:$0xff] %v22951_v32  ;;  %v22967_v57 = vadd.f32 %v8694_v60, %v22867_v55  ;;  %17064 = vmatprep.mubr.msk.bf16.mxu0 %vm484_vm1, %v11007_v29  ;;  %v11321_v55 = vor.u32 %v11320_v3, %v11317_v1  ;;  %v11345_v60 = vshll.u32 %v22610_v19, 16  ;;  %v11011_v3 = vsel %vm900_vm3, %v11008_v22, %v11010_v48 }
 0x3e7   : > { %v22974_v42 = vpop.f32.mrf.mxu1  ;;  %17087 = vmatmul.mubr.msk.bf16.vlgmr.msra.gmra.mxu1 %vm484_vm1, %v11304_v31  ;;  %v22977_v45 = vpop.f32.mrf.mxu0  ;;  %v11342_v31 = vshrl.u32 %v22610_v19, 16  ;;  %v12778_v62 = vrot.slane %v22992_v23, 3  ;;  %v11338_v19 = vrot.slane %v11336_v4, 2 }
 0x3e8   : > { %25317 = vst [vmem:[#allocation55_spill] sm:$0xff] %v22967_v57  ;;  %17153 = vmatpush3.bf16.msra.mxu1 %v22574_v35  ;;  %17090 = vmatprep.mubr.msk.bf16.mxu1 %vm484_vm1, %v11313_v0  ;;  %v11009_v35 = vsel %vm900_vm3, %v11006_v25, %v11008_v22  ;;  %v22996_v0 = vld [vmem:[%s17749_s25 + $0x1c0] sm:$0xff]   ;;  %v11322_v41 = vsel %vm1587_vm4, %v11312_v7, %v11321_v55  ;;  %v11347_v33 = vrot.slane %v11345_v60, 2  ;;  %v11012_v7 = vrot.slane %v22661_v49, 1 }
 0x3e9   : > { %v22984_v30 = vpop.f32.mrf.mxu1  ;;  %v22986_v29 = vpop.f32.mrf.mxu0  ;;  %17220 = vmatprep.subr.bf16.mxu1 %v22961_v13  ;;  %25320 = vst [vmem:[#allocation79_spill] sm:$0xff] %v22996_v0  ;;  %v12780_v57 = vrot.slane %v22996_v0, 3  ;;  %v11331_v25 = vsel %vm1587_vm4, %v11321_v55, %v11330_v9  ;;  %v11344_v46 = vrot.slane %v11342_v31, 1  ;;  %v23013_v22 = vsel %vm3088_vm5, %v12776_v27, %v12778_v62  ;;  %v23040_v13 = vld [vmem:[%s17749_s25 + $0x1d0] sm:$0xff]  }
 0x3ea   : > { %25319 = vst [vmem:[#allocation72_spill] sm:$0xff] %v22986_v29  ;;  %25323 = vst [vmem:[#allocation82_spill] sm:$0xff] %v23013_v22  ;;  %v11014_v55 = vrot.slane %v22706_v26, 1  ;;  %v11339_v27 = vor.u32 %v11338_v19, %v11335_v8  ;;  %v11351_v31 = vshrl.u32 %v22613_v37, 16  ;;  %v11354_v60 = vshll.u32 %v22613_v37, 16 }
 0x3eb   : > { %v22998_v1 = vpop.f32.mrf.mxu1  ;;  %v23000_v16 = vpop.f32.mrf.mxu0  ;;  %v23018_v61 = vsel %vm3088_vm5, %v12778_v62, %v12780_v57  ;;  %v11360_v22 = vshrl.u32 %v22658_v59, 16  ;;  %25328 = vst [vmem:[#allocation21_spill] sm:$0xff] %v23040_v13 }
 0x3ec   : > { %25321 = vst [vmem:[#allocation17_spill] sm:$0xff] %v23000_v16  ;;  %25324 = vst [vmem:[#allocation76_spill] sm:$0xff] %v23018_v61  ;;  %v11348_v61 = vor.u32 %v11347_v33, %v11344_v46  ;;  %v11015_v37 = vsel %vm900_vm3, %v11012_v7, %v11014_v55  ;;  %v11340_v33 = vsel %vm1587_vm4, %v11330_v9, %v11339_v27  ;;  %v11353_v46 = vrot.slane %v11351_v31, 1 }
 0x3ed   : > { %v23006_v32 = vpop.f32.mrf.mxu1  ;;  %v23008_v43 = vpop.f32.mrf.mxu0  ;;  %17065 = vmatmul.mubr.msk.bf16.gmra.mxu0 %vm484_vm1, %v11009_v35  ;;  %v11362_v29 = vrot.slane %v11360_v22, 1  ;;  %v11016_v9 = vrot.slane %v22709_v12, 1  ;;  %v11018_v22 = vrot.slane %v22755_v56, 1 }
 0x3ee   : > { %25322 = vst [vmem:[#allocation75_spill] sm:$0xff] %v23008_v43  ;;  %17068 = vmatprep.mubr.msk.bf16.mxu0 %vm484_vm1, %v11011_v3  ;;  %v23036_v43 = vld [vmem:[%s17749_s25 + $0x1c8] sm:$0xff]  }
 0x3ef   : > { %v23020_v4 = vpop.f32.mrf.mxu1  ;;  %17091 = vmatmul.mubr.msk.bf16.gmra.mxu1 %vm484_vm1, %v11322_v41  ;;  %v23023_v35 = vpop.f32.mrf.mxu0  ;;  %v11363_v41 = vshll.u32 %v22658_v59, 16  ;;  %25327 = vst [vmem:[#allocation57_spill] sm:$0xff] %v23036_v43  ;;  %v12784_v59 = vrot.slane %v23040_v13, 3  ;;  %v23084_v13 = vld [vmem:[%s17749_s25 + $0x1e0] sm:$0xff]  }
 0x3f0   : > { %25325 = vst [vmem:[#allocation83_spill] sm:$0xff] %v23023_v35  ;;  %17094 = vmatprep.mubr.msk.bf16.mxu1 %vm484_vm1, %v11331_v25  ;;  %v11013_v35 = vsel %vm900_vm3, %v11010_v48, %v11012_v7  ;;  %v12782_v25 = vrot.slane %v23036_v43, 3  ;;  %v11349_v48 = vsel %vm1587_vm4, %v11339_v27, %v11348_v61  ;;  %v11369_v27 = vshrl.u32 %v22661_v49, 16  ;;  %25337 = vst [vmem:[#allocation59_spill] sm:$0xff] %v23084_v13 }
 0x3f1   : > { %v23029_v3 = vpop.f32.mrf.mxu1  ;;  %v23031_v62 = vpop.f32.mrf.mxu0 }
 0x3f2   : > { %25326 = vst [vmem:[#allocation25_spill] sm:$0xff] %v23031_v62  ;;  %v11356_v62 = vrot.slane %v11354_v60, 2  ;;  %v23057_v7 = vsel %vm3088_vm5, %v12780_v57, %v12782_v25  ;;  %v23062_v31 = vsel %vm3088_vm5, %v12782_v25, %v12784_v59 }
 0x3f3   : > { %v23042_v8 = vpop.f32.mrf.mxu1  ;;  %v23044_v19 = vpop.f32.mrf.mxu0  ;;  %25331 = vst [vmem:[#allocation12_spill] sm:$0xff] %v23057_v7  ;;  %25332 = vst [vmem:[#allocation26_spill] sm:$0xff] %v23062_v31  ;;  %v11378_v7 = vshrl.u32 %v22706_v26, 16 }
 0x3f4   : > { %25329 = vst [vmem:[#allocation38_spill] sm:$0xff] %v23044_v19  ;;  %v11365_v19 = vrot.slane %v11363_v41, 2  ;;  %v11357_v57 = vor.u32 %v11356_v62, %v11353_v46  ;;  %v11372_v41 = vshll.u32 %v22661_v49, 16  ;;  %v11019_v49 = vsel %vm900_vm3, %v11016_v9, %v11018_v22 }
 0x3f5   : > { %v23050_v0 = vpop.f32.mrf.mxu1  ;;  %v23052_v16 = vpop.f32.mrf.mxu0  ;;  %17069 = vmatmul.mubr.msk.bf16.gmra.mxu0 %vm484_vm1, %v11013_v35 }
 0x3f6   : > { %25330 = vst [vmem:[#allocation84_spill] sm:$0xff] %v23052_v16  ;;  %17072 = vmatprep.mubr.msk.bf16.mxu0 %vm484_vm1, %v11015_v37  ;;  %v11366_v31 = vor.u32 %v11365_v19, %v11362_v29  ;;  %v23080_v16 = vld [vmem:[%s17749_s25 + $0x1d8] sm:$0xff]   ;;  %v11358_v29 = vsel %vm1587_vm4, %v11348_v61, %v11357_v57  ;;  %v11371_v19 = vrot.slane %v11369_v27, 1  ;;  %v11020_v61 = vrot.slane %v22761_v21, 1 }
 0x3f7   : > { %v23064_v60 = vpop.f32.mrf.mxu1  ;;  %17095 = vmatmul.mubr.msk.bf16.gmra.mxu1 %vm484_vm1, %v11340_v33  ;;  %v23067_v35 = vpop.f32.mrf.mxu0  ;;  %v11381_v33 = vshll.u32 %v22706_v26, 16  ;;  %25336 = vst [vmem:[#allocation46_spill] sm:$0xff] %v23080_v16  ;;  %v12788_v26 = vrot.slane %v23084_v13, 3  ;;  %v17608_v13 = vld [vmem:[%s17749_s25 + $0x210] ss:$0 sps:$4 sm:$0x11]  }
 0x3f8   : > { %25333 = vst [vmem:[#allocation45_spill] sm:$0xff] %v23067_v35  ;;  %17098 = vmatprep.mubr.msk.bf16.mxu1 %vm484_vm1, %v11349_v48  ;;  %v11017_v35 = vsel %vm900_vm3, %v11014_v55, %v11016_v9  ;;  %v12786_v48 = vrot.slane %v23080_v16, 3  ;;  %v11367_v55 = vsel %vm1587_vm4, %v11357_v57, %v11366_v31  ;;  %v11387_v57 = vshrl.u32 %v22709_v12, 16 }
 0x3f9   : > { %v23073_v37 = vpop.f32.mrf.mxu1  ;;  %v23075_v25 = vpop.f32.mrf.mxu0 }
 0x3fa   : > { %25334 = vst [vmem:[#allocation39_spill] sm:$0xff] %v23073_v37  ;;  %25335 = vst [vmem:[#allocation33_spill] sm:$0xff] %v23075_v25  ;;  %v11374_v25 = vrot.slane %v11372_v41, 2  ;;  %v23101_v9 = vsel %vm3088_vm5, %v12784_v59, %v12786_v48  ;;  %v23106_v27 = vsel %vm3088_vm5, %v12786_v48, %v12788_v26 }
 0x3fb   : > { %v23086_v62 = vpop.f32.mrf.mxu1  ;;  %v23088_v46 = vpop.f32.mrf.mxu0  ;;  %25341 = vst [vmem:[#allocation34_spill] sm:$0xff] %v23101_v9  ;;  %25342 = vst [vmem:[#allocation54_spill] sm:$0xff] %v23106_v27  ;;  %v11396_v9 = vshrl.u32 %v22755_v56, 16 }
 0x3fc   : > { %25338 = vst [vmem:[#allocation7_spill] sm:$0xff] %v23086_v62  ;;  %25339 = vst [vmem:[#allocation78_spill] sm:$0xff] %v23088_v46  ;;  %v11380_v62 = vrot.slane %v11378_v7, 1  ;;  %v11383_v46 = vrot.slane %v11381_v33, 2  ;;  %v11022_v7 = vrot.slane %v22808_v6, 1  ;;  %v11375_v59 = vor.u32 %v11374_v25, %v11371_v19 }
 0x3fd   : > { %v23094_v43 = vpop.f32.mrf.mxu1  ;;  %v23096_v37 = vpop.f32.mrf.mxu0  ;;  %17073 = vmatmul.mubr.msk.bf16.gmra.mxu0 %vm484_vm1, %v11017_v35  ;;  %v11390_v33 = vshll.u32 %v22709_v12, 16 }
 0x3fe   : > { %25340 = vst [vmem:[#allocation53_spill] sm:$0xff] %v23096_v37  ;;  %17076 = vmatprep.mubr.msk.bf16.mxu0 %vm484_vm1, %v11019_v49  ;;  %v11384_v27 = vor.u32 %v11383_v46, %v11380_v62  ;;  %v23124_v37 = vld [vmem:[%s17749_s25 + $0x1e8] sm:$0xff]   ;;  %v11023_v12 = vsel %vm900_vm3, %v11020_v61, %v11022_v7  ;;  %v11376_v62 = vsel %vm1587_vm4, %v11366_v31, %v11375_v59  ;;  %v11389_v46 = vrot.slane %v11387_v57, 1 }
 0x3ff   : > { %v23108_v41 = vpop.f32.mrf.mxu1  ;;  %17099 = vmatmul.mubr.msk.bf16.gmra.mxu1 %vm484_vm1, %v11358_v29  ;;  %v23111_v35 = vpop.f32.mrf.mxu0  ;;  %v11399_v29 = vshll.u32 %v22755_v56, 16  ;;  %v11392_v16 = vrot.slane %v11390_v33, 2  ;;  %v11024_v31 = vrot.slane %v17608_v13, 1 }
 0x400   : > { %25343 = vst [vmem:[#allocation35_spill] sm:$0xff] %v23108_v41  ;;  %25344 = vst [vmem:[#allocation64_spill] sm:$0xff] %v23111_v35  ;;  %17102 = vmatprep.mubr.msk.bf16.mxu1 %vm484_vm1, %v11367_v55  ;;  %v11021_v35 = vsel %vm900_vm3, %v11018_v22, %v11020_v61  ;;  %v23129_v55 = vld [vmem:[%s17749_s25 + $0x1f0] sm:$0xff]   ;;  %v11398_v41 = vrot.slane %v11396_v9, 1 }
 0x401   : > { %v23117_v49 = vpop.f32.mrf.mxu1  ;;  %v23119_v48 = vpop.f32.mrf.mxu0  ;;  %25347 = vst [vmem:[#allocation85_spill] sm:$0xff] %v23129_v55  ;;  %v12792_v56 = vrot.slane %v23129_v55, 3  ;;  %v11393_v9 = vor.u32 %v11392_v16, %v11389_v46 }
 0x402   : > { %25345 = vst [vmem:[#allocation36_spill] sm:$0xff] %v23117_v49  ;;  %25346 = vst [vmem:[#allocation73_spill] sm:$0xff] %v23119_v48  ;;  %v12790_v48 = vrot.slane %v23124_v37, 3 }
 0x403   : > { %v23131_v25 = vpop.f32.mrf.mxu1  ;;  %v23133_v19 = vpop.f32.mrf.mxu0 }
 0x404   : > { %25348 = vst [vmem:[#allocation40_spill] sm:$0xff] %v23131_v25  ;;  %25349 = vst [vmem:[#allocation16_spill] sm:$0xff] %v23133_v19  ;;  %v11385_v25 = vsel %vm1587_vm4, %v11375_v59, %v11384_v27  ;;  %v11401_v19 = vrot.slane %v11399_v29, 2  ;;  %v23146_v61 = vsel %vm3088_vm5, %v12788_v26, %v12790_v48  ;;  %v23150_v57 = vsel %vm3088_vm5, %v12790_v48, %v12792_v56 }
 0x405   : > { %v23139_v49 = vpop.f32.mrf.mxu1  ;;  %v23141_v22 = vpop.f32.mrf.mxu0  ;;  %17077 = vmatmul.mubr.msk.bf16.gmra.mxu0 %vm484_vm1, %v11021_v35  ;;  %25351 = vst [vmem:[#allocation63_spill] sm:$0xff] %v23146_v61  ;;  %25352 = vst [vmem:[#allocation74_spill] sm:$0xff] %v23150_v57  ;;  %v11405_v26 = vshrl.u32 %v22761_v21, 16  ;;  %v11408_v59 = vshll.u32 %v22761_v21, 16  ;;  %v11417_v57 = vshll.u32 %v22808_v6, 16  ;;  %v11025_v61 = vsel %vm900_vm3, %v11022_v7, %v11024_v31 }
 0x406   : > { %25350 = vst [vmem:[#allocation41_spill] sm:$0xff] %v23141_v22  ;;  %17080 = vmatprep.mubr.msk.bf16.mxu0 %vm484_vm1, %v11023_v12  ;;  %v11402_v48 = vor.u32 %v11401_v19, %v11398_v41  ;;  %v11414_v12 = vshrl.u32 %v22808_v6, 16  ;;  %v23178_v21 = vld [vmem:[%s17749_s25 + $0x210] ss:$0 sps:$4 sm:$0x33]   ;;  %v11394_v41 = vsel %vm1587_vm4, %v11384_v27, %v11393_v9  ;;  %v25360_v27 = vld [vmem:[#allocation10_spill] sm:$0xff] }
 0x407   : > { %v23152_v33 = vpop.f32.mrf.mxu1  ;;  %17103 = vmatmul.mubr.msk.bf16.gmra.mxu1 %vm484_vm1, %v11376_v62  ;;  %v23155_v35 = vpop.f32.mrf.mxu0  ;;  %v23167_v62 = vld [vmem:[%s17749_s25 + $0x1f8] sm:$0xff]   ;;  %25357 = vst [vmem:[#allocation8_spill] sm:$0xff] %v23178_v21  ;;  %v11407_v19 = vrot.slane %v11405_v26, 1 }
 0x408   : > { %25353 = vst [vmem:[#allocation80_spill] sm:$0xff] %v23155_v35  ;;  %17106 = vmatprep.mubr.msk.bf16.mxu1 %vm484_vm1, %v11385_v25  ;;  %v23171_v35 = vld [vmem:[%s17749_s25 + $0x200] sm:$0xff]   ;;  %v12794_v46 = vrot.slane %v23167_v62, 3  ;;  %v11403_v7 = vsel %vm1587_vm4, %v11393_v9, %v11402_v48  ;;  %v11416_v31 = vrot.slane %v11414_v12, 1  ;;  %v11423_v9 = vshrl.u32 %v23178_v21, 16 }
 0x409   : > { %v23160_v29 = vpop.f32.mrf.mxu1  ;;  %v23162_v13 = vpop.f32.mrf.mxu0  ;;  %v12796_v22 = vrot.slane %v23171_v35, 3 }
 0x40a   : > { %25354 = vst [vmem:[#allocation86_spill] sm:$0xff] %v23162_v13  ;;  %v11410_v13 = vrot.slane %v11408_v59, 2 }
 0x40b   : > { %v23173_v16 = vpop.f32.mrf.mxu1  ;;  %v23175_v25 = vpop.f32.mrf.mxu0  ;;  %v23195_v26 = vsel %vm3088_vm5, %v12794_v46, %v12796_v22 }
 0x40c   : > { %25355 = vst [vmem:[#allocation81_spill] sm:$0xff] %v23173_v16  ;;  %25356 = vst [vmem:[#allocation87_spill] sm:$0xff] %v23175_v25  ;;  %v11419_v25 = vrot.slane %v11417_v57, 2  ;;  %v23190_v16 = vsel %vm3088_vm5, %v12792_v56, %v12794_v46  ;;  %v11426_v57 = vshll.u32 %v23178_v21, 16  ;;  %v11411_v56 = vor.u32 %v11410_v13, %v11407_v19  ;;  %v23210_v46 = vld [vmem:[%s17749_s25 + $0x208] sm:$0xff]  }
 0x40d   : > { %v23183_v6 = vpop.f32.mrf.mxu1  ;;  %v23185_v55 = vpop.f32.mrf.mxu0  ;;  %17081 = vmatmul.mubr.msk.bf16.gmra.mxu0 %vm484_vm1, %v11025_v61  ;;  %25359 = vst [vmem:[#allocation13_spill] sm:$0xff] %v23190_v16  ;;  %25361 = vst [vmem:[#allocation19_spill] sm:$0xff] %v23195_v26  ;;  %v9106_v26 = vadd.f32 %v22871_v36, %v22593_v14  ;;  %v11425_v21 = vrot.slane %v11423_v9, 1  ;;  %v23225_v13 = vld [vmem:[%s24742_s1 + $0x8] sm:$0xff]   ;;  %v9104_v19 = vadd.f32 %v22881_v2, %v22604_v58 }
 0x40e   : > { %25358 = vst [vmem:[#allocation56_spill] sm:$0xff] %v23185_v55  ;;  %17120 = vmatprep.mubr.msk.bf16.mxu0 %vm484_vm1, %v25360_v27  ;;  %v11420_v27 = vor.u32 %v11419_v25, %v11416_v31  ;;  %25365 = vst [vmem:[#allocation6_spill] sm:$0xff] %v23210_v46  ;;  %v23216_v55 = vld [vmem:[%s17749_s25 + $0x210] sm:$0xff]   ;;  %v12798_v25 = vrot.slane %v23210_v46, 3  ;;  %v11412_v36 = vsel %vm1587_vm4, %v11402_v48, %v11411_v56 }
 0x40f   : > { %v23197_v59 = vpop.f32.mrf.mxu1  ;;  %17107 = vmatmul.mubr.msk.bf16.gmra.mxu1 %vm484_vm1, %v11394_v41  ;;  %v23200_v61 = vpop.f32.mrf.mxu0  ;;  %v11964_v41 = vld [vmem:[%s17749_s25 + $0x1a0] sm:$0xc]  ;;  %v9511_v14 = vadd.f32 %v22974_v42, %v9106_v26  ;;  %v12800_v31 = vrot.slane %v23216_v55, 3  ;;  %v9107_v9 = vadd.f32 %v22892_v17, %v22616_v28  ;;  %v9509_v2 = vadd.f32 %v22984_v30, %v9104_v19 }
 0x410   : > { %25362 = vst [vmem:[#allocation37_spill] sm:$0xff] %v23197_v59  ;;  %25363 = vst [vmem:[#allocation14_spill] sm:$0xff] %v23200_v61  ;;  %17110 = vmatprep.mubr.msk.bf16.mxu1 %vm484_vm1, %v11403_v7  ;;  %v11428_v7 = vrot.slane %v11426_v57, 2  ;;  %v23241_v46 = vcombine.low %v11964_v41, %v22927_v50  ;;  %v23244_v58 = vsel %vm3088_vm5, %v12796_v22, %v12798_v25 }
 0x411   : > { %v23205_v12 = vpop.f32.mrf.mxu1  ;;  %v23207_v16 = vpop.f32.mrf.mxu0  ;;  %25367 = vst [vmem:[#allocation10_spill] sm:$0xff] %v23244_v58  ;;  %v23251_v28 = vsel %vm3088_vm5, %v12798_v25, %v12800_v31  ;;  %v9105_v30 = vadd.f32 %v22900_v18, %v22628_v34  ;;  %v12083_v18 = vrot.slane %v22935_v10, 2 }
 0x412   : > { %25364 = vst [vmem:[#allocation47_spill] sm:$0xff] %v23207_v16  ;;  %v11421_v16 = vsel %vm1587_vm4, %v11411_v56, %v11420_v27  ;;  %25368 = vst [vmem:[#allocation88_spill] sm:$0xff] %v23251_v28  ;;  %v11429_v50 = vor.u32 %v11428_v7, %v11425_v21  ;;  %v9110_v21 = vadd.f32 %v22907_v11, %v22643_v52  ;;  %v12082_v34 = vrot.slane %v23241_v46, 2 }
 0x413   : > { %v23218_v61 = vpop.f32.mrf.mxu1  ;;  %v23220_v59 = vpop.f32.mrf.mxu0  ;;  %v9510_v56 = vadd.f32 %v23006_v32, %v9105_v30 }
 0x414   : > { %25366 = vst [vmem:[#allocation11_spill] sm:$0xff] %v23220_v59  ;;  %v11430_v19 = vsel %vm1587_vm4, %v11420_v27, %v11429_v50  ;;  %v12084_v27 = vsel %vm1994_vm2, %v12082_v34, %v12083_v18 }
 0x415   : > { %v23235_v57 = vpop.f32.mrf.mxu1  ;;  %v16918_v59 = vpop.f32.mrf.mxu0  ;;  %17121 = vmatmul.mubr.msk.bf16.vlgmr.msra.gmra.mxu0 %vm484_vm1, %v22490_v15 }
 0x416   : > { %v9797_v42 = vadd.f32 %v16918_v59, %v9511_v14  ;;  %17187 = vmatpush3.bf16.msra.mxu0 %v22861_v24  ;;  %17124 = vmatprep.mubr.msk.bf16.mxu0 %vm484_vm1, %v22533_v51  ;;  %v9512_v24 = vadd.f32 %v22998_v1, %v9107_v9  ;;  %v23263_v51 = vld [vmem:[%s24743_s2] ss:$0 sm:$0xff]  ;;  %v23274_v1 = vld [vmem:[%s17749_s25 + $0x218] sm:$0xff]  }
 0x417   : > { %v23253_v15 = vpop.f32.mrf.mxu1  ;;  %17111 = vmatmul.mubr.msk.bf16.gmra.mxu1 %vm484_vm1, %v11412_v36  ;;  %v9668_v17 = vpop.f32.mrf.mxu0  ;;  %17254 = vmatprep.subr.bf16.mxu0 %v23225_v13  ;;  %v24848_v14 = vrot.slane %v23274_v1, 3  ;;  %v9515_v36 = vadd.f32 %v23020_v4, %v9110_v21  ;;  %v12085_v21 = vrot.slane %v22943_v39, 2 }
 0x418   : > { %v9829_v22 = vadd.f32 %v23263_v51, %v9797_v42  ;;  %v9795_v48 = vadd.f32 %v9668_v17, %v9509_v2  ;;  %17114 = vmatprep.mubr.msk.bf16.mxu1 %vm484_vm1, %v11421_v16  ;;  %v9108_v16 = vadd.f32 %v22917_v5, %v22652_v44  ;;  %v9111_v42 = vadd.f32 %v22930_v38, %v22664_v47  ;;  %v25369_v5 = vld [vmem:[#allocation43_spill] sm:$0xff] }
 0x419   : > { %v23269_v26 = vpop.f32.mrf.mxu1  ;;  %v16919_v59 = vpop.f32.mrf.mxu0  ;;  %v23297_v4 = vsel %vm3088_vm5, %v12800_v31, %v24848_v14 }
 0x41a   : > { %v9861_v41 = vmax.f32 %v9829_v22, 0.0  ;;  %v9827_v7 = vadd.f32 %v23263_v51, %v9795_v48  ;;  %v9798_v25 = vadd.f32 %v16919_v59, %v9512_v24  ;;  %25370 = vst [vmem:[#allocation43_spill] sm:$0xff] %v23297_v4  ;;  %v9513_v50 = vadd.f32 %v23029_v3, %v9108_v16  ;;  %v25371_v24 = vld [vmem:[#allocation51_spill] sm:$0xff] }
 0x41b   : > { %v23280_v52 = vpop.f32.mrf.mxu1  ;;  %v9671_v11 = vpop.f32.mrf.mxu0  ;;  %v9109_v22 = vadd.f32 %v22945_v53, %v22676_v63  ;;  %v9516_v3 = vadd.f32 %v23042_v8, %v9111_v42  ;;  %v9114_v63 = vadd.f32 %v22954_v54, %v22691_v40  ;;  %v12086_v40 = vsel %vm1994_vm2, %v12083_v18, %v12085_v21  ;;  %v25372_v42 = vld [vmem:[#allocation22_spill] sm:$0xff]  ;;  %v25375_v18 = vld [vmem:[#allocation39_spill] sm:$0xff] }
 0x41c   : > { %9893 = vst [vmem:[%s19882_s17 + $0x210] sm:$0xff] %v9861_v41  ;;  %v9859_v9 = vmax.f32 %v9827_v7, 0.0  ;;  %v9830_v32 = vadd.f32 %v23263_v51, %v9798_v25  ;;  %v9796_v2 = vadd.f32 %v9671_v11, %v9510_v56  ;;  %v12087_v7 = vrot.slane %v22992_v23, 2 }
 0x41d   : > { %v23289_v17 = vpop.f32.mrf.mxu1  ;;  %v16922_v44 = vpop.f32.mrf.mxu0  ;;  %17125 = vmatmul.mubr.msk.bf16.gmra.mxu0 %vm484_vm1, %v25369_v5  ;;  %v9514_v25 = vadd.f32 %v23050_v0, %v9109_v22  ;;  %v9519_v54 = vadd.f32 %v23064_v60, %v9114_v63  ;;  %v23340_v60 = vld [vmem:[%s24742_s1] sm:$0xff]   ;;  %v25376_v22 = vld [vmem:[#allocation65_spill] sm:$0xff] }
 0x41e   : > { %9891 = vst [vmem:[%s19882_s17 + $0x200] sm:$0xff] %v9859_v9  ;;  %v9862_v30 = vmax.f32 %v9830_v32, 0.0  ;;  %v9828_v47 = vadd.f32 %v23263_v51, %v9796_v2  ;;  %v9801_v38 = vadd.f32 %v16922_v44, %v9515_v36  ;;  %17128 = vmatprep.mubr.msk.bf16.mxu0 %vm484_vm1, %v25371_v24  ;;  %v25373_v44 = vld [vmem:[#allocation72_spill] sm:$0xff] }
 0x41f   : > { %v23306_v48 = vpop.f32.mrf.mxu1  ;;  %17115 = vmatmul.mubr.msk.bf16.gmra.mxu1 %vm484_vm1, %v11430_v19  ;;  %v9684_v31 = vpop.f32.mrf.mxu0  ;;  %v9112_v19 = vadd.f32 %v22977_v45, %v22700_v20  ;;  %v9115_v5 = vadd.f32 %v25373_v44, %v25372_v42  ;;  %v25374_v20 = vld [vmem:[#allocation44_spill] sm:$0xff]  ;;  %v12088_v45 = vsel %vm1994_vm2, %v12085_v21, %v12087_v7 }
 0x420   : > { %9894 = vst [vmem:[%s19882_s17 + $0x218] sm:$0xff] %v9862_v30  ;;  %v9860_v59 = vmax.f32 %v9828_v47, 0.0  ;;  %v9833_v34 = vadd.f32 %v23263_v51, %v9801_v38  ;;  %v9799_v56 = vadd.f32 %v9684_v31, %v9513_v50  ;;  %17154 = vmatprep.mubr.msk.bf16.mxu1 %vm484_vm1, %v12084_v27  ;;  %v25377_v31 = vld [vmem:[#allocation42_spill] sm:$0xff] }
 0x421   : > { %v23316_v53 = vpop.f32.mrf.mxu1  ;;  %v16923_v41 = vpop.f32.mrf.mxu0  ;;  %v9517_v30 = vadd.f32 %v25375_v18, %v9112_v19  ;;  %v25385_v18 = vld [vmem:[#allocation49_spill] sm:$0xff] }
 0x422   : > { %9892 = vst [vmem:[%s19882_s17 + $0x208] sm:$0xff] %v9860_v59  ;;  %v9865_v8 = vmax.f32 %v9833_v34, 0.0  ;;  %v9831_v16 = vadd.f32 %v23263_v51, %v9799_v56  ;;  %v9802_v11 = vadd.f32 %v16923_v41, %v9516_v3  ;;  %v25378_v3 = vld [vmem:[#allocation17_spill] sm:$0xff]  ;;  %v25379_v56 = vld [vmem:[#allocation79_spill] sm:$0xff] }
 0x423   : > { %v23324_v36 = vpop.f32.mrf.mxu1  ;;  %v9687_v9 = vpop.f32.mrf.mxu0  ;;  %v9113_v59 = vadd.f32 %v25378_v3, %v25377_v31  ;;  %v12089_v63 = vrot.slane %v25379_v56, 2  ;;  %v25380_v41 = vld [vmem:[#allocation7_spill] sm:$0xff] }
 0x424   : > { %9897 = vst [vmem:[%s19882_s17 + $0x230] sm:$0xff] %v9865_v8  ;;  %v9863_v32 = vmax.f32 %v9831_v16, 0.0  ;;  %v9834_v0 = vadd.f32 %v23263_v51, %v9802_v11  ;;  %v9800_v2 = vadd.f32 %v9687_v9, %v9514_v25  ;;  %v9520_v25 = vadd.f32 %v25380_v41, %v9115_v5  ;;  %v25381_v11 = vld [vmem:[#allocation24_spill] sm:$0xff]  ;;  %v25389_v41 = vld [vmem:[#allocation25_spill] sm:$0xff] }
 0x425   : > { %v23332_v27 = vpop.f32.mrf.mxu1  ;;  %v16926_v50 = vpop.f32.mrf.mxu0  ;;  %17129 = vmatmul.mubr.msk.bf16.gmra.mxu0 %vm484_vm1, %v25374_v20  ;;  %v25382_v9 = vld [vmem:[#allocation60_spill] sm:$0xff]  ;;  %v9518_v44 = vadd.f32 %v23094_v43, %v9113_v59 }
 0x426   : > { %9895 = vst [vmem:[%s19882_s17 + $0x220] sm:$0xff] %v9863_v32  ;;  %v9866_v47 = vmax.f32 %v9834_v0, 0.0  ;;  %v9832_v38 = vadd.f32 %v23263_v51, %v9800_v2  ;;  %v9805_v24 = vadd.f32 %v16926_v50, %v9519_v54  ;;  %17132 = vmatprep.mubr.msk.bf16.mxu0 %vm484_vm1, %v25376_v22  ;;  %v25383_v54 = vld [vmem:[#allocation75_spill] sm:$0xff]  ;;  %v25384_v2 = vld [vmem:[#allocation57_spill] sm:$0xff] }
 0x427   : > { %v23349_v34 = vpop.f32.mrf.mxu1  ;;  %17155 = vmatmul.mubr.msk.bf16.vlgmr.msra.gmra.mxu1 %vm484_vm1, %v12086_v40  ;;  %v9700_v21 = vpop.f32.mrf.mxu0  ;;  %v9118_v32 = vadd.f32 %v25383_v54, %v25382_v9  ;;  %v12091_v42 = vrot.slane %v25384_v2, 2  ;;  %v25387_v22 = vld [vmem:[#allocation35_spill] sm:$0xff] }
 0x428   : > { %9898 = vst [vmem:[%s19882_s17 + $0x238] sm:$0xff] %v9866_v47  ;;  %v9864_v8 = vmax.f32 %v9832_v38, 0.0  ;;  %v9837_v16 = vadd.f32 %v23263_v51, %v9805_v24  ;;  %17221 = vmatpush3.bf16.msra.mxu1 %v25381_v11  ;;  %v9803_v19 = vadd.f32 %v9700_v21, %v9517_v30  ;;  %17158 = vmatprep.mubr.msk.bf16.mxu1 %vm484_vm1, %v12088_v45  ;;  %v25386_v45 = vld [vmem:[#allocation83_spill] sm:$0xff]  ;;  %v25388_v21 = vld [vmem:[#allocation61_spill] sm:$0xff]  ;;  %v25390_v11 = vld [vmem:[#allocation48_spill] sm:$0xff] }
 0x429   : > { %v23360_v40 = vpop.f32.mrf.mxu1  ;;  %v16927_v0 = vpop.f32.mrf.mxu0  ;;  %17264 = vmatprep.subr.bf16.mxu1 %v23340_v60  ;;  %v9116_v30 = vadd.f32 %v25386_v45, %v25385_v18  ;;  %v12090_v24 = vsel %vm1994_vm2, %v12087_v7, %v12089_v63  ;;  %v9523_v31 = vadd.f32 %v25387_v22, %v9118_v32  ;;  %v25391_v7 = vld [vmem:[#allocation36_spill] sm:$0xff] }
 0x42a   : > { %9896 = vst [vmem:[%s19882_s17 + $0x228] sm:$0xff] %v9864_v8  ;;  %v9869_v5 = vmax.f32 %v9837_v16, 0.0  ;;  %v9835_v50 = vadd.f32 %v23263_v51, %v9803_v19  ;;  %v9806_v20 = vadd.f32 %v16927_v0, %v9520_v25  ;;  %v9119_v8 = vadd.f32 %v25389_v41, %v25388_v21  ;;  %v25398_v21 = vld [vmem:[#allocation84_spill] sm:$0xff] }
 0x42b   : > { %v23369_v47 = vpop.f32.mrf.mxu1  ;;  %v9703_v38 = vpop.f32.mrf.mxu0  ;;  %v12092_v19 = vsel %vm1994_vm2, %v12089_v63, %v12091_v42  ;;  %v9521_v9 = vadd.f32 %v25391_v7, %v9116_v30  ;;  %v25395_v63 = vld [vmem:[#allocation21_spill] sm:$0xff]  ;;  %v25396_v30 = vld [vmem:[#allocation40_spill] sm:$0xff] }
 0x42c   : > { %9901 = vst [vmem:[%s19882_s17 + $0x250] sm:$0xff] %v9869_v5  ;;  %v9867_v3 = vmax.f32 %v9835_v50, 0.0  ;;  %v9838_v43 = vadd.f32 %v23263_v51, %v9806_v20  ;;  %v9804_v59 = vadd.f32 %v9703_v38, %v9518_v44  ;;  %v25392_v44 = vld [vmem:[#allocation4_spill] sm:$0xff]  ;;  %v25393_v5 = vld [vmem:[#allocation69_spill] sm:$0xff]  ;;  %v25394_v50 = vld [vmem:[#allocation38_spill] sm:$0xff]  ;;  %v12093_v38 = vrot.slane %v25395_v63, 2 }
 0x42d   : > { %v23377_v25 = vpop.f32.mrf.mxu1  ;;  %v16930_v16 = vpop.f32.mrf.mxu0  ;;  %17133 = vmatmul.mubr.msk.bf16.gmra.mxu0 %vm484_vm1, %v25390_v11  ;;  %v9117_v20 = vadd.f32 %v25394_v50, %v25393_v5  ;;  %v9524_v22 = vadd.f32 %v25396_v30, %v9119_v8 }
 0x42e   : > { %9899 = vst [vmem:[%s19882_s17 + $0x240] sm:$0xff] %v9867_v3  ;;  %v9870_v54 = vmax.f32 %v9838_v43, 0.0  ;;  %v9836_v32 = vadd.f32 %v23263_v51, %v9804_v59  ;;  %v9809_v0 = vadd.f32 %v16930_v16, %v9523_v31  ;;  %17136 = vmatprep.mubr.msk.bf16.mxu0 %vm484_vm1, %v25392_v44  ;;  %v25397_v59 = vld [vmem:[#allocation77_spill] sm:$0xff] }
 0x42f   : > { %v23389_v18 = vpop.f32.mrf.mxu1  ;;  %17159 = vmatmul.mubr.msk.bf16.gmra.mxu1 %vm484_vm1, %v12090_v24  ;;  %v9716_v45 = vpop.f32.mrf.mxu0  ;;  %v9122_v41 = vadd.f32 %v25398_v21, %v25397_v59  ;;  %v25399_v24 = vld [vmem:[#allocation46_spill] sm:$0xff]  ;;  %v9522_v44 = vadd.f32 %v23139_v49, %v9117_v20 }
 0x430   : > { %9902 = vst [vmem:[%s19882_s17 + $0x258] sm:$0xff] %v9870_v54  ;;  %v9868_v3 = vmax.f32 %v9836_v32, 0.0  ;;  %v9841_v31 = vadd.f32 %v23263_v51, %v9809_v0  ;;  %v9807_v43 = vadd.f32 %v9716_v45, %v9521_v9  ;;  %17162 = vmatprep.mubr.msk.bf16.mxu1 %vm484_vm1, %v12092_v19  ;;  %v12095_v7 = vrot.slane %v25399_v24, 2  ;;  %v25400_v0 = vld [vmem:[#allocation27_spill] sm:$0xff]  ;;  %v25401_v9 = vld [vmem:[#allocation45_spill] sm:$0xff] }
 0x431   : > { %v23399_v16 = vpop.f32.mrf.mxu1  ;;  %v16931_v11 = vpop.f32.mrf.mxu0  ;;  %v9120_v5 = vadd.f32 %v25401_v9, %v25400_v0  ;;  %v12094_v45 = vsel %vm1994_vm2, %v12091_v42, %v12093_v38  ;;  %v9527_v30 = vadd.f32 %v23152_v33, %v9122_v41  ;;  %v25405_v9 = vld [vmem:[#allocation59_spill] sm:$0xff]  ;;  %v12099_v33 = vrot.slane %v23124_v37, 2 }
 0x432   : > { %9900 = vst [vmem:[%s19882_s17 + $0x248] sm:$0xff] %v9868_v3  ;;  %v9873_v8 = vmax.f32 %v9841_v31, 0.0  ;;  %v9839_v54 = vadd.f32 %v23263_v51, %v9807_v43  ;;  %v9810_v32 = vadd.f32 %v16931_v11, %v9524_v22  ;;  %v25402_v3 = vld [vmem:[#allocation28_spill] sm:$0xff]  ;;  %v25403_v31 = vld [vmem:[#allocation33_spill] sm:$0xff]  ;;  %v25404_v11 = vld [vmem:[#allocation50_spill] sm:$0xff]  ;;  %v12096_v0 = vsel %vm1994_vm2, %v12093_v38, %v12095_v7 }
 0x433   : > { %v23407_v50 = vpop.f32.mrf.mxu1  ;;  %v9719_v19 = vpop.f32.mrf.mxu0  ;;  %v9123_v43 = vadd.f32 %v25403_v31, %v25402_v3  ;;  %v12097_v42 = vrot.slane %v25405_v9, 2  ;;  %v9525_v41 = vadd.f32 %v23160_v29, %v9120_v5  ;;  %v25408_v3 = vld [vmem:[#allocation78_spill] sm:$0xff]  ;;  %v25409_v9 = vld [vmem:[#allocation85_spill] sm:$0xff]  ;;  %v12103_v29 = vrot.slane %v23167_v62, 2 }
 0x434   : > { %9905 = vst [vmem:[%s19882_s17 + $0x270] sm:$0xff] %v9873_v8  ;;  %v9871_v59 = vmax.f32 %v9839_v54, 0.0  ;;  %v9842_v49 = vadd.f32 %v23263_v51, %v9810_v32  ;;  %v9808_v20 = vadd.f32 %v9719_v19, %v9522_v44  ;;  %v25406_v32 = vld [vmem:[#allocation2_spill] sm:$0xff]  ;;  %v25407_v19 = vld [vmem:[#allocation67_spill] sm:$0xff]  ;;  %v12101_v14 = vrot.slane %v25409_v9, 2  ;;  %v25410_v5 = vld [vmem:[#allocation81_spill] sm:$0xff] }
 0x435   : > { %v23415_v22 = vpop.f32.mrf.mxu1  ;;  %v16934_v21 = vpop.f32.mrf.mxu0  ;;  %17137 = vmatmul.mubr.msk.bf16.gmra.mxu0 %vm484_vm1, %v25404_v11  ;;  %v9121_v31 = vadd.f32 %v25408_v3, %v25407_v19  ;;  %v12098_v4 = vsel %vm1994_vm2, %v12095_v7, %v12097_v42  ;;  %v12100_v28 = vsel %vm1994_vm2, %v12097_v42, %v12099_v33  ;;  %v25416_v42 = vld [vmem:[#allocation8_spill] sm:$0xff] }
 0x436   : > { %9903 = vst [vmem:[%s19882_s17 + $0x260] sm:$0xff] %v9871_v59  ;;  %v9874_v44 = vmax.f32 %v9842_v49, 0.0  ;;  %v9840_v8 = vadd.f32 %v23263_v51, %v9808_v20  ;;  %v9813_v54 = vadd.f32 %v16934_v21, %v9527_v30  ;;  %17140 = vmatprep.mubr.msk.bf16.mxu0 %vm484_vm1, %v25406_v32  ;;  %v9528_v59 = vadd.f32 %v25410_v5, %v9123_v43  ;;  %v25411_v21 = vld [vmem:[#allocation66_spill] sm:$0xff]  ;;  %v25412_v32 = vld [vmem:[#allocation53_spill] sm:$0xff] }
 0x437   : > { %v23429_v11 = vpop.f32.mrf.mxu1  ;;  %17163 = vmatmul.mubr.msk.bf16.gmra.mxu1 %vm484_vm1, %v12094_v45  ;;  %v9732_v38 = vpop.f32.mrf.mxu0  ;;  %v9126_v19 = vadd.f32 %v25412_v32, %v25411_v21  ;;  %v23453_v58 = vsel %vm1994_vm2, %v12099_v33, %v12101_v14  ;;  %v23456_v7 = vsel %vm1994_vm2, %v12101_v14, %v12103_v29  ;;  %v25422_v14 = vrot.slane %v23171_v35, 2 }
 0x438   : > { %9906 = vst [vmem:[%s19882_s17 + $0x278] sm:$0xff] %v9874_v44  ;;  %v9872_v30 = vmax.f32 %v9840_v8, 0.0  ;;  %v9845_v49 = vadd.f32 %v23263_v51, %v9813_v54  ;;  %v9811_v20 = vadd.f32 %v9732_v38, %v9525_v41  ;;  %17166 = vmatprep.mubr.msk.bf16.mxu1 %vm484_vm1, %v12096_v0  ;;  %v9526_v44 = vadd.f32 %v23183_v6, %v9121_v31  ;;  %v25413_v54 = vld [vmem:[#allocation29_spill] sm:$0xff]  ;;  %v25414_v38 = vld [vmem:[#allocation64_spill] sm:$0xff] }
 0x439   : > { %v23440_v3 = vpop.f32.mrf.mxu1  ;;  %v16935_v45 = vpop.f32.mrf.mxu0  ;;  %v9124_v5 = vadd.f32 %v25414_v38, %v25413_v54  ;;  %v11715_v6 = vrot.slane %v25416_v42, 2  ;;  %v25417_v31 = vld [vmem:[#allocation37_spill] sm:$0xff]  ;;  %v23471_v42 = vsel %vm1994_vm2, %v12103_v29, %v25422_v14 }
 0x43a   : > { %9904 = vst [vmem:[%s19882_s17 + $0x268] sm:$0xff] %v9872_v30  ;;  %v9877_v8 = vmax.f32 %v9845_v49, 0.0  ;;  %v9843_v41 = vadd.f32 %v23263_v51, %v9811_v20  ;;  %v9814_v0 = vadd.f32 %v16935_v45, %v9528_v59  ;;  %v9531_v30 = vadd.f32 %v25417_v31, %v9126_v19  ;;  %v25418_v45 = vld [vmem:[#allocation9_spill] sm:$0xff]  ;;  %v25423_v31 = vld [vmem:[#allocation20_spill] sm:$0xff] }
 0x43b   : > { %v23450_v21 = vpop.f32.mrf.mxu1  ;;  %v9735_v32 = vpop.f32.mrf.mxu0  ;;  %v25419_v54 = vld [vmem:[#allocation73_spill] sm:$0xff]  ;;  %v12369_v19 = vshrl.u32 %v23241_v46, 16 }
 0x43c   : > { %25415 = vst [vmem:[#allocation51_spill] sm:$0xff] %v23450_v21  ;;  %9909 = vst [vmem:[%s19882_s17 + $0x290] sm:$0xff] %v9877_v8  ;;  %v9875_v49 = vmax.f32 %v9843_v41, 0.0  ;;  %v9846_v59 = vadd.f32 %v23263_v51, %v9814_v0  ;;  %v9812_v20 = vadd.f32 %v9735_v32, %v9526_v44  ;;  %v9127_v38 = vadd.f32 %v25419_v54, %v25418_v45  ;;  %v25421_v21 = vld [vmem:[#allocation3_spill] sm:$0xff]  ;;  %v25425_v45 = vld [vmem:[#allocation16_spill] sm:$0xff] }
 0x43d   : > { %v23464_v43 = vpop.f32.mrf.mxu1  ;;  %v16938_v33 = vpop.f32.mrf.mxu0  ;;  %17141 = vmatmul.mubr.msk.bf16.gmra.mxu0 %vm484_vm1, %v25421_v21  ;;  %v12372_v8 = vshll.u32 %v23241_v46, 16  ;;  %v9529_v44 = vadd.f32 %v23205_v12, %v9124_v5  ;;  %v25424_v21 = vld [vmem:[#allocation68_spill] sm:$0xff]  ;;  %v12377_v5 = vshrl.u32 %v22935_v10, 16 }
 0x43e   : > { %25420 = vst [vmem:[#allocation22_spill] sm:$0xff] %v23464_v43  ;;  %9907 = vst [vmem:[%s19882_s17 + $0x280] sm:$0xff] %v9875_v49  ;;  %v9878_v41 = vmax.f32 %v9846_v59, 0.0  ;;  %v9844_v0 = vadd.f32 %v23263_v51, %v9812_v20  ;;  %v9817_v32 = vadd.f32 %v16938_v33, %v9531_v30  ;;  %17144 = vmatprep.mubr.msk.bf16.mxu0 %vm484_vm1, %v25423_v31  ;;  %v25426_v43 = vld [vmem:[#allocation62_spill] sm:$0xff]  ;;  %v12380_v30 = vshll.u32 %v22935_v10, 16  ;;  %v25429_v31 = vld [vmem:[#allocation41_spill] sm:$0xff] }
 0x43f   : > { %v9125_v54 = vadd.f32 %v25425_v45, %v25424_v21  ;;  %v23482_v29 = vpop.f32.mrf.mxu1  ;;  %17167 = vmatmul.mubr.msk.bf16.gmra.mxu1 %vm484_vm1, %v12098_v4  ;;  %v9748_v14 = vpop.f32.mrf.mxu0  ;;  %v25427_v46 = vrot.slane %v25426_v43, 2  ;;  %v9532_v49 = vadd.f32 %v23218_v61, %v9127_v38  ;;  %v25428_v4 = vld [vmem:[#allocation32_spill] sm:$0xff]  ;;  %v12371_v45 = vrot.slane %v12369_v19, 2 }
 0x440   : > { %9910 = vst [vmem:[%s19882_s17 + $0x298] sm:$0xff] %v9878_v41  ;;  %v9876_v59 = vmax.f32 %v9844_v0, 0.0  ;;  %v9849_v20 = vadd.f32 %v23263_v51, %v9817_v32  ;;  %v9815_v33 = vadd.f32 %v9748_v14, %v9529_v44  ;;  %17170 = vmatprep.mubr.msk.bf16.mxu1 %vm484_vm1, %v12100_v28  ;;  %v9130_v43 = vadd.f32 %v25429_v31, %v25428_v4  ;;  %v25431_v0 = vld [vmem:[#allocation18_spill] sm:$0xff]  ;;  %v25432_v28 = vld [vmem:[#allocation80_spill] sm:$0xff] }
 0x441   : > { %v23488_v12 = vsel %vm1994_vm2, %v25427_v46, %v11715_v6  ;;  %v23498_v21 = vpop.f32.mrf.mxu1  ;;  %v16939_v6 = vpop.f32.mrf.mxu0  ;;  %v12374_v46 = vrot.slane %v12372_v8, 3  ;;  %v12386_v10 = vshrl.u32 %v22943_v39, 16  ;;  %v9530_v61 = vadd.f32 %v23235_v57, %v9125_v54 }
 0x442   : > { %25430 = vst [vmem:[#allocation72_spill] sm:$0xff] %v23498_v21  ;;  %9908 = vst [vmem:[%s19882_s17 + $0x288] sm:$0xff] %v9876_v59  ;;  %v9881_v38 = vmax.f32 %v9849_v20, 0.0  ;;  %v9847_v41 = vadd.f32 %v23263_v51, %v9815_v33  ;;  %v9818_v44 = vadd.f32 %v16939_v6, %v9532_v49  ;;  %v9128_v32 = vadd.f32 %v25432_v28, %v25431_v0  ;;  %v25434_v20 = vld [vmem:[#allocation52_spill] sm:$0xff]  ;;  %v25435_v49 = vld [vmem:[#allocation86_spill] sm:$0xff] }
 0x443   : > { %v23506_v14 = vpop.f32.mrf.mxu1  ;;  %v9751_v4 = vpop.f32.mrf.mxu0  ;;  %v12379_v31 = vrot.slane %v12377_v5, 2  ;;  %v12382_v21 = vrot.slane %v12380_v30, 3  ;;  %v12389_v19 = vshll.u32 %v22943_v39, 16  ;;  %v9535_v8 = vadd.f32 %v23253_v15, %v9130_v43  ;;  %v25436_v28 = vld [vmem:[#allocation15_spill] sm:$0xff]  ;;  %v25437_v5 = vld [vmem:[#allocation6_spill] sm:$0xff] }
 0x444   : > { %25433 = vst [vmem:[#allocation44_spill] sm:$0xff] %v23506_v14  ;;  %9913 = vst [vmem:[%s19882_s17 + $0x2b0] sm:$0xff] %v9881_v38  ;;  %v9879_v57 = vmax.f32 %v9847_v41, 0.0  ;;  %v9850_v54 = vadd.f32 %v23263_v51, %v9818_v44  ;;  %v9816_v59 = vadd.f32 %v9751_v4, %v9530_v61  ;;  %v9131_v33 = vadd.f32 %v25435_v49, %v25434_v20  ;;  %v25438_v41 = vld [vmem:[#allocation70_spill] sm:$0xff]  ;;  %v25440_v4 = vld [vmem:[#allocation87_spill] sm:$0xff] }
 0x445   : > { %v23514_v6 = vpop.f32.mrf.mxu1  ;;  %v16942_v0 = vpop.f32.mrf.mxu0  ;;  %17145 = vmatmul.mubr.msk.bf16.gmra.mxu0 %vm484_vm1, %v25436_v28  ;;  %v12107_v30 = vrot.slane %v25437_v5, 2  ;;  %v12375_v14 = vor.u32 %v12374_v46, %v12371_v45  ;;  %v12388_v39 = vrot.slane %v12386_v10, 2  ;;  %v9533_v15 = vadd.f32 %v23269_v26, %v9128_v32  ;;  %v25439_v44 = vld [vmem:[#allocation58_spill] sm:$0xff] }
 0x446   : > { %9911 = vst [vmem:[%s19882_s17 + $0x2a0] sm:$0xff] %v9879_v57  ;;  %v9882_v43 = vmax.f32 %v9850_v54, 0.0  ;;  %v9848_v61 = vadd.f32 %v23263_v51, %v9816_v59  ;;  %v9821_v38 = vadd.f32 %v16942_v0, %v9535_v8  ;;  %17148 = vmatprep.mubr.msk.bf16.mxu0 %vm484_vm1, %v25438_v41  ;;  %v9129_v20 = vadd.f32 %v25440_v4, %v25439_v44  ;;  %v25441_v59 = vld [vmem:[#allocation5_spill] sm:$0xff]  ;;  %v25442_v0 = vld [vmem:[#allocation56_spill] sm:$0xff]  ;;  %v25445_v41 = vld [vmem:[#allocation14_spill] sm:$0xff] }
 0x447   : > { %v23526_v49 = vpop.f32.mrf.mxu1  ;;  %17171 = vmatmul.mubr.msk.bf16.gmra.mxu1 %vm484_vm1, %v23453_v58  ;;  %v9764_v45 = vpop.f32.mrf.mxu0  ;;  %v12383_v46 = vor.u32 %v12382_v21, %v12379_v31  ;;  %v12395_v26 = vshrl.u32 %v22992_v23, 16  ;;  %v12398_v10 = vshll.u32 %v22992_v23, 16  ;;  %v9536_v32 = vadd.f32 %v23280_v52, %v9131_v33 }
 0x448   : > { %9914 = vst [vmem:[%s19882_s17 + $0x2b8] sm:$0xff] %v9882_v43  ;;  %v9880_v8 = vmax.f32 %v9848_v61, 0.0  ;;  %v9853_v57 = vadd.f32 %v23263_v51, %v9821_v38  ;;  %v9819_v54 = vadd.f32 %v9764_v45, %v9533_v15  ;;  %17174 = vmatprep.mubr.msk.bf16.mxu1 %vm484_vm1, %v23456_v7  ;;  %v9134_v58 = vadd.f32 %v25442_v0, %v25441_v59  ;;  %v25444_v38 = vld [vmem:[#allocation30_spill] sm:$0xff] }
 0x449   : > { %v23539_v28 = vpop.f32.mrf.mxu1  ;;  %v16943_v21 = vpop.f32.mrf.mxu0  ;;  %v25443_v23 = vrot.slane %v23171_v35, 2  ;;  %v12109_v31 = vrot.slane %v23216_v55, 2  ;;  %v12391_v33 = vrot.slane %v12389_v19, 3  ;;  %v9534_v15 = vadd.f32 %v23289_v17, %v9129_v20 }
 0x44a   : > { %9912 = vst [vmem:[%s19882_s17 + $0x2a8] sm:$0xff] %v9880_v8  ;;  %v9885_v7 = vmax.f32 %v9853_v57, 0.0  ;;  %v9851_v43 = vadd.f32 %v23263_v51, %v9819_v54  ;;  %v9822_v61 = vadd.f32 %v16943_v21, %v9536_v32  ;;  %v9132_v44 = vadd.f32 %v25445_v41, %v25444_v38  ;;  %v25446_v57 = vld [vmem:[#allocation71_spill] sm:$0xff] }
 0x44b   : > { %v12108_v52 = vsel %vm1994_vm2, %v25443_v23, %v12107_v30  ;;  %v23552_v4 = vpop.f32.mrf.mxu1  ;;  %v9767_v45 = vpop.f32.mrf.mxu0  ;;  %v12384_v59 = vsel %vm2681_vm6, %v12375_v14, %v12383_v46  ;;  %v12397_v0 = vrot.slane %v12395_v26, 2  ;;  %v12400_v23 = vrot.slane %v12398_v10, 3  ;;  %v25447_v32 = vld [vmem:[#allocation47_spill] sm:$0xff] }
 0x44c   : > { %v9539_v19 = vadd.f32 %v23306_v48, %v9134_v58  ;;  %9917 = vst [vmem:[%s19882_s17 + $0x2d0] sm:$0xff] %v9885_v7  ;;  %v9883_v17 = vmax.f32 %v9851_v43, 0.0  ;;  %v9854_v20 = vadd.f32 %v23263_v51, %v9822_v61  ;;  %v9820_v8 = vadd.f32 %v9767_v45, %v9534_v15  ;;  %v25448_v43 = vld [vmem:[#allocation55_spill] sm:$0xff] }
 0x44d   : > { %v9135_v54 = vadd.f32 %v25447_v32, %v25446_v57  ;;  %v23560_v21 = vpop.f32.mrf.mxu1  ;;  %v16946_v38 = vpop.f32.mrf.mxu0  ;;  %17149 = vmatmul.mubr.msk.bf16.gmra.mxu0 %vm484_vm1, %v23488_v12  ;;  %v12392_v14 = vor.u32 %v12391_v33, %v12388_v39  ;;  %v12404_v26 = vshrl.u32 %v25379_v56, 16  ;;  %v12407_v48 = vshll.u32 %v25379_v56, 16  ;;  %v25449_v61 = vld [vmem:[#allocation11_spill] sm:$0xff] }
 0x44e   : > { %v9537_v10 = vadd.f32 %v23316_v53, %v9132_v44  ;;  %9915 = vst [vmem:[%s19882_s17 + $0x2c0] sm:$0xff] %v9883_v17  ;;  %v9886_v58 = vmax.f32 %v9854_v20, 0.0  ;;  %v9852_v15 = vadd.f32 %v23263_v51, %v9820_v8  ;;  %v9825_v7 = vadd.f32 %v16946_v38, %v9539_v19  ;;  %17188 = vmatprep.mubr.msk.bf16.mxu0 %vm484_vm1, %v12384_v59 }
 0x44f   : > { %v9133_v41 = vadd.f32 %v25449_v61, %v25448_v43  ;;  %v23572_v45 = vpop.f32.mrf.mxu1  ;;  %17175 = vmatmul.mubr.msk.bf16.gmra.mxu1 %vm484_vm1, %v23471_v42  ;;  %v9780_v12 = vpop.f32.mrf.mxu0  ;;  %v23576_v39 = vor.u32 %v12400_v23, %v12397_v0  ;;  %v12413_v53 = vshrl.u32 %v25384_v2, 16  ;;  %v12416_v56 = vshll.u32 %v25384_v2, 16 }
 0x450   : > { %v9540_v33 = vadd.f32 %v23324_v36, %v9135_v54  ;;  %9918 = vst [vmem:[%s19882_s17 + $0x2d8] sm:$0xff] %v9886_v58  ;;  %v9884_v44 = vmax.f32 %v9852_v15, 0.0  ;;  %v9857_v59 = vadd.f32 %v23263_v51, %v9825_v7  ;;  %v9823_v19 = vadd.f32 %v9780_v12, %v9537_v10  ;;  %17178 = vmatprep.mubr.msk.bf16.mxu1 %vm484_vm1, %v12108_v52  ;;  %v17630_v15 = vld [vmem:[%s17749_s25 + $0x220] ss:$0 sps:$4 sm:$0x33]  }
 0x451   : > { %v23584_v17 = vpop.f32.mrf.mxu1  ;;  %v16947_v42 = vpop.f32.mrf.mxu0  ;;  %v12393_v0 = vsel %vm2681_vm6, %v12383_v46, %v12392_v14  ;;  %v12111_v23 = vrot.slane %v23274_v1, 2  ;;  %v12406_v20 = vrot.slane %v12404_v26, 2  ;;  %v12409_v8 = vrot.slane %v12407_v48, 3  ;;  %v23598_v26 = vld [vmem:[%s24742_s1 + $0x10] sm:$0xff]  }
 0x452   : > { %v9538_v2 = vadd.f32 %v23332_v27, %v9133_v41  ;;  %9916 = vst [vmem:[%s19882_s17 + $0x2c8] sm:$0xff] %v9884_v44  ;;  %v9889_v36 = vmax.f32 %v9857_v59, 0.0  ;;  %v9855_v57 = vadd.f32 %v23263_v51, %v9823_v19  ;;  %v9826_v32 = vadd.f32 %v16947_v42, %v9540_v33  ;;  %v17666_v33 = vld [vmem:[%s17749_s25 + $0x1d0] sm:$0xff]  }
 0x453   : > { %v23591_v54 = vpop.f32.mrf.mxu1  ;;  %v9783_v52 = vpop.f32.mrf.mxu0  ;;  %v12402_v38 = vsel %vm2681_vm6, %v12392_v14, %v23576_v39  ;;  %v12415_v46 = vrot.slane %v12413_v53, 2  ;;  %v12418_v10 = vrot.slane %v12416_v56, 3  ;;  %v12110_v14 = vsel %vm1994_vm2, %v12107_v30, %v12109_v31 }
 0x454   : > { %9921 = vst [vmem:[%s19882_s17 + $0x2f0] sm:$0xff] %v9889_v36  ;;  %v9887_v27 = vmax.f32 %v9855_v57, 0.0  ;;  %v9858_v48 = vadd.f32 %v23263_v51, %v9826_v32  ;;  %v9824_v58 = vadd.f32 %v9783_v52, %v9538_v2  ;;  %v12112_v61 = vsel %vm1994_vm2, %v12109_v31, %v12111_v23 }
 0x455   : > { %v23608_v7 = vpop.f32.mrf.mxu1  ;;  %v16986_v43 = vpop.f32.mrf.mxu0  ;;  %17189 = vmatmul.mubr.msk.bf16.vlgmr.msra.gmra.mxu0 %vm484_vm1, %v12393_v0  ;;  %v12410_v41 = vor.u32 %v12409_v8, %v12406_v20  ;;  %v12422_v12 = vshrl.u32 %v25395_v63, 16  ;;  %v12425_v44 = vshll.u32 %v17666_v33, 16  ;;  %v12419_v31 = vor.u32 %v12418_v10, %v12415_v46 }
 0x456   : > { %9919 = vst [vmem:[%s19882_s17 + $0x2e0] sm:$0xff] %v9887_v27  ;;  %v9890_v53 = vmax.f32 %v9858_v48, 0.0  ;;  %v9856_v56 = vadd.f32 %v23263_v51, %v9824_v58  ;;  %v23618_v30 = vadd.f32 %v16986_v43, %v23349_v34  ;;  %17255 = vmatpush3.bf16.msra.mxu0 %v23225_v13  ;;  %17192 = vmatprep.mubr.msk.bf16.mxu0 %vm484_vm1, %v12402_v38  ;;  %v12431_v19 = vshrl.u32 %v25399_v24, 16  ;;  %v17667_v58 = vld [vmem:[%s17749_s25 + $0x1e0] sm:$0xff]  }
 0x457   : > { %v23623_v59 = vpop.f32.mrf.mxu1  ;;  %17179 = vmatmul.mubr.msk.bf16.gmra.mxu1 %vm484_vm1, %v12110_v14  ;;  %v10462_v63 = vpop.f32.mrf.mxu0  ;;  %v12434_v51 = vshll.u32 %v25399_v24, 16  ;;  %17274 = vmatprep.subr.bf16.mxu0 %v23598_v26  ;;  %v12113_v42 = vrot.slane %v17630_v15, 2  ;;  %v12411_v24 = vsel %vm2681_vm6, %v23576_v39, %v12410_v41  ;;  %v12424_v2 = vrot.slane %v12422_v12, 2 }
 0x458   : > { %9922 = vst [vmem:[%s19882_s17 + $0x2f8] sm:$0xff] %v9890_v53  ;;  %v9888_v34 = vmax.f32 %v9856_v56, 0.0  ;;  %v23631_v13 = vadd.f32 %v10462_v63, %v23360_v40  ;;  %17182 = vmatprep.mubr.msk.bf16.mxu1 %vm484_vm1, %v12112_v61  ;;  %v12427_v36 = vrot.slane %v12425_v44, 3  ;;  %v12420_v32 = vsel %vm2681_vm6, %v12410_v41, %v12419_v31 }
 0x459   : > { %v23634_v0 = vpop.f32.mrf.mxu1  ;;  %v16987_v20 = vpop.f32.mrf.mxu0  ;;  %v12433_v52 = vrot.slane %v12431_v19, 2  ;;  %v12436_v38 = vrot.slane %v12434_v51, 3  ;;  %v12114_v10 = vsel %vm1994_vm2, %v12111_v23, %v12113_v42  ;;  %v12440_v14 = vshrl.u32 %v17667_v58, 16 }
 0x45a   : > { %9920 = vst [vmem:[%s19882_s17 + $0x2e8] sm:$0xff] %v9888_v34  ;;  %v23638_v8 = vadd.f32 %v16987_v20, %v23369_v47  ;;  %v12428_v48 = vor.u32 %v12427_v36, %v12424_v2  ;;  %v12443_v15 = vshll.u32 %v17667_v58, 16  ;;  %v12449_v61 = vshrl.u32 %v23124_v37, 16  ;;  %v23687_v36 = vld [vmem:[%s24742_s1 + $0x18] sm:$0xff]   ;;  %v25452_v58 = vld [vmem:[#allocation82_spill] sm:$0xff] }
 0x45b   : > { %v23642_v57 = vpop.f32.mrf.mxu1  ;;  %v10465_v40 = vpop.f32.mrf.mxu0  ;;  %v12437_v23 = vor.u32 %v12436_v38, %v12433_v52  ;;  %v12452_v41 = vshll.u32 %v23124_v37, 16  ;;  %v12442_v63 = vrot.slane %v12440_v14, 2  ;;  %v25451_v52 = vld [vmem:[#allocation31_spill] sm:$0xff] }
 0x45c   : > { %v23646_v46 = vadd.f32 %v10465_v40, %v23377_v25  ;;  %v12429_v44 = vsel %vm2681_vm6, %v12419_v31, %v12428_v48  ;;  %v12445_v19 = vrot.slane %v12443_v15, 3  ;;  %v12461_v31 = vshll.u32 %v25409_v9, 16 }
 0x45d   : > { %v23649_v47 = vpop.f32.mrf.mxu1  ;;  %v16990_v27 = vpop.f32.mrf.mxu0  ;;  %17193 = vmatmul.mubr.msk.bf16.gmra.mxu0 %vm484_vm1, %v12411_v24  ;;  %v12438_v37 = vsel %vm2681_vm6, %v12428_v48, %v12437_v23  ;;  %v12454_v42 = vrot.slane %v12452_v41, 3 }
 0x45e   : > { %v23653_v39 = vadd.f32 %v16990_v27, %v23389_v18  ;;  %17196 = vmatprep.mubr.msk.bf16.mxu0 %vm484_vm1, %v12420_v32  ;;  %v25450_v18 = vld [vmem:[#allocation23_spill] sm:$0xff]  ;;  %v12467_v27 = vshrl.u32 %v23167_v62, 16 }
 0x45f   : > { %v23657_v43 = vpop.f32.mrf.mxu1  ;;  %17183 = vmatmul.mubr.msk.bf16.gmra.mxu1 %vm484_vm1, %v12114_v10  ;;  %v10478_v25 = vpop.f32.mrf.mxu0 }
 0x460   : > { %v23663_v12 = vadd.f32 %v10478_v25, %v23399_v16  ;;  %17222 = vmatprep.mubr.msk.bf16.mxu1 %vm484_vm1, %v25450_v18  ;;  %v12451_v16 = vrot.slane %v12449_v61, 2  ;;  %v12463_v61 = vrot.slane %v12461_v31, 3 }
 0x461   : > { %v23667_v53 = vpop.f32.mrf.mxu1  ;;  %v16991_v56 = vpop.f32.mrf.mxu0 }
 0x462   : > { %v23670_v33 = vadd.f32 %v16991_v56, %v23407_v50  ;;  %v12458_v50 = vshrl.u32 %v25409_v9, 16  ;;  %v12455_v10 = vor.u32 %v12454_v42, %v12451_v16  ;;  %v12470_v9 = vshll.u32 %v23167_v62, 16  ;;  %v25453_v62 = vld [vmem:[#allocation51_spill] sm:$0xff] }
 0x463   : > { %v23673_v51 = vpop.f32.mrf.mxu1  ;;  %v10481_v34 = vpop.f32.mrf.mxu0 }
 0x464   : > { %v23677_v20 = vadd.f32 %v10481_v34, %v23415_v22  ;;  %v12446_v22 = vor.u32 %v12445_v19, %v12442_v63  ;;  %v12460_v25 = vrot.slane %v12458_v50, 2  ;;  %v12472_v63 = vrot.slane %v12470_v9, 3  ;;  %v25454_v34 = vld [vmem:[#allocation22_spill] sm:$0xff] }
 0x465   : > { %v23679_v24 = vpop.f32.mrf.mxu1  ;;  %v16994_v2 = vpop.f32.mrf.mxu0  ;;  %17197 = vmatmul.mubr.msk.bf16.gmra.mxu0 %vm484_vm1, %v12429_v44  ;;  %v12469_v44 = vrot.slane %v12467_v27, 2  ;;  %v12476_v50 = vshrl.u32 %v23171_v35, 16 }
 0x466   : > { %v23690_v40 = vadd.f32 %v16994_v2, %v23429_v11  ;;  %17200 = vmatprep.mubr.msk.bf16.mxu0 %vm484_vm1, %v12438_v37  ;;  %v12456_v56 = vsel %vm2681_vm6, %v12446_v22, %v12455_v10  ;;  %v12464_v42 = vor.u32 %v12463_v61, %v12460_v25  ;;  %v25458_v61 = vld [vmem:[#allocation44_spill] sm:$0xff] }
 0x467   : > { %v17020_v32 = vpop.f32.mrf.mxu1  ;;  %17223 = vmatmul.mubr.msk.bf16.vlgmr.msra.gmra.mxu1 %vm484_vm1, %v25451_v52  ;;  %v10494_v38 = vpop.f32.mrf.mxu0  ;;  %v12473_v52 = vor.u32 %v12472_v63, %v12469_v44 }
 0x468   : > { %v23698_v48 = vadd.f32 %v17020_v32, %v23618_v30  ;;  %17265 = vmatpush3.bf16.msra.mxu1 %v23340_v60  ;;  %v23702_v11 = vadd.f32 %v10494_v38, %v23440_v3  ;;  %17226 = vmatprep.mubr.msk.bf16.mxu1 %vm484_vm1, %v25452_v58  ;;  %v12447_v60 = vsel %vm2681_vm6, %v12437_v23, %v12446_v22  ;;  %v25455_v22 = vld [vmem:[#allocation76_spill] sm:$0xff]  ;;  %v12485_v38 = vshrl.u32 %v25437_v5, 16 }
 0x469   : > { %v10716_v14 = vpop.f32.mrf.mxu1  ;;  %v16995_v15 = vpop.f32.mrf.mxu0  ;;  %17284 = vmatprep.subr.bf16.mxu1 %v23687_v36  ;;  %v25457_v58 = vld [vmem:[#allocation12_spill] sm:$0xff] }
 0x46a   : > { %v23708_v41 = vadd.f32 %v10716_v14, %v23631_v13  ;;  %v23711_v30 = vadd.f32 %v16995_v15, %v25453_v62  ;;  %v12465_v15 = vsel %vm2681_vm6, %v12455_v10, %v12464_v42 }
 0x46b   : > { %v17021_v18 = vpop.f32.mrf.mxu1  ;;  %v10497_v3 = vpop.f32.mrf.mxu0 }
 0x46c   : > { %v23716_v19 = vadd.f32 %v17021_v18, %v23638_v8  ;;  %v23719_v37 = vadd.f32 %v10497_v3, %v25454_v34  ;;  %v12479_v8 = vshll.u32 %v23171_v35, 16  ;;  %v12474_v3 = vsel %vm2681_vm6, %v12464_v42, %v12473_v52 }
 0x46d   : > { %v10719_v16 = vpop.f32.mrf.mxu1  ;;  %v16998_v13 = vpop.f32.mrf.mxu0  ;;  %17201 = vmatmul.mubr.msk.bf16.gmra.mxu0 %vm484_vm1, %v12447_v60 }
 0x46e   : > { %v23723_v2 = vadd.f32 %v10719_v16, %v23646_v46  ;;  %v23726_v23 = vadd.f32 %v16998_v13, %v23482_v29  ;;  %17204 = vmatprep.mubr.msk.bf16.mxu0 %vm484_vm1, %v12456_v56  ;;  %v12488_v46 = vshll.u32 %v25437_v5, 16  ;;  %v25456_v29 = vld [vmem:[#allocation72_spill] sm:$0xff]  ;;  %v12478_v5 = vrot.slane %v12476_v50, 2 }
 0x46f   : > { %v17024_v31 = vpop.f32.mrf.mxu1  ;;  %17227 = vmatmul.mubr.msk.bf16.gmra.mxu1 %vm484_vm1, %v25455_v22  ;;  %v10510_v32 = vpop.f32.mrf.mxu0  ;;  %v12481_v60 = vrot.slane %v12479_v8, 3  ;;  %v12487_v56 = vrot.slane %v12485_v38, 2  ;;  %v12494_v16 = vshrl.u32 %v23216_v55, 16  ;;  %v12497_v13 = vshll.u32 %v23216_v55, 16  ;;  %v25459_v8 = vld [vmem:[#allocation26_spill] sm:$0xff] }
 0x470   : > { %v23736_v27 = vadd.f32 %v17024_v31, %v23653_v39  ;;  %v23739_v9 = vadd.f32 %v10510_v32, %v25456_v29  ;;  %17230 = vmatprep.mubr.msk.bf16.mxu1 %vm484_vm1, %v25457_v58  ;;  %v12490_v44 = vrot.slane %v12488_v46, 3  ;;  %v12503_v32 = vshrl.u32 %v23274_v1, 16  ;;  %v25460_v38 = vld [vmem:[#allocation34_spill] sm:$0xff] }
 0x471   : > { %v10732_v35 = vpop.f32.mrf.mxu1  ;;  %v16999_v14 = vpop.f32.mrf.mxu0  ;;  %v12506_v55 = vshll.u32 %v23274_v1, 16  ;;  %v13149_v46 = vld [vmem:[%s17749_s25 + $0x200] sm:$0xf]  ;;  %v23781_v29 = vld [vmem:[%s17749_s25 + $0x204] sm:$0xf] }
 0x472   : > { %v23745_v25 = vadd.f32 %v10732_v35, %v23663_v12  ;;  %v23748_v62 = vadd.f32 %v16999_v14, %v25458_v61  ;;  %v12491_v22 = vor.u32 %v12490_v44, %v12487_v56  ;;  %v12496_v14 = vrot.slane %v12494_v16, 2 }
 0x473   : > { %v17025_v39 = vpop.f32.mrf.mxu1  ;;  %v10513_v18 = vpop.f32.mrf.mxu0  ;;  %v12508_v56 = vrot.slane %v12506_v55, 3  ;;  %v23795_v44 = vcombine.low %v13149_v46, %v23781_v29 }
 0x474   : > { %v23752_v63 = vadd.f32 %v17025_v39, %v23670_v33  ;;  %v23755_v34 = vadd.f32 %v10513_v18, %v23514_v6  ;;  %v12482_v6 = vor.u32 %v12481_v60, %v12478_v5 }
 0x475   : > { %v10735_v10 = vpop.f32.mrf.mxu1  ;;  %v17002_v12 = vpop.f32.mrf.mxu0  ;;  %17205 = vmatmul.mubr.msk.bf16.gmra.mxu0 %vm484_vm1, %v12465_v15  ;;  %v12499_v15 = vrot.slane %v12497_v13, 3 }
 0x476   : > { %v23761_v42 = vadd.f32 %v10735_v10, %v23677_v20  ;;  %v23764_v50 = vadd.f32 %v17002_v12, %v23526_v49  ;;  %17208 = vmatprep.mubr.msk.bf16.mxu0 %vm484_vm1, %v12474_v3  ;;  %v12492_v18 = vsel %vm2681_vm6, %v12482_v6, %v12491_v22  ;;  %v12505_v3 = vrot.slane %v12503_v32, 2  ;;  %v23816_v32 = vld [vmem:[%s17749_s25 + $0x208] sm:$0xff]  }
 0x477   : > { %v17028_v33 = vpop.f32.mrf.mxu1  ;;  %17231 = vmatmul.mubr.msk.bf16.gmra.mxu1 %vm484_vm1, %v25459_v8  ;;  %v10526_v31 = vpop.f32.mrf.mxu0  ;;  %v12500_v12 = vor.u32 %v12499_v15, %v12496_v14 }
 0x478   : > { %v23772_v20 = vadd.f32 %v17028_v33, %v23690_v40  ;;  %v23775_v49 = vadd.f32 %v10526_v31, %v23539_v28  ;;  %17234 = vmatprep.mubr.msk.bf16.mxu1 %vm484_vm1, %v25460_v38  ;;  %v12483_v40 = vsel %vm2681_vm6, %v12473_v52, %v12482_v6  ;;  %v23791_v28 = vld [vmem:[%s17749_s25 + $0x220] ss:$0 sps:$4 sm:$0x77]   ;;  %v12509_v31 = vor.u32 %v12508_v56, %v12505_v3  ;;  %v25462_v38 = vld [vmem:[#allocation63_spill] sm:$0xff] }
 0x479   : > { %v10748_v58 = vpop.f32.mrf.mxu1  ;;  %v17003_v35 = vpop.f32.mrf.mxu0  ;;  %v12512_v6 = vshrl.u32 %v23791_v28, 16  ;;  %v13193_v56 = vshll.u32 %v23816_v32, 16 }
 0x47a   : > { %v23784_v61 = vadd.f32 %v10748_v58, %v23702_v11  ;;  %v23787_v5 = vadd.f32 %v17003_v35, %v23552_v4  ;;  %v12501_v35 = vsel %vm2681_vm6, %v12491_v22, %v12500_v12 }
 0x47b   : > { %v17029_v60 = vpop.f32.mrf.mxu1  ;;  %v10529_v39 = vpop.f32.mrf.mxu0 }
 0x47c   : > { %v23798_v11 = vadd.f32 %v17029_v60, %v23711_v30  ;;  %v23801_v4 = vadd.f32 %v10529_v39, %v23560_v21  ;;  %v12515_v30 = vshll.u32 %v23791_v28, 16  ;;  %v25461_v21 = vld [vmem:[#allocation54_spill] sm:$0xff] }
 0x47d   : > { %v10751_v10 = vpop.f32.mrf.mxu1  ;;  %v17006_v52 = vpop.f32.mrf.mxu0  ;;  %17209 = vmatmul.mubr.msk.bf16.gmra.mxu0 %vm484_vm1, %v12483_v40  ;;  %v12514_v40 = vrot.slane %v12512_v6, 2 }
 0x47e   : > { %v23805_v16 = vadd.f32 %v10751_v10, %v23719_v37  ;;  %v23808_v13 = vadd.f32 %v17006_v52, %v23572_v45  ;;  %17212 = vmatprep.mubr.msk.bf16.mxu0 %vm484_vm1, %v12492_v18  ;;  %v13188_v37 = vshll.u32 %v23795_v44, 16  ;;  %v13186_v18 = vshrl.u32 %v23795_v44, 16  ;;  %v23845_v52 = vld [vmem:[%s17749_s25 + $0x210] sm:$0xff]  }
 0x47f   : > { %v17032_v33 = vpop.f32.mrf.mxu1  ;;  %17235 = vmatmul.mubr.msk.bf16.gmra.mxu1 %vm484_vm1, %v25461_v21  ;;  %v10542_v8 = vpop.f32.mrf.mxu0 }
 0x480   : > { %v23820_v55 = vadd.f32 %v17032_v33, %v23726_v23  ;;  %v23823_v45 = vadd.f32 %v10542_v8, %v23584_v17  ;;  %17238 = vmatprep.mubr.msk.bf16.mxu1 %vm484_vm1, %v25462_v38  ;;  %v12517_v23 = vrot.slane %v12515_v30, 3  ;;  %v12510_v17 = vsel %vm2681_vm6, %v12500_v12, %v12509_v31  ;;  %v25463_v33 = vld [vmem:[#allocation74_spill] sm:$0xff] }
 0x481   : > { %v10764_v46 = vpop.f32.mrf.mxu1  ;;  %v17007_v58 = vpop.f32.mrf.mxu0  ;;  %v13190_v3 = vrot.slane %v13188_v37, 1  ;;  %v13195_v8 = vrot.slane %v13193_v56, 1  ;;  %v23857_v37 = vld [vmem:[%s17749_s25 + $0x218] sm:$0xff]  }
 0x482   : > { %v23829_v14 = vadd.f32 %v10764_v46, %v23739_v9  ;;  %v23832_v15 = vadd.f32 %v17007_v58, %v23591_v54  ;;  %v12518_v30 = vor.u32 %v12517_v23, %v12514_v40  ;;  %v13201_v40 = vshll.u32 %v23845_v52, 16 }
 0x483   : > { %v17033_v60 = vpop.f32.mrf.mxu1  ;;  %v10545_v39 = vpop.f32.mrf.mxu0  ;;  %v13191_v21 = vor.u32 %v13190_v3, %v13186_v18  ;;  %v13205_v18 = vshrl.u32 %v23845_v52, 16  ;;  %v13209_v3 = vshll.u32 %v23857_v37, 16 }
 0x484   : > { %v23838_v22 = vadd.f32 %v17033_v60, %v23748_v62  ;;  %v23841_v9 = vadd.f32 %v10545_v39, %v23608_v7 }
 0x485   : > { %v10767_v54 = vpop.f32.mrf.mxu1  ;;  %v17010_v10 = vpop.f32.mrf.mxu0  ;;  %17213 = vmatmul.mubr.msk.bf16.gmra.mxu0 %vm484_vm1, %v12501_v35  ;;  %v13197_v35 = vshrl.u32 %v23816_v32, 16 }
 0x486   : > { %v23848_v12 = vadd.f32 %v10767_v54, %v23755_v34  ;;  %v23851_v6 = vadd.f32 %v17010_v10, %v23623_v59  ;;  %17216 = vmatprep.mubr.msk.bf16.mxu0 %vm484_vm1, %v12510_v17  ;;  %v25464_v59 = vld [vmem:[#allocation13_spill] sm:$0xff]  ;;  %v13196_v17 = vsel %vm345_vm0, %v13191_v21, %v13195_v8  ;;  %v13203_v10 = vrot.slane %v13201_v40, 1 }
 0x487   : > { %v17036_v62 = vpop.f32.mrf.mxu1  ;;  %17239 = vmatmul.mubr.msk.bf16.gmra.mxu1 %vm484_vm1, %v25463_v33  ;;  %v10558_v7 = vpop.f32.mrf.mxu0 }
 0x488   : > { %v23860_v38 = vadd.f32 %v17036_v62, %v23764_v50  ;;  %v23863_v34 = vadd.f32 %v10558_v7, %v23634_v0  ;;  %17242 = vmatprep.mubr.msk.bf16.mxu1 %vm484_vm1, %v25464_v59  ;;  %v12519_v50 = vsel %vm2681_vm6, %v12509_v31, %v12518_v30  ;;  %v13199_v31 = vor.u32 %v13197_v35, %v13195_v8 }
 0x489   : > { %v10780_v46 = vpop.f32.mrf.mxu1  ;;  %v17011_v58 = vpop.f32.mrf.mxu0  ;;  %v13207_v21 = vor.u32 %v13205_v18, %v13203_v10  ;;  %v13211_v59 = vrot.slane %v13209_v3, 1 }
 0x48a   : > { %v23870_v23 = vadd.f32 %v10780_v46, %v23775_v49  ;;  %v23873_v60 = vadd.f32 %v17011_v58, %v23642_v57  ;;  %v25466_v46 = vld [vmem:[#allocation10_spill] sm:$0xff]  ;;  %v13204_v40 = vsel %vm345_vm0, %v13199_v31, %v13203_v10 }
 0x48b   : > { %v17037_v0 = vpop.f32.mrf.mxu1  ;;  %v10561_v39 = vpop.f32.mrf.mxu0  ;;  %v13212_v18 = vsel %vm345_vm0, %v13207_v21, %v13211_v59 }
 0x48c   : > { %v23880_v56 = vadd.f32 %v17037_v0, %v23787_v5  ;;  %v23883_v49 = vadd.f32 %v10561_v39, %v23649_v47  ;;  %v23894_v5 = vld [vmem:[%s17749_s25 + $0x220] ss:$0 sps:$4 sm:$0x11]   ;;  %v25465_v47 = vld [vmem:[#allocation19_spill] sm:$0xff] }
 0x48d   : > { %v10783_v54 = vpop.f32.mrf.mxu1  ;;  %v17014_v57 = vpop.f32.mrf.mxu0  ;;  %17217 = vmatmul.mubr.msk.bf16.gmra.mxu0 %vm484_vm1, %v12519_v50  ;;  %v13217_v39 = vshll.u32 %v23894_v5, 16 }
 0x48e   : > { %v23887_v30 = vadd.f32 %v10783_v54, %v23801_v4  ;;  %v23890_v62 = vadd.f32 %v17014_v57, %v23657_v43  ;;  %17256 = vmatprep.mubr.msk.bf16.mxu0 %vm484_vm1, %v13196_v17  ;;  %v13383_v43 = vld [vmem:[%s17749_s25 + $0x200] sm:$0xe] }
 0x48f   : > { %v17040_v33 = vpop.f32.mrf.mxu1  ;;  %17243 = vmatmul.mubr.msk.bf16.gmra.mxu1 %vm484_vm1, %v25465_v47  ;;  %v10574_v7 = vpop.f32.mrf.mxu0  ;;  %v15309_v3 = vcombine.low %v13383_v43, %v23781_v29  ;;  %v23921_v54 = vld [vmem:[%s24742_s1 + $0x20] sm:$0xff]   ;;  %v25467_v47 = vld [vmem:[#allocation88_spill] sm:$0xff] }
 0x490   : > { %v23899_v8 = vadd.f32 %v17040_v33, %v23808_v13  ;;  %v23902_v4 = vadd.f32 %v10574_v7, %v23667_v53  ;;  %17246 = vmatprep.mubr.msk.bf16.mxu1 %vm484_vm1, %v25466_v46  ;;  %v13213_v13 = vshrl.u32 %v23857_v37, 16  ;;  %v12804_v46 = vrot.slane %v23791_v28, 3  ;;  %v13489_v43 = vld [vmem:[%s17749_s25 + $0x210] sm:$0xe]  ;;  %v23967_v28 = vld [vmem:[%s17749_s25 + $0x218] sm:$0xff]  }
 0x491   : > { %v10796_v58 = vpop.f32.mrf.mxu1  ;;  %v17015_v35 = vpop.f32.mrf.mxu0  ;;  %v13389_v21 = vrot.slane %v15309_v3, 1 }
 0x492   : > { %v23909_v50 = vadd.f32 %v10796_v58, %v23823_v45  ;;  %v23912_v0 = vadd.f32 %v17015_v35, %v23673_v51  ;;  %v13215_v33 = vor.u32 %v13213_v13, %v13211_v59  ;;  %v25468_v59 = vld [vmem:[#allocation43_spill] sm:$0xff]  ;;  %v23953_v58 = vld [vmem:[%s17749_s25 + $0x214] sm:$0xf] }
 0x493   : > { %v17041_v53 = vpop.f32.mrf.mxu1  ;;  %v10577_v17 = vpop.f32.mrf.mxu0 }
 0x494   : > { %v23924_v45 = vadd.f32 %v17041_v53, %v23832_v15  ;;  %v23927_v51 = vadd.f32 %v10577_v17, %v23679_v24  ;;  %v13219_v15 = vrot.slane %v13217_v39, 1 }
 0x495   : > { %v10799_v57 = vpop.f32.mrf.mxu1  ;;  %v17054_v31 = vpop.f32.mrf.mxu0  ;;  %17257 = vmatmul.mubr.msk.bf16.vlgmr.msra.gmra.mxu0 %vm484_vm1, %v13204_v40 }
 0x496   : > { %v23931_v10 = vadd.f32 %v10799_v57, %v23841_v9  ;;  %v23934_v29 = vadd.f32 %v17054_v31, %v23698_v48  ;;  %17275 = vmatpush3.bf16.msra.mxu0 %v23598_v26  ;;  %17260 = vmatprep.mubr.msk.bf16.mxu0 %vm484_vm1, %v13212_v18  ;;  %v13390_v9 = vrot.slane %v23816_v32, 1  ;;  %v23964_v18 = vcombine.low %v13489_v43, %v23953_v58 }
 0x497   : > { %v17044_v24 = vpop.f32.mrf.mxu1  ;;  %17247 = vmatmul.mubr.msk.bf16.gmra.mxu1 %vm484_vm1, %v25467_v47  ;;  %v11114_v7 = vpop.f32.mrf.mxu0  ;;  %17294 = vmatprep.subr.bf16.mxu0 %v23921_v54 }
 0x498   : > { %v23943_v48 = vadd.f32 %v17044_v24, %v23851_v6  ;;  %v23946_v26 = vadd.f32 %v11114_v7, %v23708_v41  ;;  %17250 = vmatprep.mubr.msk.bf16.mxu1 %vm484_vm1, %v25468_v59  ;;  %v13220_v6 = vsel %vm345_vm0, %v13215_v33, %v13219_v15  ;;  %v13391_v17 = vsel %vm900_vm3, %v13389_v21, %v13390_v9 }
 0x499   : > { %v10812_v35 = vpop.f32.mrf.mxu1  ;;  %v17055_v40 = vpop.f32.mrf.mxu0  ;;  %v13630_v7 = vshrl.u32 %v23964_v18, 16  ;;  %v13633_v21 = vshll.u32 %v23964_v18, 16 }
 0x49a   : > { %v23956_v13 = vadd.f32 %v10812_v35, %v23863_v34  ;;  %v23959_v39 = vadd.f32 %v17055_v40, %v23716_v19  ;;  %v25469_v19 = vrot.slane %v23274_v1, 3  ;;  %v24002_v40 = vld [vmem:[%s17749_s25 + $0x220] sm:$0xff]  }
 0x49b   : > { %v17045_v41 = vpop.f32.mrf.mxu1  ;;  %v11117_v53 = vpop.f32.mrf.mxu0 }
 0x49c   : > { %v23970_v3 = vadd.f32 %v17045_v41, %v23873_v60  ;;  %v23973_v34 = vadd.f32 %v11117_v53, %v23723_v2  ;;  %v12805_v57 = vsel %vm3088_vm5, %v25469_v19, %v12804_v46  ;;  %v13392_v2 = vrot.slane %v23845_v52, 1 }
 0x49d   : > { %v10815_v31 = vpop.f32.mrf.mxu1  ;;  %v17058_v33 = vpop.f32.mrf.mxu0  ;;  %17261 = vmatmul.mubr.msk.bf16.gmra.mxu0 %vm484_vm1, %v13220_v6  ;;  %v13394_v60 = vrot.slane %v23857_v37, 1  ;;  %v13632_v19 = vrot.slane %v13630_v7, 1  ;;  %v13647_v7 = vshrl.u32 %v24002_v40, 16 }
 0x49e   : > { %v23980_v15 = vadd.f32 %v10815_v31, %v23883_v49  ;;  %v23983_v24 = vadd.f32 %v17058_v33, %v23736_v27  ;;  %17276 = vmatprep.mubr.msk.bf16.mxu0 %vm484_vm1, %v13391_v17  ;;  %v13638_v49 = vshrl.u32 %v23967_v28, 16  ;;  %v13641_v27 = vshll.u32 %v23967_v28, 16  ;;  %v24015_v33 = vld [vmem:[%s24742_s1 + $0x30] sm:$0xff]  }
 0x49f   : > { %v17048_v1 = vpop.f32.mrf.mxu1  ;;  %17251 = vmatmul.mubr.msk.bf16.gmra.mxu1 %vm484_vm1, %v12805_v57  ;;  %v11130_v47 = vpop.f32.mrf.mxu0  ;;  %v13395_v53 = vsel %vm900_vm3, %v13392_v2, %v13394_v60  ;;  %v13635_v57 = vrot.slane %v13633_v21, 2  ;;  %v13650_v21 = vshll.u32 %v24002_v40, 16 }
 0x4a0   : > { %v23994_v59 = vadd.f32 %v17048_v1, %v23890_v62  ;;  %v23997_v46 = vadd.f32 %v11130_v47, %v23745_v25  ;;  %17266 = vmatprep.mubr.msk.bf16.mxu1 %vm484_vm1, %v23795_v44  ;;  %v13393_v62 = vsel %vm900_vm3, %v13390_v9, %v13392_v2  ;;  %v13640_v31 = vrot.slane %v13638_v49, 1  ;;  %v24030_v47 = vld [vmem:[%s24742_s1 + $0x28] sm:$0xff]  }
 0x4a1   : > { %v10828_v43 = vpop.f32.mrf.mxu1  ;;  %v17059_v35 = vpop.f32.mrf.mxu0  ;;  %v13643_v44 = vrot.slane %v13641_v27, 2 }
 0x4a2   : > { %v24005_v6 = vadd.f32 %v10828_v43, %v23902_v4  ;;  %v24008_v41 = vadd.f32 %v17059_v35, %v23752_v63  ;;  %v24018_v4 = vld [vmem:[%s17749_s25 + $0x228] sm:$0xff]   ;;  %v13636_v35 = vor.u32 %v13635_v57, %v13632_v19  ;;  %v13649_v19 = vrot.slane %v13647_v7, 1 }
 0x4a3   : > { %v17049_v25 = vpop.f32.mrf.mxu1  ;;  %v11133_v17 = vpop.f32.mrf.mxu0  ;;  %v13652_v57 = vrot.slane %v13650_v21, 2 }
 0x4a4   : > { %v24021_v63 = vadd.f32 %v17049_v25, %v23912_v0  ;;  %v24024_v9 = vadd.f32 %v11133_v17, %v23761_v42  ;;  %v13396_v42 = vrot.slane %v23894_v5, 1  ;;  %v13523_v25 = vrot.slane %v23964_v18, 1 }
 0x4a5   : > { %v10831_v2 = vpop.f32.mrf.mxu1  ;;  %v17062_v1 = vpop.f32.mrf.mxu0  ;;  %17277 = vmatmul.mubr.msk.bf16.vlgmr.msra.gmra.mxu0 %vm484_vm1, %v13393_v62  ;;  %v13644_v62 = vor.u32 %v13643_v44, %v13640_v31  ;;  %v13524_v17 = vrot.slane %v23967_v28, 1  ;;  %v24068_v31 = vld [vmem:[%s17749_s25 + $0x230] ss:$0 sps:$4 sm:$0x33]  }
 0x4a6   : > { %v24035_v49 = vadd.f32 %v10831_v2, %v23927_v51  ;;  %v24038_v0 = vadd.f32 %v17062_v1, %v23772_v20  ;;  %17295 = vmatpush3.bf16.msra.mxu0 %v23921_v54  ;;  %17280 = vmatprep.mubr.msk.bf16.mxu0 %vm484_vm1, %v13395_v53  ;;  %v13656_v51 = vshrl.u32 %v24018_v4, 16  ;;  %v13659_v20 = vshll.u32 %v24018_v4, 16 }
 0x4a7   : > { %v17088_v27 = vpop.f32.mrf.mxu1  ;;  %17267 = vmatmul.mubr.msk.bf16.vlgmr.msra.gmra.mxu1 %vm484_vm1, %v23816_v32  ;;  %v11146_v43 = vpop.f32.mrf.mxu0  ;;  %17314 = vmatprep.subr.bf16.mxu0 %v24015_v33  ;;  %v13645_v18 = vsel %vm1587_vm4, %v13636_v35, %v13644_v62 }
 0x4a8   : > { %v24049_v54 = vadd.f32 %v17088_v27, %v23934_v29  ;;  %17285 = vmatpush3.bf16.msra.mxu1 %v23687_v36  ;;  %v24053_v5 = vadd.f32 %v11146_v43, %v23784_v61  ;;  %17270 = vmatprep.mubr.msk.bf16.mxu1 %vm484_vm1, %v23845_v52  ;;  %v13397_v61 = vsel %vm900_vm3, %v13394_v60, %v13396_v42  ;;  %v13658_v2 = vrot.slane %v13656_v51, 1 }
 0x4a9   : > { %v11519_v32 = vpop.f32.mrf.mxu1  ;;  %v17063_v53 = vpop.f32.mrf.mxu0  ;;  %17304 = vmatprep.subr.bf16.mxu1 %v24030_v47  ;;  %v13661_v1 = vrot.slane %v13659_v20, 2  ;;  %v13653_v60 = vor.u32 %v13652_v57, %v13649_v19 }
 0x4aa   : > { %v24061_v29 = vadd.f32 %v11519_v32, %v23946_v26  ;;  %v24064_v36 = vadd.f32 %v17063_v53, %v23798_v11  ;;  %v13525_v11 = vsel %vm900_vm3, %v13523_v25, %v13524_v17  ;;  %v13870_v53 = vld [vmem:[%s17749_s25 + $0x220] sm:$0xc]  ;;  %v24100_v25 = vld [vmem:[%s17749_s25 + $0x224] sm:$0xf] }
 0x4ab   : > { %v17089_v52 = vpop.f32.mrf.mxu1  ;;  %v11149_v44 = vpop.f32.mrf.mxu0  ;;  %v13662_v20 = vor.u32 %v13661_v1, %v13658_v2 }
 0x4ac   : > { %v24072_v27 = vadd.f32 %v17089_v52, %v23959_v39  ;;  %v24075_v7 = vadd.f32 %v11149_v44, %v23805_v16  ;;  %v13665_v16 = vshrl.u32 %v24068_v31, 16  ;;  %v13668_v39 = vshll.u32 %v24068_v31, 16 }
 0x4ad   : > { %v11522_v26 = vpop.f32.mrf.mxu1  ;;  %v17066_v21 = vpop.f32.mrf.mxu0  ;;  %17281 = vmatmul.mubr.msk.bf16.gmra.mxu0 %vm484_vm1, %v13397_v61  ;;  %v13528_v61 = vrot.slane %v24018_v4, 1 }
 0x4ae   : > { %v24080_v42 = vadd.f32 %v11522_v26, %v23973_v34  ;;  %v24083_v43 = vadd.f32 %v17066_v21, %v23820_v55  ;;  %17296 = vmatprep.mubr.msk.bf16.mxu0 %vm484_vm1, %v13645_v18  ;;  %v13526_v55 = vrot.slane %v24002_v40, 1  ;;  %v13667_v52 = vrot.slane %v13665_v16, 1  ;;  %v13764_v18 = vld [vmem:[%s17749_s25 + $0x210] sm:$0xc] }
 0x4af   : > { %v17092_v35 = vpop.f32.mrf.mxu1  ;;  %17271 = vmatmul.mubr.msk.bf16.gmra.mxu1 %vm484_vm1, %v23857_v37  ;;  %v11162_v51 = vpop.f32.mrf.mxu0  ;;  %v13654_v37 = vsel %vm1587_vm4, %v13644_v62, %v13653_v60  ;;  %v13670_v44 = vrot.slane %v13668_v39, 2  ;;  %v13663_v26 = vsel %vm1587_vm4, %v13653_v60, %v13662_v20  ;;  %v24113_v21 = vcombine.low %v13870_v53, %v24100_v25  ;;  %v24116_v62 = vld [vmem:[%s17749_s25 + $0x228] sm:$0xff]   ;;  %v17649_v39 = vld [vmem:[%s17749_s25 + $0x230] ss:$0 sps:$4 sm:$0x11]  }
 0x4b0   : > { %v24091_v32 = vadd.f32 %v17092_v35, %v23983_v24  ;;  %v24094_v34 = vadd.f32 %v11162_v51, %v23829_v14  ;;  %17286 = vmatprep.mubr.msk.bf16.mxu1 %vm484_vm1, %v13525_v11  ;;  %v13527_v16 = vsel %vm900_vm3, %v13524_v17, %v13526_v55  ;;  %v13529_v51 = vsel %vm900_vm3, %v13526_v55, %v13528_v61 }
 0x4b1   : > { %v11535_v19 = vpop.f32.mrf.mxu1  ;;  %v17067_v57 = vpop.f32.mrf.mxu0  ;;  %v15337_v53 = vcombine.low %v13764_v18, %v23953_v58  ;;  %v13671_v17 = vor.u32 %v13670_v44, %v13667_v52  ;;  %v13904_v55 = vrot.slane %v24113_v21, 2 }
 0x4b2   : > { %v24105_v24 = vadd.f32 %v11535_v19, %v23997_v46  ;;  %v24108_v14 = vadd.f32 %v17067_v57, %v23838_v22  ;;  %v24121_v46 = vld [vmem:[%s24742_s1 + $0x40] sm:$0xff]   ;;  %v24137_v19 = vld [vmem:[%s24742_s1 + $0x38] sm:$0xff]  }
 0x4b3   : > { %v17093_v2 = vpop.f32.mrf.mxu1  ;;  %v11165_v1 = vpop.f32.mrf.mxu0  ;;  %v13770_v18 = vrot.slane %v15337_v53, 2 }
 0x4b4   : > { %v24124_v22 = vadd.f32 %v17093_v2, %v24008_v41  ;;  %v24127_v11 = vadd.f32 %v11165_v1, %v23848_v12  ;;  %v13771_v2 = vrot.slane %v23967_v28, 2 }
 0x4b5   : > { %v11538_v60 = vpop.f32.mrf.mxu1  ;;  %v17070_v35 = vpop.f32.mrf.mxu0  ;;  %17297 = vmatmul.mubr.msk.bf16.vlgmr.msra.gmra.mxu0 %vm484_vm1, %v13654_v37  ;;  %v13905_v37 = vrot.slane %v24116_v62, 2 }
 0x4b6   : > { %v24140_v41 = vadd.f32 %v11538_v60, %v24024_v9  ;;  %v24143_v12 = vadd.f32 %v17070_v35, %v23860_v38  ;;  %17315 = vmatpush3.bf16.msra.mxu0 %v24015_v33  ;;  %17300 = vmatprep.mubr.msk.bf16.mxu0 %vm484_vm1, %v13663_v26  ;;  %v13530_v33 = vrot.slane %v17649_v39, 1  ;;  %v24173_v60 = vld [vmem:[%s17749_s25 + $0x238] sm:$0xff]  }
 0x4b7   : > { %v17096_v57 = vpop.f32.mrf.mxu1  ;;  %17287 = vmatmul.mubr.msk.bf16.vlgmr.msra.gmra.mxu1 %vm484_vm1, %v13527_v16  ;;  %v11178_v58 = vpop.f32.mrf.mxu0  ;;  %17334 = vmatprep.subr.bf16.mxu0 %v24121_v46  ;;  %v13906_v39 = vsel %vm1994_vm2, %v13904_v55, %v13905_v37  ;;  %v13775_v55 = vrot.slane %v24018_v4, 2  ;;  %v17658_v4 = vld [vmem:[%s17749_s25 + $0x240] ss:$0 sps:$4 sm:$0x33]  }
 0x4b8   : > { %v24152_v9 = vadd.f32 %v17096_v57, %v24038_v0  ;;  %17305 = vmatpush3.bf16.msra.mxu1 %v24030_v47  ;;  %v24156_v38 = vadd.f32 %v11178_v58, %v23870_v23  ;;  %17290 = vmatprep.mubr.msk.bf16.mxu1 %vm484_vm1, %v13529_v51  ;;  %v13672_v47 = vsel %vm1587_vm4, %v13662_v20, %v13671_v17  ;;  %v24169_v23 = vld [vmem:[%s17749_s25 + $0x230] sm:$0xff]   ;;  %v13909_v57 = vrot.slane %v24173_v60, 2 }
 0x4b9   : > { %v11551_v52 = vpop.f32.mrf.mxu1  ;;  %v17071_v44 = vpop.f32.mrf.mxu0  ;;  %17324 = vmatprep.subr.bf16.mxu1 %v24137_v19  ;;  %v13772_v20 = vsel %vm1994_vm2, %v13770_v18, %v13771_v2  ;;  %v14011_v18 = vshrl.u32 %v24113_v21, 16 }
 0x4ba   : > { %v24162_v1 = vadd.f32 %v11551_v52, %v24053_v5  ;;  %v24165_v0 = vadd.f32 %v17071_v44, %v23880_v56  ;;  %v13531_v5 = vsel %vm900_vm3, %v13528_v61, %v13530_v33  ;;  %v14145_v33 = vld [vmem:[%s17749_s25 + $0x220] sm:$0x8] }
 0x4bb   : > { %v17097_v26 = vpop.f32.mrf.mxu1  ;;  %v11181_v16 = vpop.f32.mrf.mxu0 }
 0x4bc   : > { %v24176_v28 = vadd.f32 %v17097_v26, %v24064_v36  ;;  %v24179_v35 = vadd.f32 %v11181_v16, %v23887_v30  ;;  %v13907_v30 = vrot.slane %v24169_v23, 2  ;;  %v14019_v26 = vshrl.u32 %v24116_v62, 16 }
 0x4bd   : > { %v11554_v56 = vpop.f32.mrf.mxu1  ;;  %v17074_v51 = vpop.f32.mrf.mxu0  ;;  %17301 = vmatmul.mubr.msk.bf16.gmra.mxu0 %vm484_vm1, %v13672_v47  ;;  %v14014_v47 = vshll.u32 %v24113_v21, 16 }
 0x4be   : > { %v24185_v53 = vadd.f32 %v11554_v56, %v24075_v7  ;;  %v24188_v17 = vadd.f32 %v17074_v51, %v23899_v8  ;;  %17316 = vmatprep.mubr.msk.bf16.mxu0 %vm484_vm1, %v13906_v39  ;;  %v13773_v8 = vrot.slane %v24002_v40, 2  ;;  %v13908_v40 = vsel %vm1994_vm2, %v13905_v37, %v13907_v30 }
 0x4bf   : > { %v17100_v36 = vpop.f32.mrf.mxu1  ;;  %17291 = vmatmul.mubr.msk.bf16.gmra.mxu1 %vm484_vm1, %v13531_v5  ;;  %v11194_v61 = vpop.f32.mrf.mxu0  ;;  %v13910_v56 = vsel %vm1994_vm2, %v13907_v30, %v13909_v57  ;;  %v15365_v51 = vcombine.low %v14145_v33, %v24100_v25  ;;  %v14013_v37 = vrot.slane %v14011_v18, 2  ;;  %v14152_v18 = vrot.slane %v24116_v62, 3 }
 0x4c0   : > { %v24195_v58 = vadd.f32 %v17100_v36, %v24083_v43  ;;  %v24198_v7 = vadd.f32 %v11194_v61, %v23909_v50  ;;  %17306 = vmatprep.mubr.msk.bf16.mxu1 %vm484_vm1, %v13772_v20  ;;  %v14022_v43 = vshll.u32 %v24116_v62, 16 }
 0x4c1   : > { %v11567_v52 = vpop.f32.mrf.mxu1  ;;  %v17075_v44 = vpop.f32.mrf.mxu0  ;;  %v14151_v33 = vrot.slane %v15365_v51, 3 }
 0x4c2   : > { %v24209_v50 = vadd.f32 %v11567_v52, %v24094_v34  ;;  %v24212_v16 = vadd.f32 %v17075_v44, %v23924_v45  ;;  %v13774_v34 = vsel %vm1994_vm2, %v13771_v2, %v13773_v8  ;;  %v13776_v45 = vsel %vm1994_vm2, %v13773_v8, %v13775_v55 }
 0x4c3   : > { %v17101_v39 = vpop.f32.mrf.mxu1  ;;  %v11197_v5 = vpop.f32.mrf.mxu0  ;;  %v14016_v52 = vrot.slane %v14014_v47, 3  ;;  %v14021_v44 = vrot.slane %v14019_v26, 2  ;;  %v14024_v30 = vrot.slane %v14022_v43, 3  ;;  %v14028_v47 = vshrl.u32 %v24169_v23, 16 }
 0x4c4   : > { %v24219_v21 = vadd.f32 %v17101_v39, %v24108_v14  ;;  %v24222_v20 = vadd.f32 %v11197_v5, %v23931_v10  ;;  %v13911_v10 = vrot.slane %v17658_v4, 2  ;;  %v14037_v39 = vshrl.u32 %v24173_v60, 16 }
 0x4c5   : > { %v11570_v36 = vpop.f32.mrf.mxu1  ;;  %v17078_v61 = vpop.f32.mrf.mxu0  ;;  %17317 = vmatmul.mubr.msk.bf16.vlgmr.msra.gmra.mxu0 %vm484_vm1, %v13908_v40  ;;  %v14017_v62 = vor.u32 %v14016_v52, %v14013_v37  ;;  %v14025_v4 = vor.u32 %v14024_v30, %v14021_v44  ;;  %v14040_v5 = vshll.u32 %v24173_v60, 16  ;;  %v17660_v37 = vld [vmem:[%s17749_s25 + $0x240] ss:$0 sps:$4 sm:$0x77]  }
 0x4c6   : > { %v24228_v25 = vadd.f32 %v11570_v36, %v24127_v11  ;;  %v24231_v14 = vadd.f32 %v17078_v61, %v23943_v48  ;;  %17335 = vmatpush3.bf16.msra.mxu0 %v24121_v46  ;;  %17320 = vmatprep.mubr.msk.bf16.mxu0 %vm484_vm1, %v13910_v56  ;;  %v14031_v11 = vshll.u32 %v24169_v23, 16  ;;  %v13777_v46 = vrot.slane %v24068_v31, 2 }
 0x4c7   : > { %v17104_v2 = vpop.f32.mrf.mxu1  ;;  %17307 = vmatmul.mubr.msk.bf16.vlgmr.msra.gmra.mxu1 %vm484_vm1, %v13774_v34  ;;  %v11210_v8 = vpop.f32.mrf.mxu0  ;;  %v14153_v31 = vsel %vm3088_vm5, %v14151_v33, %v14152_v18  ;;  %v14030_v34 = vrot.slane %v14028_v47, 2  ;;  %v14039_v44 = vrot.slane %v14037_v39, 2  ;;  %v14042_v30 = vrot.slane %v14040_v5, 3 }
 0x4c8   : > { %v24240_v26 = vadd.f32 %v17104_v2, %v24143_v12  ;;  %17325 = vmatpush3.bf16.msra.mxu1 %v24137_v19  ;;  %v24244_v48 = vadd.f32 %v11210_v8, %v23956_v13  ;;  %17310 = vmatprep.mubr.msk.bf16.mxu1 %vm484_vm1, %v13776_v45  ;;  %v13912_v13 = vsel %vm1994_vm2, %v13909_v57, %v13911_v10  ;;  %v14033_v45 = vrot.slane %v14031_v11, 3 }
 0x4c9   : > { %v11583_v43 = vpop.f32.mrf.mxu1  ;;  %v17079_v40 = vpop.f32.mrf.mxu0  ;;  %v14026_v57 = vsel %vm2681_vm6, %v14017_v62, %v14025_v4  ;;  %v14156_v33 = vrot.slane %v24173_v60, 3 }
 0x4ca   : > { %v24251_v12 = vadd.f32 %v11583_v43, %v24156_v38  ;;  %v24254_v19 = vadd.f32 %v17079_v40, %v23970_v3  ;;  %v13778_v38 = vsel %vm1994_vm2, %v13775_v55, %v13777_v46  ;;  %v14034_v8 = vor.u32 %v14033_v45, %v14030_v34 }
 0x4cb   : > { %v17105_v56 = vpop.f32.mrf.mxu1  ;;  %v11213_v51 = vpop.f32.mrf.mxu0  ;;  %v14043_v40 = vor.u32 %v14042_v30, %v14039_v44 }
 0x4cc   : > { %v24259_v36 = vadd.f32 %v17105_v56, %v24165_v0  ;;  %v24262_v61 = vadd.f32 %v11213_v51, %v23980_v15  ;;  %v14154_v15 = vrot.slane %v24169_v23, 3 }
 0x4cd   : > { %v11586_v52 = vpop.f32.mrf.mxu1  ;;  %v17082_v3 = vpop.f32.mrf.mxu0  ;;  %17321 = vmatmul.mubr.msk.bf16.gmra.mxu0 %vm484_vm1, %v13912_v13 }
 0x4ce   : > { %v24269_v10 = vadd.f32 %v11586_v52, %v24179_v35  ;;  %v11271_v0 = vadd.f32 %v17082_v3, %v23994_v59  ;;  %17336 = vmatprep.mubr.msk.bf16.mxu0 %vm484_vm1, %v14153_v31  ;;  %v14046_v35 = vshrl.u32 %v17660_v37, 16  ;;  %v14049_v59 = vshll.u32 %v17660_v37, 16 }
 0x4cf   : > { %v17108_v2 = vpop.f32.mrf.mxu1  ;;  %17311 = vmatmul.mubr.msk.bf16.gmra.mxu1 %vm484_vm1, %v13778_v38  ;;  %v11226_v55 = vpop.f32.mrf.mxu0  ;;  %v14155_v39 = vsel %vm3088_vm5, %v14152_v18, %v14154_v15 }
 0x4d0   : > { %v24277_v47 = vadd.f32 %v17108_v2, %v24188_v17  ;;  %v11269_v11 = vadd.f32 %v11226_v55, %v24005_v6  ;;  %17326 = vmatprep.mubr.msk.bf16.mxu1 %vm484_vm1, %v14026_v57  ;;  %v14035_v17 = vsel %vm2681_vm6, %v14025_v4, %v14034_v8  ;;  %v14157_v6 = vsel %vm3088_vm5, %v14154_v15, %v14156_v33 }
 0x4d1   : > { %v11599_v46 = vpop.f32.mrf.mxu1  ;;  %v17083_v43 = vpop.f32.mrf.mxu0  ;;  %v14048_v51 = vrot.slane %v14046_v35, 2  ;;  %v14051_v31 = vrot.slane %v14049_v59, 3 }
 0x4d2   : > { %v24282_v23 = vadd.f32 %v11599_v46, %v24198_v7  ;;  %v11272_v62 = vadd.f32 %v17083_v43, %v24021_v63  ;;  %v14044_v63 = vsel %vm2681_vm6, %v14034_v8, %v14043_v40 }
 0x4d3   : > { %v17109_v60 = vpop.f32.mrf.mxu1  ;;  %v11229_v5 = vpop.f32.mrf.mxu0 }
 0x4d4   : > { %v24289_v13 = vadd.f32 %v17109_v60, %v24212_v16  ;;  %v11270_v56 = vadd.f32 %v11229_v5, %v24035_v49  ;;  %v14158_v16 = vrot.slane %v17660_v37, 3 }
 0x4d5   : > { %v11602_v34 = vpop.f32.mrf.mxu1  ;;  %v17122_v7 = vpop.f32.mrf.mxu0  ;;  %17337 = vmatmul.mubr.msk.bf16.vlgmr.msra.gmra.mxu0 %vm484_vm1, %v14155_v39 }
 0x4d6   : > { %v24295_v18 = vadd.f32 %v11602_v34, %v24222_v20  ;;  %v24298_v4 = vadd.f32 %v17122_v7, %v24049_v54  ;;  %17340 = vmatprep.mubr.msk.bf16.mxu0 %vm484_vm1, %v14157_v6  ;;  %v14052_v20 = vor.u32 %v14051_v31, %v14048_v51  ;;  %v14159_v44 = vsel %vm3088_vm5, %v14156_v33, %v14158_v16 }
 0x4d7   : > { %v17112_v45 = vpop.f32.mrf.mxu1  ;;  %17327 = vmatmul.mubr.msk.bf16.vlgmr.msra.gmra.mxu1 %vm484_vm1, %v14035_v17  ;;  %v11805_v49 = vpop.f32.mrf.mxu0 }
 0x4d8   : > { %v24303_v38 = vadd.f32 %v17112_v45, %v24231_v14  ;;  %v24306_v52 = vadd.f32 %v11805_v49, %v24061_v29  ;;  %17330 = vmatprep.mubr.msk.bf16.mxu1 %vm484_vm1, %v14044_v63  ;;  %v14053_v2 = vsel %vm2681_vm6, %v14043_v40, %v14052_v20 }
 0x4d9   : > { %v11615_v3 = vpop.f32.mrf.mxu1  ;;  %v17123_v57 = vpop.f32.mrf.mxu0 }
 0x4da   : > { %v24310_v54 = vadd.f32 %v11615_v3, %v24244_v48  ;;  %v24313_v37 = vadd.f32 %v17123_v57, %v24072_v27 }
 0x4db   : > { %v17113_v30 = vpop.f32.mrf.mxu1  ;;  %v11808_v15 = vpop.f32.mrf.mxu0 }
 0x4dc   : > { %v24317_v14 = vadd.f32 %v17113_v30, %v24254_v19  ;;  %v24320_v29 = vadd.f32 %v11808_v15, %v24080_v42 }
 0x4dd   : > { %v11618_v55 = vpop.f32.mrf.mxu1  ;;  %v17126_v8 = vpop.f32.mrf.mxu0  ;;  %17341 = vmatmul.mubr.msk.bf16.gmra.mxu0 %vm484_vm1, %v14159_v44 }
 0x4de   : > { %v24325_v48 = vadd.f32 %v11618_v55, %v24262_v61  ;;  %v24328_v27 = vadd.f32 %v17126_v8, %v24091_v32 }
 0x4df   : > { %v17116_v33 = vpop.f32.mrf.mxu1  ;;  %17331 = vmatmul.mubr.msk.bf16.gmra.mxu1 %vm484_vm1, %v14053_v2  ;;  %v11821_v19 = vpop.f32.mrf.mxu0 }
 0x4e0   : > { %v24331_v35 = vadd.f32 %v17116_v33, %v11271_v0  ;;  %v24334_v42 = vadd.f32 %v11821_v19, %v24105_v24 }
 0x4e1   : > { %v11631_v59 = vpop.f32.mrf.mxu1  ;;  %v17127_v46 = vpop.f32.mrf.mxu0 }
 0x4e2   : > { %v24336_v43 = vadd.f32 %v11631_v59, %v11269_v11  ;;  %v24339_v40 = vadd.f32 %v17127_v46, %v24124_v22 }
 0x4e3   : > { %v17117_v61 = vpop.f32.mrf.mxu1  ;;  %v11824_v39 = vpop.f32.mrf.mxu0 }
 0x4e4   : > { %v24341_v32 = vadd.f32 %v17117_v61, %v11272_v62  ;;  %v24344_v60 = vadd.f32 %v11824_v39, %v24140_v41 }
 0x4e5   : > { %v11634_v5 = vpop.f32.mrf.mxu1  ;;  %v17130_v0 = vpop.f32.mrf.mxu0 }
 0x4e6   : > { %v24346_v17 = vadd.f32 %v11634_v5, %v11270_v56  ;;  %v24349_v24 = vadd.f32 %v17130_v0, %v24152_v9 }
 0x4e7   : > { %v24351_v6 = vpop.f32.mrf.mxu1  ;;  %v11837_v11 = vpop.f32.mrf.mxu0 }
 0x4e8   : > { %v24354_v22 = vadd.f32 %v11837_v11, %v24162_v1 }
 0x4e9   : > { %v24356_v51 = vpop.f32.mrf.mxu1  ;;  %v17131_v62 = vpop.f32.mrf.mxu0 }
 0x4ea   : > { %v24359_v31 = vadd.f32 %v17131_v62, %v24176_v28 }
 0x4eb   : > { %v24361_v41 = vpop.f32.mrf.mxu1  ;;  %v11840_v34 = vpop.f32.mrf.mxu0 }
 0x4ec   : > { %v24364_v56 = vadd.f32 %v11840_v34, %v24185_v53 }
 0x4ed   : > { %v24366_v9 = vpop.f32.mrf.mxu1  ;;  %v17134_v7 = vpop.f32.mrf.mxu0 }
 0x4ee   : > { %v24369_v63 = vadd.f32 %v17134_v7, %v24195_v58 }
 0x4ef   : > { %v24371_v1 = vpop.f32.mrf.mxu1  ;;  %v11853_v16 = vpop.f32.mrf.mxu0 }
 0x4f0   : > { %v24374_v45 = vadd.f32 %v11853_v16, %v24209_v50 }
 0x4f1   : > { %v24376_v28 = vpop.f32.mrf.mxu1  ;;  %v17135_v49 = vpop.f32.mrf.mxu0 }
 0x4f2   : > { %v24379_v20 = vadd.f32 %v17135_v49, %v24219_v21 }
 0x4f3   : > { %v24381_v53 = vpop.f32.mrf.mxu1  ;;  %v11856_v3 = vpop.f32.mrf.mxu0 }
 0x4f4   : > { %v24384_v57 = vadd.f32 %v11856_v3, %v24228_v25 }
 0x4f5   : > { %v24386_v58 = vpop.f32.mrf.mxu1  ;;  %v17138_v44 = vpop.f32.mrf.mxu0 }
 0x4f6   : > { %v24389_v30 = vadd.f32 %v17138_v44, %v24240_v26 }
 0x4f7   : > { %v24391_v50 = vpop.f32.mrf.mxu1  ;;  %v11869_v15 = vpop.f32.mrf.mxu0 }
 0x4f8   : > { %v24394_v2 = vadd.f32 %v11869_v15, %v24251_v12 }
 0x4f9   : > { %v24396_v21 = vpop.f32.mrf.mxu1  ;;  %v17139_v55 = vpop.f32.mrf.mxu0 }
 0x4fa   : > { %v24399_v8 = vadd.f32 %v17139_v55, %v24259_v36 }
 0x4fb   : > { %v24401_v25 = vpop.f32.mrf.mxu1  ;;  %v11872_v33 = vpop.f32.mrf.mxu0 }
 0x4fc   : > { %v24404_v19 = vadd.f32 %v11872_v33, %v24269_v10 }
 0x4fd   : > { %v24406_v26 = vpop.f32.mrf.mxu1  ;;  %v17142_v59 = vpop.f32.mrf.mxu0 }
 0x4fe   : > { %v24409_v46 = vadd.f32 %v17142_v59, %v24277_v47 }
 0x4ff   : > { %v24411_v12 = vpop.f32.mrf.mxu1  ;;  %v11885_v61 = vpop.f32.mrf.mxu0 }
 0x500   : > { %v24414_v39 = vadd.f32 %v11885_v61, %v24282_v23 }
 0x501   : > { %v24416_v36 = vpop.f32.mrf.mxu1  ;;  %v17143_v5 = vpop.f32.mrf.mxu0 }
 0x502   : > { %v24419_v0 = vadd.f32 %v17143_v5, %v24289_v13 }
 0x503   : > { %v24421_v10 = vpop.f32.mrf.mxu1  ;;  %v11888_v11 = vpop.f32.mrf.mxu0 }
 0x504   : > { %25470 = vst [vmem:[#allocation39_spill] sm:$0xff] %v24419_v0  ;;  %v24424_v62 = vadd.f32 %v11888_v11, %v24295_v18 }
 0x505   : > { %v24426_v47 = vpop.f32.mrf.mxu1  ;;  %v17146_v34 = vpop.f32.mrf.mxu0 }
 0x506   : > { %25471 = vst [vmem:[#allocation65_spill] sm:$0xff] %v24424_v62  ;;  %v24429_v7 = vadd.f32 %v17146_v34, %v24303_v38 }
 0x507   : > { %v24431_v23 = vpop.f32.mrf.mxu1  ;;  %v11901_v16 = vpop.f32.mrf.mxu0 }
 0x508   : > { %25472 = vst [vmem:[#allocation42_spill] sm:$0xff] %v24429_v7  ;;  %v24434_v49 = vadd.f32 %v11901_v16, %v24310_v54 }
 0x509   : > { %v24436_v13 = vpop.f32.mrf.mxu1  ;;  %v17147_v3 = vpop.f32.mrf.mxu0 }
 0x50a   : > { %25473 = vst [vmem:[#allocation17_spill] sm:$0xff] %v24434_v49  ;;  %v24439_v44 = vadd.f32 %v17147_v3, %v24317_v14 }
 0x50b   : > { %v24441_v18 = vpop.f32.mrf.mxu1  ;;  %v11904_v15 = vpop.f32.mrf.mxu0 }
 0x50c   : > { %25474 = vst [vmem:[#allocation79_spill] sm:$0xff] %v24439_v44  ;;  %v24444_v55 = vadd.f32 %v11904_v15, %v24325_v48 }
 0x50d   : > { %v24446_v38 = vpop.f32.mrf.mxu1  ;;  %v17150_v33 = vpop.f32.mrf.mxu0 }
 0x50e   : > { %25475 = vst [vmem:[#allocation7_spill] sm:$0xff] %v24444_v55  ;;  %v24449_v59 = vadd.f32 %v17150_v33, %v24331_v35 }
 0x50f   : > { %v24451_v54 = vpop.f32.mrf.mxu1  ;;  %v11917_v61 = vpop.f32.mrf.mxu0 }
 0x510   : > { %25476 = vst [vmem:[#allocation24_spill] sm:$0xff] %v24449_v59  ;;  %v24454_v5 = vadd.f32 %v11917_v61, %v24336_v43 }
 0x511   : > { %v24456_v14 = vpop.f32.mrf.mxu1  ;;  %v17151_v11 = vpop.f32.mrf.mxu0 }
 0x512   : > { %25477 = vst [vmem:[#allocation60_spill] sm:$0xff] %v24454_v5  ;;  %v24459_v34 = vadd.f32 %v17151_v11, %v24341_v32 }
 0x513   : > { %v24461_v48 = vpop.f32.mrf.mxu1  ;;  %v11920_v16 = vpop.f32.mrf.mxu0 }
 0x514   : > { %25478 = vst [vmem:[#allocation75_spill] sm:$0xff] %v24459_v34  ;;  %25479 = vst [vmem:[#allocation57_spill] sm:$0xff] %v24461_v48  ;;  %v24464_v3 = vadd.f32 %v11920_v16, %v24346_v17 }
 0x515   : > { %v24466_v35 = vpop.f32.mrf.mxu1  ;;  %v17190_v15 = vpop.f32.mrf.mxu0 }
 0x516   : > { %25480 = vst [vmem:[#allocation49_spill] sm:$0xff] %v24464_v3  ;;  %25481 = vst [vmem:[#allocation83_spill] sm:$0xff] %v24466_v35 }
 0x517   : > { %v24468_v33 = vpop.f32.mrf.mxu1  ;;  %v12608_v59 = vpop.f32.mrf.mxu0 }
 0x518   : > { %25482 = vst [vmem:[#allocation35_spill] sm:$0xff] %v24468_v33  ;;  %v12332_v33 = vadd.f32 %v24351_v6, %v24298_v4  ;;  %v12331_v4 = vadd.f32 %v24366_v9, %v24320_v29 }
 0x519   : > { %v24470_v43 = vpop.f32.mrf.mxu1  ;;  %v17191_v61 = vpop.f32.mrf.mxu0 }
 0x51a   : > { %25483 = vst [vmem:[#allocation61_spill] sm:$0xff] %v24470_v43 }
 0x51b   : > { %v24472_v5 = vpop.f32.mrf.mxu1  ;;  %v12611_v55 = vpop.f32.mrf.mxu0 }
 0x51c   : > { %25484 = vst [vmem:[#allocation25_spill] sm:$0xff] %v24472_v5  ;;  %v12330_v5 = vadd.f32 %v24356_v51, %v24306_v52  ;;  %v24497_v52 = vld [vmem:[%s24743_s2] ss:$0 sm:$0xff] }
 0x51d   : > { %v24474_v32 = vpop.f32.mrf.mxu1  ;;  %v17194_v11 = vpop.f32.mrf.mxu0 }
 0x51e   : > { %25485 = vst [vmem:[#allocation48_spill] sm:$0xff] %v24474_v32  ;;  %v12737_v32 = vadd.f32 %v17190_v15, %v12332_v33 }
 0x51f   : > { %v24476_v34 = vpop.f32.mrf.mxu1  ;;  %v12624_v44 = vpop.f32.mrf.mxu0 }
 0x520   : > { %25486 = vst [vmem:[#allocation36_spill] sm:$0xff] %v24476_v34  ;;  %v12333_v34 = vadd.f32 %v24361_v41, %v24313_v37  ;;  %v12336_v37 = vadd.f32 %v24371_v1, %v24328_v27 }
 0x521   : > { %v24478_v17 = vpop.f32.mrf.mxu1  ;;  %v17195_v16 = vpop.f32.mrf.mxu0 }
 0x522   : > { %25487 = vst [vmem:[#allocation4_spill] sm:$0xff] %v24478_v17  ;;  %v12735_v17 = vadd.f32 %v12608_v59, %v12330_v5  ;;  %v12738_v6 = vadd.f32 %v17191_v61, %v12333_v34  ;;  %v12736_v5 = vadd.f32 %v12611_v55, %v12331_v4  ;;  %v12334_v34 = vadd.f32 %v24376_v28, %v24334_v42 }
 0x523   : > { %v24480_v3 = vpop.f32.mrf.mxu1  ;;  %v12627_v49 = vpop.f32.mrf.mxu0  ;;  %v12337_v55 = vadd.f32 %v24381_v53, %v24339_v40 }
 0x524   : > { %25488 = vst [vmem:[#allocation69_spill] sm:$0xff] %v24480_v3  ;;  %v12739_v4 = vadd.f32 %v12624_v44, %v12334_v34  ;;  %v12340_v44 = vadd.f32 %v24391_v50, %v24349_v24 }
 0x525   : > { %v24484_v43 = vpop.f32.mrf.mxu1  ;;  %v17198_v7 = vpop.f32.mrf.mxu0 }
 0x527   : > { %v17224_v35 = vpop.f32.mrf.mxu1  ;;  %v12640_v62 = vpop.f32.mrf.mxu0 }
 0x528   : > { %v13023_v48 = vadd.f32 %v17224_v35, %v12737_v32 }
 0x529   : > { %v12894_v0 = vpop.f32.mrf.mxu1  ;;  %v24490_v3 = vpop.f32.mrf.mxu0 }
 0x52a   : > { %v13055_v51 = vadd.f32 %v24497_v52, %v13023_v48  ;;  %v13021_v15 = vadd.f32 %v12894_v0, %v12735_v17  ;;  %v12741_v48 = vadd.f32 %v17194_v11, %v12336_v37  ;;  %v12335_v11 = vadd.f32 %v24386_v58, %v24344_v60 }
 0x52b   : > { %v17225_v41 = vpop.f32.mrf.mxu1  ;;  %v24502_v59 = vpop.f32.mrf.mxu0  ;;  %v12742_v37 = vadd.f32 %v17195_v16, %v12337_v55  ;;  %v12338_v16 = vadd.f32 %v24396_v21, %v24354_v22 }
 0x52c   : > { %v13087_v35 = vmax.f32 %v13055_v51, 0.0  ;;  %v13053_v29 = vadd.f32 %v24497_v52, %v13021_v15  ;;  %v13024_v9 = vadd.f32 %v17225_v41, %v12738_v6 }
 0x52d   : > { %v12897_v33 = vpop.f32.mrf.mxu1  ;;  %v24507_v61 = vpop.f32.mrf.mxu0  ;;  %v12743_v55 = vadd.f32 %v12640_v62, %v12338_v16 }
 0x52e   : > { %13119 = vst [vmem:[%s19882_s17 + $0x310] sm:$0xff] %v13087_v35  ;;  %v13085_v0 = vmax.f32 %v13053_v29, 0.0  ;;  %v13056_v27 = vadd.f32 %v24497_v52, %v13024_v9  ;;  %v13022_v1 = vadd.f32 %v12897_v33, %v12736_v5  ;;  %v12740_v29 = vadd.f32 %v12627_v49, %v12335_v11 }
 0x52f   : > { %v17228_v32 = vpop.f32.mrf.mxu1  ;;  %v24513_v17 = vpop.f32.mrf.mxu0  ;;  %v12341_v49 = vadd.f32 %v24401_v25, %v24359_v31 }
 0x530   : > { %13117 = vst [vmem:[%s19882_s17 + $0x300] sm:$0xff] %v13085_v0  ;;  %v13088_v42 = vmax.f32 %v13056_v27, 0.0  ;;  %v13054_v28 = vadd.f32 %v24497_v52, %v13022_v1  ;;  %v13027_v6 = vadd.f32 %v17228_v32, %v12741_v48  ;;  %v12745_v48 = vadd.f32 %v17198_v7, %v12340_v44 }
 0x531   : > { %v12910_v51 = vpop.f32.mrf.mxu1  ;;  %v24519_v15 = vpop.f32.mrf.mxu0  ;;  %v12339_v7 = vadd.f32 %v24406_v26, %v24364_v56 }
 0x532   : > { %13120 = vst [vmem:[%s19882_s17 + $0x318] sm:$0xff] %v13088_v42  ;;  %v13086_v40 = vmax.f32 %v13054_v28, 0.0  ;;  %v13059_v53 = vadd.f32 %v24497_v52, %v13027_v6  ;;  %v13025_v41 = vadd.f32 %v12910_v51, %v12739_v4  ;;  %v12746_v28 = vadd.f32 %v24490_v3, %v12341_v49 }
 0x533   : > { %v17229_v5 = vpop.f32.mrf.mxu1  ;;  %v24525_v35 = vpop.f32.mrf.mxu0  ;;  %v12344_v6 = vadd.f32 %v24411_v12, %v24369_v63 }
 0x534   : > { %13118 = vst [vmem:[%s19882_s17 + $0x308] sm:$0xff] %v13086_v40  ;;  %v13091_v60 = vmax.f32 %v13059_v53, 0.0  ;;  %v13057_v58 = vadd.f32 %v24497_v52, %v13025_v41  ;;  %v13028_v9 = vadd.f32 %v17229_v5, %v12742_v37  ;;  %v12744_v37 = vadd.f32 %v24502_v59, %v12339_v7 }
 0x535   : > { %v12913_v34 = vpop.f32.mrf.mxu1  ;;  %v24531_v33 = vpop.f32.mrf.mxu0  ;;  %v12342_v40 = vadd.f32 %v24416_v36, %v24374_v45  ;;  %v12749_v44 = vadd.f32 %v24507_v61, %v12344_v6  ;;  %v12345_v5 = vadd.f32 %v24421_v10, %v24379_v20 }
 0x536   : > { %13123 = vst [vmem:[%s19882_s17 + $0x330] sm:$0xff] %v13091_v60  ;;  %v13089_v24 = vmax.f32 %v13057_v58, 0.0  ;;  %v13060_v50 = vadd.f32 %v24497_v52, %v13028_v9  ;;  %v13026_v0 = vadd.f32 %v12913_v34, %v12740_v29  ;;  %v12343_v9 = vadd.f32 %v24426_v47, %v24384_v57 }
 0x537   : > { %v17232_v27 = vpop.f32.mrf.mxu1  ;;  %v24537_v1 = vpop.f32.mrf.mxu0  ;;  %v12747_v58 = vadd.f32 %v24513_v17, %v12342_v40 }
 0x538   : > { %13121 = vst [vmem:[%s19882_s17 + $0x320] sm:$0xff] %v13089_v24  ;;  %v13092_v22 = vmax.f32 %v13060_v50, 0.0  ;;  %v13058_v21 = vadd.f32 %v24497_v52, %v13026_v0  ;;  %v13031_v32 = vadd.f32 %v17232_v27, %v12745_v48  ;;  %v12750_v48 = vadd.f32 %v24519_v15, %v12345_v5 }
 0x539   : > { %v12926_v4 = vpop.f32.mrf.mxu1  ;;  %v24543_v42 = vpop.f32.mrf.mxu0  ;;  %v12348_v24 = vadd.f32 %v24431_v23, %v24389_v30  ;;  %v12748_v49 = vadd.f32 %v24525_v35, %v12343_v9  ;;  %v12346_v27 = vadd.f32 %v24436_v13, %v24394_v2 }
 0x53a   : > { %13124 = vst [vmem:[%s19882_s17 + $0x338] sm:$0xff] %v13092_v22  ;;  %v13090_v31 = vmax.f32 %v13058_v21, 0.0  ;;  %v13063_v25 = vadd.f32 %v24497_v52, %v13031_v32  ;;  %v13029_v62 = vadd.f32 %v12926_v4, %v12743_v55  ;;  %v12349_v32 = vadd.f32 %v24441_v18, %v24399_v8 }
 0x53b   : > { %v17233_v11 = vpop.f32.mrf.mxu1  ;;  %v24550_v51 = vpop.f32.mrf.mxu0  ;;  %v12753_v21 = vadd.f32 %v24531_v33, %v12348_v24  ;;  %v25494_v24 = vld [vmem:[#allocation35_spill] sm:$0xff] }
 0x53c   : > { %13122 = vst [vmem:[%s19882_s17 + $0x328] sm:$0xff] %v13090_v31  ;;  %v13095_v56 = vmax.f32 %v13063_v25, 0.0  ;;  %v13061_v26 = vadd.f32 %v24497_v52, %v13029_v62  ;;  %v13032_v3 = vadd.f32 %v17233_v11, %v12746_v28  ;;  %v12751_v28 = vadd.f32 %v24537_v1, %v12346_v27 }
 0x53d   : > { %v12929_v53 = vpop.f32.mrf.mxu1  ;;  %v24557_v41 = vpop.f32.mrf.mxu0  ;;  %v12347_v31 = vadd.f32 %v24446_v38, %v24404_v19  ;;  %v12754_v6 = vadd.f32 %v24543_v42, %v12349_v32  ;;  %v12352_v11 = vadd.f32 %v24451_v54, %v24409_v46 }
 0x53e   : > { %13127 = vst [vmem:[%s19882_s17 + $0x350] sm:$0xff] %v13095_v56  ;;  %v13093_v63 = vmax.f32 %v13061_v26, 0.0  ;;  %v13064_v12 = vadd.f32 %v24497_v52, %v13032_v3  ;;  %v13030_v59 = vadd.f32 %v12929_v53, %v12744_v37  ;;  %v12350_v3 = vadd.f32 %v24456_v14, %v24414_v39 }
 0x53f   : > { %v17236_v29 = vpop.f32.mrf.mxu1  ;;  %v24564_v60 = vpop.f32.mrf.mxu0  ;;  %v12752_v26 = vadd.f32 %v24550_v51, %v12347_v31 }
 0x540   : > { %13125 = vst [vmem:[%s19882_s17 + $0x340] sm:$0xff] %v13093_v63  ;;  %v13096_v45 = vmax.f32 %v13064_v12, 0.0  ;;  %v13062_v36 = vadd.f32 %v24497_v52, %v13030_v59  ;;  %v13035_v61 = vadd.f32 %v17236_v29, %v12749_v44  ;;  %v12757_v44 = vadd.f32 %v24557_v41, %v12352_v11  ;;  %v25489_v63 = vld [vmem:[#allocation39_spill] sm:$0xff]  ;;  %v25490_v12 = vld [vmem:[#allocation57_spill] sm:$0xff]  ;;  %v25500_v11 = vld [vmem:[#allocation48_spill] sm:$0xff] }
 0x541   : > { %v12942_v16 = vpop.f32.mrf.mxu1  ;;  %v24571_v34 = vpop.f32.mrf.mxu0  ;;  %v12353_v59 = vadd.f32 %v25490_v12, %v25489_v63 }
 0x542   : > { %13128 = vst [vmem:[%s19882_s17 + $0x358] sm:$0xff] %v13096_v45  ;;  %v13094_v20 = vmax.f32 %v13062_v36, 0.0  ;;  %v13067_v10 = vadd.f32 %v24497_v52, %v13035_v61  ;;  %v13033_v17 = vadd.f32 %v12942_v16, %v12747_v58  ;;  %v12755_v58 = vadd.f32 %v24564_v60, %v12350_v3  ;;  %v25491_v45 = vld [vmem:[#allocation65_spill] sm:$0xff]  ;;  %v25492_v36 = vld [vmem:[#allocation83_spill] sm:$0xff] }
 0x543   : > { %v17237_v50 = vpop.f32.mrf.mxu1  ;;  %v24578_v0 = vpop.f32.mrf.mxu0  ;;  %v12351_v61 = vadd.f32 %v25492_v36, %v25491_v45 }
 0x544   : > { %13126 = vst [vmem:[%s19882_s17 + $0x348] sm:$0xff] %v13094_v20  ;;  %v13099_v57 = vmax.f32 %v13067_v10, 0.0  ;;  %v13065_v47 = vadd.f32 %v24497_v52, %v13033_v17  ;;  %v13036_v15 = vadd.f32 %v17237_v50, %v12750_v48  ;;  %v12758_v48 = vadd.f32 %v24571_v34, %v12353_v59  ;;  %v25493_v17 = vld [vmem:[#allocation42_spill] sm:$0xff] }
 0x545   : > { %v12945_v55 = vpop.f32.mrf.mxu1  ;;  %v24585_v22 = vpop.f32.mrf.mxu0  ;;  %v12356_v50 = vadd.f32 %v25494_v24, %v25493_v17 }
 0x546   : > { %13131 = vst [vmem:[%s19882_s17 + $0x370] sm:$0xff] %v13099_v57  ;;  %v13097_v30 = vmax.f32 %v13065_v47, 0.0  ;;  %v13068_v23 = vadd.f32 %v24497_v52, %v13036_v15  ;;  %v13034_v35 = vadd.f32 %v12945_v55, %v12748_v49  ;;  %v12756_v47 = vadd.f32 %v24578_v0, %v12351_v61  ;;  %v25495_v55 = vld [vmem:[#allocation17_spill] sm:$0xff] }
 0x547   : > { %v17240_v7 = vpop.f32.mrf.mxu1  ;;  %v24592_v4 = vpop.f32.mrf.mxu0  ;;  %v12761_v32 = vadd.f32 %v24585_v22, %v12356_v50 }
 0x548   : > { %13129 = vst [vmem:[%s19882_s17 + $0x360] sm:$0xff] %v13097_v30  ;;  %v13100_v2 = vmax.f32 %v13068_v23, 0.0  ;;  %v13066_v13 = vadd.f32 %v24497_v52, %v13034_v35  ;;  %v13039_v33 = vadd.f32 %v17240_v7, %v12753_v21  ;;  %v25496_v21 = vld [vmem:[#allocation61_spill] sm:$0xff] }
 0x549   : > { %v12958_v25 = vpop.f32.mrf.mxu1  ;;  %v24599_v62 = vpop.f32.mrf.mxu0  ;;  %v12354_v30 = vadd.f32 %v25496_v21, %v25495_v55 }
 0x54a   : > { %13132 = vst [vmem:[%s19882_s17 + $0x378] sm:$0xff] %v13100_v2  ;;  %v13098_v8 = vmax.f32 %v13066_v13, 0.0  ;;  %v13071_v18 = vadd.f32 %v24497_v52, %v13039_v33  ;;  %v13037_v1 = vadd.f32 %v12958_v25, %v12751_v28  ;;  %v25497_v2 = vld [vmem:[#allocation79_spill] sm:$0xff]  ;;  %v25498_v13 = vld [vmem:[#allocation25_spill] sm:$0xff] }
 0x54b   : > { %v17241_v37 = vpop.f32.mrf.mxu1  ;;  %v24606_v56 = vpop.f32.mrf.mxu0  ;;  %v12357_v33 = vadd.f32 %v25498_v13, %v25497_v2 }
 0x54c   : > { %13130 = vst [vmem:[%s19882_s17 + $0x368] sm:$0xff] %v13098_v8  ;;  %v13103_v19 = vmax.f32 %v13071_v18, 0.0  ;;  %v13069_v38 = vadd.f32 %v24497_v52, %v13037_v1  ;;  %v13040_v42 = vadd.f32 %v17241_v37, %v12754_v6  ;;  %v12759_v6 = vadd.f32 %v24592_v4, %v12354_v30  ;;  %v25499_v1 = vld [vmem:[#allocation7_spill] sm:$0xff] }
 0x54d   : > { %v12961_v40 = vpop.f32.mrf.mxu1  ;;  %v24613_v53 = vpop.f32.mrf.mxu0  ;;  %v12355_v37 = vadd.f32 %v25500_v11, %v25499_v1 }
 0x54e   : > { %13135 = vst [vmem:[%s19882_s17 + $0x390] sm:$0xff] %v13103_v19  ;;  %v13101_v46 = vmax.f32 %v13069_v38, 0.0  ;;  %v13072_v54 = vadd.f32 %v24497_v52, %v13040_v42  ;;  %v13038_v51 = vadd.f32 %v12961_v40, %v12752_v26  ;;  %v12762_v38 = vadd.f32 %v24599_v62, %v12357_v33  ;;  %v25501_v40 = vld [vmem:[#allocation24_spill] sm:$0xff] }
 0x54f   : > { %v17244_v5 = vpop.f32.mrf.mxu1  ;;  %v24620_v29 = vpop.f32.mrf.mxu0  ;;  %v12760_v63 = vadd.f32 %v24606_v56, %v12355_v37 }
 0x550   : > { %13133 = vst [vmem:[%s19882_s17 + $0x380] sm:$0xff] %v13101_v46  ;;  %v13104_v39 = vmax.f32 %v13072_v54, 0.0  ;;  %v13070_v14 = vadd.f32 %v24497_v52, %v13038_v51  ;;  %v13043_v41 = vadd.f32 %v17244_v5, %v12757_v44  ;;  %v25502_v44 = vld [vmem:[#allocation36_spill] sm:$0xff] }
 0x551   : > { %v12974_v9 = vpop.f32.mrf.mxu1  ;;  %v24627_v16 = vpop.f32.mrf.mxu0  ;;  %v12360_v46 = vadd.f32 %v25502_v44, %v25501_v40  ;;  %v25503_v5 = vld [vmem:[#allocation60_spill] sm:$0xff] }
 0x552   : > { %13136 = vst [vmem:[%s19882_s17 + $0x398] sm:$0xff] %v13104_v39  ;;  %v13102_v20 = vmax.f32 %v13070_v14, 0.0  ;;  %v13075_v10 = vadd.f32 %v24497_v52, %v13043_v41  ;;  %v13041_v60 = vadd.f32 %v12974_v9, %v12755_v58  ;;  %v25504_v58 = vld [vmem:[#allocation4_spill] sm:$0xff]  ;;  %v25505_v9 = vld [vmem:[#allocation75_spill] sm:$0xff] }
 0x553   : > { %v17245_v49 = vpop.f32.mrf.mxu1  ;;  %v24634_v57 = vpop.f32.mrf.mxu0  ;;  %v12358_v39 = vadd.f32 %v25504_v58, %v25503_v5  ;;  %v12765_v45 = vadd.f32 %v24613_v53, %v12360_v46 }
 0x554   : > { %13134 = vst [vmem:[%s19882_s17 + $0x388] sm:$0xff] %v13102_v20  ;;  %v13107_v15 = vmax.f32 %v13075_v10, 0.0  ;;  %v13073_v27 = vadd.f32 %v24497_v52, %v13041_v60  ;;  %v13044_v34 = vadd.f32 %v17245_v49, %v12758_v48  ;;  %v25506_v48 = vld [vmem:[#allocation69_spill] sm:$0xff] }
 0x555   : > { %v12977_v23 = vpop.f32.mrf.mxu1  ;;  %v24641_v35 = vpop.f32.mrf.mxu0  ;;  %v12361_v20 = vadd.f32 %v25506_v48, %v25505_v9  ;;  %v12763_v17 = vadd.f32 %v24620_v29, %v12358_v39  ;;  %v25507_v49 = vld [vmem:[#allocation49_spill] sm:$0xff] }
 0x556   : > { %13139 = vst [vmem:[%s19882_s17 + $0x3b0] sm:$0xff] %v13107_v15  ;;  %v13105_v7 = vmax.f32 %v13073_v27, 0.0  ;;  %v13076_v28 = vadd.f32 %v24497_v52, %v13044_v34  ;;  %v13042_v0 = vadd.f32 %v12977_v23, %v12756_v47  ;;  %v12359_v47 = vadd.f32 %v24484_v43, %v25507_v49 }
 0x557   : > { %v17248_v31 = vpop.f32.mrf.mxu1  ;;  %v24648_v25 = vpop.f32.mrf.mxu0  ;;  %v12766_v34 = vadd.f32 %v24627_v16, %v12361_v20 }
 0x558   : > { %13137 = vst [vmem:[%s19882_s17 + $0x3a0] sm:$0xff] %v13105_v7  ;;  %v13108_v8 = vmax.f32 %v13076_v28, 0.0  ;;  %v13074_v18 = vadd.f32 %v24497_v52, %v13042_v0  ;;  %v13047_v22 = vadd.f32 %v17248_v31, %v12761_v32  ;;  %v12764_v32 = vadd.f32 %v24634_v57, %v12359_v47 }
 0x559   : > { %v12990_v26 = vpop.f32.mrf.mxu1  ;;  %v24655_v19 = vpop.f32.mrf.mxu0 }
 0x55a   : > { %13140 = vst [vmem:[%s19882_s17 + $0x3b8] sm:$0xff] %v13108_v8  ;;  %v13106_v42 = vmax.f32 %v13074_v18, 0.0  ;;  %v13079_v3 = vadd.f32 %v24497_v52, %v13047_v22  ;;  %v13045_v4 = vadd.f32 %v12990_v26, %v12759_v6 }
 0x55b   : > { %v17249_v54 = vpop.f32.mrf.mxu1  ;;  %v24662_v51 = vpop.f32.mrf.mxu0 }
 0x55c   : > { %13138 = vst [vmem:[%s19882_s17 + $0x3a8] sm:$0xff] %v13106_v42  ;;  %v13111_v12 = vmax.f32 %v13079_v3, 0.0  ;;  %v13077_v59 = vadd.f32 %v24497_v52, %v13045_v4  ;;  %v13048_v62 = vadd.f32 %v17249_v54, %v12762_v38 }
 0x55d   : > { %v12993_v14 = vpop.f32.mrf.mxu1  ;;  %v24669_v41 = vpop.f32.mrf.mxu0 }
 0x55e   : > { %13143 = vst [vmem:[%s19882_s17 + $0x3d0] sm:$0xff] %v13111_v12  ;;  %v13109_v36 = vmax.f32 %v13077_v59, 0.0  ;;  %v13080_v61 = vadd.f32 %v24497_v52, %v13048_v62  ;;  %v13046_v56 = vadd.f32 %v12993_v14, %v12760_v63 }
 0x55f   : > { %v17252_v10 = vpop.f32.mrf.mxu1  ;;  %v24676_v60 = vpop.f32.mrf.mxu0 }
 0x560   : > { %13141 = vst [vmem:[%s19882_s17 + $0x3c0] sm:$0xff] %v13109_v36  ;;  %v13112_v24 = vmax.f32 %v13080_v61, 0.0  ;;  %v13078_v50 = vadd.f32 %v24497_v52, %v13046_v56  ;;  %v13051_v53 = vadd.f32 %v17252_v10, %v12765_v45 }
 0x561   : > { %v13006_v15 = vpop.f32.mrf.mxu1  ;;  %v24683_v27 = vpop.f32.mrf.mxu0 }
 0x562   : > { %13144 = vst [vmem:[%s19882_s17 + $0x3d8] sm:$0xff] %v13112_v24  ;;  %v13110_v55 = vmax.f32 %v13078_v50, 0.0  ;;  %v13083_v21 = vadd.f32 %v24497_v52, %v13051_v53  ;;  %v13049_v29 = vadd.f32 %v13006_v15, %v12763_v17 }
 0x563   : > { %v17253_v30 = vpop.f32.mrf.mxu1  ;;  %v24688_v23 = vpop.f32.mrf.mxu0 }
 0x564   : > { %13142 = vst [vmem:[%s19882_s17 + $0x3c8] sm:$0xff] %v13110_v55  ;;  %v13115_v7 = vmax.f32 %v13083_v21, 0.0  ;;  %v13081_v43 = vadd.f32 %v24497_v52, %v13049_v29  ;;  %v13052_v28 = vadd.f32 %v17253_v30, %v12766_v34 }
 0x565   : > { %v13009_v0 = vpop.f32.mrf.mxu1  ;;  %v17278_v2 = vpop.f32.mrf.mxu0 }
 0x566   : > { %13147 = vst [vmem:[%s19882_s17 + $0x3f0] sm:$0xff] %v13115_v7  ;;  %v13113_v16 = vmax.f32 %v13081_v43, 0.0  ;;  %v13084_v13 = vadd.f32 %v24497_v52, %v13052_v28  ;;  %v13050_v33 = vadd.f32 %v13009_v0, %v12764_v32 }
 0x567   : > { %v17268_v31 = vpop.f32.mrf.mxu1  ;;  %v13450_v6 = vpop.f32.mrf.mxu0 }
 0x568   : > { %13145 = vst [vmem:[%s19882_s17 + $0x3e0] sm:$0xff] %v13113_v16  ;;  %v13116_v8 = vmax.f32 %v13084_v13, 0.0  ;;  %v13082_v57 = vadd.f32 %v24497_v52, %v13050_v33  ;;  %v13361_v24 = vadd.f32 %v17268_v31, %v24641_v35 }
 0x569   : > { %v13352_v18 = vpop.f32.mrf.mxu1  ;;  %v17279_v22 = vpop.f32.mrf.mxu0 }
 0x56a   : > { %13148 = vst [vmem:[%s19882_s17 + $0x3f8] sm:$0xff] %v13116_v8  ;;  %v13114_v1 = vmax.f32 %v13082_v57, 0.0  ;;  %v13353_v49 = vadd.f32 %v13352_v18, %v24648_v25  ;;  %v13483_v34 = vadd.f32 %v17278_v2, %v13361_v24 }
 0x56b   : > { %v17269_v11 = vpop.f32.mrf.mxu1  ;;  %v13453_v37 = vpop.f32.mrf.mxu0 }
 0x56c   : > { %13146 = vst [vmem:[%s19882_s17 + $0x3e8] sm:$0xff] %v13114_v1  ;;  %v13364_v55 = vadd.f32 %v17269_v11, %v24655_v19  ;;  %v13481_v30 = vadd.f32 %v13450_v6, %v13353_v49 }
 0x56d   : > { %v13355_v26 = vpop.f32.mrf.mxu1  ;;  %v17282_v38 = vpop.f32.mrf.mxu0 }
 0x56e   : > { %v13356_v32 = vadd.f32 %v13355_v26, %v24662_v51  ;;  %v13484_v35 = vadd.f32 %v17279_v22, %v13364_v55 }
 0x56f   : > { %v17272_v42 = vpop.f32.mrf.mxu1  ;;  %v13466_v3 = vpop.f32.mrf.mxu0 }
 0x570   : > { %v13377_v43 = vadd.f32 %v17272_v42, %v24669_v41  ;;  %v13482_v31 = vadd.f32 %v13453_v37, %v13356_v32 }
 0x571   : > { %v13368_v4 = vpop.f32.mrf.mxu1  ;;  %v17283_v40 = vpop.f32.mrf.mxu0 }
 0x572   : > { %v13369_v13 = vadd.f32 %v13368_v4, %v24676_v60  ;;  %v13487_v19 = vadd.f32 %v17282_v38, %v13377_v43 }
 0x573   : > { %v17273_v44 = vpop.f32.mrf.mxu1  ;;  %v24699_v46 = vpop.f32.mrf.mxu0 }
 0x574   : > { %v13380_v57 = vadd.f32 %v17273_v44, %v24683_v27  ;;  %v13485_v41 = vadd.f32 %v13466_v3, %v13369_v13 }
 0x575   : > { %v13371_v54 = vpop.f32.mrf.mxu1  ;;  %v17298_v63 = vpop.f32.mrf.mxu0 }
 0x576   : > { %v13372_v26 = vadd.f32 %v13371_v54, %v24688_v23 }
 0x577   : > { %v17288_v12 = vpop.f32.mrf.mxu1  ;;  %v13725_v59 = vpop.f32.mrf.mxu0 }
 0x578   : > { %v13617_v7 = vadd.f32 %v17288_v12, %v13483_v34  ;;  %v13486_v44 = vadd.f32 %v24699_v46, %v13372_v26 }
 0x579   : > { %v13584_v62 = vpop.f32.mrf.mxu1  ;;  %v17299_v5 = vpop.f32.mrf.mxu0 }
 0x57a   : > { %v13615_v16 = vadd.f32 %v13584_v62, %v13481_v30  ;;  %v13758_v2 = vadd.f32 %v17298_v63, %v13617_v7  ;;  %v13488_v62 = vadd.f32 %v17283_v40, %v13380_v57 }
 0x57b   : > { %v17289_v58 = vpop.f32.mrf.mxu1  ;;  %v13728_v39 = vpop.f32.mrf.mxu0 }
 0x57c   : > { %v13618_v8 = vadd.f32 %v17289_v58, %v13484_v35  ;;  %v13756_v51 = vadd.f32 %v13725_v59, %v13615_v16 }
 0x57d   : > { %v13587_v14 = vpop.f32.mrf.mxu1  ;;  %v17302_v45 = vpop.f32.mrf.mxu0 }
 0x57e   : > { %v13616_v1 = vadd.f32 %v13587_v14, %v13482_v31  ;;  %v13759_v60 = vadd.f32 %v17299_v5, %v13618_v8 }
 0x57f   : > { %v17292_v36 = vpop.f32.mrf.mxu1  ;;  %v13741_v61 = vpop.f32.mrf.mxu0 }
 0x580   : > { %v13621_v22 = vadd.f32 %v17292_v36, %v13487_v19  ;;  %v13757_v38 = vadd.f32 %v13728_v39, %v13616_v1 }
 0x581   : > { %v13600_v56 = vpop.f32.mrf.mxu1  ;;  %v24701_v9 = vpop.f32.mrf.mxu0 }
 0x582   : > { %v13619_v37 = vadd.f32 %v13600_v56, %v13485_v41  ;;  %v13762_v59 = vadd.f32 %v17302_v45, %v13621_v22 }
 0x583   : > { %v17293_v48 = vpop.f32.mrf.mxu1  ;;  %v24703_v20 = vpop.f32.mrf.mxu0 }
 0x584   : > { %v13622_v14 = vadd.f32 %v17293_v48, %v13488_v62  ;;  %v13760_v36 = vadd.f32 %v13741_v61, %v13619_v37 }
 0x585   : > { %v13603_v10 = vpop.f32.mrf.mxu1  ;;  %v17318_v17 = vpop.f32.mrf.mxu0 }
 0x586   : > { %v13620_v34 = vadd.f32 %v13603_v10, %v13486_v44  ;;  %v13763_v39 = vadd.f32 %v24701_v9, %v13622_v14 }
 0x587   : > { %v17308_v50 = vpop.f32.mrf.mxu1  ;;  %v13965_v53 = vpop.f32.mrf.mxu0 }
 0x588   : > { %v13864_v11 = vadd.f32 %v17308_v50, %v13758_v2  ;;  %v13761_v61 = vadd.f32 %v24703_v20, %v13620_v34 }
 0x589   : > { %v13831_v47 = vpop.f32.mrf.mxu1  ;;  %v17319_v15 = vpop.f32.mrf.mxu0 }
 0x58a   : > { %v13862_v4 = vadd.f32 %v13831_v47, %v13756_v51  ;;  %v13998_v24 = vadd.f32 %v17318_v17, %v13864_v11 }
 0x58b   : > { %v17309_v21 = vpop.f32.mrf.mxu1  ;;  %v13968_v29 = vpop.f32.mrf.mxu0 }
 0x58c   : > { %v13865_v27 = vadd.f32 %v17309_v21, %v13759_v60  ;;  %v13996_v49 = vadd.f32 %v13965_v53, %v13862_v4 }
 0x58d   : > { %v13834_v28 = vpop.f32.mrf.mxu1  ;;  %v17322_v0 = vpop.f32.mrf.mxu0 }
 0x58e   : > { %v13863_v23 = vadd.f32 %v13834_v28, %v13757_v38  ;;  %v13999_v56 = vadd.f32 %v17319_v15, %v13865_v27 }
 0x58f   : > { %v17312_v25 = vpop.f32.mrf.mxu1  ;;  %v13981_v33 = vpop.f32.mrf.mxu0 }
 0x590   : > { %v13868_v5 = vadd.f32 %v17312_v25, %v13762_v59  ;;  %v13997_v45 = vadd.f32 %v13968_v29, %v13863_v23 }
 0x591   : > { %v13847_v6 = vpop.f32.mrf.mxu1  ;;  %v17323_v18 = vpop.f32.mrf.mxu0 }
 0x592   : > { %v13866_v17 = vadd.f32 %v13847_v6, %v13760_v36  ;;  %v14002_v10 = vadd.f32 %v17322_v0, %v13868_v5 }
 0x593   : > { %v17313_v42 = vpop.f32.mrf.mxu1  ;;  %v13984_v12 = vpop.f32.mrf.mxu0 }
 0x594   : > { %v13869_v7 = vadd.f32 %v17313_v42, %v13763_v39  ;;  %v14000_v13 = vadd.f32 %v13981_v33, %v13866_v17 }
 0x595   : > { %v13850_v63 = vpop.f32.mrf.mxu1  ;;  %v17338_v58 = vpop.f32.mrf.mxu0 }
 0x596   : > { %v13867_v25 = vadd.f32 %v13850_v63, %v13761_v61  ;;  %v14003_v19 = vadd.f32 %v17323_v18, %v13869_v7 }
 0x597   : > { %v17328_v50 = vpop.f32.mrf.mxu1  ;;  %v14212_v3 = vpop.f32.mrf.mxu0 }
 0x598   : > { %v14139_v54 = vadd.f32 %v17328_v50, %v13998_v24  ;;  %v14001_v41 = vadd.f32 %v13984_v12, %v13867_v25 }
 0x599   : > { %v14106_v47 = vpop.f32.mrf.mxu1  ;;  %v17339_v40 = vpop.f32.mrf.mxu0 }
 0x59a   : > { %v14245_v55 = vadd.f32 %v17338_v58, %v14139_v54  ;;  %v14137_v30 = vadd.f32 %v14106_v47, %v13996_v49 }
 0x59b   : > { %v17329_v21 = vpop.f32.mrf.mxu1  ;;  %v14215_v46 = vpop.f32.mrf.mxu0 }
 0x59c   : > { %v14253_v48 = vadd.f32 %v24497_v52, %v14245_v55  ;;  %v14243_v53 = vadd.f32 %v14212_v3, %v14137_v30  ;;  %v14140_v32 = vadd.f32 %v17329_v21, %v13999_v56 }
 0x59d   : > { %v14109_v43 = vpop.f32.mrf.mxu1  ;;  %v17342_v28 = vpop.f32.mrf.mxu0 }
 0x59e   : > { %v14261_v15 = vmax.f32 %v14253_v48, 0.0  ;;  %v14251_v35 = vadd.f32 %v24497_v52, %v14243_v53  ;;  %v14246_v9 = vadd.f32 %v17339_v40, %v14140_v32  ;;  %v14138_v16 = vadd.f32 %v14109_v43, %v13997_v45 }
 0x59f   : > { %v17332_v29 = vpop.f32.mrf.mxu1  ;;  %v14228_v31 = vpop.f32.mrf.mxu0 }
 0x5a0   : > { %14269 = vst [vmem:[%s19882_s17 + $0x410] sm:$0xff] %v14261_v15  ;;  %v14259_v2 = vmax.f32 %v14251_v35, 0.0  ;;  %v14254_v8 = vadd.f32 %v24497_v52, %v14246_v9  ;;  %v14244_v20 = vadd.f32 %v14215_v46, %v14138_v16  ;;  %v14143_v0 = vadd.f32 %v17332_v29, %v14002_v10 }
 0x5a1   : > { %v14122_v57 = vpop.f32.mrf.mxu1  ;;  %v17343_v6 = vpop.f32.mrf.mxu0 }
 0x5a2   : > { %14267 = vst [vmem:[%s19882_s17 + $0x400] sm:$0xff] %v14259_v2  ;;  %v14262_v51 = vmax.f32 %v14254_v8, 0.0  ;;  %v14252_v1 = vadd.f32 %v24497_v52, %v14244_v20  ;;  %v14249_v11 = vadd.f32 %v17342_v28, %v14143_v0  ;;  %v14141_v33 = vadd.f32 %v14122_v57, %v14000_v13 }
 0x5a3   : > { %v17333_v26 = vpop.f32.mrf.mxu1  ;;  %v14231_v62 = vpop.f32.mrf.mxu0 }
 0x5a4   : > { %14270 = vst [vmem:[%s19882_s17 + $0x418] sm:$0xff] %v14262_v51  ;;  %v14260_v22 = vmax.f32 %v14252_v1, 0.0  ;;  %v14257_v42 = vadd.f32 %v24497_v52, %v14249_v11  ;;  %v14247_v60 = vadd.f32 %v14228_v31, %v14141_v33  ;;  %v14144_v18 = vadd.f32 %v17333_v26, %v14003_v19 }
 0x5a5   : > { %v14125_v4 = vpop.f32.mrf.mxu1 }
 0x5a6   : > { %14268 = vst [vmem:[%s19882_s17 + $0x408] sm:$0xff] %v14260_v22  ;;  %v14265_v37 = vmax.f32 %v14257_v42, 0.0  ;;  %v14255_v63 = vadd.f32 %v24497_v52, %v14247_v60  ;;  %v14250_v58 = vadd.f32 %v17343_v6, %v14144_v18  ;;  %v14142_v38 = vadd.f32 %v14125_v4, %v14001_v41 }
 0x5a8   : > { %14273 = vst [vmem:[%s19882_s17 + $0x430] sm:$0xff] %v14265_v37  ;;  %v14263_v12 = vmax.f32 %v14255_v63, 0.0  ;;  %v14258_v24 = vadd.f32 %v24497_v52, %v14250_v58  ;;  %v14248_v27 = vadd.f32 %v14231_v62, %v14142_v38 }
 0x5aa   : > { %14271 = vst [vmem:[%s19882_s17 + $0x420] sm:$0xff] %v14263_v12  ;;  %v14266_v44 = vmax.f32 %v14258_v24, 0.0  ;;  %v14256_v59 = vadd.f32 %v24497_v52, %v14248_v27 }
 0x5ac   : > { %14274 = vst [vmem:[%s19882_s17 + $0x438] sm:$0xff] %v14266_v44  ;;  %v14264_v14 = vmax.f32 %v14256_v59, 0.0 }
 0x5ae   : > { %14272 = vst [vmem:[%s19882_s17 + $0x428] sm:$0xff] %v14264_v14 }
 0x5af PF: > { %s13_s14 = sadd.s32 1, %s17691_s14   ;;  %s25508_s12 = smov %s17687_s13 }
 0x5b0   : > { %p10_p5 = scmp.ge.s32.totalorder %s13_s14, 4   ;;  %s25509_s13 = smov %s25511_s15 }
 0x5b2   :  { %12 = sbr.rel (!%p10_p5) target bundleno = 2 (0x2), region = 76 }

</bundles_post_ra>
